<compile_context>
chip_gen: v5e
topology: v5e:2x2
jax: 0.10.0
libtpu: 0.0.40
codegen_flags: <defaults>
</compile_context>

<pallas_src>
import numpy as np
import jax
import jax.numpy as jnp
from jax import lax
from jax.experimental import pallas as pl
from jax.experimental.pallas import tpu as pltpu

BN_EPS = 1e-5          # nn.BatchNorm2d default


# ---------------------------------------------------------------------------
# In-kernel building blocks
# ---------------------------------------------------------------------------
def _row_col_iota(H, W):
    """(1, H*W) int32 row / column index of every flattened spatial position."""
    flat = lax.broadcasted_iota(jnp.int32, (1, H * W), 1)
    if W & (W - 1) == 0:                       # power of two: shift / and
        yy = flat >> (W.bit_length() - 1)
        xx = flat & (W - 1)
    else:                                      # fallback (unused in this script)
        yy = flat // W
        xx = flat % W
    return yy, xx


def _conv_bn_mish(inputs, w_ref, bn_scale_ref, bn_shift_ref,
                  line_ref, patch_ref, H, W, d, pad):
    """3x3 conv (dilation d, zero padding d) + folded BatchNorm + Mish.

    inputs : list of (C_i, H*W) activations (channel-concatenated conv input,
             in concatenation order).
    w_ref  : (C_out, 9 * sum(C_i)) im2col weight; column order is
             [input segment][kernel tap ky,kx][segment channel].
    """
    HW = H * W
    yy, xx = _row_col_iota(H, W)

    # Per-tap flat shift + border mask (destination coordinates).  A flat
    # spatial shift wraps across image rows / past the array ends; the mask
    # zeroes exactly those positions, reproducing zero padding.
    taps = []
    for ky in range(3):
        for kx in range(3):
            oy, ox = (ky - 1) * d, (kx - 1) * d
            m = None
            if oy < 0:
                t = jnp.where(yy >= -oy, 1.0, 0.0)
                m = t if m is None else m * t
            if oy > 0:
                t = jnp.where(yy < H - oy, 1.0, 0.0)
                m = t if m is None else m * t
            if ox < 0:
                t = jnp.where(xx >= -ox, 1.0, 0.0)
                m = t if m is None else m * t
            if ox > 0:
                t = jnp.where(xx < W - ox, 1.0, 0.0)
                m = t if m is None else m * t
            taps.append((oy * W + ox, m))

    row = 0
    for a in inputs:
        c_i = a.shape[0]
        # Park the activation in the centre of the zero-bordered line buffer;
        # every tap is then a statically-offset window read (no in-kernel
        # gather / concatenate needed).
        line_ref[0:c_i, pad:pad + HW] = a
        for k, mask in taps:
            if k == 0:
                blk = a
            else:
                blk = line_ref[0:c_i, pad + k:pad + k + HW] * mask
            patch_ref[row:row + c_i, 0:HW] = blk
            row += c_i

    # One MXU matmul per conv layer, then folded BatchNorm + Mish.
    y = jnp.dot(w_ref[...], patch_ref[0:row, 0:HW],
                preferred_element_type=jnp.float32)
    y = y * bn_scale_ref[...] + bn_shift_ref[...]
    return y * jnp.tanh(jnp.log(1.0 + jnp.exp(y)))        # Mish = x*tanh(softplus)


def _maxpool2x2(a, sel_ref, line_ref, W, pad):
    """2x2 / stride-2 max pool: window maxima via shifted line-buffer reads,
    then a 0/1 selection matmul (keeps the lane axis dense)."""
    c, HW = a.shape
    line_ref[0:c, pad:pad + HW] = a
    m = jnp.maximum(a, line_ref[0:c, pad + 1:pad + 1 + HW])
    m = jnp.maximum(m, jnp.maximum(line_ref[0:c, pad + W:pad + W + HW],
                                   line_ref[0:c, pad + W + 1:pad + W + 1 + HW]))
    return jnp.dot(m, sel_ref[...], preferred_element_type=jnp.float32)


def _make_rsu5_kernel(H, W, pad):
    H1, W1 = H, W
    H2, W2 = H // 2, W // 2
    H3, W3 = H // 4, W // 4
    H4, W4 = H // 8, W // 8

    def kernel(x_ref,
               w_in, a_in, b_in,
               w_1, a_1, b_1,
               w_2, a_2, b_2,
               w_3, a_3, b_3,
               w_4, a_4, b_4,
               w_5, a_5, b_5,
               w_4d, a_4d, b_4d,
               w_3d, a_3d, b_3d,
               w_2d, a_2d, b_2d,
               w_1d, a_1d, b_1d,
               sel1, sel2, sel3,
               up4, up3, up2,
               o_ref,
               line_ref, patch_ref):
        # Border columns of the line buffer are read (then masked to zero);
        # they must be finite, so clear the buffer once per image.
        line_ref[...] = jnp.zeros_like(line_ref)

        x = x_ref[0]                                              # (in_ch, H*W)
        hxin = _conv_bn_mish([x], w_in, a_in, b_in, line_ref, patch_ref, H1, W1, 1, pad)
        hx1 = _conv_bn_mish([hxin], w_1, a_1, b_1, line_ref, patch_ref, H1, W1, 1, pad)
        hx = _maxpool2x2(hx1, sel1, line_ref, W1, pad)
        hx2 = _conv_bn_mish([hx], w_2, a_2, b_2, line_ref, patch_ref, H2, W2, 1, pad)
        hx = _maxpool2x2(hx2, sel2, line_ref, W2, pad)
        hx3 = _conv_bn_mish([hx], w_3, a_3, b_3, line_ref, patch_ref, H3, W3, 1, pad)
        hx = _maxpool2x2(hx3, sel3, line_ref, W3, pad)
        hx4 = _conv_bn_mish([hx], w_4, a_4, b_4, line_ref, patch_ref, H4, W4, 1, pad)
        hx5 = _conv_bn_mish([hx4], w_5, a_5, b_5, line_ref, patch_ref, H4, W4, 2, pad)

        hx4d = _conv_bn_mish([hx5, hx4], w_4d, a_4d, b_4d, line_ref, patch_ref, H4, W4, 1, pad)
        hx4dup = jnp.dot(hx4d, up4[...], preferred_element_type=jnp.float32)
        hx3d = _conv_bn_mish([hx4dup, hx3], w_3d, a_3d, b_3d, line_ref, patch_ref, H3, W3, 1, pad)
        hx3dup = jnp.dot(hx3d, up3[...], preferred_element_type=jnp.float32)
        hx2d = _conv_bn_mish([hx3dup, hx2], w_2d, a_2d, b_2d, line_ref, patch_ref, H2, W2, 1, pad)
        hx2dup = jnp.dot(hx2d, up2[...], preferred_element_type=jnp.float32)
        hx1d = _conv_bn_mish([hx2dup, hx1], w_1d, a_1d, b_1d, line_ref, patch_ref, H1, W1, 1, pad)

        o_ref[0] = hx1d + hxin                                    # residual add

    return kernel


# ---------------------------------------------------------------------------
# Host-side helpers (parameter folding / constant matrices)
# ---------------------------------------------------------------------------
def _fold_bn(p):
    """Fold conv bias + inference-mode BatchNorm into per-channel scale/shift."""
    _, b, gamma, beta, rmean, rvar = p
    sc = gamma / jnp.sqrt(rvar + BN_EPS)
    return sc.reshape(-1, 1), (beta + sc * (b - rmean)).reshape(-1, 1)


def _conv_weight_mat(w, splits):
    """(C_out, sum(splits), 3, 3) -> (C_out, 9*sum(splits)) im2col weight whose
    column order matches the kernel's patch layout."""
    c_out = w.shape[0]
    segs, base = [], 0
    for c in splits:
        seg = w[:, base:base + c]                          # (C_out, c, 3, 3)
        segs.append(jnp.transpose(seg, (0, 2, 3, 1)).reshape(c_out, 9 * c))
        base += c
    return segs[0] if len(segs) == 1 else jnp.concatenate(segs, axis=1)


def _pool_select_matrix(H, W):
    """0/1 matrix selecting the top-left element of every 2x2 window."""
    Ho, Wo = H // 2, W // 2
    S = np.zeros((H * W, Ho * Wo), np.float32)
    for i in range(Ho):
        for j in range(Wo):
            S[(2 * i) * W + 2 * j, i * Wo + j] = 1.0
    return S


def _interp_matrix(n_in, n_out):
    """1D bilinear resize matrix, align_corners=False (F.interpolate default)."""
    A = np.zeros((n_out, n_in), np.float32)
    scale = n_in / n_out
    for p in range(n_out):
        src = max((p + 0.5) * scale - 0.5, 0.0)
        i0 = min(int(np.floor(src)), n_in - 1)
        i1 = min(i0 + 1, n_in - 1)
        f = src - i0
        A[p, i0] += 1.0 - f
        A[p, i1] += f
    return A


def _upsample_matrix(Hs, Ws, Ht, Wt):
    Ah = _interp_matrix(Hs, Ht)                            # (Ht, Hs)
    Aw = _interp_matrix(Ws, Wt)                            # (Wt, Ws)
    return np.ascontiguousarray(np.kron(Ah, Aw).T.astype(np.float32))


# ---------------------------------------------------------------------------
# Fused RSU5 forward (single pallas_call)
# ---------------------------------------------------------------------------
def rsu5_forward(x, params):
    B, in_ch, H, W = x.shape
    assert H % 8 == 0 and W % 8 == 0, "need three exact 2x2 poolings"
    (pin, p1, p2, p3, p4, p5, p4d, p3d, p2d, p1d) = params
    out_ch = pin[0].shape[0]
    mid_ch = p1[0].shape[0]
    HW = H * W
    H2, W2, H3, W3, H4, W4 = H // 2, W // 2, H // 4, W // 4, H // 8, W // 8

    def conv_operands(p, splits):
        scale, shift = _fold_bn(p)
        return [_conv_weight_mat(p[0], splits), scale, shift]

    operands = [x.reshape(B, in_ch, HW)]
    operands += conv_operands(pin, [in_ch])
    operands += conv_operands(p1, [out_ch])
    operands += conv_operands(p2, [mid_ch])
    operands += conv_operands(p3, [mid_ch])
    operands += conv_operands(p4, [mid_ch])
    operands += conv_operands(p5, [mid_ch])
    operands += conv_operands(p4d, [mid_ch, mid_ch])       # cat(hx5, hx4)
    operands += conv_operands(p3d, [mid_ch, mid_ch])       # cat(hx4dup, hx3)
    operands += conv_operands(p2d, [mid_ch, mid_ch])       # cat(hx3dup, hx2)
    operands += conv_operands(p1d, [mid_ch, mid_ch])       # cat(hx2dup, hx1)
    operands += [
        jnp.asarray(_pool_select_matrix(H, W)),
        jnp.asarray(_pool_select_matrix(H2, W2)),
        jnp.asarray(_pool_select_matrix(H3, W3)),
        jnp.asarray(_upsample_matrix(H4, W4, H3, W3)),
        jnp.asarray(_upsample_matrix(H3, W3, H2, W2)),
        jnp.asarray(_upsample_matrix(H2, W2, H, W)),
    ]

    in_specs = [pl.BlockSpec((1, in_ch, HW), lambda b: (b, 0, 0))]
    in_specs += [pl.BlockSpec(op.shape, lambda b: (0, 0)) for op in operands[1:]]
    out_specs = pl.BlockSpec((1, out_ch, HW), lambda b: (b, 0, 0))

    # Line-buffer padding must cover the largest flat tap / pool shift.
    pad = max(W + 1, 2 * (W4 + 1))
    line_rows = max(in_ch, out_ch, mid_ch)
    patch_rows = 9 * max(in_ch, out_ch, mid_ch, 2 * mid_ch)

    out = pl.pallas_call(
        _make_rsu5_kernel(H, W, pad),
        out_shape=jax.ShapeDtypeStruct((B, out_ch, HW), jnp.float32),
        grid=(B,),
        in_specs=in_specs,
        out_specs=out_specs,
        scratch_shapes=[
            pltpu.VMEM((line_rows, HW + 2 * pad), jnp.float32),   # line buffer
            pltpu.VMEM((patch_rows, HW), jnp.float32),            # im2col patches
        ],
        compiler_params=pltpu.CompilerParams(
            dimension_semantics=("parallel",)),   # batch axis -> both TCs on v7x
    )(*operands)
    return out.reshape(B, out_ch, H, W)


# ---------------------------------------------------------------------------
# Pure-JAX reference (correctness check only)
# ---------------------------------------------------------------------------
def rsu5_reference(x, params):
    hp = lax.Precision.HIGHEST

    def rebnconv(h, p, d):
        w, b, gamma, beta, rmean, rvar = p
        y = lax.conv_general_dilated(h, w, (1, 1), [(d, d), (d, d)],
                                     rhs_dilation=(d, d),
                                     dimension_numbers=('NCHW', 'OIHW', 'NCHW'),
                                     precision=hp)
        y = y + b[None, :, None, None]
        sc = gamma / jnp.sqrt(rvar + BN_EPS)
        y = (y - rmean[None, :, None, None]) * sc[None, :, None, None] \
            + beta[None, :, None, None]
        return y * jnp.tanh(jax.nn.softplus(y))               # Mish

    def pool(h):
        return lax.reduce_window(h, -jnp.inf, lax.max,
                                 (1, 1, 2, 2), (1, 1, 2, 2), 'VALID')

    def up_to(h, Ht, Wt):
        Ah = jnp.asarray(_interp_matrix(h.shape[2], Ht))
        Aw = jnp.asarray(_interp_matrix(h.shape[3], Wt))
        return jnp.einsum('pi,ncij,qj->ncpq', Ah, h, Aw, precision=hp)

    (pin, p1, p2, p3, p4, p5, p4d, p3d, p2d, p1d) = params
    hxin = rebnconv(x, pin, 1)
    hx1 = rebnconv(hxin, p1, 1)
    hx2 = rebnconv(pool(hx1), p2, 1)
    hx3 = rebnconv(pool(hx2), p3, 1)
    hx4 = rebnconv(pool(hx3), p4, 1)
    hx5 = rebnconv(hx4, p5, 2)
    hx4d = rebnconv(jnp.concatenate([hx5, hx4], axis=1), p4d, 1)
    hx4dup = up_to(hx4d, hx3.shape[2], hx3.shape[3])
    hx3d = rebnconv(jnp.concatenate([hx4dup, hx3], axis=1), p3d, 1)
    hx3dup = up_to(hx3d, hx2.shape[2], hx2.shape[3])
    hx2d = rebnconv(jnp.concatenate([hx3dup, hx2], axis=1), p2d, 1)
    hx2dup = up_to(hx2d, hx1.shape[2], hx1.shape[3])
    hx1d = rebnconv(jnp.concatenate([hx2dup, hx1], axis=1), p1d, 1)
    return hx1d + hxin


# ---------------------------------------------------------------------------
# Main
# ---------------------------------------------------------------------------
if __name__ == "__main__":
    B = 2
    in_ch, mid_ch, out_ch = 3, 12, 3          # RSU5 defaults
    H = W = 16

    key = jax.random.PRNGKey(0)
    key, kx = jax.random.split(key)
    x = jax.random.normal(kx, (B, in_ch, H, W), jnp.float32)

    def make_rebnconv(k, c_in, c_out):
        ks = jax.random.split(k, 6)
        w = 0.2 * jax.random.normal(ks[0], (c_out, c_in, 3, 3), jnp.float32)
        b = 0.1 * jax.random.normal(ks[1], (c_out,), jnp.float32)
        gamma = 1.0 + 0.1 * jax.random.normal(ks[2], (c_out,), jnp.float32)
        beta = 0.1 * jax.random.normal(ks[3], (c_out,), jnp.float32)
        rmean = 0.1 * jax.random.normal(ks[4], (c_out,), jnp.float32)
        rvar = 1.0 + 0.1 * jax.random.uniform(ks[5], (c_out,), jnp.float32)
        return (w, b, gamma, beta, rmean, rvar)

    layer_io = [(in_ch, out_ch),       # rebnconvin
                (out_ch, mid_ch),      # rebnconv1
                (mid_ch, mid_ch),      # rebnconv2
                (mid_ch, mid_ch),      # rebnconv3
                (mid_ch, mid_ch),      # rebnconv4
                (mid_ch, mid_ch),      # rebnconv5 (dirate=2)
                (2 * mid_ch, mid_ch),  # rebnconv4d
                (2 * mid_ch, mid_ch),  # rebnconv3d
                (2 * mid_ch, mid_ch),  # rebnconv2d
                (2 * mid_ch, out_ch)]  # rebnconv1d
    params = []
    for ci, co in layer_io:
        key, kk = jax.random.split(key)
        params.append(make_rebnconv(kk, ci, co))
    params = tuple(params)

    out = jax.block_until_ready(rsu5_forward(x, params))
    assert out.shape == (B, out_ch, H, W), out.shape

    ref = jax.block_until_ready(rsu5_reference(x, params))
    np.testing.assert_allclose(np.asarray(out), np.asarray(ref),
                               rtol=1e-2, atol=1e-2)

    print("KERNEL_OK")
</pallas_src>

<mosaic_0001>
module attributes {stable_mosaic.version = 11 : i64} {
  func.func @kernel(%arg0: i32, %arg1: memref<1x3x256xf32, #tpu.memory_space<vmem>>, %arg2: memref<3x27xf32, #tpu.memory_space<vmem>>, %arg3: memref<3x1xf32, #tpu.memory_space<vmem>>, %arg4: memref<3x1xf32, #tpu.memory_space<vmem>>, %arg5: memref<12x27xf32, #tpu.memory_space<vmem>>, %arg6: memref<12x1xf32, #tpu.memory_space<vmem>>, %arg7: memref<12x1xf32, #tpu.memory_space<vmem>>, %arg8: memref<12x108xf32, #tpu.memory_space<vmem>>, %arg9: memref<12x1xf32, #tpu.memory_space<vmem>>, %arg10: memref<12x1xf32, #tpu.memory_space<vmem>>, %arg11: memref<12x108xf32, #tpu.memory_space<vmem>>, %arg12: memref<12x1xf32, #tpu.memory_space<vmem>>, %arg13: memref<12x1xf32, #tpu.memory_space<vmem>>, %arg14: memref<12x108xf32, #tpu.memory_space<vmem>>, %arg15: memref<12x1xf32, #tpu.memory_space<vmem>>, %arg16: memref<12x1xf32, #tpu.memory_space<vmem>>, %arg17: memref<12x108xf32, #tpu.memory_space<vmem>>, %arg18: memref<12x1xf32, #tpu.memory_space<vmem>>, %arg19: memref<12x1xf32, #tpu.memory_space<vmem>>, %arg20: memref<12x216xf32, #tpu.memory_space<vmem>>, %arg21: memref<12x1xf32, #tpu.memory_space<vmem>>, %arg22: memref<12x1xf32, #tpu.memory_space<vmem>>, %arg23: memref<12x216xf32, #tpu.memory_space<vmem>>, %arg24: memref<12x1xf32, #tpu.memory_space<vmem>>, %arg25: memref<12x1xf32, #tpu.memory_space<vmem>>, %arg26: memref<12x216xf32, #tpu.memory_space<vmem>>, %arg27: memref<12x1xf32, #tpu.memory_space<vmem>>, %arg28: memref<12x1xf32, #tpu.memory_space<vmem>>, %arg29: memref<3x216xf32, #tpu.memory_space<vmem>>, %arg30: memref<3x1xf32, #tpu.memory_space<vmem>>, %arg31: memref<3x1xf32, #tpu.memory_space<vmem>>, %arg32: memref<256x64xf32, #tpu.memory_space<vmem>>, %arg33: memref<64x16xf32, #tpu.memory_space<vmem>>, %arg34: memref<16x4xf32, #tpu.memory_space<vmem>>, %arg35: memref<4x16xf32, #tpu.memory_space<vmem>>, %arg36: memref<16x64xf32, #tpu.memory_space<vmem>>, %arg37: memref<64x256xf32, #tpu.memory_space<vmem>>, %arg38: memref<1x3x256xf32, #tpu.memory_space<vmem>>, %arg39: memref<12x290xf32, #tpu.memory_space<vmem>>, %arg40: memref<216x256xf32, #tpu.memory_space<vmem>>) attributes {dimension_semantics = [#tpu.dimension_semantics<parallel>], iteration_bounds = array<i64: 2>, scalar_prefetch = 0 : i64, scratch_operands = 2 : i64, tpu.core_type = #tpu.core_type<tc>, window_params = [{transform_indices = @transform_0, window_bounds = array<i64: 1, 3, 256>}, {pipeline_mode = #tpu.pipeline_mode<synchronous>, transform_indices = @transform_1, window_bounds = array<i64: 3, 27>}, {pipeline_mode = #tpu.pipeline_mode<synchronous>, transform_indices = @transform_2, window_bounds = array<i64: 3, 1>}, {pipeline_mode = #tpu.pipeline_mode<synchronous>, transform_indices = @transform_3, window_bounds = array<i64: 3, 1>}, {pipeline_mode = #tpu.pipeline_mode<synchronous>, transform_indices = @transform_4, window_bounds = array<i64: 12, 27>}, {pipeline_mode = #tpu.pipeline_mode<synchronous>, transform_indices = @transform_5, window_bounds = array<i64: 12, 1>}, {pipeline_mode = #tpu.pipeline_mode<synchronous>, transform_indices = @transform_6, window_bounds = array<i64: 12, 1>}, {pipeline_mode = #tpu.pipeline_mode<synchronous>, transform_indices = @transform_7, window_bounds = array<i64: 12, 108>}, {pipeline_mode = #tpu.pipeline_mode<synchronous>, transform_indices = @transform_8, window_bounds = array<i64: 12, 1>}, {pipeline_mode = #tpu.pipeline_mode<synchronous>, transform_indices = @transform_9, window_bounds = array<i64: 12, 1>}, {pipeline_mode = #tpu.pipeline_mode<synchronous>, transform_indices = @transform_10, window_bounds = array<i64: 12, 108>}, {pipeline_mode = #tpu.pipeline_mode<synchronous>, transform_indices = @transform_11, window_bounds = array<i64: 12, 1>}, {pipeline_mode = #tpu.pipeline_mode<synchronous>, transform_indices = @transform_12, window_bounds = array<i64: 12, 1>}, {pipeline_mode = #tpu.pipeline_mode<synchronous>, transform_indices = @transform_13, window_bounds = array<i64: 12, 108>}, {pipeline_mode = #tpu.pipeline_mode<synchronous>, transform_indices = @transform_14, window_bounds = array<i64: 12, 1>}, {pipeline_mode = #tpu.pipeline_mode<synchronous>, transform_indices = @transform_15, window_bounds = array<i64: 12, 1>}, {pipeline_mode = #tpu.pipeline_mode<synchronous>, transform_indices = @transform_16, window_bounds = array<i64: 12, 108>}, {pipeline_mode = #tpu.pipeline_mode<synchronous>, transform_indices = @transform_17, window_bounds = array<i64: 12, 1>}, {pipeline_mode = #tpu.pipeline_mode<synchronous>, transform_indices = @transform_18, window_bounds = array<i64: 12, 1>}, {pipeline_mode = #tpu.pipeline_mode<synchronous>, transform_indices = @transform_19, window_bounds = array<i64: 12, 216>}, {pipeline_mode = #tpu.pipeline_mode<synchronous>, transform_indices = @transform_20, window_bounds = array<i64: 12, 1>}, {pipeline_mode = #tpu.pipeline_mode<synchronous>, transform_indices = @transform_21, window_bounds = array<i64: 12, 1>}, {pipeline_mode = #tpu.pipeline_mode<synchronous>, transform_indices = @transform_22, window_bounds = array<i64: 12, 216>}, {pipeline_mode = #tpu.pipeline_mode<synchronous>, transform_indices = @transform_23, window_bounds = array<i64: 12, 1>}, {pipeline_mode = #tpu.pipeline_mode<synchronous>, transform_indices = @transform_24, window_bounds = array<i64: 12, 1>}, {pipeline_mode = #tpu.pipeline_mode<synchronous>, transform_indices = @transform_25, window_bounds = array<i64: 12, 216>}, {pipeline_mode = #tpu.pipeline_mode<synchronous>, transform_indices = @transform_26, window_bounds = array<i64: 12, 1>}, {pipeline_mode = #tpu.pipeline_mode<synchronous>, transform_indices = @transform_27, window_bounds = array<i64: 12, 1>}, {pipeline_mode = #tpu.pipeline_mode<synchronous>, transform_indices = @transform_28, window_bounds = array<i64: 3, 216>}, {pipeline_mode = #tpu.pipeline_mode<synchronous>, transform_indices = @transform_29, window_bounds = array<i64: 3, 1>}, {pipeline_mode = #tpu.pipeline_mode<synchronous>, transform_indices = @transform_30, window_bounds = array<i64: 3, 1>}, {pipeline_mode = #tpu.pipeline_mode<synchronous>, transform_indices = @transform_31, window_bounds = array<i64: 256, 64>}, {pipeline_mode = #tpu.pipeline_mode<synchronous>, transform_indices = @transform_32, window_bounds = array<i64: 64, 16>}, {pipeline_mode = #tpu.pipeline_mode<synchronous>, transform_indices = @transform_33, window_bounds = array<i64: 16, 4>}, {pipeline_mode = #tpu.pipeline_mode<synchronous>, transform_indices = @transform_34, window_bounds = array<i64: 4, 16>}, {pipeline_mode = #tpu.pipeline_mode<synchronous>, transform_indices = @transform_35, window_bounds = array<i64: 16, 64>}, {pipeline_mode = #tpu.pipeline_mode<synchronous>, transform_indices = @transform_36, window_bounds = array<i64: 64, 256>}, {transform_indices = @transform_37, window_bounds = array<i64: 1, 3, 256>}]} {
    %cst = arith.constant 0.000000e+00 : f32
    %0 = vector.broadcast %cst : f32 to vector<12x290xf32>
    %c0 = arith.constant 0 : index
    %c0_0 = arith.constant 0 : index
    %1 = vector.load %arg39[%c0, %c0_0] : memref<12x290xf32, #tpu.memory_space<vmem>>, vector<12x290xf32>
    tpu.vector_store %arg39[%c0, %c0_0], %0 {strides = array<i32>} : memref<12x290xf32, #tpu.memory_space<vmem>>, vector<12x290xf32>,
    %c0_1 = arith.constant 0 : index
    %c0_2 = arith.constant 0 : index
    %c0_3 = arith.constant 0 : index
    %2 = vector.load %arg1[%c0_1, %c0_2, %c0_3] : memref<1x3x256xf32, #tpu.memory_space<vmem>>, vector<1x3x256xf32>
    %3 = vector.shape_cast %2 : vector<1x3x256xf32> to vector<3x256xf32>
    %4 = tpu.iota {dimensions = array<i32: 1>} : vector<1x256xi32>
    %c4_i32 = arith.constant 4 : i32
    %5 = vector.broadcast %c4_i32 : i32 to vector<1x256xi32>
    %6 = arith.shrsi %4, %5 : vector<1x256xi32>
    %c15_i32 = arith.constant 15 : i32
    %7 = vector.broadcast %c15_i32 : i32 to vector<1x256xi32>
    %8 = arith.andi %4, %7 : vector<1x256xi32>
    %c1_i32 = arith.constant 1 : i32
    %9 = vector.broadcast %c1_i32 : i32 to vector<1x256xi32>
    %10 = arith.cmpi sge, %6, %9 : vector<1x256xi32>
    %cst_4 = arith.constant 1.000000e+00 : f32
    %cst_5 = arith.constant 0.000000e+00 : f32
    %11 = vector.broadcast %cst_4 : f32 to vector<1x256xf32>
    %12 = vector.broadcast %cst_5 : f32 to vector<1x256xf32>
    %13 = arith.select %10, %11, %12 : vector<1x256xi1>, vector<1x256xf32>
    %c1_i32_6 = arith.constant 1 : i32
    %14 = vector.broadcast %c1_i32_6 : i32 to vector<1x256xi32>
    %15 = arith.cmpi sge, %8, %14 : vector<1x256xi32>
    %cst_7 = arith.constant 1.000000e+00 : f32
    %cst_8 = arith.constant 0.000000e+00 : f32
    %16 = vector.broadcast %cst_7 : f32 to vector<1x256xf32>
    %17 = vector.broadcast %cst_8 : f32 to vector<1x256xf32>
    %18 = arith.select %15, %16, %17 : vector<1x256xi1>, vector<1x256xf32>
    %19 = arith.mulf %13, %18 : vector<1x256xf32>
    %c1_i32_9 = arith.constant 1 : i32
    %20 = vector.broadcast %c1_i32_9 : i32 to vector<1x256xi32>
    %21 = arith.cmpi sge, %6, %20 : vector<1x256xi32>
    %cst_10 = arith.constant 1.000000e+00 : f32
    %cst_11 = arith.constant 0.000000e+00 : f32
    %22 = vector.broadcast %cst_10 : f32 to vector<1x256xf32>
    %23 = vector.broadcast %cst_11 : f32 to vector<1x256xf32>
    %24 = arith.select %21, %22, %23 : vector<1x256xi1>, vector<1x256xf32>
    %c1_i32_12 = arith.constant 1 : i32
    %25 = vector.broadcast %c1_i32_12 : i32 to vector<1x256xi32>
    %26 = arith.cmpi sge, %6, %25 : vector<1x256xi32>
    %cst_13 = arith.constant 1.000000e+00 : f32
    %cst_14 = arith.constant 0.000000e+00 : f32
    %27 = vector.broadcast %cst_13 : f32 to vector<1x256xf32>
    %28 = vector.broadcast %cst_14 : f32 to vector<1x256xf32>
    %29 = arith.select %26, %27, %28 : vector<1x256xi1>, vector<1x256xf32>
    %c15_i32_15 = arith.constant 15 : i32
    %30 = vector.broadcast %c15_i32_15 : i32 to vector<1x256xi32>
    %31 = arith.cmpi slt, %8, %30 : vector<1x256xi32>
    %cst_16 = arith.constant 1.000000e+00 : f32
    %cst_17 = arith.constant 0.000000e+00 : f32
    %32 = vector.broadcast %cst_16 : f32 to vector<1x256xf32>
    %33 = vector.broadcast %cst_17 : f32 to vector<1x256xf32>
    %34 = arith.select %31, %32, %33 : vector<1x256xi1>, vector<1x256xf32>
    %35 = arith.mulf %29, %34 : vector<1x256xf32>
    %c1_i32_18 = arith.constant 1 : i32
    %36 = vector.broadcast %c1_i32_18 : i32 to vector<1x256xi32>
    %37 = arith.cmpi sge, %8, %36 : vector<1x256xi32>
    %cst_19 = arith.constant 1.000000e+00 : f32
    %cst_20 = arith.constant 0.000000e+00 : f32
    %38 = vector.broadcast %cst_19 : f32 to vector<1x256xf32>
    %39 = vector.broadcast %cst_20 : f32 to vector<1x256xf32>
    %40 = arith.select %37, %38, %39 : vector<1x256xi1>, vector<1x256xf32>
    %c15_i32_21 = arith.constant 15 : i32
    %41 = vector.broadcast %c15_i32_21 : i32 to vector<1x256xi32>
    %42 = arith.cmpi slt, %8, %41 : vector<1x256xi32>
    %cst_22 = arith.constant 1.000000e+00 : f32
    %cst_23 = arith.constant 0.000000e+00 : f32
    %43 = vector.broadcast %cst_22 : f32 to vector<1x256xf32>
    %44 = vector.broadcast %cst_23 : f32 to vector<1x256xf32>
    %45 = arith.select %42, %43, %44 : vector<1x256xi1>, vector<1x256xf32>
    %c15_i32_24 = arith.constant 15 : i32
    %46 = vector.broadcast %c15_i32_24 : i32 to vector<1x256xi32>
    %47 = arith.cmpi slt, %6, %46 : vector<1x256xi32>
    %cst_25 = arith.constant 1.000000e+00 : f32
    %cst_26 = arith.constant 0.000000e+00 : f32
    %48 = vector.broadcast %cst_25 : f32 to vector<1x256xf32>
    %49 = vector.broadcast %cst_26 : f32 to vector<1x256xf32>
    %50 = arith.select %47, %48, %49 : vector<1x256xi1>, vector<1x256xf32>
    %c1_i32_27 = arith.constant 1 : i32
    %51 = vector.broadcast %c1_i32_27 : i32 to vector<1x256xi32>
    %52 = arith.cmpi sge, %8, %51 : vector<1x256xi32>
    %cst_28 = arith.constant 1.000000e+00 : f32
    %cst_29 = arith.constant 0.000000e+00 : f32
    %53 = vector.broadcast %cst_28 : f32 to vector<1x256xf32>
    %54 = vector.broadcast %cst_29 : f32 to vector<1x256xf32>
    %55 = arith.select %52, %53, %54 : vector<1x256xi1>, vector<1x256xf32>
    %56 = arith.mulf %50, %55 : vector<1x256xf32>
    %c15_i32_30 = arith.constant 15 : i32
    %57 = vector.broadcast %c15_i32_30 : i32 to vector<1x256xi32>
    %58 = arith.cmpi slt, %6, %57 : vector<1x256xi32>
    %cst_31 = arith.constant 1.000000e+00 : f32
    %cst_32 = arith.constant 0.000000e+00 : f32
    %59 = vector.broadcast %cst_31 : f32 to vector<1x256xf32>
    %60 = vector.broadcast %cst_32 : f32 to vector<1x256xf32>
    %61 = arith.select %58, %59, %60 : vector<1x256xi1>, vector<1x256xf32>
    %c15_i32_33 = arith.constant 15 : i32
    %62 = vector.broadcast %c15_i32_33 : i32 to vector<1x256xi32>
    %63 = arith.cmpi slt, %6, %62 : vector<1x256xi32>
    %cst_34 = arith.constant 1.000000e+00 : f32
    %cst_35 = arith.constant 0.000000e+00 : f32
    %64 = vector.broadcast %cst_34 : f32 to vector<1x256xf32>
    %65 = vector.broadcast %cst_35 : f32 to vector<1x256xf32>
    %66 = arith.select %63, %64, %65 : vector<1x256xi1>, vector<1x256xf32>
    %c15_i32_36 = arith.constant 15 : i32
    %67 = vector.broadcast %c15_i32_36 : i32 to vector<1x256xi32>
    %68 = arith.cmpi slt, %8, %67 : vector<1x256xi32>
    %cst_37 = arith.constant 1.000000e+00 : f32
    %cst_38 = arith.constant 0.000000e+00 : f32
    %69 = vector.broadcast %cst_37 : f32 to vector<1x256xf32>
    %70 = vector.broadcast %cst_38 : f32 to vector<1x256xf32>
    %71 = arith.select %68, %69, %70 : vector<1x256xi1>, vector<1x256xf32>
    %72 = arith.mulf %66, %71 : vector<1x256xf32>
    %c0_39 = arith.constant 0 : index
    %c17 = arith.constant 17 : index
    %73 = vector.load %arg39[%c0_39, %c17] : memref<12x290xf32, #tpu.memory_space<vmem>>, vector<3x256xf32>
    tpu.vector_store %arg39[%c0_39, %c17], %3 {strides = array<i32>} : memref<12x290xf32, #tpu.memory_space<vmem>>, vector<3x256xf32>,
    %c0_40 = arith.constant 0 : index
    %c0_41 = arith.constant 0 : index
    %74 = vector.load %arg39[%c0_40, %c0_41] : memref<12x290xf32, #tpu.memory_space<vmem>>, vector<3x256xf32>
    %75 = vector.broadcast %19 : vector<1x256xf32> to vector<3x256xf32>
    %76 = arith.mulf %74, %75 : vector<3x256xf32>
    %c0_42 = arith.constant 0 : index
    %c0_43 = arith.constant 0 : index
    %77 = vector.load %arg40[%c0_42, %c0_43] : memref<216x256xf32, #tpu.memory_space<vmem>>, vector<3x256xf32>
    tpu.vector_store %arg40[%c0_42, %c0_43], %76 {strides = array<i32>} : memref<216x256xf32, #tpu.memory_space<vmem>>, vector<3x256xf32>,
    %c0_44 = arith.constant 0 : index
    %c1 = arith.constant 1 : index
    %78 = vector.load %arg39[%c0_44, %c1] : memref<12x290xf32, #tpu.memory_space<vmem>>, vector<3x256xf32>
    %79 = vector.broadcast %24 : vector<1x256xf32> to vector<3x256xf32>
    %80 = arith.mulf %78, %79 : vector<3x256xf32>
    %c3 = arith.constant 3 : index
    %c0_45 = arith.constant 0 : index
    %81 = vector.load %arg40[%c3, %c0_45] : memref<216x256xf32, #tpu.memory_space<vmem>>, vector<3x256xf32>
    tpu.vector_store %arg40[%c3, %c0_45], %80 {strides = array<i32>} : memref<216x256xf32, #tpu.memory_space<vmem>>, vector<3x256xf32>,
    %c0_46 = arith.constant 0 : index
    %c2 = arith.constant 2 : index
    %82 = vector.load %arg39[%c0_46, %c2] : memref<12x290xf32, #tpu.memory_space<vmem>>, vector<3x256xf32>
    %83 = vector.broadcast %35 : vector<1x256xf32> to vector<3x256xf32>
    %84 = arith.mulf %82, %83 : vector<3x256xf32>
    %c6 = arith.constant 6 : index
    %c0_47 = arith.constant 0 : index
    %85 = vector.load %arg40[%c6, %c0_47] : memref<216x256xf32, #tpu.memory_space<vmem>>, vector<3x256xf32>
    tpu.vector_store %arg40[%c6, %c0_47], %84 {strides = array<i32>} : memref<216x256xf32, #tpu.memory_space<vmem>>, vector<3x256xf32>,
    %c0_48 = arith.constant 0 : index
    %c16 = arith.constant 16 : index
    %86 = vector.load %arg39[%c0_48, %c16] : memref<12x290xf32, #tpu.memory_space<vmem>>, vector<3x256xf32>
    %87 = vector.broadcast %40 : vector<1x256xf32> to vector<3x256xf32>
    %88 = arith.mulf %86, %87 : vector<3x256xf32>
    %c9 = arith.constant 9 : index
    %c0_49 = arith.constant 0 : index
    %89 = vector.load %arg40[%c9, %c0_49] : memref<216x256xf32, #tpu.memory_space<vmem>>, vector<3x256xf32>
    tpu.vector_store %arg40[%c9, %c0_49], %88 {strides = array<i32>} : memref<216x256xf32, #tpu.memory_space<vmem>>, vector<3x256xf32>,
    %c12 = arith.constant 12 : index
    %c0_50 = arith.constant 0 : index
    %90 = vector.load %arg40[%c12, %c0_50] : memref<216x256xf32, #tpu.memory_space<vmem>>, vector<3x256xf32>
    tpu.vector_store %arg40[%c12, %c0_50], %3 {strides = array<i32>} : memref<216x256xf32, #tpu.memory_space<vmem>>, vector<3x256xf32>,
    %c0_51 = arith.constant 0 : index
    %c18 = arith.constant 18 : index
    %91 = vector.load %arg39[%c0_51, %c18] : memref<12x290xf32, #tpu.memory_space<vmem>>, vector<3x256xf32>
    %92 = vector.broadcast %45 : vector<1x256xf32> to vector<3x256xf32>
    %93 = arith.mulf %91, %92 : vector<3x256xf32>
    %c15 = arith.constant 15 : index
    %c0_52 = arith.constant 0 : index
    %94 = vector.load %arg40[%c15, %c0_52] : memref<216x256xf32, #tpu.memory_space<vmem>>, vector<3x256xf32>
    tpu.vector_store %arg40[%c15, %c0_52], %93 {strides = array<i32>} : memref<216x256xf32, #tpu.memory_space<vmem>>, vector<3x256xf32>,
    %c0_53 = arith.constant 0 : index
    %c32 = arith.constant 32 : index
    %95 = vector.load %arg39[%c0_53, %c32] : memref<12x290xf32, #tpu.memory_space<vmem>>, vector<3x256xf32>
    %96 = vector.broadcast %56 : vector<1x256xf32> to vector<3x256xf32>
    %97 = arith.mulf %95, %96 : vector<3x256xf32>
    %c18_54 = arith.constant 18 : index
    %c0_55 = arith.constant 0 : index
    %98 = vector.load %arg40[%c18_54, %c0_55] : memref<216x256xf32, #tpu.memory_space<vmem>>, vector<3x256xf32>
    tpu.vector_store %arg40[%c18_54, %c0_55], %97 {strides = array<i32>} : memref<216x256xf32, #tpu.memory_space<vmem>>, vector<3x256xf32>,
    %c0_56 = arith.constant 0 : index
    %c33 = arith.constant 33 : index
    %99 = vector.load %arg39[%c0_56, %c33] : memref<12x290xf32, #tpu.memory_space<vmem>>, vector<3x256xf32>
    %100 = vector.broadcast %61 : vector<1x256xf32> to vector<3x256xf32>
    %101 = arith.mulf %99, %100 : vector<3x256xf32>
    %c21 = arith.constant 21 : index
    %c0_57 = arith.constant 0 : index
    %102 = vector.load %arg40[%c21, %c0_57] : memref<216x256xf32, #tpu.memory_space<vmem>>, vector<3x256xf32>
    tpu.vector_store %arg40[%c21, %c0_57], %101 {strides = array<i32>} : memref<216x256xf32, #tpu.memory_space<vmem>>, vector<3x256xf32>,
    %c0_58 = arith.constant 0 : index
    %c34 = arith.constant 34 : index
    %103 = vector.load %arg39[%c0_58, %c34] : memref<12x290xf32, #tpu.memory_space<vmem>>, vector<3x256xf32>
    %104 = vector.broadcast %72 : vector<1x256xf32> to vector<3x256xf32>
    %105 = arith.mulf %103, %104 : vector<3x256xf32>
    %c24 = arith.constant 24 : index
    %c0_59 = arith.constant 0 : index
    %106 = vector.load %arg40[%c24, %c0_59] : memref<216x256xf32, #tpu.memory_space<vmem>>, vector<3x256xf32>
    tpu.vector_store %arg40[%c24, %c0_59], %105 {strides = array<i32>} : memref<216x256xf32, #tpu.memory_space<vmem>>, vector<3x256xf32>,
    %c0_60 = arith.constant 0 : index
    %c0_61 = arith.constant 0 : index
    %107 = vector.load %arg2[%c0_60, %c0_61] : memref<3x27xf32, #tpu.memory_space<vmem>>, vector<3x27xf32>
    %c0_62 = arith.constant 0 : index
    %c0_63 = arith.constant 0 : index
    %108 = vector.load %arg40[%c0_62, %c0_63] : memref<216x256xf32, #tpu.memory_space<vmem>>, vector<27x256xf32>
    %cst_64 = arith.constant dense<0.000000e+00> : vector<3x256xf32>
    %109 = tpu.matmul %107, %108, %cst_64 {dimension_numbers = #tpu.dot_dimension_numbers<[1], [0], [0], [1], [0, 0, 1, 1], [], []>} : vector<3x27xf32>, vector<27x256xf32>, vector<3x256xf32> -> vector<3x256xf32>
    %c0_65 = arith.constant 0 : index
    %c0_66 = arith.constant 0 : index
    %110 = vector.load %arg3[%c0_65, %c0_66] : memref<3x1xf32, #tpu.memory_space<vmem>>, vector<3x1xf32>
    %111 = vector.broadcast %110 : vector<3x1xf32> to vector<3x256xf32>
    %112 = arith.mulf %109, %111 : vector<3x256xf32>
    %c0_67 = arith.constant 0 : index
    %c0_68 = arith.constant 0 : index
    %113 = vector.load %arg4[%c0_67, %c0_68] : memref<3x1xf32, #tpu.memory_space<vmem>>, vector<3x1xf32>
    %114 = vector.broadcast %113 : vector<3x1xf32> to vector<3x256xf32>
    %115 = arith.addf %112, %114 : vector<3x256xf32>
    %116 = math.exp %115 : vector<3x256xf32>
    %cst_69 = arith.constant 1.000000e+00 : f32
    %117 = vector.broadcast %cst_69 : f32 to vector<3x256xf32>
    %118 = arith.addf %117, %116 : vector<3x256xf32>
    %119 = math.log %118 : vector<3x256xf32>
    %120 = math.tanh %119 : vector<3x256xf32>
    %121 = arith.mulf %115, %120 : vector<3x256xf32>
    %122 = tpu.iota {dimensions = array<i32: 1>} : vector<1x256xi32>
    %c4_i32_70 = arith.constant 4 : i32
    %123 = vector.broadcast %c4_i32_70 : i32 to vector<1x256xi32>
    %124 = arith.shrsi %122, %123 : vector<1x256xi32>
    %c15_i32_71 = arith.constant 15 : i32
    %125 = vector.broadcast %c15_i32_71 : i32 to vector<1x256xi32>
    %126 = arith.andi %122, %125 : vector<1x256xi32>
    %c1_i32_72 = arith.constant 1 : i32
    %127 = vector.broadcast %c1_i32_72 : i32 to vector<1x256xi32>
    %128 = arith.cmpi sge, %124, %127 : vector<1x256xi32>
    %cst_73 = arith.constant 1.000000e+00 : f32
    %cst_74 = arith.constant 0.000000e+00 : f32
    %129 = vector.broadcast %cst_73 : f32 to vector<1x256xf32>
    %130 = vector.broadcast %cst_74 : f32 to vector<1x256xf32>
    %131 = arith.select %128, %129, %130 : vector<1x256xi1>, vector<1x256xf32>
    %c1_i32_75 = arith.constant 1 : i32
    %132 = vector.broadcast %c1_i32_75 : i32 to vector<1x256xi32>
    %133 = arith.cmpi sge, %126, %132 : vector<1x256xi32>
    %cst_76 = arith.constant 1.000000e+00 : f32
    %cst_77 = arith.constant 0.000000e+00 : f32
    %134 = vector.broadcast %cst_76 : f32 to vector<1x256xf32>
    %135 = vector.broadcast %cst_77 : f32 to vector<1x256xf32>
    %136 = arith.select %133, %134, %135 : vector<1x256xi1>, vector<1x256xf32>
    %137 = arith.mulf %131, %136 : vector<1x256xf32>
    %c1_i32_78 = arith.constant 1 : i32
    %138 = vector.broadcast %c1_i32_78 : i32 to vector<1x256xi32>
    %139 = arith.cmpi sge, %124, %138 : vector<1x256xi32>
    %cst_79 = arith.constant 1.000000e+00 : f32
    %cst_80 = arith.constant 0.000000e+00 : f32
    %140 = vector.broadcast %cst_79 : f32 to vector<1x256xf32>
    %141 = vector.broadcast %cst_80 : f32 to vector<1x256xf32>
    %142 = arith.select %139, %140, %141 : vector<1x256xi1>, vector<1x256xf32>
    %c1_i32_81 = arith.constant 1 : i32
    %143 = vector.broadcast %c1_i32_81 : i32 to vector<1x256xi32>
    %144 = arith.cmpi sge, %124, %143 : vector<1x256xi32>
    %cst_82 = arith.constant 1.000000e+00 : f32
    %cst_83 = arith.constant 0.000000e+00 : f32
    %145 = vector.broadcast %cst_82 : f32 to vector<1x256xf32>
    %146 = vector.broadcast %cst_83 : f32 to vector<1x256xf32>
    %147 = arith.select %144, %145, %146 : vector<1x256xi1>, vector<1x256xf32>
    %c15_i32_84 = arith.constant 15 : i32
    %148 = vector.broadcast %c15_i32_84 : i32 to vector<1x256xi32>
    %149 = arith.cmpi slt, %126, %148 : vector<1x256xi32>
    %cst_85 = arith.constant 1.000000e+00 : f32
    %cst_86 = arith.constant 0.000000e+00 : f32
    %150 = vector.broadcast %cst_85 : f32 to vector<1x256xf32>
    %151 = vector.broadcast %cst_86 : f32 to vector<1x256xf32>
    %152 = arith.select %149, %150, %151 : vector<1x256xi1>, vector<1x256xf32>
    %153 = arith.mulf %147, %152 : vector<1x256xf32>
    %c1_i32_87 = arith.constant 1 : i32
    %154 = vector.broadcast %c1_i32_87 : i32 to vector<1x256xi32>
    %155 = arith.cmpi sge, %126, %154 : vector<1x256xi32>
    %cst_88 = arith.constant 1.000000e+00 : f32
    %cst_89 = arith.constant 0.000000e+00 : f32
    %156 = vector.broadcast %cst_88 : f32 to vector<1x256xf32>
    %157 = vector.broadcast %cst_89 : f32 to vector<1x256xf32>
    %158 = arith.select %155, %156, %157 : vector<1x256xi1>, vector<1x256xf32>
    %c15_i32_90 = arith.constant 15 : i32
    %159 = vector.broadcast %c15_i32_90 : i32 to vector<1x256xi32>
    %160 = arith.cmpi slt, %126, %159 : vector<1x256xi32>
    %cst_91 = arith.constant 1.000000e+00 : f32
    %cst_92 = arith.constant 0.000000e+00 : f32
    %161 = vector.broadcast %cst_91 : f32 to vector<1x256xf32>
    %162 = vector.broadcast %cst_92 : f32 to vector<1x256xf32>
    %163 = arith.select %160, %161, %162 : vector<1x256xi1>, vector<1x256xf32>
    %c15_i32_93 = arith.constant 15 : i32
    %164 = vector.broadcast %c15_i32_93 : i32 to vector<1x256xi32>
    %165 = arith.cmpi slt, %124, %164 : vector<1x256xi32>
    %cst_94 = arith.constant 1.000000e+00 : f32
    %cst_95 = arith.constant 0.000000e+00 : f32
    %166 = vector.broadcast %cst_94 : f32 to vector<1x256xf32>
    %167 = vector.broadcast %cst_95 : f32 to vector<1x256xf32>
    %168 = arith.select %165, %166, %167 : vector<1x256xi1>, vector<1x256xf32>
    %c1_i32_96 = arith.constant 1 : i32
    %169 = vector.broadcast %c1_i32_96 : i32 to vector<1x256xi32>
    %170 = arith.cmpi sge, %126, %169 : vector<1x256xi32>
    %cst_97 = arith.constant 1.000000e+00 : f32
    %cst_98 = arith.constant 0.000000e+00 : f32
    %171 = vector.broadcast %cst_97 : f32 to vector<1x256xf32>
    %172 = vector.broadcast %cst_98 : f32 to vector<1x256xf32>
    %173 = arith.select %170, %171, %172 : vector<1x256xi1>, vector<1x256xf32>
    %174 = arith.mulf %168, %173 : vector<1x256xf32>
    %c15_i32_99 = arith.constant 15 : i32
    %175 = vector.broadcast %c15_i32_99 : i32 to vector<1x256xi32>
    %176 = arith.cmpi slt, %124, %175 : vector<1x256xi32>
    %cst_100 = arith.constant 1.000000e+00 : f32
    %cst_101 = arith.constant 0.000000e+00 : f32
    %177 = vector.broadcast %cst_100 : f32 to vector<1x256xf32>
    %178 = vector.broadcast %cst_101 : f32 to vector<1x256xf32>
    %179 = arith.select %176, %177, %178 : vector<1x256xi1>, vector<1x256xf32>
    %c15_i32_102 = arith.constant 15 : i32
    %180 = vector.broadcast %c15_i32_102 : i32 to vector<1x256xi32>
    %181 = arith.cmpi slt, %124, %180 : vector<1x256xi32>
    %cst_103 = arith.constant 1.000000e+00 : f32
    %cst_104 = arith.constant 0.000000e+00 : f32
    %182 = vector.broadcast %cst_103 : f32 to vector<1x256xf32>
    %183 = vector.broadcast %cst_104 : f32 to vector<1x256xf32>
    %184 = arith.select %181, %182, %183 : vector<1x256xi1>, vector<1x256xf32>
    %c15_i32_105 = arith.constant 15 : i32
    %185 = vector.broadcast %c15_i32_105 : i32 to vector<1x256xi32>
    %186 = arith.cmpi slt, %126, %185 : vector<1x256xi32>
    %cst_106 = arith.constant 1.000000e+00 : f32
    %cst_107 = arith.constant 0.000000e+00 : f32
    %187 = vector.broadcast %cst_106 : f32 to vector<1x256xf32>
    %188 = vector.broadcast %cst_107 : f32 to vector<1x256xf32>
    %189 = arith.select %186, %187, %188 : vector<1x256xi1>, vector<1x256xf32>
    %190 = arith.mulf %184, %189 : vector<1x256xf32>
    %c0_108 = arith.constant 0 : index
    %c17_109 = arith.constant 17 : index
    %191 = vector.load %arg39[%c0_108, %c17_109] : memref<12x290xf32, #tpu.memory_space<vmem>>, vector<3x256xf32>
    tpu.vector_store %arg39[%c0_108, %c17_109], %121 {strides = array<i32>} : memref<12x290xf32, #tpu.memory_space<vmem>>, vector<3x256xf32>,
    %c0_110 = arith.constant 0 : index
    %c0_111 = arith.constant 0 : index
    %192 = vector.load %arg39[%c0_110, %c0_111] : memref<12x290xf32, #tpu.memory_space<vmem>>, vector<3x256xf32>
    %193 = vector.broadcast %137 : vector<1x256xf32> to vector<3x256xf32>
    %194 = arith.mulf %192, %193 : vector<3x256xf32>
    %c0_112 = arith.constant 0 : index
    %c0_113 = arith.constant 0 : index
    %195 = vector.load %arg40[%c0_112, %c0_113] : memref<216x256xf32, #tpu.memory_space<vmem>>, vector<3x256xf32>
    tpu.vector_store %arg40[%c0_112, %c0_113], %194 {strides = array<i32>} : memref<216x256xf32, #tpu.memory_space<vmem>>, vector<3x256xf32>,
    %c0_114 = arith.constant 0 : index
    %c1_115 = arith.constant 1 : index
    %196 = vector.load %arg39[%c0_114, %c1_115] : memref<12x290xf32, #tpu.memory_space<vmem>>, vector<3x256xf32>
    %197 = vector.broadcast %142 : vector<1x256xf32> to vector<3x256xf32>
    %198 = arith.mulf %196, %197 : vector<3x256xf32>
    %c3_116 = arith.constant 3 : index
    %c0_117 = arith.constant 0 : index
    %199 = vector.load %arg40[%c3_116, %c0_117] : memref<216x256xf32, #tpu.memory_space<vmem>>, vector<3x256xf32>
    tpu.vector_store %arg40[%c3_116, %c0_117], %198 {strides = array<i32>} : memref<216x256xf32, #tpu.memory_space<vmem>>, vector<3x256xf32>,
    %c0_118 = arith.constant 0 : index
    %c2_119 = arith.constant 2 : index
    %200 = vector.load %arg39[%c0_118, %c2_119] : memref<12x290xf32, #tpu.memory_space<vmem>>, vector<3x256xf32>
    %201 = vector.broadcast %153 : vector<1x256xf32> to vector<3x256xf32>
    %202 = arith.mulf %200, %201 : vector<3x256xf32>
    %c6_120 = arith.constant 6 : index
    %c0_121 = arith.constant 0 : index
    %203 = vector.load %arg40[%c6_120, %c0_121] : memref<216x256xf32, #tpu.memory_space<vmem>>, vector<3x256xf32>
    tpu.vector_store %arg40[%c6_120, %c0_121], %202 {strides = array<i32>} : memref<216x256xf32, #tpu.memory_space<vmem>>, vector<3x256xf32>,
    %c0_122 = arith.constant 0 : index
    %c16_123 = arith.constant 16 : index
    %204 = vector.load %arg39[%c0_122, %c16_123] : memref<12x290xf32, #tpu.memory_space<vmem>>, vector<3x256xf32>
    %205 = vector.broadcast %158 : vector<1x256xf32> to vector<3x256xf32>
    %206 = arith.mulf %204, %205 : vector<3x256xf32>
    %c9_124 = arith.constant 9 : index
    %c0_125 = arith.constant 0 : index
    %207 = vector.load %arg40[%c9_124, %c0_125] : memref<216x256xf32, #tpu.memory_space<vmem>>, vector<3x256xf32>
    tpu.vector_store %arg40[%c9_124, %c0_125], %206 {strides = array<i32>} : memref<216x256xf32, #tpu.memory_space<vmem>>, vector<3x256xf32>,
    %c12_126 = arith.constant 12 : index
    %c0_127 = arith.constant 0 : index
    %208 = vector.load %arg40[%c12_126, %c0_127] : memref<216x256xf32, #tpu.memory_space<vmem>>, vector<3x256xf32>
    tpu.vector_store %arg40[%c12_126, %c0_127], %121 {strides = array<i32>} : memref<216x256xf32, #tpu.memory_space<vmem>>, vector<3x256xf32>,
    %c0_128 = arith.constant 0 : index
    %c18_129 = arith.constant 18 : index
    %209 = vector.load %arg39[%c0_128, %c18_129] : memref<12x290xf32, #tpu.memory_space<vmem>>, vector<3x256xf32>
    %210 = vector.broadcast %163 : vector<1x256xf32> to vector<3x256xf32>
    %211 = arith.mulf %209, %210 : vector<3x256xf32>
    %c15_130 = arith.constant 15 : index
    %c0_131 = arith.constant 0 : index
    %212 = vector.load %arg40[%c15_130, %c0_131] : memref<216x256xf32, #tpu.memory_space<vmem>>, vector<3x256xf32>
    tpu.vector_store %arg40[%c15_130, %c0_131], %211 {strides = array<i32>} : memref<216x256xf32, #tpu.memory_space<vmem>>, vector<3x256xf32>,
    %c0_132 = arith.constant 0 : index
    %c32_133 = arith.constant 32 : index
    %213 = vector.load %arg39[%c0_132, %c32_133] : memref<12x290xf32, #tpu.memory_space<vmem>>, vector<3x256xf32>
    %214 = vector.broadcast %174 : vector<1x256xf32> to vector<3x256xf32>
    %215 = arith.mulf %213, %214 : vector<3x256xf32>
    %c18_134 = arith.constant 18 : index
    %c0_135 = arith.constant 0 : index
    %216 = vector.load %arg40[%c18_134, %c0_135] : memref<216x256xf32, #tpu.memory_space<vmem>>, vector<3x256xf32>
    tpu.vector_store %arg40[%c18_134, %c0_135], %215 {strides = array<i32>} : memref<216x256xf32, #tpu.memory_space<vmem>>, vector<3x256xf32>,
    %c0_136 = arith.constant 0 : index
    %c33_137 = arith.constant 33 : index
    %217 = vector.load %arg39[%c0_136, %c33_137] : memref<12x290xf32, #tpu.memory_space<vmem>>, vector<3x256xf32>
    %218 = vector.broadcast %179 : vector<1x256xf32> to vector<3x256xf32>
    %219 = arith.mulf %217, %218 : vector<3x256xf32>
    %c21_138 = arith.constant 21 : index
    %c0_139 = arith.constant 0 : index
    %220 = vector.load %arg40[%c21_138, %c0_139] : memref<216x256xf32, #tpu.memory_space<vmem>>, vector<3x256xf32>
    tpu.vector_store %arg40[%c21_138, %c0_139], %219 {strides = array<i32>} : memref<216x256xf32, #tpu.memory_space<vmem>>, vector<3x256xf32>,
    %c0_140 = arith.constant 0 : index
    %c34_141 = arith.constant 34 : index
    %221 = vector.load %arg39[%c0_140, %c34_141] : memref<12x290xf32, #tpu.memory_space<vmem>>, vector<3x256xf32>
    %222 = vector.broadcast %190 : vector<1x256xf32> to vector<3x256xf32>
    %223 = arith.mulf %221, %222 : vector<3x256xf32>
    %c24_142 = arith.constant 24 : index
    %c0_143 = arith.constant 0 : index
    %224 = vector.load %arg40[%c24_142, %c0_143] : memref<216x256xf32, #tpu.memory_space<vmem>>, vector<3x256xf32>
    tpu.vector_store %arg40[%c24_142, %c0_143], %223 {strides = array<i32>} : memref<216x256xf32, #tpu.memory_space<vmem>>, vector<3x256xf32>,
    %c0_144 = arith.constant 0 : index
    %c0_145 = arith.constant 0 : index
    %225 = vector.load %arg5[%c0_144, %c0_145] : memref<12x27xf32, #tpu.memory_space<vmem>>, vector<12x27xf32>
    %c0_146 = arith.constant 0 : index
    %c0_147 = arith.constant 0 : index
    %226 = vector.load %arg40[%c0_146, %c0_147] : memref<216x256xf32, #tpu.memory_space<vmem>>, vector<27x256xf32>
    %cst_148 = arith.constant dense<0.000000e+00> : vector<12x256xf32>
    %227 = tpu.matmul %225, %226, %cst_148 {dimension_numbers = #tpu.dot_dimension_numbers<[1], [0], [0], [1], [0, 0, 1, 1], [], []>} : vector<12x27xf32>, vector<27x256xf32>, vector<12x256xf32> -> vector<12x256xf32>
    %c0_149 = arith.constant 0 : index
    %c0_150 = arith.constant 0 : index
    %228 = vector.load %arg6[%c0_149, %c0_150] : memref<12x1xf32, #tpu.memory_space<vmem>>, vector<12x1xf32>
    %229 = vector.broadcast %228 : vector<12x1xf32> to vector<12x256xf32>
    %230 = arith.mulf %227, %229 : vector<12x256xf32>
    %c0_151 = arith.constant 0 : index
    %c0_152 = arith.constant 0 : index
    %231 = vector.load %arg7[%c0_151, %c0_152] : memref<12x1xf32, #tpu.memory_space<vmem>>, vector<12x1xf32>
    %232 = vector.broadcast %231 : vector<12x1xf32> to vector<12x256xf32>
    %233 = arith.addf %230, %232 : vector<12x256xf32>
    %234 = math.exp %233 : vector<12x256xf32>
    %cst_153 = arith.constant 1.000000e+00 : f32
    %235 = vector.broadcast %cst_153 : f32 to vector<12x256xf32>
    %236 = arith.addf %235, %234 : vector<12x256xf32>
    %237 = math.log %236 : vector<12x256xf32>
    %238 = math.tanh %237 : vector<12x256xf32>
    %239 = arith.mulf %233, %238 : vector<12x256xf32>
    %c0_154 = arith.constant 0 : index
    %c17_155 = arith.constant 17 : index
    %240 = vector.load %arg39[%c0_154, %c17_155] : memref<12x290xf32, #tpu.memory_space<vmem>>, vector<12x256xf32>
    tpu.vector_store %arg39[%c0_154, %c17_155], %239 {strides = array<i32>} : memref<12x290xf32, #tpu.memory_space<vmem>>, vector<12x256xf32>,
    %c0_156 = arith.constant 0 : index
    %c18_157 = arith.constant 18 : index
    %241 = vector.load %arg39[%c0_156, %c18_157] : memref<12x290xf32, #tpu.memory_space<vmem>>, vector<12x256xf32>
    %242 = arith.maximumf %239, %241 : vector<12x256xf32>
    %c0_158 = arith.constant 0 : index
    %c33_159 = arith.constant 33 : index
    %243 = vector.load %arg39[%c0_158, %c33_159] : memref<12x290xf32, #tpu.memory_space<vmem>>, vector<12x256xf32>
    %c0_160 = arith.constant 0 : index
    %c34_161 = arith.constant 34 : index
    %244 = vector.load %arg39[%c0_160, %c34_161] : memref<12x290xf32, #tpu.memory_space<vmem>>, vector<12x256xf32>
    %245 = arith.maximumf %243, %244 : vector<12x256xf32>
    %246 = arith.maximumf %242, %245 : vector<12x256xf32>
    %c0_162 = arith.constant 0 : index
    %c0_163 = arith.constant 0 : index
    %247 = vector.load %arg32[%c0_162, %c0_163] : memref<256x64xf32, #tpu.memory_space<vmem>>, vector<256x64xf32>
    %cst_164 = arith.constant dense<0.000000e+00> : vector<12x64xf32>
    %248 = tpu.matmul %246, %247, %cst_164 {dimension_numbers = #tpu.dot_dimension_numbers<[1], [0], [0], [1], [0, 0, 1, 1], [], []>} : vector<12x256xf32>, vector<256x64xf32>, vector<12x64xf32> -> vector<12x64xf32>
    %249 = tpu.iota {dimensions = array<i32: 1>} : vector<1x64xi32>
    %c3_i32 = arith.constant 3 : i32
    %250 = vector.broadcast %c3_i32 : i32 to vector<1x64xi32>
    %251 = arith.shrsi %249, %250 : vector<1x64xi32>
    %c7_i32 = arith.constant 7 : i32
    %252 = vector.broadcast %c7_i32 : i32 to vector<1x64xi32>
    %253 = arith.andi %249, %252 : vector<1x64xi32>
    %c1_i32_165 = arith.constant 1 : i32
    %254 = vector.broadcast %c1_i32_165 : i32 to vector<1x64xi32>
    %255 = arith.cmpi sge, %251, %254 : vector<1x64xi32>
    %cst_166 = arith.constant 1.000000e+00 : f32
    %cst_167 = arith.constant 0.000000e+00 : f32
    %256 = vector.broadcast %cst_166 : f32 to vector<1x64xf32>
    %257 = vector.broadcast %cst_167 : f32 to vector<1x64xf32>
    %258 = arith.select %255, %256, %257 : vector<1x64xi1>, vector<1x64xf32>
    %c1_i32_168 = arith.constant 1 : i32
    %259 = vector.broadcast %c1_i32_168 : i32 to vector<1x64xi32>
    %260 = arith.cmpi sge, %253, %259 : vector<1x64xi32>
    %cst_169 = arith.constant 1.000000e+00 : f32
    %cst_170 = arith.constant 0.000000e+00 : f32
    %261 = vector.broadcast %cst_169 : f32 to vector<1x64xf32>
    %262 = vector.broadcast %cst_170 : f32 to vector<1x64xf32>
    %263 = arith.select %260, %261, %262 : vector<1x64xi1>, vector<1x64xf32>
    %264 = arith.mulf %258, %263 : vector<1x64xf32>
    %c1_i32_171 = arith.constant 1 : i32
    %265 = vector.broadcast %c1_i32_171 : i32 to vector<1x64xi32>
    %266 = arith.cmpi sge, %251, %265 : vector<1x64xi32>
    %cst_172 = arith.constant 1.000000e+00 : f32
    %cst_173 = arith.constant 0.000000e+00 : f32
    %267 = vector.broadcast %cst_172 : f32 to vector<1x64xf32>
    %268 = vector.broadcast %cst_173 : f32 to vector<1x64xf32>
    %269 = arith.select %266, %267, %268 : vector<1x64xi1>, vector<1x64xf32>
    %c1_i32_174 = arith.constant 1 : i32
    %270 = vector.broadcast %c1_i32_174 : i32 to vector<1x64xi32>
    %271 = arith.cmpi sge, %251, %270 : vector<1x64xi32>
    %cst_175 = arith.constant 1.000000e+00 : f32
    %cst_176 = arith.constant 0.000000e+00 : f32
    %272 = vector.broadcast %cst_175 : f32 to vector<1x64xf32>
    %273 = vector.broadcast %cst_176 : f32 to vector<1x64xf32>
    %274 = arith.select %271, %272, %273 : vector<1x64xi1>, vector<1x64xf32>
    %c7_i32_177 = arith.constant 7 : i32
    %275 = vector.broadcast %c7_i32_177 : i32 to vector<1x64xi32>
    %276 = arith.cmpi slt, %253, %275 : vector<1x64xi32>
    %cst_178 = arith.constant 1.000000e+00 : f32
    %cst_179 = arith.constant 0.000000e+00 : f32
    %277 = vector.broadcast %cst_178 : f32 to vector<1x64xf32>
    %278 = vector.broadcast %cst_179 : f32 to vector<1x64xf32>
    %279 = arith.select %276, %277, %278 : vector<1x64xi1>, vector<1x64xf32>
    %280 = arith.mulf %274, %279 : vector<1x64xf32>
    %c1_i32_180 = arith.constant 1 : i32
    %281 = vector.broadcast %c1_i32_180 : i32 to vector<1x64xi32>
    %282 = arith.cmpi sge, %253, %281 : vector<1x64xi32>
    %cst_181 = arith.constant 1.000000e+00 : f32
    %cst_182 = arith.constant 0.000000e+00 : f32
    %283 = vector.broadcast %cst_181 : f32 to vector<1x64xf32>
    %284 = vector.broadcast %cst_182 : f32 to vector<1x64xf32>
    %285 = arith.select %282, %283, %284 : vector<1x64xi1>, vector<1x64xf32>
    %c7_i32_183 = arith.constant 7 : i32
    %286 = vector.broadcast %c7_i32_183 : i32 to vector<1x64xi32>
    %287 = arith.cmpi slt, %253, %286 : vector<1x64xi32>
    %cst_184 = arith.constant 1.000000e+00 : f32
    %cst_185 = arith.constant 0.000000e+00 : f32
    %288 = vector.broadcast %cst_184 : f32 to vector<1x64xf32>
    %289 = vector.broadcast %cst_185 : f32 to vector<1x64xf32>
    %290 = arith.select %287, %288, %289 : vector<1x64xi1>, vector<1x64xf32>
    %c7_i32_186 = arith.constant 7 : i32
    %291 = vector.broadcast %c7_i32_186 : i32 to vector<1x64xi32>
    %292 = arith.cmpi slt, %251, %291 : vector<1x64xi32>
    %cst_187 = arith.constant 1.000000e+00 : f32
    %cst_188 = arith.constant 0.000000e+00 : f32
    %293 = vector.broadcast %cst_187 : f32 to vector<1x64xf32>
    %294 = vector.broadcast %cst_188 : f32 to vector<1x64xf32>
    %295 = arith.select %292, %293, %294 : vector<1x64xi1>, vector<1x64xf32>
    %c1_i32_189 = arith.constant 1 : i32
    %296 = vector.broadcast %c1_i32_189 : i32 to vector<1x64xi32>
    %297 = arith.cmpi sge, %253, %296 : vector<1x64xi32>
    %cst_190 = arith.constant 1.000000e+00 : f32
    %cst_191 = arith.constant 0.000000e+00 : f32
    %298 = vector.broadcast %cst_190 : f32 to vector<1x64xf32>
    %299 = vector.broadcast %cst_191 : f32 to vector<1x64xf32>
    %300 = arith.select %297, %298, %299 : vector<1x64xi1>, vector<1x64xf32>
    %301 = arith.mulf %295, %300 : vector<1x64xf32>
    %c7_i32_192 = arith.constant 7 : i32
    %302 = vector.broadcast %c7_i32_192 : i32 to vector<1x64xi32>
    %303 = arith.cmpi slt, %251, %302 : vector<1x64xi32>
    %cst_193 = arith.constant 1.000000e+00 : f32
    %cst_194 = arith.constant 0.000000e+00 : f32
    %304 = vector.broadcast %cst_193 : f32 to vector<1x64xf32>
    %305 = vector.broadcast %cst_194 : f32 to vector<1x64xf32>
    %306 = arith.select %303, %304, %305 : vector<1x64xi1>, vector<1x64xf32>
    %c7_i32_195 = arith.constant 7 : i32
    %307 = vector.broadcast %c7_i32_195 : i32 to vector<1x64xi32>
    %308 = arith.cmpi slt, %251, %307 : vector<1x64xi32>
    %cst_196 = arith.constant 1.000000e+00 : f32
    %cst_197 = arith.constant 0.000000e+00 : f32
    %309 = vector.broadcast %cst_196 : f32 to vector<1x64xf32>
    %310 = vector.broadcast %cst_197 : f32 to vector<1x64xf32>
    %311 = arith.select %308, %309, %310 : vector<1x64xi1>, vector<1x64xf32>
    %c7_i32_198 = arith.constant 7 : i32
    %312 = vector.broadcast %c7_i32_198 : i32 to vector<1x64xi32>
    %313 = arith.cmpi slt, %253, %312 : vector<1x64xi32>
    %cst_199 = arith.constant 1.000000e+00 : f32
    %cst_200 = arith.constant 0.000000e+00 : f32
    %314 = vector.broadcast %cst_199 : f32 to vector<1x64xf32>
    %315 = vector.broadcast %cst_200 : f32 to vector<1x64xf32>
    %316 = arith.select %313, %314, %315 : vector<1x64xi1>, vector<1x64xf32>
    %317 = arith.mulf %311, %316 : vector<1x64xf32>
    %c0_201 = arith.constant 0 : index
    %c17_202 = arith.constant 17 : index
    %318 = vector.load %arg39[%c0_201, %c17_202] : memref<12x290xf32, #tpu.memory_space<vmem>>, vector<12x64xf32>
    tpu.vector_store %arg39[%c0_201, %c17_202], %248 {strides = array<i32>} : memref<12x290xf32, #tpu.memory_space<vmem>>, vector<12x64xf32>,
    %c0_203 = arith.constant 0 : index
    %c8 = arith.constant 8 : index
    %319 = vector.load %arg39[%c0_203, %c8] : memref<12x290xf32, #tpu.memory_space<vmem>>, vector<12x64xf32>
    %320 = vector.broadcast %264 : vector<1x64xf32> to vector<12x64xf32>
    %321 = arith.mulf %319, %320 : vector<12x64xf32>
    %c0_204 = arith.constant 0 : index
    %c0_205 = arith.constant 0 : index
    %322 = vector.load %arg40[%c0_204, %c0_205] : memref<216x256xf32, #tpu.memory_space<vmem>>, vector<12x64xf32>
    tpu.vector_store %arg40[%c0_204, %c0_205], %321 {strides = array<i32>} : memref<216x256xf32, #tpu.memory_space<vmem>>, vector<12x64xf32>,
    %c0_206 = arith.constant 0 : index
    %c9_207 = arith.constant 9 : index
    %323 = vector.load %arg39[%c0_206, %c9_207] : memref<12x290xf32, #tpu.memory_space<vmem>>, vector<12x64xf32>
    %324 = vector.broadcast %269 : vector<1x64xf32> to vector<12x64xf32>
    %325 = arith.mulf %323, %324 : vector<12x64xf32>
    %c12_208 = arith.constant 12 : index
    %c0_209 = arith.constant 0 : index
    %326 = vector.load %arg40[%c12_208, %c0_209] : memref<216x256xf32, #tpu.memory_space<vmem>>, vector<12x64xf32>
    tpu.vector_store %arg40[%c12_208, %c0_209], %325 {strides = array<i32>} : memref<216x256xf32, #tpu.memory_space<vmem>>, vector<12x64xf32>,
    %c0_210 = arith.constant 0 : index
    %c10 = arith.constant 10 : index
    %327 = vector.load %arg39[%c0_210, %c10] : memref<12x290xf32, #tpu.memory_space<vmem>>, vector<12x64xf32>
    %328 = vector.broadcast %280 : vector<1x64xf32> to vector<12x64xf32>
    %329 = arith.mulf %327, %328 : vector<12x64xf32>
    %c24_211 = arith.constant 24 : index
    %c0_212 = arith.constant 0 : index
    %330 = vector.load %arg40[%c24_211, %c0_212] : memref<216x256xf32, #tpu.memory_space<vmem>>, vector<12x64xf32>
    tpu.vector_store %arg40[%c24_211, %c0_212], %329 {strides = array<i32>} : memref<216x256xf32, #tpu.memory_space<vmem>>, vector<12x64xf32>,
    %c0_213 = arith.constant 0 : index
    %c16_214 = arith.constant 16 : index
    %331 = vector.load %arg39[%c0_213, %c16_214] : memref<12x290xf32, #tpu.memory_space<vmem>>, vector<12x64xf32>
    %332 = vector.broadcast %285 : vector<1x64xf32> to vector<12x64xf32>
    %333 = arith.mulf %331, %332 : vector<12x64xf32>
    %c36 = arith.constant 36 : index
    %c0_215 = arith.constant 0 : index
    %334 = vector.load %arg40[%c36, %c0_215] : memref<216x256xf32, #tpu.memory_space<vmem>>, vector<12x64xf32>
    tpu.vector_store %arg40[%c36, %c0_215], %333 {strides = array<i32>} : memref<216x256xf32, #tpu.memory_space<vmem>>, vector<12x64xf32>,
    %c48 = arith.constant 48 : index
    %c0_216 = arith.constant 0 : index
    %335 = vector.load %arg40[%c48, %c0_216] : memref<216x256xf32, #tpu.memory_space<vmem>>, vector<12x64xf32>
    tpu.vector_store %arg40[%c48, %c0_216], %248 {strides = array<i32>} : memref<216x256xf32, #tpu.memory_space<vmem>>, vector<12x64xf32>,
    %c0_217 = arith.constant 0 : index
    %c18_218 = arith.constant 18 : index
    %336 = vector.load %arg39[%c0_217, %c18_218] : memref<12x290xf32, #tpu.memory_space<vmem>>, vector<12x64xf32>
    %337 = vector.broadcast %290 : vector<1x64xf32> to vector<12x64xf32>
    %338 = arith.mulf %336, %337 : vector<12x64xf32>
    %c60 = arith.constant 60 : index
    %c0_219 = arith.constant 0 : index
    %339 = vector.load %arg40[%c60, %c0_219] : memref<216x256xf32, #tpu.memory_space<vmem>>, vector<12x64xf32>
    tpu.vector_store %arg40[%c60, %c0_219], %338 {strides = array<i32>} : memref<216x256xf32, #tpu.memory_space<vmem>>, vector<12x64xf32>,
    %c0_220 = arith.constant 0 : index
    %c24_221 = arith.constant 24 : index
    %340 = vector.load %arg39[%c0_220, %c24_221] : memref<12x290xf32, #tpu.memory_space<vmem>>, vector<12x64xf32>
    %341 = vector.broadcast %301 : vector<1x64xf32> to vector<12x64xf32>
    %342 = arith.mulf %340, %341 : vector<12x64xf32>
    %c72 = arith.constant 72 : index
    %c0_222 = arith.constant 0 : index
    %343 = vector.load %arg40[%c72, %c0_222] : memref<216x256xf32, #tpu.memory_space<vmem>>, vector<12x64xf32>
    tpu.vector_store %arg40[%c72, %c0_222], %342 {strides = array<i32>} : memref<216x256xf32, #tpu.memory_space<vmem>>, vector<12x64xf32>,
    %c0_223 = arith.constant 0 : index
    %c25 = arith.constant 25 : index
    %344 = vector.load %arg39[%c0_223, %c25] : memref<12x290xf32, #tpu.memory_space<vmem>>, vector<12x64xf32>
    %345 = vector.broadcast %306 : vector<1x64xf32> to vector<12x64xf32>
    %346 = arith.mulf %344, %345 : vector<12x64xf32>
    %c84 = arith.constant 84 : index
    %c0_224 = arith.constant 0 : index
    %347 = vector.load %arg40[%c84, %c0_224] : memref<216x256xf32, #tpu.memory_space<vmem>>, vector<12x64xf32>
    tpu.vector_store %arg40[%c84, %c0_224], %346 {strides = array<i32>} : memref<216x256xf32, #tpu.memory_space<vmem>>, vector<12x64xf32>,
    %c0_225 = arith.constant 0 : index
    %c26 = arith.constant 26 : index
    %348 = vector.load %arg39[%c0_225, %c26] : memref<12x290xf32, #tpu.memory_space<vmem>>, vector<12x64xf32>
    %349 = vector.broadcast %317 : vector<1x64xf32> to vector<12x64xf32>
    %350 = arith.mulf %348, %349 : vector<12x64xf32>
    %c96 = arith.constant 96 : index
    %c0_226 = arith.constant 0 : index
    %351 = vector.load %arg40[%c96, %c0_226] : memref<216x256xf32, #tpu.memory_space<vmem>>, vector<12x64xf32>
    tpu.vector_store %arg40[%c96, %c0_226], %350 {strides = array<i32>} : memref<216x256xf32, #tpu.memory_space<vmem>>, vector<12x64xf32>,
    %c0_227 = arith.constant 0 : index
    %c0_228 = arith.constant 0 : index
    %352 = vector.load %arg8[%c0_227, %c0_228] : memref<12x108xf32, #tpu.memory_space<vmem>>, vector<12x108xf32>
    %c0_229 = arith.constant 0 : index
    %c0_230 = arith.constant 0 : index
    %353 = vector.load %arg40[%c0_229, %c0_230] : memref<216x256xf32, #tpu.memory_space<vmem>>, vector<108x64xf32>
    %cst_231 = arith.constant dense<0.000000e+00> : vector<12x64xf32>
    %354 = tpu.matmul %352, %353, %cst_231 {dimension_numbers = #tpu.dot_dimension_numbers<[1], [0], [0], [1], [0, 0, 1, 1], [], []>} : vector<12x108xf32>, vector<108x64xf32>, vector<12x64xf32> -> vector<12x64xf32>
    %c0_232 = arith.constant 0 : index
    %c0_233 = arith.constant 0 : index
    %355 = vector.load %arg9[%c0_232, %c0_233] : memref<12x1xf32, #tpu.memory_space<vmem>>, vector<12x1xf32>
    %356 = vector.broadcast %355 : vector<12x1xf32> to vector<12x64xf32>
    %357 = arith.mulf %354, %356 : vector<12x64xf32>
    %c0_234 = arith.constant 0 : index
    %c0_235 = arith.constant 0 : index
    %358 = vector.load %arg10[%c0_234, %c0_235] : memref<12x1xf32, #tpu.memory_space<vmem>>, vector<12x1xf32>
    %359 = vector.broadcast %358 : vector<12x1xf32> to vector<12x64xf32>
    %360 = arith.addf %357, %359 : vector<12x64xf32>
    %361 = math.exp %360 : vector<12x64xf32>
    %cst_236 = arith.constant 1.000000e+00 : f32
    %362 = vector.broadcast %cst_236 : f32 to vector<12x64xf32>
    %363 = arith.addf %362, %361 : vector<12x64xf32>
    %364 = math.log %363 : vector<12x64xf32>
    %365 = math.tanh %364 : vector<12x64xf32>
    %366 = arith.mulf %360, %365 : vector<12x64xf32>
    %c0_237 = arith.constant 0 : index
    %c17_238 = arith.constant 17 : index
    %367 = vector.load %arg39[%c0_237, %c17_238] : memref<12x290xf32, #tpu.memory_space<vmem>>, vector<12x64xf32>
    tpu.vector_store %arg39[%c0_237, %c17_238], %366 {strides = array<i32>} : memref<12x290xf32, #tpu.memory_space<vmem>>, vector<12x64xf32>,
    %c0_239 = arith.constant 0 : index
    %c18_240 = arith.constant 18 : index
    %368 = vector.load %arg39[%c0_239, %c18_240] : memref<12x290xf32, #tpu.memory_space<vmem>>, vector<12x64xf32>
    %369 = arith.maximumf %366, %368 : vector<12x64xf32>
    %c0_241 = arith.constant 0 : index
    %c25_242 = arith.constant 25 : index
    %370 = vector.load %arg39[%c0_241, %c25_242] : memref<12x290xf32, #tpu.memory_space<vmem>>, vector<12x64xf32>
    %c0_243 = arith.constant 0 : index
    %c26_244 = arith.constant 26 : index
    %371 = vector.load %arg39[%c0_243, %c26_244] : memref<12x290xf32, #tpu.memory_space<vmem>>, vector<12x64xf32>
    %372 = arith.maximumf %370, %371 : vector<12x64xf32>
    %373 = arith.maximumf %369, %372 : vector<12x64xf32>
    %c0_245 = arith.constant 0 : index
    %c0_246 = arith.constant 0 : index
    %374 = vector.load %arg33[%c0_245, %c0_246] : memref<64x16xf32, #tpu.memory_space<vmem>>, vector<64x16xf32>
    %cst_247 = arith.constant dense<0.000000e+00> : vector<12x16xf32>
    %375 = tpu.matmul %373, %374, %cst_247 {dimension_numbers = #tpu.dot_dimension_numbers<[1], [0], [0], [1], [0, 0, 1, 1], [], []>} : vector<12x64xf32>, vector<64x16xf32>, vector<12x16xf32> -> vector<12x16xf32>
    %376 = tpu.iota {dimensions = array<i32: 1>} : vector<1x16xi32>
    %c2_i32 = arith.constant 2 : i32
    %377 = vector.broadcast %c2_i32 : i32 to vector<1x16xi32>
    %378 = arith.shrsi %376, %377 : vector<1x16xi32>
    %c3_i32_248 = arith.constant 3 : i32
    %379 = vector.broadcast %c3_i32_248 : i32 to vector<1x16xi32>
    %380 = arith.andi %376, %379 : vector<1x16xi32>
    %c1_i32_249 = arith.constant 1 : i32
    %381 = vector.broadcast %c1_i32_249 : i32 to vector<1x16xi32>
    %382 = arith.cmpi sge, %378, %381 : vector<1x16xi32>
    %cst_250 = arith.constant 1.000000e+00 : f32
    %cst_251 = arith.constant 0.000000e+00 : f32
    %383 = vector.broadcast %cst_250 : f32 to vector<1x16xf32>
    %384 = vector.broadcast %cst_251 : f32 to vector<1x16xf32>
    %385 = arith.select %382, %383, %384 : vector<1x16xi1>, vector<1x16xf32>
    %c1_i32_252 = arith.constant 1 : i32
    %386 = vector.broadcast %c1_i32_252 : i32 to vector<1x16xi32>
    %387 = arith.cmpi sge, %380, %386 : vector<1x16xi32>
    %cst_253 = arith.constant 1.000000e+00 : f32
    %cst_254 = arith.constant 0.000000e+00 : f32
    %388 = vector.broadcast %cst_253 : f32 to vector<1x16xf32>
    %389 = vector.broadcast %cst_254 : f32 to vector<1x16xf32>
    %390 = arith.select %387, %388, %389 : vector<1x16xi1>, vector<1x16xf32>
    %391 = arith.mulf %385, %390 : vector<1x16xf32>
    %c1_i32_255 = arith.constant 1 : i32
    %392 = vector.broadcast %c1_i32_255 : i32 to vector<1x16xi32>
    %393 = arith.cmpi sge, %378, %392 : vector<1x16xi32>
    %cst_256 = arith.constant 1.000000e+00 : f32
    %cst_257 = arith.constant 0.000000e+00 : f32
    %394 = vector.broadcast %cst_256 : f32 to vector<1x16xf32>
    %395 = vector.broadcast %cst_257 : f32 to vector<1x16xf32>
    %396 = arith.select %393, %394, %395 : vector<1x16xi1>, vector<1x16xf32>
    %c1_i32_258 = arith.constant 1 : i32
    %397 = vector.broadcast %c1_i32_258 : i32 to vector<1x16xi32>
    %398 = arith.cmpi sge, %378, %397 : vector<1x16xi32>
    %cst_259 = arith.constant 1.000000e+00 : f32
    %cst_260 = arith.constant 0.000000e+00 : f32
    %399 = vector.broadcast %cst_259 : f32 to vector<1x16xf32>
    %400 = vector.broadcast %cst_260 : f32 to vector<1x16xf32>
    %401 = arith.select %398, %399, %400 : vector<1x16xi1>, vector<1x16xf32>
    %c3_i32_261 = arith.constant 3 : i32
    %402 = vector.broadcast %c3_i32_261 : i32 to vector<1x16xi32>
    %403 = arith.cmpi slt, %380, %402 : vector<1x16xi32>
    %cst_262 = arith.constant 1.000000e+00 : f32
    %cst_263 = arith.constant 0.000000e+00 : f32
    %404 = vector.broadcast %cst_262 : f32 to vector<1x16xf32>
    %405 = vector.broadcast %cst_263 : f32 to vector<1x16xf32>
    %406 = arith.select %403, %404, %405 : vector<1x16xi1>, vector<1x16xf32>
    %407 = arith.mulf %401, %406 : vector<1x16xf32>
    %c1_i32_264 = arith.constant 1 : i32
    %408 = vector.broadcast %c1_i32_264 : i32 to vector<1x16xi32>
    %409 = arith.cmpi sge, %380, %408 : vector<1x16xi32>
    %cst_265 = arith.constant 1.000000e+00 : f32
    %cst_266 = arith.constant 0.000000e+00 : f32
    %410 = vector.broadcast %cst_265 : f32 to vector<1x16xf32>
    %411 = vector.broadcast %cst_266 : f32 to vector<1x16xf32>
    %412 = arith.select %409, %410, %411 : vector<1x16xi1>, vector<1x16xf32>
    %c3_i32_267 = arith.constant 3 : i32
    %413 = vector.broadcast %c3_i32_267 : i32 to vector<1x16xi32>
    %414 = arith.cmpi slt, %380, %413 : vector<1x16xi32>
    %cst_268 = arith.constant 1.000000e+00 : f32
    %cst_269 = arith.constant 0.000000e+00 : f32
    %415 = vector.broadcast %cst_268 : f32 to vector<1x16xf32>
    %416 = vector.broadcast %cst_269 : f32 to vector<1x16xf32>
    %417 = arith.select %414, %415, %416 : vector<1x16xi1>, vector<1x16xf32>
    %c3_i32_270 = arith.constant 3 : i32
    %418 = vector.broadcast %c3_i32_270 : i32 to vector<1x16xi32>
    %419 = arith.cmpi slt, %378, %418 : vector<1x16xi32>
    %cst_271 = arith.constant 1.000000e+00 : f32
    %cst_272 = arith.constant 0.000000e+00 : f32
    %420 = vector.broadcast %cst_271 : f32 to vector<1x16xf32>
    %421 = vector.broadcast %cst_272 : f32 to vector<1x16xf32>
    %422 = arith.select %419, %420, %421 : vector<1x16xi1>, vector<1x16xf32>
    %c1_i32_273 = arith.constant 1 : i32
    %423 = vector.broadcast %c1_i32_273 : i32 to vector<1x16xi32>
    %424 = arith.cmpi sge, %380, %423 : vector<1x16xi32>
    %cst_274 = arith.constant 1.000000e+00 : f32
    %cst_275 = arith.constant 0.000000e+00 : f32
    %425 = vector.broadcast %cst_274 : f32 to vector<1x16xf32>
    %426 = vector.broadcast %cst_275 : f32 to vector<1x16xf32>
    %427 = arith.select %424, %425, %426 : vector<1x16xi1>, vector<1x16xf32>
    %428 = arith.mulf %422, %427 : vector<1x16xf32>
    %c3_i32_276 = arith.constant 3 : i32
    %429 = vector.broadcast %c3_i32_276 : i32 to vector<1x16xi32>
    %430 = arith.cmpi slt, %378, %429 : vector<1x16xi32>
    %cst_277 = arith.constant 1.000000e+00 : f32
    %cst_278 = arith.constant 0.000000e+00 : f32
    %431 = vector.broadcast %cst_277 : f32 to vector<1x16xf32>
    %432 = vector.broadcast %cst_278 : f32 to vector<1x16xf32>
    %433 = arith.select %430, %431, %432 : vector<1x16xi1>, vector<1x16xf32>
    %c3_i32_279 = arith.constant 3 : i32
    %434 = vector.broadcast %c3_i32_279 : i32 to vector<1x16xi32>
    %435 = arith.cmpi slt, %378, %434 : vector<1x16xi32>
    %cst_280 = arith.constant 1.000000e+00 : f32
    %cst_281 = arith.constant 0.000000e+00 : f32
    %436 = vector.broadcast %cst_280 : f32 to vector<1x16xf32>
    %437 = vector.broadcast %cst_281 : f32 to vector<1x16xf32>
    %438 = arith.select %435, %436, %437 : vector<1x16xi1>, vector<1x16xf32>
    %c3_i32_282 = arith.constant 3 : i32
    %439 = vector.broadcast %c3_i32_282 : i32 to vector<1x16xi32>
    %440 = arith.cmpi slt, %380, %439 : vector<1x16xi32>
    %cst_283 = arith.constant 1.000000e+00 : f32
    %cst_284 = arith.constant 0.000000e+00 : f32
    %441 = vector.broadcast %cst_283 : f32 to vector<1x16xf32>
    %442 = vector.broadcast %cst_284 : f32 to vector<1x16xf32>
    %443 = arith.select %440, %441, %442 : vector<1x16xi1>, vector<1x16xf32>
    %444 = arith.mulf %438, %443 : vector<1x16xf32>
    %c0_285 = arith.constant 0 : index
    %c17_286 = arith.constant 17 : index
    %445 = vector.load %arg39[%c0_285, %c17_286] : memref<12x290xf32, #tpu.memory_space<vmem>>, vector<12x16xf32>
    tpu.vector_store %arg39[%c0_285, %c17_286], %375 {strides = array<i32>} : memref<12x290xf32, #tpu.memory_space<vmem>>, vector<12x16xf32>,
    %c0_287 = arith.constant 0 : index
    %c12_288 = arith.constant 12 : index
    %446 = vector.load %arg39[%c0_287, %c12_288] : memref<12x290xf32, #tpu.memory_space<vmem>>, vector<12x16xf32>
    %447 = vector.broadcast %391 : vector<1x16xf32> to vector<12x16xf32>
    %448 = arith.mulf %446, %447 : vector<12x16xf32>
    %c0_289 = arith.constant 0 : index
    %c0_290 = arith.constant 0 : index
    %449 = vector.load %arg40[%c0_289, %c0_290] : memref<216x256xf32, #tpu.memory_space<vmem>>, vector<12x16xf32>
    tpu.vector_store %arg40[%c0_289, %c0_290], %448 {strides = array<i32>} : memref<216x256xf32, #tpu.memory_space<vmem>>, vector<12x16xf32>,
    %c0_291 = arith.constant 0 : index
    %c13 = arith.constant 13 : index
    %450 = vector.load %arg39[%c0_291, %c13] : memref<12x290xf32, #tpu.memory_space<vmem>>, vector<12x16xf32>
    %451 = vector.broadcast %396 : vector<1x16xf32> to vector<12x16xf32>
    %452 = arith.mulf %450, %451 : vector<12x16xf32>
    %c12_292 = arith.constant 12 : index
    %c0_293 = arith.constant 0 : index
    %453 = vector.load %arg40[%c12_292, %c0_293] : memref<216x256xf32, #tpu.memory_space<vmem>>, vector<12x16xf32>
    tpu.vector_store %arg40[%c12_292, %c0_293], %452 {strides = array<i32>} : memref<216x256xf32, #tpu.memory_space<vmem>>, vector<12x16xf32>,
    %c0_294 = arith.constant 0 : index
    %c14 = arith.constant 14 : index
    %454 = vector.load %arg39[%c0_294, %c14] : memref<12x290xf32, #tpu.memory_space<vmem>>, vector<12x16xf32>
    %455 = vector.broadcast %407 : vector<1x16xf32> to vector<12x16xf32>
    %456 = arith.mulf %454, %455 : vector<12x16xf32>
    %c24_295 = arith.constant 24 : index
    %c0_296 = arith.constant 0 : index
    %457 = vector.load %arg40[%c24_295, %c0_296] : memref<216x256xf32, #tpu.memory_space<vmem>>, vector<12x16xf32>
    tpu.vector_store %arg40[%c24_295, %c0_296], %456 {strides = array<i32>} : memref<216x256xf32, #tpu.memory_space<vmem>>, vector<12x16xf32>,
    %c0_297 = arith.constant 0 : index
    %c16_298 = arith.constant 16 : index
    %458 = vector.load %arg39[%c0_297, %c16_298] : memref<12x290xf32, #tpu.memory_space<vmem>>, vector<12x16xf32>
    %459 = vector.broadcast %412 : vector<1x16xf32> to vector<12x16xf32>
    %460 = arith.mulf %458, %459 : vector<12x16xf32>
    %c36_299 = arith.constant 36 : index
    %c0_300 = arith.constant 0 : index
    %461 = vector.load %arg40[%c36_299, %c0_300] : memref<216x256xf32, #tpu.memory_space<vmem>>, vector<12x16xf32>
    tpu.vector_store %arg40[%c36_299, %c0_300], %460 {strides = array<i32>} : memref<216x256xf32, #tpu.memory_space<vmem>>, vector<12x16xf32>,
    %c48_301 = arith.constant 48 : index
    %c0_302 = arith.constant 0 : index
    %462 = vector.load %arg40[%c48_301, %c0_302] : memref<216x256xf32, #tpu.memory_space<vmem>>, vector<12x16xf32>
    tpu.vector_store %arg40[%c48_301, %c0_302], %375 {strides = array<i32>} : memref<216x256xf32, #tpu.memory_space<vmem>>, vector<12x16xf32>,
    %c0_303 = arith.constant 0 : index
    %c18_304 = arith.constant 18 : index
    %463 = vector.load %arg39[%c0_303, %c18_304] : memref<12x290xf32, #tpu.memory_space<vmem>>, vector<12x16xf32>
    %464 = vector.broadcast %417 : vector<1x16xf32> to vector<12x16xf32>
    %465 = arith.mulf %463, %464 : vector<12x16xf32>
    %c60_305 = arith.constant 60 : index
    %c0_306 = arith.constant 0 : index
    %466 = vector.load %arg40[%c60_305, %c0_306] : memref<216x256xf32, #tpu.memory_space<vmem>>, vector<12x16xf32>
    tpu.vector_store %arg40[%c60_305, %c0_306], %465 {strides = array<i32>} : memref<216x256xf32, #tpu.memory_space<vmem>>, vector<12x16xf32>,
    %c0_307 = arith.constant 0 : index
    %c20 = arith.constant 20 : index
    %467 = vector.load %arg39[%c0_307, %c20] : memref<12x290xf32, #tpu.memory_space<vmem>>, vector<12x16xf32>
    %468 = vector.broadcast %428 : vector<1x16xf32> to vector<12x16xf32>
    %469 = arith.mulf %467, %468 : vector<12x16xf32>
    %c72_308 = arith.constant 72 : index
    %c0_309 = arith.constant 0 : index
    %470 = vector.load %arg40[%c72_308, %c0_309] : memref<216x256xf32, #tpu.memory_space<vmem>>, vector<12x16xf32>
    tpu.vector_store %arg40[%c72_308, %c0_309], %469 {strides = array<i32>} : memref<216x256xf32, #tpu.memory_space<vmem>>, vector<12x16xf32>,
    %c0_310 = arith.constant 0 : index
    %c21_311 = arith.constant 21 : index
    %471 = vector.load %arg39[%c0_310, %c21_311] : memref<12x290xf32, #tpu.memory_space<vmem>>, vector<12x16xf32>
    %472 = vector.broadcast %433 : vector<1x16xf32> to vector<12x16xf32>
    %473 = arith.mulf %471, %472 : vector<12x16xf32>
    %c84_312 = arith.constant 84 : index
    %c0_313 = arith.constant 0 : index
    %474 = vector.load %arg40[%c84_312, %c0_313] : memref<216x256xf32, #tpu.memory_space<vmem>>, vector<12x16xf32>
    tpu.vector_store %arg40[%c84_312, %c0_313], %473 {strides = array<i32>} : memref<216x256xf32, #tpu.memory_space<vmem>>, vector<12x16xf32>,
    %c0_314 = arith.constant 0 : index
    %c22 = arith.constant 22 : index
    %475 = vector.load %arg39[%c0_314, %c22] : memref<12x290xf32, #tpu.memory_space<vmem>>, vector<12x16xf32>
    %476 = vector.broadcast %444 : vector<1x16xf32> to vector<12x16xf32>
    %477 = arith.mulf %475, %476 : vector<12x16xf32>
    %c96_315 = arith.constant 96 : index
    %c0_316 = arith.constant 0 : index
    %478 = vector.load %arg40[%c96_315, %c0_316] : memref<216x256xf32, #tpu.memory_space<vmem>>, vector<12x16xf32>
    tpu.vector_store %arg40[%c96_315, %c0_316], %477 {strides = array<i32>} : memref<216x256xf32, #tpu.memory_space<vmem>>, vector<12x16xf32>,
    %c0_317 = arith.constant 0 : index
    %c0_318 = arith.constant 0 : index
    %479 = vector.load %arg11[%c0_317, %c0_318] : memref<12x108xf32, #tpu.memory_space<vmem>>, vector<12x108xf32>
    %c0_319 = arith.constant 0 : index
    %c0_320 = arith.constant 0 : index
    %480 = vector.load %arg40[%c0_319, %c0_320] : memref<216x256xf32, #tpu.memory_space<vmem>>, vector<108x16xf32>
    %cst_321 = arith.constant dense<0.000000e+00> : vector<12x16xf32>
    %481 = tpu.matmul %479, %480, %cst_321 {dimension_numbers = #tpu.dot_dimension_numbers<[1], [0], [0], [1], [0, 0, 1, 1], [], []>} : vector<12x108xf32>, vector<108x16xf32>, vector<12x16xf32> -> vector<12x16xf32>
    %c0_322 = arith.constant 0 : index
    %c0_323 = arith.constant 0 : index
    %482 = vector.load %arg12[%c0_322, %c0_323] : memref<12x1xf32, #tpu.memory_space<vmem>>, vector<12x1xf32>
    %483 = vector.broadcast %482 : vector<12x1xf32> to vector<12x16xf32>
    %484 = arith.mulf %481, %483 : vector<12x16xf32>
    %c0_324 = arith.constant 0 : index
    %c0_325 = arith.constant 0 : index
    %485 = vector.load %arg13[%c0_324, %c0_325] : memref<12x1xf32, #tpu.memory_space<vmem>>, vector<12x1xf32>
    %486 = vector.broadcast %485 : vector<12x1xf32> to vector<12x16xf32>
    %487 = arith.addf %484, %486 : vector<12x16xf32>
    %488 = math.exp %487 : vector<12x16xf32>
    %cst_326 = arith.constant 1.000000e+00 : f32
    %489 = vector.broadcast %cst_326 : f32 to vector<12x16xf32>
    %490 = arith.addf %489, %488 : vector<12x16xf32>
    %491 = math.log %490 : vector<12x16xf32>
    %492 = math.tanh %491 : vector<12x16xf32>
    %493 = arith.mulf %487, %492 : vector<12x16xf32>
    %c0_327 = arith.constant 0 : index
    %c17_328 = arith.constant 17 : index
    %494 = vector.load %arg39[%c0_327, %c17_328] : memref<12x290xf32, #tpu.memory_space<vmem>>, vector<12x16xf32>
    tpu.vector_store %arg39[%c0_327, %c17_328], %493 {strides = array<i32>} : memref<12x290xf32, #tpu.memory_space<vmem>>, vector<12x16xf32>,
    %c0_329 = arith.constant 0 : index
    %c18_330 = arith.constant 18 : index
    %495 = vector.load %arg39[%c0_329, %c18_330] : memref<12x290xf32, #tpu.memory_space<vmem>>, vector<12x16xf32>
    %496 = arith.maximumf %493, %495 : vector<12x16xf32>
    %c0_331 = arith.constant 0 : index
    %c21_332 = arith.constant 21 : index
    %497 = vector.load %arg39[%c0_331, %c21_332] : memref<12x290xf32, #tpu.memory_space<vmem>>, vector<12x16xf32>
    %c0_333 = arith.constant 0 : index
    %c22_334 = arith.constant 22 : index
    %498 = vector.load %arg39[%c0_333, %c22_334] : memref<12x290xf32, #tpu.memory_space<vmem>>, vector<12x16xf32>
    %499 = arith.maximumf %497, %498 : vector<12x16xf32>
    %500 = arith.maximumf %496, %499 : vector<12x16xf32>
    %c0_335 = arith.constant 0 : index
    %c0_336 = arith.constant 0 : index
    %501 = vector.load %arg34[%c0_335, %c0_336] : memref<16x4xf32, #tpu.memory_space<vmem>>, vector<16x4xf32>
    %cst_337 = arith.constant dense<0.000000e+00> : vector<12x4xf32>
    %502 = tpu.matmul %500, %501, %cst_337 {dimension_numbers = #tpu.dot_dimension_numbers<[1], [0], [0], [1], [0, 0, 1, 1], [], []>} : vector<12x16xf32>, vector<16x4xf32>, vector<12x4xf32> -> vector<12x4xf32>
    %503 = tpu.iota {dimensions = array<i32: 1>} : vector<1x4xi32>
    %c1_i32_338 = arith.constant 1 : i32
    %504 = vector.broadcast %c1_i32_338 : i32 to vector<1x4xi32>
    %505 = arith.shrsi %503, %504 : vector<1x4xi32>
    %c1_i32_339 = arith.constant 1 : i32
    %506 = vector.broadcast %c1_i32_339 : i32 to vector<1x4xi32>
    %507 = arith.andi %503, %506 : vector<1x4xi32>
    %c1_i32_340 = arith.constant 1 : i32
    %508 = vector.broadcast %c1_i32_340 : i32 to vector<1x4xi32>
    %509 = arith.cmpi sge, %505, %508 : vector<1x4xi32>
    %cst_341 = arith.constant 1.000000e+00 : f32
    %cst_342 = arith.constant 0.000000e+00 : f32
    %510 = vector.broadcast %cst_341 : f32 to vector<1x4xf32>
    %511 = vector.broadcast %cst_342 : f32 to vector<1x4xf32>
    %512 = arith.select %509, %510, %511 : vector<1x4xi1>, vector<1x4xf32>
    %c1_i32_343 = arith.constant 1 : i32
    %513 = vector.broadcast %c1_i32_343 : i32 to vector<1x4xi32>
    %514 = arith.cmpi sge, %507, %513 : vector<1x4xi32>
    %cst_344 = arith.constant 1.000000e+00 : f32
    %cst_345 = arith.constant 0.000000e+00 : f32
    %515 = vector.broadcast %cst_344 : f32 to vector<1x4xf32>
    %516 = vector.broadcast %cst_345 : f32 to vector<1x4xf32>
    %517 = arith.select %514, %515, %516 : vector<1x4xi1>, vector<1x4xf32>
    %518 = arith.mulf %512, %517 : vector<1x4xf32>
    %c1_i32_346 = arith.constant 1 : i32
    %519 = vector.broadcast %c1_i32_346 : i32 to vector<1x4xi32>
    %520 = arith.cmpi sge, %505, %519 : vector<1x4xi32>
    %cst_347 = arith.constant 1.000000e+00 : f32
    %cst_348 = arith.constant 0.000000e+00 : f32
    %521 = vector.broadcast %cst_347 : f32 to vector<1x4xf32>
    %522 = vector.broadcast %cst_348 : f32 to vector<1x4xf32>
    %523 = arith.select %520, %521, %522 : vector<1x4xi1>, vector<1x4xf32>
    %c1_i32_349 = arith.constant 1 : i32
    %524 = vector.broadcast %c1_i32_349 : i32 to vector<1x4xi32>
    %525 = arith.cmpi sge, %505, %524 : vector<1x4xi32>
    %cst_350 = arith.constant 1.000000e+00 : f32
    %cst_351 = arith.constant 0.000000e+00 : f32
    %526 = vector.broadcast %cst_350 : f32 to vector<1x4xf32>
    %527 = vector.broadcast %cst_351 : f32 to vector<1x4xf32>
    %528 = arith.select %525, %526, %527 : vector<1x4xi1>, vector<1x4xf32>
    %c1_i32_352 = arith.constant 1 : i32
    %529 = vector.broadcast %c1_i32_352 : i32 to vector<1x4xi32>
    %530 = arith.cmpi slt, %507, %529 : vector<1x4xi32>
    %cst_353 = arith.constant 1.000000e+00 : f32
    %cst_354 = arith.constant 0.000000e+00 : f32
    %531 = vector.broadcast %cst_353 : f32 to vector<1x4xf32>
    %532 = vector.broadcast %cst_354 : f32 to vector<1x4xf32>
    %533 = arith.select %530, %531, %532 : vector<1x4xi1>, vector<1x4xf32>
    %534 = arith.mulf %528, %533 : vector<1x4xf32>
    %c1_i32_355 = arith.constant 1 : i32
    %535 = vector.broadcast %c1_i32_355 : i32 to vector<1x4xi32>
    %536 = arith.cmpi sge, %507, %535 : vector<1x4xi32>
    %cst_356 = arith.constant 1.000000e+00 : f32
    %cst_357 = arith.constant 0.000000e+00 : f32
    %537 = vector.broadcast %cst_356 : f32 to vector<1x4xf32>
    %538 = vector.broadcast %cst_357 : f32 to vector<1x4xf32>
    %539 = arith.select %536, %537, %538 : vector<1x4xi1>, vector<1x4xf32>
    %c1_i32_358 = arith.constant 1 : i32
    %540 = vector.broadcast %c1_i32_358 : i32 to vector<1x4xi32>
    %541 = arith.cmpi slt, %507, %540 : vector<1x4xi32>
    %cst_359 = arith.constant 1.000000e+00 : f32
    %cst_360 = arith.constant 0.000000e+00 : f32
    %542 = vector.broadcast %cst_359 : f32 to vector<1x4xf32>
    %543 = vector.broadcast %cst_360 : f32 to vector<1x4xf32>
    %544 = arith.select %541, %542, %543 : vector<1x4xi1>, vector<1x4xf32>
    %c1_i32_361 = arith.constant 1 : i32
    %545 = vector.broadcast %c1_i32_361 : i32 to vector<1x4xi32>
    %546 = arith.cmpi slt, %505, %545 : vector<1x4xi32>
    %cst_362 = arith.constant 1.000000e+00 : f32
    %cst_363 = arith.constant 0.000000e+00 : f32
    %547 = vector.broadcast %cst_362 : f32 to vector<1x4xf32>
    %548 = vector.broadcast %cst_363 : f32 to vector<1x4xf32>
    %549 = arith.select %546, %547, %548 : vector<1x4xi1>, vector<1x4xf32>
    %c1_i32_364 = arith.constant 1 : i32
    %550 = vector.broadcast %c1_i32_364 : i32 to vector<1x4xi32>
    %551 = arith.cmpi sge, %507, %550 : vector<1x4xi32>
    %cst_365 = arith.constant 1.000000e+00 : f32
    %cst_366 = arith.constant 0.000000e+00 : f32
    %552 = vector.broadcast %cst_365 : f32 to vector<1x4xf32>
    %553 = vector.broadcast %cst_366 : f32 to vector<1x4xf32>
    %554 = arith.select %551, %552, %553 : vector<1x4xi1>, vector<1x4xf32>
    %555 = arith.mulf %549, %554 : vector<1x4xf32>
    %c1_i32_367 = arith.constant 1 : i32
    %556 = vector.broadcast %c1_i32_367 : i32 to vector<1x4xi32>
    %557 = arith.cmpi slt, %505, %556 : vector<1x4xi32>
    %cst_368 = arith.constant 1.000000e+00 : f32
    %cst_369 = arith.constant 0.000000e+00 : f32
    %558 = vector.broadcast %cst_368 : f32 to vector<1x4xf32>
    %559 = vector.broadcast %cst_369 : f32 to vector<1x4xf32>
    %560 = arith.select %557, %558, %559 : vector<1x4xi1>, vector<1x4xf32>
    %c1_i32_370 = arith.constant 1 : i32
    %561 = vector.broadcast %c1_i32_370 : i32 to vector<1x4xi32>
    %562 = arith.cmpi slt, %505, %561 : vector<1x4xi32>
    %cst_371 = arith.constant 1.000000e+00 : f32
    %cst_372 = arith.constant 0.000000e+00 : f32
    %563 = vector.broadcast %cst_371 : f32 to vector<1x4xf32>
    %564 = vector.broadcast %cst_372 : f32 to vector<1x4xf32>
    %565 = arith.select %562, %563, %564 : vector<1x4xi1>, vector<1x4xf32>
    %c1_i32_373 = arith.constant 1 : i32
    %566 = vector.broadcast %c1_i32_373 : i32 to vector<1x4xi32>
    %567 = arith.cmpi slt, %507, %566 : vector<1x4xi32>
    %cst_374 = arith.constant 1.000000e+00 : f32
    %cst_375 = arith.constant 0.000000e+00 : f32
    %568 = vector.broadcast %cst_374 : f32 to vector<1x4xf32>
    %569 = vector.broadcast %cst_375 : f32 to vector<1x4xf32>
    %570 = arith.select %567, %568, %569 : vector<1x4xi1>, vector<1x4xf32>
    %571 = arith.mulf %565, %570 : vector<1x4xf32>
    %c0_376 = arith.constant 0 : index
    %c17_377 = arith.constant 17 : index
    %572 = vector.load %arg39[%c0_376, %c17_377] : memref<12x290xf32, #tpu.memory_space<vmem>>, vector<12x4xf32>
    tpu.vector_store %arg39[%c0_376, %c17_377], %502 {strides = array<i32>} : memref<12x290xf32, #tpu.memory_space<vmem>>, vector<12x4xf32>,
    %c0_378 = arith.constant 0 : index
    %c14_379 = arith.constant 14 : index
    %573 = vector.load %arg39[%c0_378, %c14_379] : memref<12x290xf32, #tpu.memory_space<vmem>>, vector<12x4xf32>
    %574 = vector.broadcast %518 : vector<1x4xf32> to vector<12x4xf32>
    %575 = arith.mulf %573, %574 : vector<12x4xf32>
    %c0_380 = arith.constant 0 : index
    %c0_381 = arith.constant 0 : index
    %576 = vector.load %arg40[%c0_380, %c0_381] : memref<216x256xf32, #tpu.memory_space<vmem>>, vector<12x4xf32>
    tpu.vector_store %arg40[%c0_380, %c0_381], %575 {strides = array<i32>} : memref<216x256xf32, #tpu.memory_space<vmem>>, vector<12x4xf32>,
    %c0_382 = arith.constant 0 : index
    %c15_383 = arith.constant 15 : index
    %577 = vector.load %arg39[%c0_382, %c15_383] : memref<12x290xf32, #tpu.memory_space<vmem>>, vector<12x4xf32>
    %578 = vector.broadcast %523 : vector<1x4xf32> to vector<12x4xf32>
    %579 = arith.mulf %577, %578 : vector<12x4xf32>
    %c12_384 = arith.constant 12 : index
    %c0_385 = arith.constant 0 : index
    %580 = vector.load %arg40[%c12_384, %c0_385] : memref<216x256xf32, #tpu.memory_space<vmem>>, vector<12x4xf32>
    tpu.vector_store %arg40[%c12_384, %c0_385], %579 {strides = array<i32>} : memref<216x256xf32, #tpu.memory_space<vmem>>, vector<12x4xf32>,
    %c0_386 = arith.constant 0 : index
    %c16_387 = arith.constant 16 : index
    %581 = vector.load %arg39[%c0_386, %c16_387] : memref<12x290xf32, #tpu.memory_space<vmem>>, vector<12x4xf32>
    %582 = vector.broadcast %534 : vector<1x4xf32> to vector<12x4xf32>
    %583 = arith.mulf %581, %582 : vector<12x4xf32>
    %c24_388 = arith.constant 24 : index
    %c0_389 = arith.constant 0 : index
    %584 = vector.load %arg40[%c24_388, %c0_389] : memref<216x256xf32, #tpu.memory_space<vmem>>, vector<12x4xf32>
    tpu.vector_store %arg40[%c24_388, %c0_389], %583 {strides = array<i32>} : memref<216x256xf32, #tpu.memory_space<vmem>>, vector<12x4xf32>,
    %c0_390 = arith.constant 0 : index
    %c16_391 = arith.constant 16 : index
    %585 = vector.load %arg39[%c0_390, %c16_391] : memref<12x290xf32, #tpu.memory_space<vmem>>, vector<12x4xf32>
    %586 = vector.broadcast %539 : vector<1x4xf32> to vector<12x4xf32>
    %587 = arith.mulf %585, %586 : vector<12x4xf32>
    %c36_392 = arith.constant 36 : index
    %c0_393 = arith.constant 0 : index
    %588 = vector.load %arg40[%c36_392, %c0_393] : memref<216x256xf32, #tpu.memory_space<vmem>>, vector<12x4xf32>
    tpu.vector_store %arg40[%c36_392, %c0_393], %587 {strides = array<i32>} : memref<216x256xf32, #tpu.memory_space<vmem>>, vector<12x4xf32>,
    %c48_394 = arith.constant 48 : index
    %c0_395 = arith.constant 0 : index
    %589 = vector.load %arg40[%c48_394, %c0_395] : memref<216x256xf32, #tpu.memory_space<vmem>>, vector<12x4xf32>
    tpu.vector_store %arg40[%c48_394, %c0_395], %502 {strides = array<i32>} : memref<216x256xf32, #tpu.memory_space<vmem>>, vector<12x4xf32>,
    %c0_396 = arith.constant 0 : index
    %c18_397 = arith.constant 18 : index
    %590 = vector.load %arg39[%c0_396, %c18_397] : memref<12x290xf32, #tpu.memory_space<vmem>>, vector<12x4xf32>
    %591 = vector.broadcast %544 : vector<1x4xf32> to vector<12x4xf32>
    %592 = arith.mulf %590, %591 : vector<12x4xf32>
    %c60_398 = arith.constant 60 : index
    %c0_399 = arith.constant 0 : index
    %593 = vector.load %arg40[%c60_398, %c0_399] : memref<216x256xf32, #tpu.memory_space<vmem>>, vector<12x4xf32>
    tpu.vector_store %arg40[%c60_398, %c0_399], %592 {strides = array<i32>} : memref<216x256xf32, #tpu.memory_space<vmem>>, vector<12x4xf32>,
    %c0_400 = arith.constant 0 : index
    %c18_401 = arith.constant 18 : index
    %594 = vector.load %arg39[%c0_400, %c18_401] : memref<12x290xf32, #tpu.memory_space<vmem>>, vector<12x4xf32>
    %595 = vector.broadcast %555 : vector<1x4xf32> to vector<12x4xf32>
    %596 = arith.mulf %594, %595 : vector<12x4xf32>
    %c72_402 = arith.constant 72 : index
    %c0_403 = arith.constant 0 : index
    %597 = vector.load %arg40[%c72_402, %c0_403] : memref<216x256xf32, #tpu.memory_space<vmem>>, vector<12x4xf32>
    tpu.vector_store %arg40[%c72_402, %c0_403], %596 {strides = array<i32>} : memref<216x256xf32, #tpu.memory_space<vmem>>, vector<12x4xf32>,
    %c0_404 = arith.constant 0 : index
    %c19 = arith.constant 19 : index
    %598 = vector.load %arg39[%c0_404, %c19] : memref<12x290xf32, #tpu.memory_space<vmem>>, vector<12x4xf32>
    %599 = vector.broadcast %560 : vector<1x4xf32> to vector<12x4xf32>
    %600 = arith.mulf %598, %599 : vector<12x4xf32>
    %c84_405 = arith.constant 84 : index
    %c0_406 = arith.constant 0 : index
    %601 = vector.load %arg40[%c84_405, %c0_406] : memref<216x256xf32, #tpu.memory_space<vmem>>, vector<12x4xf32>
    tpu.vector_store %arg40[%c84_405, %c0_406], %600 {strides = array<i32>} : memref<216x256xf32, #tpu.memory_space<vmem>>, vector<12x4xf32>,
    %c0_407 = arith.constant 0 : index
    %c20_408 = arith.constant 20 : index
    %602 = vector.load %arg39[%c0_407, %c20_408] : memref<12x290xf32, #tpu.memory_space<vmem>>, vector<12x4xf32>
    %603 = vector.broadcast %571 : vector<1x4xf32> to vector<12x4xf32>
    %604 = arith.mulf %602, %603 : vector<12x4xf32>
    %c96_409 = arith.constant 96 : index
    %c0_410 = arith.constant 0 : index
    %605 = vector.load %arg40[%c96_409, %c0_410] : memref<216x256xf32, #tpu.memory_space<vmem>>, vector<12x4xf32>
    tpu.vector_store %arg40[%c96_409, %c0_410], %604 {strides = array<i32>} : memref<216x256xf32, #tpu.memory_space<vmem>>, vector<12x4xf32>,
    %c0_411 = arith.constant 0 : index
    %c0_412 = arith.constant 0 : index
    %606 = vector.load %arg14[%c0_411, %c0_412] : memref<12x108xf32, #tpu.memory_space<vmem>>, vector<12x108xf32>
    %c0_413 = arith.constant 0 : index
    %c0_414 = arith.constant 0 : index
    %607 = vector.load %arg40[%c0_413, %c0_414] : memref<216x256xf32, #tpu.memory_space<vmem>>, vector<108x4xf32>
    %cst_415 = arith.constant dense<0.000000e+00> : vector<12x4xf32>
    %608 = tpu.matmul %606, %607, %cst_415 {dimension_numbers = #tpu.dot_dimension_numbers<[1], [0], [0], [1], [0, 0, 1, 1], [], []>} : vector<12x108xf32>, vector<108x4xf32>, vector<12x4xf32> -> vector<12x4xf32>
    %c0_416 = arith.constant 0 : index
    %c0_417 = arith.constant 0 : index
    %609 = vector.load %arg15[%c0_416, %c0_417] : memref<12x1xf32, #tpu.memory_space<vmem>>, vector<12x1xf32>
    %610 = vector.broadcast %609 : vector<12x1xf32> to vector<12x4xf32>
    %611 = arith.mulf %608, %610 : vector<12x4xf32>
    %c0_418 = arith.constant 0 : index
    %c0_419 = arith.constant 0 : index
    %612 = vector.load %arg16[%c0_418, %c0_419] : memref<12x1xf32, #tpu.memory_space<vmem>>, vector<12x1xf32>
    %613 = vector.broadcast %612 : vector<12x1xf32> to vector<12x4xf32>
    %614 = arith.addf %611, %613 : vector<12x4xf32>
    %615 = math.exp %614 : vector<12x4xf32>
    %cst_420 = arith.constant 1.000000e+00 : f32
    %616 = vector.broadcast %cst_420 : f32 to vector<12x4xf32>
    %617 = arith.addf %616, %615 : vector<12x4xf32>
    %618 = math.log %617 : vector<12x4xf32>
    %619 = math.tanh %618 : vector<12x4xf32>
    %620 = arith.mulf %614, %619 : vector<12x4xf32>
    %621 = tpu.iota {dimensions = array<i32: 1>} : vector<1x4xi32>
    %c1_i32_421 = arith.constant 1 : i32
    %622 = vector.broadcast %c1_i32_421 : i32 to vector<1x4xi32>
    %623 = arith.shrsi %621, %622 : vector<1x4xi32>
    %c1_i32_422 = arith.constant 1 : i32
    %624 = vector.broadcast %c1_i32_422 : i32 to vector<1x4xi32>
    %625 = arith.andi %621, %624 : vector<1x4xi32>
    %c2_i32_423 = arith.constant 2 : i32
    %626 = vector.broadcast %c2_i32_423 : i32 to vector<1x4xi32>
    %627 = arith.cmpi sge, %623, %626 : vector<1x4xi32>
    %cst_424 = arith.constant 1.000000e+00 : f32
    %cst_425 = arith.constant 0.000000e+00 : f32
    %628 = vector.broadcast %cst_424 : f32 to vector<1x4xf32>
    %629 = vector.broadcast %cst_425 : f32 to vector<1x4xf32>
    %630 = arith.select %627, %628, %629 : vector<1x4xi1>, vector<1x4xf32>
    %c2_i32_426 = arith.constant 2 : i32
    %631 = vector.broadcast %c2_i32_426 : i32 to vector<1x4xi32>
    %632 = arith.cmpi sge, %625, %631 : vector<1x4xi32>
    %cst_427 = arith.constant 1.000000e+00 : f32
    %cst_428 = arith.constant 0.000000e+00 : f32
    %633 = vector.broadcast %cst_427 : f32 to vector<1x4xf32>
    %634 = vector.broadcast %cst_428 : f32 to vector<1x4xf32>
    %635 = arith.select %632, %633, %634 : vector<1x4xi1>, vector<1x4xf32>
    %636 = arith.mulf %630, %635 : vector<1x4xf32>
    %c2_i32_429 = arith.constant 2 : i32
    %637 = vector.broadcast %c2_i32_429 : i32 to vector<1x4xi32>
    %638 = arith.cmpi sge, %623, %637 : vector<1x4xi32>
    %cst_430 = arith.constant 1.000000e+00 : f32
    %cst_431 = arith.constant 0.000000e+00 : f32
    %639 = vector.broadcast %cst_430 : f32 to vector<1x4xf32>
    %640 = vector.broadcast %cst_431 : f32 to vector<1x4xf32>
    %641 = arith.select %638, %639, %640 : vector<1x4xi1>, vector<1x4xf32>
    %c2_i32_432 = arith.constant 2 : i32
    %642 = vector.broadcast %c2_i32_432 : i32 to vector<1x4xi32>
    %643 = arith.cmpi sge, %623, %642 : vector<1x4xi32>
    %cst_433 = arith.constant 1.000000e+00 : f32
    %cst_434 = arith.constant 0.000000e+00 : f32
    %644 = vector.broadcast %cst_433 : f32 to vector<1x4xf32>
    %645 = vector.broadcast %cst_434 : f32 to vector<1x4xf32>
    %646 = arith.select %643, %644, %645 : vector<1x4xi1>, vector<1x4xf32>
    %c0_i32 = arith.constant 0 : i32
    %647 = vector.broadcast %c0_i32 : i32 to vector<1x4xi32>
    %648 = arith.cmpi slt, %625, %647 : vector<1x4xi32>
    %cst_435 = arith.constant 1.000000e+00 : f32
    %cst_436 = arith.constant 0.000000e+00 : f32
    %649 = vector.broadcast %cst_435 : f32 to vector<1x4xf32>
    %650 = vector.broadcast %cst_436 : f32 to vector<1x4xf32>
    %651 = arith.select %648, %649, %650 : vector<1x4xi1>, vector<1x4xf32>
    %652 = arith.mulf %646, %651 : vector<1x4xf32>
    %c2_i32_437 = arith.constant 2 : i32
    %653 = vector.broadcast %c2_i32_437 : i32 to vector<1x4xi32>
    %654 = arith.cmpi sge, %625, %653 : vector<1x4xi32>
    %cst_438 = arith.constant 1.000000e+00 : f32
    %cst_439 = arith.constant 0.000000e+00 : f32
    %655 = vector.broadcast %cst_438 : f32 to vector<1x4xf32>
    %656 = vector.broadcast %cst_439 : f32 to vector<1x4xf32>
    %657 = arith.select %654, %655, %656 : vector<1x4xi1>, vector<1x4xf32>
    %c0_i32_440 = arith.constant 0 : i32
    %658 = vector.broadcast %c0_i32_440 : i32 to vector<1x4xi32>
    %659 = arith.cmpi slt, %625, %658 : vector<1x4xi32>
    %cst_441 = arith.constant 1.000000e+00 : f32
    %cst_442 = arith.constant 0.000000e+00 : f32
    %660 = vector.broadcast %cst_441 : f32 to vector<1x4xf32>
    %661 = vector.broadcast %cst_442 : f32 to vector<1x4xf32>
    %662 = arith.select %659, %660, %661 : vector<1x4xi1>, vector<1x4xf32>
    %c0_i32_443 = arith.constant 0 : i32
    %663 = vector.broadcast %c0_i32_443 : i32 to vector<1x4xi32>
    %664 = arith.cmpi slt, %623, %663 : vector<1x4xi32>
    %cst_444 = arith.constant 1.000000e+00 : f32
    %cst_445 = arith.constant 0.000000e+00 : f32
    %665 = vector.broadcast %cst_444 : f32 to vector<1x4xf32>
    %666 = vector.broadcast %cst_445 : f32 to vector<1x4xf32>
    %667 = arith.select %664, %665, %666 : vector<1x4xi1>, vector<1x4xf32>
    %c2_i32_446 = arith.constant 2 : i32
    %668 = vector.broadcast %c2_i32_446 : i32 to vector<1x4xi32>
    %669 = arith.cmpi sge, %625, %668 : vector<1x4xi32>
    %cst_447 = arith.constant 1.000000e+00 : f32
    %cst_448 = arith.constant 0.000000e+00 : f32
    %670 = vector.broadcast %cst_447 : f32 to vector<1x4xf32>
    %671 = vector.broadcast %cst_448 : f32 to vector<1x4xf32>
    %672 = arith.select %669, %670, %671 : vector<1x4xi1>, vector<1x4xf32>
    %673 = arith.mulf %667, %672 : vector<1x4xf32>
    %c0_i32_449 = arith.constant 0 : i32
    %674 = vector.broadcast %c0_i32_449 : i32 to vector<1x4xi32>
    %675 = arith.cmpi slt, %623, %674 : vector<1x4xi32>
    %cst_450 = arith.constant 1.000000e+00 : f32
    %cst_451 = arith.constant 0.000000e+00 : f32
    %676 = vector.broadcast %cst_450 : f32 to vector<1x4xf32>
    %677 = vector.broadcast %cst_451 : f32 to vector<1x4xf32>
    %678 = arith.select %675, %676, %677 : vector<1x4xi1>, vector<1x4xf32>
    %c0_i32_452 = arith.constant 0 : i32
    %679 = vector.broadcast %c0_i32_452 : i32 to vector<1x4xi32>
    %680 = arith.cmpi slt, %623, %679 : vector<1x4xi32>
    %cst_453 = arith.constant 1.000000e+00 : f32
    %cst_454 = arith.constant 0.000000e+00 : f32
    %681 = vector.broadcast %cst_453 : f32 to vector<1x4xf32>
    %682 = vector.broadcast %cst_454 : f32 to vector<1x4xf32>
    %683 = arith.select %680, %681, %682 : vector<1x4xi1>, vector<1x4xf32>
    %c0_i32_455 = arith.constant 0 : i32
    %684 = vector.broadcast %c0_i32_455 : i32 to vector<1x4xi32>
    %685 = arith.cmpi slt, %625, %684 : vector<1x4xi32>
    %cst_456 = arith.constant 1.000000e+00 : f32
    %cst_457 = arith.constant 0.000000e+00 : f32
    %686 = vector.broadcast %cst_456 : f32 to vector<1x4xf32>
    %687 = vector.broadcast %cst_457 : f32 to vector<1x4xf32>
    %688 = arith.select %685, %686, %687 : vector<1x4xi1>, vector<1x4xf32>
    %689 = arith.mulf %683, %688 : vector<1x4xf32>
    %c0_458 = arith.constant 0 : index
    %c17_459 = arith.constant 17 : index
    %690 = vector.load %arg39[%c0_458, %c17_459] : memref<12x290xf32, #tpu.memory_space<vmem>>, vector<12x4xf32>
    tpu.vector_store %arg39[%c0_458, %c17_459], %620 {strides = array<i32>} : memref<12x290xf32, #tpu.memory_space<vmem>>, vector<12x4xf32>,
    %c0_460 = arith.constant 0 : index
    %c11 = arith.constant 11 : index
    %691 = vector.load %arg39[%c0_460, %c11] : memref<12x290xf32, #tpu.memory_space<vmem>>, vector<12x4xf32>
    %692 = vector.broadcast %636 : vector<1x4xf32> to vector<12x4xf32>
    %693 = arith.mulf %691, %692 : vector<12x4xf32>
    %c0_461 = arith.constant 0 : index
    %c0_462 = arith.constant 0 : index
    %694 = vector.load %arg40[%c0_461, %c0_462] : memref<216x256xf32, #tpu.memory_space<vmem>>, vector<12x4xf32>
    tpu.vector_store %arg40[%c0_461, %c0_462], %693 {strides = array<i32>} : memref<216x256xf32, #tpu.memory_space<vmem>>, vector<12x4xf32>,
    %c0_463 = arith.constant 0 : index
    %c13_464 = arith.constant 13 : index
    %695 = vector.load %arg39[%c0_463, %c13_464] : memref<12x290xf32, #tpu.memory_space<vmem>>, vector<12x4xf32>
    %696 = vector.broadcast %641 : vector<1x4xf32> to vector<12x4xf32>
    %697 = arith.mulf %695, %696 : vector<12x4xf32>
    %c12_465 = arith.constant 12 : index
    %c0_466 = arith.constant 0 : index
    %698 = vector.load %arg40[%c12_465, %c0_466] : memref<216x256xf32, #tpu.memory_space<vmem>>, vector<12x4xf32>
    tpu.vector_store %arg40[%c12_465, %c0_466], %697 {strides = array<i32>} : memref<216x256xf32, #tpu.memory_space<vmem>>, vector<12x4xf32>,
    %c0_467 = arith.constant 0 : index
    %c15_468 = arith.constant 15 : index
    %699 = vector.load %arg39[%c0_467, %c15_468] : memref<12x290xf32, #tpu.memory_space<vmem>>, vector<12x4xf32>
    %700 = vector.broadcast %652 : vector<1x4xf32> to vector<12x4xf32>
    %701 = arith.mulf %699, %700 : vector<12x4xf32>
    %c24_469 = arith.constant 24 : index
    %c0_470 = arith.constant 0 : index
    %702 = vector.load %arg40[%c24_469, %c0_470] : memref<216x256xf32, #tpu.memory_space<vmem>>, vector<12x4xf32>
    tpu.vector_store %arg40[%c24_469, %c0_470], %701 {strides = array<i32>} : memref<216x256xf32, #tpu.memory_space<vmem>>, vector<12x4xf32>,
    %c0_471 = arith.constant 0 : index
    %c15_472 = arith.constant 15 : index
    %703 = vector.load %arg39[%c0_471, %c15_472] : memref<12x290xf32, #tpu.memory_space<vmem>>, vector<12x4xf32>
    %704 = vector.broadcast %657 : vector<1x4xf32> to vector<12x4xf32>
    %705 = arith.mulf %703, %704 : vector<12x4xf32>
    %c36_473 = arith.constant 36 : index
    %c0_474 = arith.constant 0 : index
    %706 = vector.load %arg40[%c36_473, %c0_474] : memref<216x256xf32, #tpu.memory_space<vmem>>, vector<12x4xf32>
    tpu.vector_store %arg40[%c36_473, %c0_474], %705 {strides = array<i32>} : memref<216x256xf32, #tpu.memory_space<vmem>>, vector<12x4xf32>,
    %c48_475 = arith.constant 48 : index
    %c0_476 = arith.constant 0 : index
    %707 = vector.load %arg40[%c48_475, %c0_476] : memref<216x256xf32, #tpu.memory_space<vmem>>, vector<12x4xf32>
    tpu.vector_store %arg40[%c48_475, %c0_476], %620 {strides = array<i32>} : memref<216x256xf32, #tpu.memory_space<vmem>>, vector<12x4xf32>,
    %c0_477 = arith.constant 0 : index
    %c19_478 = arith.constant 19 : index
    %708 = vector.load %arg39[%c0_477, %c19_478] : memref<12x290xf32, #tpu.memory_space<vmem>>, vector<12x4xf32>
    %709 = vector.broadcast %662 : vector<1x4xf32> to vector<12x4xf32>
    %710 = arith.mulf %708, %709 : vector<12x4xf32>
    %c60_479 = arith.constant 60 : index
    %c0_480 = arith.constant 0 : index
    %711 = vector.load %arg40[%c60_479, %c0_480] : memref<216x256xf32, #tpu.memory_space<vmem>>, vector<12x4xf32>
    tpu.vector_store %arg40[%c60_479, %c0_480], %710 {strides = array<i32>} : memref<216x256xf32, #tpu.memory_space<vmem>>, vector<12x4xf32>,
    %c0_481 = arith.constant 0 : index
    %c19_482 = arith.constant 19 : index
    %712 = vector.load %arg39[%c0_481, %c19_482] : memref<12x290xf32, #tpu.memory_space<vmem>>, vector<12x4xf32>
    %713 = vector.broadcast %673 : vector<1x4xf32> to vector<12x4xf32>
    %714 = arith.mulf %712, %713 : vector<12x4xf32>
    %c72_483 = arith.constant 72 : index
    %c0_484 = arith.constant 0 : index
    %715 = vector.load %arg40[%c72_483, %c0_484] : memref<216x256xf32, #tpu.memory_space<vmem>>, vector<12x4xf32>
    tpu.vector_store %arg40[%c72_483, %c0_484], %714 {strides = array<i32>} : memref<216x256xf32, #tpu.memory_space<vmem>>, vector<12x4xf32>,
    %c0_485 = arith.constant 0 : index
    %c21_486 = arith.constant 21 : index
    %716 = vector.load %arg39[%c0_485, %c21_486] : memref<12x290xf32, #tpu.memory_space<vmem>>, vector<12x4xf32>
    %717 = vector.broadcast %678 : vector<1x4xf32> to vector<12x4xf32>
    %718 = arith.mulf %716, %717 : vector<12x4xf32>
    %c84_487 = arith.constant 84 : index
    %c0_488 = arith.constant 0 : index
    %719 = vector.load %arg40[%c84_487, %c0_488] : memref<216x256xf32, #tpu.memory_space<vmem>>, vector<12x4xf32>
    tpu.vector_store %arg40[%c84_487, %c0_488], %718 {strides = array<i32>} : memref<216x256xf32, #tpu.memory_space<vmem>>, vector<12x4xf32>,
    %c0_489 = arith.constant 0 : index
    %c23 = arith.constant 23 : index
    %720 = vector.load %arg39[%c0_489, %c23] : memref<12x290xf32, #tpu.memory_space<vmem>>, vector<12x4xf32>
    %721 = vector.broadcast %689 : vector<1x4xf32> to vector<12x4xf32>
    %722 = arith.mulf %720, %721 : vector<12x4xf32>
    %c96_490 = arith.constant 96 : index
    %c0_491 = arith.constant 0 : index
    %723 = vector.load %arg40[%c96_490, %c0_491] : memref<216x256xf32, #tpu.memory_space<vmem>>, vector<12x4xf32>
    tpu.vector_store %arg40[%c96_490, %c0_491], %722 {strides = array<i32>} : memref<216x256xf32, #tpu.memory_space<vmem>>, vector<12x4xf32>,
    %c0_492 = arith.constant 0 : index
    %c0_493 = arith.constant 0 : index
    %724 = vector.load %arg17[%c0_492, %c0_493] : memref<12x108xf32, #tpu.memory_space<vmem>>, vector<12x108xf32>
    %c0_494 = arith.constant 0 : index
    %c0_495 = arith.constant 0 : index
    %725 = vector.load %arg40[%c0_494, %c0_495] : memref<216x256xf32, #tpu.memory_space<vmem>>, vector<108x4xf32>
    %cst_496 = arith.constant dense<0.000000e+00> : vector<12x4xf32>
    %726 = tpu.matmul %724, %725, %cst_496 {dimension_numbers = #tpu.dot_dimension_numbers<[1], [0], [0], [1], [0, 0, 1, 1], [], []>} : vector<12x108xf32>, vector<108x4xf32>, vector<12x4xf32> -> vector<12x4xf32>
    %c0_497 = arith.constant 0 : index
    %c0_498 = arith.constant 0 : index
    %727 = vector.load %arg18[%c0_497, %c0_498] : memref<12x1xf32, #tpu.memory_space<vmem>>, vector<12x1xf32>
    %728 = vector.broadcast %727 : vector<12x1xf32> to vector<12x4xf32>
    %729 = arith.mulf %726, %728 : vector<12x4xf32>
    %c0_499 = arith.constant 0 : index
    %c0_500 = arith.constant 0 : index
    %730 = vector.load %arg19[%c0_499, %c0_500] : memref<12x1xf32, #tpu.memory_space<vmem>>, vector<12x1xf32>
    %731 = vector.broadcast %730 : vector<12x1xf32> to vector<12x4xf32>
    %732 = arith.addf %729, %731 : vector<12x4xf32>
    %733 = math.exp %732 : vector<12x4xf32>
    %cst_501 = arith.constant 1.000000e+00 : f32
    %734 = vector.broadcast %cst_501 : f32 to vector<12x4xf32>
    %735 = arith.addf %734, %733 : vector<12x4xf32>
    %736 = math.log %735 : vector<12x4xf32>
    %737 = math.tanh %736 : vector<12x4xf32>
    %738 = arith.mulf %732, %737 : vector<12x4xf32>
    %739 = tpu.iota {dimensions = array<i32: 1>} : vector<1x4xi32>
    %c1_i32_502 = arith.constant 1 : i32
    %740 = vector.broadcast %c1_i32_502 : i32 to vector<1x4xi32>
    %741 = arith.shrsi %739, %740 : vector<1x4xi32>
    %c1_i32_503 = arith.constant 1 : i32
    %742 = vector.broadcast %c1_i32_503 : i32 to vector<1x4xi32>
    %743 = arith.andi %739, %742 : vector<1x4xi32>
    %c1_i32_504 = arith.constant 1 : i32
    %744 = vector.broadcast %c1_i32_504 : i32 to vector<1x4xi32>
    %745 = arith.cmpi sge, %741, %744 : vector<1x4xi32>
    %cst_505 = arith.constant 1.000000e+00 : f32
    %cst_506 = arith.constant 0.000000e+00 : f32
    %746 = vector.broadcast %cst_505 : f32 to vector<1x4xf32>
    %747 = vector.broadcast %cst_506 : f32 to vector<1x4xf32>
    %748 = arith.select %745, %746, %747 : vector<1x4xi1>, vector<1x4xf32>
    %c1_i32_507 = arith.constant 1 : i32
    %749 = vector.broadcast %c1_i32_507 : i32 to vector<1x4xi32>
    %750 = arith.cmpi sge, %743, %749 : vector<1x4xi32>
    %cst_508 = arith.constant 1.000000e+00 : f32
    %cst_509 = arith.constant 0.000000e+00 : f32
    %751 = vector.broadcast %cst_508 : f32 to vector<1x4xf32>
    %752 = vector.broadcast %cst_509 : f32 to vector<1x4xf32>
    %753 = arith.select %750, %751, %752 : vector<1x4xi1>, vector<1x4xf32>
    %754 = arith.mulf %748, %753 : vector<1x4xf32>
    %c1_i32_510 = arith.constant 1 : i32
    %755 = vector.broadcast %c1_i32_510 : i32 to vector<1x4xi32>
    %756 = arith.cmpi sge, %741, %755 : vector<1x4xi32>
    %cst_511 = arith.constant 1.000000e+00 : f32
    %cst_512 = arith.constant 0.000000e+00 : f32
    %757 = vector.broadcast %cst_511 : f32 to vector<1x4xf32>
    %758 = vector.broadcast %cst_512 : f32 to vector<1x4xf32>
    %759 = arith.select %756, %757, %758 : vector<1x4xi1>, vector<1x4xf32>
    %c1_i32_513 = arith.constant 1 : i32
    %760 = vector.broadcast %c1_i32_513 : i32 to vector<1x4xi32>
    %761 = arith.cmpi sge, %741, %760 : vector<1x4xi32>
    %cst_514 = arith.constant 1.000000e+00 : f32
    %cst_515 = arith.constant 0.000000e+00 : f32
    %762 = vector.broadcast %cst_514 : f32 to vector<1x4xf32>
    %763 = vector.broadcast %cst_515 : f32 to vector<1x4xf32>
    %764 = arith.select %761, %762, %763 : vector<1x4xi1>, vector<1x4xf32>
    %c1_i32_516 = arith.constant 1 : i32
    %765 = vector.broadcast %c1_i32_516 : i32 to vector<1x4xi32>
    %766 = arith.cmpi slt, %743, %765 : vector<1x4xi32>
    %cst_517 = arith.constant 1.000000e+00 : f32
    %cst_518 = arith.constant 0.000000e+00 : f32
    %767 = vector.broadcast %cst_517 : f32 to vector<1x4xf32>
    %768 = vector.broadcast %cst_518 : f32 to vector<1x4xf32>
    %769 = arith.select %766, %767, %768 : vector<1x4xi1>, vector<1x4xf32>
    %770 = arith.mulf %764, %769 : vector<1x4xf32>
    %c1_i32_519 = arith.constant 1 : i32
    %771 = vector.broadcast %c1_i32_519 : i32 to vector<1x4xi32>
    %772 = arith.cmpi sge, %743, %771 : vector<1x4xi32>
    %cst_520 = arith.constant 1.000000e+00 : f32
    %cst_521 = arith.constant 0.000000e+00 : f32
    %773 = vector.broadcast %cst_520 : f32 to vector<1x4xf32>
    %774 = vector.broadcast %cst_521 : f32 to vector<1x4xf32>
    %775 = arith.select %772, %773, %774 : vector<1x4xi1>, vector<1x4xf32>
    %c1_i32_522 = arith.constant 1 : i32
    %776 = vector.broadcast %c1_i32_522 : i32 to vector<1x4xi32>
    %777 = arith.cmpi slt, %743, %776 : vector<1x4xi32>
    %cst_523 = arith.constant 1.000000e+00 : f32
    %cst_524 = arith.constant 0.000000e+00 : f32
    %778 = vector.broadcast %cst_523 : f32 to vector<1x4xf32>
    %779 = vector.broadcast %cst_524 : f32 to vector<1x4xf32>
    %780 = arith.select %777, %778, %779 : vector<1x4xi1>, vector<1x4xf32>
    %c1_i32_525 = arith.constant 1 : i32
    %781 = vector.broadcast %c1_i32_525 : i32 to vector<1x4xi32>
    %782 = arith.cmpi slt, %741, %781 : vector<1x4xi32>
    %cst_526 = arith.constant 1.000000e+00 : f32
    %cst_527 = arith.constant 0.000000e+00 : f32
    %783 = vector.broadcast %cst_526 : f32 to vector<1x4xf32>
    %784 = vector.broadcast %cst_527 : f32 to vector<1x4xf32>
    %785 = arith.select %782, %783, %784 : vector<1x4xi1>, vector<1x4xf32>
    %c1_i32_528 = arith.constant 1 : i32
    %786 = vector.broadcast %c1_i32_528 : i32 to vector<1x4xi32>
    %787 = arith.cmpi sge, %743, %786 : vector<1x4xi32>
    %cst_529 = arith.constant 1.000000e+00 : f32
    %cst_530 = arith.constant 0.000000e+00 : f32
    %788 = vector.broadcast %cst_529 : f32 to vector<1x4xf32>
    %789 = vector.broadcast %cst_530 : f32 to vector<1x4xf32>
    %790 = arith.select %787, %788, %789 : vector<1x4xi1>, vector<1x4xf32>
    %791 = arith.mulf %785, %790 : vector<1x4xf32>
    %c1_i32_531 = arith.constant 1 : i32
    %792 = vector.broadcast %c1_i32_531 : i32 to vector<1x4xi32>
    %793 = arith.cmpi slt, %741, %792 : vector<1x4xi32>
    %cst_532 = arith.constant 1.000000e+00 : f32
    %cst_533 = arith.constant 0.000000e+00 : f32
    %794 = vector.broadcast %cst_532 : f32 to vector<1x4xf32>
    %795 = vector.broadcast %cst_533 : f32 to vector<1x4xf32>
    %796 = arith.select %793, %794, %795 : vector<1x4xi1>, vector<1x4xf32>
    %c1_i32_534 = arith.constant 1 : i32
    %797 = vector.broadcast %c1_i32_534 : i32 to vector<1x4xi32>
    %798 = arith.cmpi slt, %741, %797 : vector<1x4xi32>
    %cst_535 = arith.constant 1.000000e+00 : f32
    %cst_536 = arith.constant 0.000000e+00 : f32
    %799 = vector.broadcast %cst_535 : f32 to vector<1x4xf32>
    %800 = vector.broadcast %cst_536 : f32 to vector<1x4xf32>
    %801 = arith.select %798, %799, %800 : vector<1x4xi1>, vector<1x4xf32>
    %c1_i32_537 = arith.constant 1 : i32
    %802 = vector.broadcast %c1_i32_537 : i32 to vector<1x4xi32>
    %803 = arith.cmpi slt, %743, %802 : vector<1x4xi32>
    %cst_538 = arith.constant 1.000000e+00 : f32
    %cst_539 = arith.constant 0.000000e+00 : f32
    %804 = vector.broadcast %cst_538 : f32 to vector<1x4xf32>
    %805 = vector.broadcast %cst_539 : f32 to vector<1x4xf32>
    %806 = arith.select %803, %804, %805 : vector<1x4xi1>, vector<1x4xf32>
    %807 = arith.mulf %801, %806 : vector<1x4xf32>
    %c0_540 = arith.constant 0 : index
    %c17_541 = arith.constant 17 : index
    %808 = vector.load %arg39[%c0_540, %c17_541] : memref<12x290xf32, #tpu.memory_space<vmem>>, vector<12x4xf32>
    tpu.vector_store %arg39[%c0_540, %c17_541], %738 {strides = array<i32>} : memref<12x290xf32, #tpu.memory_space<vmem>>, vector<12x4xf32>,
    %c0_542 = arith.constant 0 : index
    %c14_543 = arith.constant 14 : index
    %809 = vector.load %arg39[%c0_542, %c14_543] : memref<12x290xf32, #tpu.memory_space<vmem>>, vector<12x4xf32>
    %810 = vector.broadcast %754 : vector<1x4xf32> to vector<12x4xf32>
    %811 = arith.mulf %809, %810 : vector<12x4xf32>
    %c0_544 = arith.constant 0 : index
    %c0_545 = arith.constant 0 : index
    %812 = vector.load %arg40[%c0_544, %c0_545] : memref<216x256xf32, #tpu.memory_space<vmem>>, vector<12x4xf32>
    tpu.vector_store %arg40[%c0_544, %c0_545], %811 {strides = array<i32>} : memref<216x256xf32, #tpu.memory_space<vmem>>, vector<12x4xf32>,
    %c0_546 = arith.constant 0 : index
    %c15_547 = arith.constant 15 : index
    %813 = vector.load %arg39[%c0_546, %c15_547] : memref<12x290xf32, #tpu.memory_space<vmem>>, vector<12x4xf32>
    %814 = vector.broadcast %759 : vector<1x4xf32> to vector<12x4xf32>
    %815 = arith.mulf %813, %814 : vector<12x4xf32>
    %c12_548 = arith.constant 12 : index
    %c0_549 = arith.constant 0 : index
    %816 = vector.load %arg40[%c12_548, %c0_549] : memref<216x256xf32, #tpu.memory_space<vmem>>, vector<12x4xf32>
    tpu.vector_store %arg40[%c12_548, %c0_549], %815 {strides = array<i32>} : memref<216x256xf32, #tpu.memory_space<vmem>>, vector<12x4xf32>,
    %c0_550 = arith.constant 0 : index
    %c16_551 = arith.constant 16 : index
    %817 = vector.load %arg39[%c0_550, %c16_551] : memref<12x290xf32, #tpu.memory_space<vmem>>, vector<12x4xf32>
    %818 = vector.broadcast %770 : vector<1x4xf32> to vector<12x4xf32>
    %819 = arith.mulf %817, %818 : vector<12x4xf32>
    %c24_552 = arith.constant 24 : index
    %c0_553 = arith.constant 0 : index
    %820 = vector.load %arg40[%c24_552, %c0_553] : memref<216x256xf32, #tpu.memory_space<vmem>>, vector<12x4xf32>
    tpu.vector_store %arg40[%c24_552, %c0_553], %819 {strides = array<i32>} : memref<216x256xf32, #tpu.memory_space<vmem>>, vector<12x4xf32>,
    %c0_554 = arith.constant 0 : index
    %c16_555 = arith.constant 16 : index
    %821 = vector.load %arg39[%c0_554, %c16_555] : memref<12x290xf32, #tpu.memory_space<vmem>>, vector<12x4xf32>
    %822 = vector.broadcast %775 : vector<1x4xf32> to vector<12x4xf32>
    %823 = arith.mulf %821, %822 : vector<12x4xf32>
    %c36_556 = arith.constant 36 : index
    %c0_557 = arith.constant 0 : index
    %824 = vector.load %arg40[%c36_556, %c0_557] : memref<216x256xf32, #tpu.memory_space<vmem>>, vector<12x4xf32>
    tpu.vector_store %arg40[%c36_556, %c0_557], %823 {strides = array<i32>} : memref<216x256xf32, #tpu.memory_space<vmem>>, vector<12x4xf32>,
    %c48_558 = arith.constant 48 : index
    %c0_559 = arith.constant 0 : index
    %825 = vector.load %arg40[%c48_558, %c0_559] : memref<216x256xf32, #tpu.memory_space<vmem>>, vector<12x4xf32>
    tpu.vector_store %arg40[%c48_558, %c0_559], %738 {strides = array<i32>} : memref<216x256xf32, #tpu.memory_space<vmem>>, vector<12x4xf32>,
    %c0_560 = arith.constant 0 : index
    %c18_561 = arith.constant 18 : index
    %826 = vector.load %arg39[%c0_560, %c18_561] : memref<12x290xf32, #tpu.memory_space<vmem>>, vector<12x4xf32>
    %827 = vector.broadcast %780 : vector<1x4xf32> to vector<12x4xf32>
    %828 = arith.mulf %826, %827 : vector<12x4xf32>
    %c60_562 = arith.constant 60 : index
    %c0_563 = arith.constant 0 : index
    %829 = vector.load %arg40[%c60_562, %c0_563] : memref<216x256xf32, #tpu.memory_space<vmem>>, vector<12x4xf32>
    tpu.vector_store %arg40[%c60_562, %c0_563], %828 {strides = array<i32>} : memref<216x256xf32, #tpu.memory_space<vmem>>, vector<12x4xf32>,
    %c0_564 = arith.constant 0 : index
    %c18_565 = arith.constant 18 : index
    %830 = vector.load %arg39[%c0_564, %c18_565] : memref<12x290xf32, #tpu.memory_space<vmem>>, vector<12x4xf32>
    %831 = vector.broadcast %791 : vector<1x4xf32> to vector<12x4xf32>
    %832 = arith.mulf %830, %831 : vector<12x4xf32>
    %c72_566 = arith.constant 72 : index
    %c0_567 = arith.constant 0 : index
    %833 = vector.load %arg40[%c72_566, %c0_567] : memref<216x256xf32, #tpu.memory_space<vmem>>, vector<12x4xf32>
    tpu.vector_store %arg40[%c72_566, %c0_567], %832 {strides = array<i32>} : memref<216x256xf32, #tpu.memory_space<vmem>>, vector<12x4xf32>,
    %c0_568 = arith.constant 0 : index
    %c19_569 = arith.constant 19 : index
    %834 = vector.load %arg39[%c0_568, %c19_569] : memref<12x290xf32, #tpu.memory_space<vmem>>, vector<12x4xf32>
    %835 = vector.broadcast %796 : vector<1x4xf32> to vector<12x4xf32>
    %836 = arith.mulf %834, %835 : vector<12x4xf32>
    %c84_570 = arith.constant 84 : index
    %c0_571 = arith.constant 0 : index
    %837 = vector.load %arg40[%c84_570, %c0_571] : memref<216x256xf32, #tpu.memory_space<vmem>>, vector<12x4xf32>
    tpu.vector_store %arg40[%c84_570, %c0_571], %836 {strides = array<i32>} : memref<216x256xf32, #tpu.memory_space<vmem>>, vector<12x4xf32>,
    %c0_572 = arith.constant 0 : index
    %c20_573 = arith.constant 20 : index
    %838 = vector.load %arg39[%c0_572, %c20_573] : memref<12x290xf32, #tpu.memory_space<vmem>>, vector<12x4xf32>
    %839 = vector.broadcast %807 : vector<1x4xf32> to vector<12x4xf32>
    %840 = arith.mulf %838, %839 : vector<12x4xf32>
    %c96_574 = arith.constant 96 : index
    %c0_575 = arith.constant 0 : index
    %841 = vector.load %arg40[%c96_574, %c0_575] : memref<216x256xf32, #tpu.memory_space<vmem>>, vector<12x4xf32>
    tpu.vector_store %arg40[%c96_574, %c0_575], %840 {strides = array<i32>} : memref<216x256xf32, #tpu.memory_space<vmem>>, vector<12x4xf32>,
    %c0_576 = arith.constant 0 : index
    %c17_577 = arith.constant 17 : index
    %842 = vector.load %arg39[%c0_576, %c17_577] : memref<12x290xf32, #tpu.memory_space<vmem>>, vector<12x4xf32>
    tpu.vector_store %arg39[%c0_576, %c17_577], %620 {strides = array<i32>} : memref<12x290xf32, #tpu.memory_space<vmem>>, vector<12x4xf32>,
    %c0_578 = arith.constant 0 : index
    %c14_579 = arith.constant 14 : index
    %843 = vector.load %arg39[%c0_578, %c14_579] : memref<12x290xf32, #tpu.memory_space<vmem>>, vector<12x4xf32>
    %844 = vector.broadcast %754 : vector<1x4xf32> to vector<12x4xf32>
    %845 = arith.mulf %843, %844 : vector<12x4xf32>
    %c108 = arith.constant 108 : index
    %c0_580 = arith.constant 0 : index
    %846 = vector.load %arg40[%c108, %c0_580] : memref<216x256xf32, #tpu.memory_space<vmem>>, vector<12x4xf32>
    tpu.vector_store %arg40[%c108, %c0_580], %845 {strides = array<i32>} : memref<216x256xf32, #tpu.memory_space<vmem>>, vector<12x4xf32>,
    %c0_581 = arith.constant 0 : index
    %c15_582 = arith.constant 15 : index
    %847 = vector.load %arg39[%c0_581, %c15_582] : memref<12x290xf32, #tpu.memory_space<vmem>>, vector<12x4xf32>
    %848 = vector.broadcast %759 : vector<1x4xf32> to vector<12x4xf32>
    %849 = arith.mulf %847, %848 : vector<12x4xf32>
    %c120 = arith.constant 120 : index
    %c0_583 = arith.constant 0 : index
    %850 = vector.load %arg40[%c120, %c0_583] : memref<216x256xf32, #tpu.memory_space<vmem>>, vector<12x4xf32>
    tpu.vector_store %arg40[%c120, %c0_583], %849 {strides = array<i32>} : memref<216x256xf32, #tpu.memory_space<vmem>>, vector<12x4xf32>,
    %c0_584 = arith.constant 0 : index
    %c16_585 = arith.constant 16 : index
    %851 = vector.load %arg39[%c0_584, %c16_585] : memref<12x290xf32, #tpu.memory_space<vmem>>, vector<12x4xf32>
    %852 = vector.broadcast %770 : vector<1x4xf32> to vector<12x4xf32>
    %853 = arith.mulf %851, %852 : vector<12x4xf32>
    %c132 = arith.constant 132 : index
    %c0_586 = arith.constant 0 : index
    %854 = vector.load %arg40[%c132, %c0_586] : memref<216x256xf32, #tpu.memory_space<vmem>>, vector<12x4xf32>
    tpu.vector_store %arg40[%c132, %c0_586], %853 {strides = array<i32>} : memref<216x256xf32, #tpu.memory_space<vmem>>, vector<12x4xf32>,
    %c0_587 = arith.constant 0 : index
    %c16_588 = arith.constant 16 : index
    %855 = vector.load %arg39[%c0_587, %c16_588] : memref<12x290xf32, #tpu.memory_space<vmem>>, vector<12x4xf32>
    %856 = vector.broadcast %775 : vector<1x4xf32> to vector<12x4xf32>
    %857 = arith.mulf %855, %856 : vector<12x4xf32>
    %c144 = arith.constant 144 : index
    %c0_589 = arith.constant 0 : index
    %858 = vector.load %arg40[%c144, %c0_589] : memref<216x256xf32, #tpu.memory_space<vmem>>, vector<12x4xf32>
    tpu.vector_store %arg40[%c144, %c0_589], %857 {strides = array<i32>} : memref<216x256xf32, #tpu.memory_space<vmem>>, vector<12x4xf32>,
    %c156 = arith.constant 156 : index
    %c0_590 = arith.constant 0 : index
    %859 = vector.load %arg40[%c156, %c0_590] : memref<216x256xf32, #tpu.memory_space<vmem>>, vector<12x4xf32>
    tpu.vector_store %arg40[%c156, %c0_590], %620 {strides = array<i32>} : memref<216x256xf32, #tpu.memory_space<vmem>>, vector<12x4xf32>,
    %c0_591 = arith.constant 0 : index
    %c18_592 = arith.constant 18 : index
    %860 = vector.load %arg39[%c0_591, %c18_592] : memref<12x290xf32, #tpu.memory_space<vmem>>, vector<12x4xf32>
    %861 = vector.broadcast %780 : vector<1x4xf32> to vector<12x4xf32>
    %862 = arith.mulf %860, %861 : vector<12x4xf32>
    %c168 = arith.constant 168 : index
    %c0_593 = arith.constant 0 : index
    %863 = vector.load %arg40[%c168, %c0_593] : memref<216x256xf32, #tpu.memory_space<vmem>>, vector<12x4xf32>
    tpu.vector_store %arg40[%c168, %c0_593], %862 {strides = array<i32>} : memref<216x256xf32, #tpu.memory_space<vmem>>, vector<12x4xf32>,
    %c0_594 = arith.constant 0 : index
    %c18_595 = arith.constant 18 : index
    %864 = vector.load %arg39[%c0_594, %c18_595] : memref<12x290xf32, #tpu.memory_space<vmem>>, vector<12x4xf32>
    %865 = vector.broadcast %791 : vector<1x4xf32> to vector<12x4xf32>
    %866 = arith.mulf %864, %865 : vector<12x4xf32>
    %c180 = arith.constant 180 : index
    %c0_596 = arith.constant 0 : index
    %867 = vector.load %arg40[%c180, %c0_596] : memref<216x256xf32, #tpu.memory_space<vmem>>, vector<12x4xf32>
    tpu.vector_store %arg40[%c180, %c0_596], %866 {strides = array<i32>} : memref<216x256xf32, #tpu.memory_space<vmem>>, vector<12x4xf32>,
    %c0_597 = arith.constant 0 : index
    %c19_598 = arith.constant 19 : index
    %868 = vector.load %arg39[%c0_597, %c19_598] : memref<12x290xf32, #tpu.memory_space<vmem>>, vector<12x4xf32>
    %869 = vector.broadcast %796 : vector<1x4xf32> to vector<12x4xf32>
    %870 = arith.mulf %868, %869 : vector<12x4xf32>
    %c192 = arith.constant 192 : index
    %c0_599 = arith.constant 0 : index
    %871 = vector.load %arg40[%c192, %c0_599] : memref<216x256xf32, #tpu.memory_space<vmem>>, vector<12x4xf32>
    tpu.vector_store %arg40[%c192, %c0_599], %870 {strides = array<i32>} : memref<216x256xf32, #tpu.memory_space<vmem>>, vector<12x4xf32>,
    %c0_600 = arith.constant 0 : index
    %c20_601 = arith.constant 20 : index
    %872 = vector.load %arg39[%c0_600, %c20_601] : memref<12x290xf32, #tpu.memory_space<vmem>>, vector<12x4xf32>
    %873 = vector.broadcast %807 : vector<1x4xf32> to vector<12x4xf32>
    %874 = arith.mulf %872, %873 : vector<12x4xf32>
    %c204 = arith.constant 204 : index
    %c0_602 = arith.constant 0 : index
    %875 = vector.load %arg40[%c204, %c0_602] : memref<216x256xf32, #tpu.memory_space<vmem>>, vector<12x4xf32>
    tpu.vector_store %arg40[%c204, %c0_602], %874 {strides = array<i32>} : memref<216x256xf32, #tpu.memory_space<vmem>>, vector<12x4xf32>,
    %c0_603 = arith.constant 0 : index
    %c0_604 = arith.constant 0 : index
    %876 = vector.load %arg20[%c0_603, %c0_604] : memref<12x216xf32, #tpu.memory_space<vmem>>, vector<12x216xf32>
    %c0_605 = arith.constant 0 : index
    %c0_606 = arith.constant 0 : index
    %877 = vector.load %arg40[%c0_605, %c0_606] : memref<216x256xf32, #tpu.memory_space<vmem>>, vector<216x4xf32>
    %cst_607 = arith.constant dense<0.000000e+00> : vector<12x4xf32>
    %878 = tpu.matmul %876, %877, %cst_607 {dimension_numbers = #tpu.dot_dimension_numbers<[1], [0], [0], [1], [0, 0, 1, 1], [], []>} : vector<12x216xf32>, vector<216x4xf32>, vector<12x4xf32> -> vector<12x4xf32>
    %c0_608 = arith.constant 0 : index
    %c0_609 = arith.constant 0 : index
    %879 = vector.load %arg21[%c0_608, %c0_609] : memref<12x1xf32, #tpu.memory_space<vmem>>, vector<12x1xf32>
    %880 = vector.broadcast %879 : vector<12x1xf32> to vector<12x4xf32>
    %881 = arith.mulf %878, %880 : vector<12x4xf32>
    %c0_610 = arith.constant 0 : index
    %c0_611 = arith.constant 0 : index
    %882 = vector.load %arg22[%c0_610, %c0_611] : memref<12x1xf32, #tpu.memory_space<vmem>>, vector<12x1xf32>
    %883 = vector.broadcast %882 : vector<12x1xf32> to vector<12x4xf32>
    %884 = arith.addf %881, %883 : vector<12x4xf32>
    %885 = math.exp %884 : vector<12x4xf32>
    %cst_612 = arith.constant 1.000000e+00 : f32
    %886 = vector.broadcast %cst_612 : f32 to vector<12x4xf32>
    %887 = arith.addf %886, %885 : vector<12x4xf32>
    %888 = math.log %887 : vector<12x4xf32>
    %889 = math.tanh %888 : vector<12x4xf32>
    %890 = arith.mulf %884, %889 : vector<12x4xf32>
    %c0_613 = arith.constant 0 : index
    %c0_614 = arith.constant 0 : index
    %891 = vector.load %arg35[%c0_613, %c0_614] : memref<4x16xf32, #tpu.memory_space<vmem>>, vector<4x16xf32>
    %cst_615 = arith.constant dense<0.000000e+00> : vector<12x16xf32>
    %892 = tpu.matmul %890, %891, %cst_615 {dimension_numbers = #tpu.dot_dimension_numbers<[1], [0], [0], [1], [0, 0, 1, 1], [], []>} : vector<12x4xf32>, vector<4x16xf32>, vector<12x16xf32> -> vector<12x16xf32>
    %893 = tpu.iota {dimensions = array<i32: 1>} : vector<1x16xi32>
    %c2_i32_616 = arith.constant 2 : i32
    %894 = vector.broadcast %c2_i32_616 : i32 to vector<1x16xi32>
    %895 = arith.shrsi %893, %894 : vector<1x16xi32>
    %c3_i32_617 = arith.constant 3 : i32
    %896 = vector.broadcast %c3_i32_617 : i32 to vector<1x16xi32>
    %897 = arith.andi %893, %896 : vector<1x16xi32>
    %c1_i32_618 = arith.constant 1 : i32
    %898 = vector.broadcast %c1_i32_618 : i32 to vector<1x16xi32>
    %899 = arith.cmpi sge, %895, %898 : vector<1x16xi32>
    %cst_619 = arith.constant 1.000000e+00 : f32
    %cst_620 = arith.constant 0.000000e+00 : f32
    %900 = vector.broadcast %cst_619 : f32 to vector<1x16xf32>
    %901 = vector.broadcast %cst_620 : f32 to vector<1x16xf32>
    %902 = arith.select %899, %900, %901 : vector<1x16xi1>, vector<1x16xf32>
    %c1_i32_621 = arith.constant 1 : i32
    %903 = vector.broadcast %c1_i32_621 : i32 to vector<1x16xi32>
    %904 = arith.cmpi sge, %897, %903 : vector<1x16xi32>
    %cst_622 = arith.constant 1.000000e+00 : f32
    %cst_623 = arith.constant 0.000000e+00 : f32
    %905 = vector.broadcast %cst_622 : f32 to vector<1x16xf32>
    %906 = vector.broadcast %cst_623 : f32 to vector<1x16xf32>
    %907 = arith.select %904, %905, %906 : vector<1x16xi1>, vector<1x16xf32>
    %908 = arith.mulf %902, %907 : vector<1x16xf32>
    %c1_i32_624 = arith.constant 1 : i32
    %909 = vector.broadcast %c1_i32_624 : i32 to vector<1x16xi32>
    %910 = arith.cmpi sge, %895, %909 : vector<1x16xi32>
    %cst_625 = arith.constant 1.000000e+00 : f32
    %cst_626 = arith.constant 0.000000e+00 : f32
    %911 = vector.broadcast %cst_625 : f32 to vector<1x16xf32>
    %912 = vector.broadcast %cst_626 : f32 to vector<1x16xf32>
    %913 = arith.select %910, %911, %912 : vector<1x16xi1>, vector<1x16xf32>
    %c1_i32_627 = arith.constant 1 : i32
    %914 = vector.broadcast %c1_i32_627 : i32 to vector<1x16xi32>
    %915 = arith.cmpi sge, %895, %914 : vector<1x16xi32>
    %cst_628 = arith.constant 1.000000e+00 : f32
    %cst_629 = arith.constant 0.000000e+00 : f32
    %916 = vector.broadcast %cst_628 : f32 to vector<1x16xf32>
    %917 = vector.broadcast %cst_629 : f32 to vector<1x16xf32>
    %918 = arith.select %915, %916, %917 : vector<1x16xi1>, vector<1x16xf32>
    %c3_i32_630 = arith.constant 3 : i32
    %919 = vector.broadcast %c3_i32_630 : i32 to vector<1x16xi32>
    %920 = arith.cmpi slt, %897, %919 : vector<1x16xi32>
    %cst_631 = arith.constant 1.000000e+00 : f32
    %cst_632 = arith.constant 0.000000e+00 : f32
    %921 = vector.broadcast %cst_631 : f32 to vector<1x16xf32>
    %922 = vector.broadcast %cst_632 : f32 to vector<1x16xf32>
    %923 = arith.select %920, %921, %922 : vector<1x16xi1>, vector<1x16xf32>
    %924 = arith.mulf %918, %923 : vector<1x16xf32>
    %c1_i32_633 = arith.constant 1 : i32
    %925 = vector.broadcast %c1_i32_633 : i32 to vector<1x16xi32>
    %926 = arith.cmpi sge, %897, %925 : vector<1x16xi32>
    %cst_634 = arith.constant 1.000000e+00 : f32
    %cst_635 = arith.constant 0.000000e+00 : f32
    %927 = vector.broadcast %cst_634 : f32 to vector<1x16xf32>
    %928 = vector.broadcast %cst_635 : f32 to vector<1x16xf32>
    %929 = arith.select %926, %927, %928 : vector<1x16xi1>, vector<1x16xf32>
    %c3_i32_636 = arith.constant 3 : i32
    %930 = vector.broadcast %c3_i32_636 : i32 to vector<1x16xi32>
    %931 = arith.cmpi slt, %897, %930 : vector<1x16xi32>
    %cst_637 = arith.constant 1.000000e+00 : f32
    %cst_638 = arith.constant 0.000000e+00 : f32
    %932 = vector.broadcast %cst_637 : f32 to vector<1x16xf32>
    %933 = vector.broadcast %cst_638 : f32 to vector<1x16xf32>
    %934 = arith.select %931, %932, %933 : vector<1x16xi1>, vector<1x16xf32>
    %c3_i32_639 = arith.constant 3 : i32
    %935 = vector.broadcast %c3_i32_639 : i32 to vector<1x16xi32>
    %936 = arith.cmpi slt, %895, %935 : vector<1x16xi32>
    %cst_640 = arith.constant 1.000000e+00 : f32
    %cst_641 = arith.constant 0.000000e+00 : f32
    %937 = vector.broadcast %cst_640 : f32 to vector<1x16xf32>
    %938 = vector.broadcast %cst_641 : f32 to vector<1x16xf32>
    %939 = arith.select %936, %937, %938 : vector<1x16xi1>, vector<1x16xf32>
    %c1_i32_642 = arith.constant 1 : i32
    %940 = vector.broadcast %c1_i32_642 : i32 to vector<1x16xi32>
    %941 = arith.cmpi sge, %897, %940 : vector<1x16xi32>
    %cst_643 = arith.constant 1.000000e+00 : f32
    %cst_644 = arith.constant 0.000000e+00 : f32
    %942 = vector.broadcast %cst_643 : f32 to vector<1x16xf32>
    %943 = vector.broadcast %cst_644 : f32 to vector<1x16xf32>
    %944 = arith.select %941, %942, %943 : vector<1x16xi1>, vector<1x16xf32>
    %945 = arith.mulf %939, %944 : vector<1x16xf32>
    %c3_i32_645 = arith.constant 3 : i32
    %946 = vector.broadcast %c3_i32_645 : i32 to vector<1x16xi32>
    %947 = arith.cmpi slt, %895, %946 : vector<1x16xi32>
    %cst_646 = arith.constant 1.000000e+00 : f32
    %cst_647 = arith.constant 0.000000e+00 : f32
    %948 = vector.broadcast %cst_646 : f32 to vector<1x16xf32>
    %949 = vector.broadcast %cst_647 : f32 to vector<1x16xf32>
    %950 = arith.select %947, %948, %949 : vector<1x16xi1>, vector<1x16xf32>
    %c3_i32_648 = arith.constant 3 : i32
    %951 = vector.broadcast %c3_i32_648 : i32 to vector<1x16xi32>
    %952 = arith.cmpi slt, %895, %951 : vector<1x16xi32>
    %cst_649 = arith.constant 1.000000e+00 : f32
    %cst_650 = arith.constant 0.000000e+00 : f32
    %953 = vector.broadcast %cst_649 : f32 to vector<1x16xf32>
    %954 = vector.broadcast %cst_650 : f32 to vector<1x16xf32>
    %955 = arith.select %952, %953, %954 : vector<1x16xi1>, vector<1x16xf32>
    %c3_i32_651 = arith.constant 3 : i32
    %956 = vector.broadcast %c3_i32_651 : i32 to vector<1x16xi32>
    %957 = arith.cmpi slt, %897, %956 : vector<1x16xi32>
    %cst_652 = arith.constant 1.000000e+00 : f32
    %cst_653 = arith.constant 0.000000e+00 : f32
    %958 = vector.broadcast %cst_652 : f32 to vector<1x16xf32>
    %959 = vector.broadcast %cst_653 : f32 to vector<1x16xf32>
    %960 = arith.select %957, %958, %959 : vector<1x16xi1>, vector<1x16xf32>
    %961 = arith.mulf %955, %960 : vector<1x16xf32>
    %c0_654 = arith.constant 0 : index
    %c17_655 = arith.constant 17 : index
    %962 = vector.load %arg39[%c0_654, %c17_655] : memref<12x290xf32, #tpu.memory_space<vmem>>, vector<12x16xf32>
    tpu.vector_store %arg39[%c0_654, %c17_655], %892 {strides = array<i32>} : memref<12x290xf32, #tpu.memory_space<vmem>>, vector<12x16xf32>,
    %c0_656 = arith.constant 0 : index
    %c12_657 = arith.constant 12 : index
    %963 = vector.load %arg39[%c0_656, %c12_657] : memref<12x290xf32, #tpu.memory_space<vmem>>, vector<12x16xf32>
    %964 = vector.broadcast %908 : vector<1x16xf32> to vector<12x16xf32>
    %965 = arith.mulf %963, %964 : vector<12x16xf32>
    %c0_658 = arith.constant 0 : index
    %c0_659 = arith.constant 0 : index
    %966 = vector.load %arg40[%c0_658, %c0_659] : memref<216x256xf32, #tpu.memory_space<vmem>>, vector<12x16xf32>
    tpu.vector_store %arg40[%c0_658, %c0_659], %965 {strides = array<i32>} : memref<216x256xf32, #tpu.memory_space<vmem>>, vector<12x16xf32>,
    %c0_660 = arith.constant 0 : index
    %c13_661 = arith.constant 13 : index
    %967 = vector.load %arg39[%c0_660, %c13_661] : memref<12x290xf32, #tpu.memory_space<vmem>>, vector<12x16xf32>
    %968 = vector.broadcast %913 : vector<1x16xf32> to vector<12x16xf32>
    %969 = arith.mulf %967, %968 : vector<12x16xf32>
    %c12_662 = arith.constant 12 : index
    %c0_663 = arith.constant 0 : index
    %970 = vector.load %arg40[%c12_662, %c0_663] : memref<216x256xf32, #tpu.memory_space<vmem>>, vector<12x16xf32>
    tpu.vector_store %arg40[%c12_662, %c0_663], %969 {strides = array<i32>} : memref<216x256xf32, #tpu.memory_space<vmem>>, vector<12x16xf32>,
    %c0_664 = arith.constant 0 : index
    %c14_665 = arith.constant 14 : index
    %971 = vector.load %arg39[%c0_664, %c14_665] : memref<12x290xf32, #tpu.memory_space<vmem>>, vector<12x16xf32>
    %972 = vector.broadcast %924 : vector<1x16xf32> to vector<12x16xf32>
    %973 = arith.mulf %971, %972 : vector<12x16xf32>
    %c24_666 = arith.constant 24 : index
    %c0_667 = arith.constant 0 : index
    %974 = vector.load %arg40[%c24_666, %c0_667] : memref<216x256xf32, #tpu.memory_space<vmem>>, vector<12x16xf32>
    tpu.vector_store %arg40[%c24_666, %c0_667], %973 {strides = array<i32>} : memref<216x256xf32, #tpu.memory_space<vmem>>, vector<12x16xf32>,
    %c0_668 = arith.constant 0 : index
    %c16_669 = arith.constant 16 : index
    %975 = vector.load %arg39[%c0_668, %c16_669] : memref<12x290xf32, #tpu.memory_space<vmem>>, vector<12x16xf32>
    %976 = vector.broadcast %929 : vector<1x16xf32> to vector<12x16xf32>
    %977 = arith.mulf %975, %976 : vector<12x16xf32>
    %c36_670 = arith.constant 36 : index
    %c0_671 = arith.constant 0 : index
    %978 = vector.load %arg40[%c36_670, %c0_671] : memref<216x256xf32, #tpu.memory_space<vmem>>, vector<12x16xf32>
    tpu.vector_store %arg40[%c36_670, %c0_671], %977 {strides = array<i32>} : memref<216x256xf32, #tpu.memory_space<vmem>>, vector<12x16xf32>,
    %c48_672 = arith.constant 48 : index
    %c0_673 = arith.constant 0 : index
    %979 = vector.load %arg40[%c48_672, %c0_673] : memref<216x256xf32, #tpu.memory_space<vmem>>, vector<12x16xf32>
    tpu.vector_store %arg40[%c48_672, %c0_673], %892 {strides = array<i32>} : memref<216x256xf32, #tpu.memory_space<vmem>>, vector<12x16xf32>,
    %c0_674 = arith.constant 0 : index
    %c18_675 = arith.constant 18 : index
    %980 = vector.load %arg39[%c0_674, %c18_675] : memref<12x290xf32, #tpu.memory_space<vmem>>, vector<12x16xf32>
    %981 = vector.broadcast %934 : vector<1x16xf32> to vector<12x16xf32>
    %982 = arith.mulf %980, %981 : vector<12x16xf32>
    %c60_676 = arith.constant 60 : index
    %c0_677 = arith.constant 0 : index
    %983 = vector.load %arg40[%c60_676, %c0_677] : memref<216x256xf32, #tpu.memory_space<vmem>>, vector<12x16xf32>
    tpu.vector_store %arg40[%c60_676, %c0_677], %982 {strides = array<i32>} : memref<216x256xf32, #tpu.memory_space<vmem>>, vector<12x16xf32>,
    %c0_678 = arith.constant 0 : index
    %c20_679 = arith.constant 20 : index
    %984 = vector.load %arg39[%c0_678, %c20_679] : memref<12x290xf32, #tpu.memory_space<vmem>>, vector<12x16xf32>
    %985 = vector.broadcast %945 : vector<1x16xf32> to vector<12x16xf32>
    %986 = arith.mulf %984, %985 : vector<12x16xf32>
    %c72_680 = arith.constant 72 : index
    %c0_681 = arith.constant 0 : index
    %987 = vector.load %arg40[%c72_680, %c0_681] : memref<216x256xf32, #tpu.memory_space<vmem>>, vector<12x16xf32>
    tpu.vector_store %arg40[%c72_680, %c0_681], %986 {strides = array<i32>} : memref<216x256xf32, #tpu.memory_space<vmem>>, vector<12x16xf32>,
    %c0_682 = arith.constant 0 : index
    %c21_683 = arith.constant 21 : index
    %988 = vector.load %arg39[%c0_682, %c21_683] : memref<12x290xf32, #tpu.memory_space<vmem>>, vector<12x16xf32>
    %989 = vector.broadcast %950 : vector<1x16xf32> to vector<12x16xf32>
    %990 = arith.mulf %988, %989 : vector<12x16xf32>
    %c84_684 = arith.constant 84 : index
    %c0_685 = arith.constant 0 : index
    %991 = vector.load %arg40[%c84_684, %c0_685] : memref<216x256xf32, #tpu.memory_space<vmem>>, vector<12x16xf32>
    tpu.vector_store %arg40[%c84_684, %c0_685], %990 {strides = array<i32>} : memref<216x256xf32, #tpu.memory_space<vmem>>, vector<12x16xf32>,
    %c0_686 = arith.constant 0 : index
    %c22_687 = arith.constant 22 : index
    %992 = vector.load %arg39[%c0_686, %c22_687] : memref<12x290xf32, #tpu.memory_space<vmem>>, vector<12x16xf32>
    %993 = vector.broadcast %961 : vector<1x16xf32> to vector<12x16xf32>
    %994 = arith.mulf %992, %993 : vector<12x16xf32>
    %c96_688 = arith.constant 96 : index
    %c0_689 = arith.constant 0 : index
    %995 = vector.load %arg40[%c96_688, %c0_689] : memref<216x256xf32, #tpu.memory_space<vmem>>, vector<12x16xf32>
    tpu.vector_store %arg40[%c96_688, %c0_689], %994 {strides = array<i32>} : memref<216x256xf32, #tpu.memory_space<vmem>>, vector<12x16xf32>,
    %c0_690 = arith.constant 0 : index
    %c17_691 = arith.constant 17 : index
    %996 = vector.load %arg39[%c0_690, %c17_691] : memref<12x290xf32, #tpu.memory_space<vmem>>, vector<12x16xf32>
    tpu.vector_store %arg39[%c0_690, %c17_691], %493 {strides = array<i32>} : memref<12x290xf32, #tpu.memory_space<vmem>>, vector<12x16xf32>,
    %c0_692 = arith.constant 0 : index
    %c12_693 = arith.constant 12 : index
    %997 = vector.load %arg39[%c0_692, %c12_693] : memref<12x290xf32, #tpu.memory_space<vmem>>, vector<12x16xf32>
    %998 = vector.broadcast %908 : vector<1x16xf32> to vector<12x16xf32>
    %999 = arith.mulf %997, %998 : vector<12x16xf32>
    %c108_694 = arith.constant 108 : index
    %c0_695 = arith.constant 0 : index
    %1000 = vector.load %arg40[%c108_694, %c0_695] : memref<216x256xf32, #tpu.memory_space<vmem>>, vector<12x16xf32>
    tpu.vector_store %arg40[%c108_694, %c0_695], %999 {strides = array<i32>} : memref<216x256xf32, #tpu.memory_space<vmem>>, vector<12x16xf32>,
    %c0_696 = arith.constant 0 : index
    %c13_697 = arith.constant 13 : index
    %1001 = vector.load %arg39[%c0_696, %c13_697] : memref<12x290xf32, #tpu.memory_space<vmem>>, vector<12x16xf32>
    %1002 = vector.broadcast %913 : vector<1x16xf32> to vector<12x16xf32>
    %1003 = arith.mulf %1001, %1002 : vector<12x16xf32>
    %c120_698 = arith.constant 120 : index
    %c0_699 = arith.constant 0 : index
    %1004 = vector.load %arg40[%c120_698, %c0_699] : memref<216x256xf32, #tpu.memory_space<vmem>>, vector<12x16xf32>
    tpu.vector_store %arg40[%c120_698, %c0_699], %1003 {strides = array<i32>} : memref<216x256xf32, #tpu.memory_space<vmem>>, vector<12x16xf32>,
    %c0_700 = arith.constant 0 : index
    %c14_701 = arith.constant 14 : index
    %1005 = vector.load %arg39[%c0_700, %c14_701] : memref<12x290xf32, #tpu.memory_space<vmem>>, vector<12x16xf32>
    %1006 = vector.broadcast %924 : vector<1x16xf32> to vector<12x16xf32>
    %1007 = arith.mulf %1005, %1006 : vector<12x16xf32>
    %c132_702 = arith.constant 132 : index
    %c0_703 = arith.constant 0 : index
    %1008 = vector.load %arg40[%c132_702, %c0_703] : memref<216x256xf32, #tpu.memory_space<vmem>>, vector<12x16xf32>
    tpu.vector_store %arg40[%c132_702, %c0_703], %1007 {strides = array<i32>} : memref<216x256xf32, #tpu.memory_space<vmem>>, vector<12x16xf32>,
    %c0_704 = arith.constant 0 : index
    %c16_705 = arith.constant 16 : index
    %1009 = vector.load %arg39[%c0_704, %c16_705] : memref<12x290xf32, #tpu.memory_space<vmem>>, vector<12x16xf32>
    %1010 = vector.broadcast %929 : vector<1x16xf32> to vector<12x16xf32>
    %1011 = arith.mulf %1009, %1010 : vector<12x16xf32>
    %c144_706 = arith.constant 144 : index
    %c0_707 = arith.constant 0 : index
    %1012 = vector.load %arg40[%c144_706, %c0_707] : memref<216x256xf32, #tpu.memory_space<vmem>>, vector<12x16xf32>
    tpu.vector_store %arg40[%c144_706, %c0_707], %1011 {strides = array<i32>} : memref<216x256xf32, #tpu.memory_space<vmem>>, vector<12x16xf32>,
    %c156_708 = arith.constant 156 : index
    %c0_709 = arith.constant 0 : index
    %1013 = vector.load %arg40[%c156_708, %c0_709] : memref<216x256xf32, #tpu.memory_space<vmem>>, vector<12x16xf32>
    tpu.vector_store %arg40[%c156_708, %c0_709], %493 {strides = array<i32>} : memref<216x256xf32, #tpu.memory_space<vmem>>, vector<12x16xf32>,
    %c0_710 = arith.constant 0 : index
    %c18_711 = arith.constant 18 : index
    %1014 = vector.load %arg39[%c0_710, %c18_711] : memref<12x290xf32, #tpu.memory_space<vmem>>, vector<12x16xf32>
    %1015 = vector.broadcast %934 : vector<1x16xf32> to vector<12x16xf32>
    %1016 = arith.mulf %1014, %1015 : vector<12x16xf32>
    %c168_712 = arith.constant 168 : index
    %c0_713 = arith.constant 0 : index
    %1017 = vector.load %arg40[%c168_712, %c0_713] : memref<216x256xf32, #tpu.memory_space<vmem>>, vector<12x16xf32>
    tpu.vector_store %arg40[%c168_712, %c0_713], %1016 {strides = array<i32>} : memref<216x256xf32, #tpu.memory_space<vmem>>, vector<12x16xf32>,
    %c0_714 = arith.constant 0 : index
    %c20_715 = arith.constant 20 : index
    %1018 = vector.load %arg39[%c0_714, %c20_715] : memref<12x290xf32, #tpu.memory_space<vmem>>, vector<12x16xf32>
    %1019 = vector.broadcast %945 : vector<1x16xf32> to vector<12x16xf32>
    %1020 = arith.mulf %1018, %1019 : vector<12x16xf32>
    %c180_716 = arith.constant 180 : index
    %c0_717 = arith.constant 0 : index
    %1021 = vector.load %arg40[%c180_716, %c0_717] : memref<216x256xf32, #tpu.memory_space<vmem>>, vector<12x16xf32>
    tpu.vector_store %arg40[%c180_716, %c0_717], %1020 {strides = array<i32>} : memref<216x256xf32, #tpu.memory_space<vmem>>, vector<12x16xf32>,
    %c0_718 = arith.constant 0 : index
    %c21_719 = arith.constant 21 : index
    %1022 = vector.load %arg39[%c0_718, %c21_719] : memref<12x290xf32, #tpu.memory_space<vmem>>, vector<12x16xf32>
    %1023 = vector.broadcast %950 : vector<1x16xf32> to vector<12x16xf32>
    %1024 = arith.mulf %1022, %1023 : vector<12x16xf32>
    %c192_720 = arith.constant 192 : index
    %c0_721 = arith.constant 0 : index
    %1025 = vector.load %arg40[%c192_720, %c0_721] : memref<216x256xf32, #tpu.memory_space<vmem>>, vector<12x16xf32>
    tpu.vector_store %arg40[%c192_720, %c0_721], %1024 {strides = array<i32>} : memref<216x256xf32, #tpu.memory_space<vmem>>, vector<12x16xf32>,
    %c0_722 = arith.constant 0 : index
    %c22_723 = arith.constant 22 : index
    %1026 = vector.load %arg39[%c0_722, %c22_723] : memref<12x290xf32, #tpu.memory_space<vmem>>, vector<12x16xf32>
    %1027 = vector.broadcast %961 : vector<1x16xf32> to vector<12x16xf32>
    %1028 = arith.mulf %1026, %1027 : vector<12x16xf32>
    %c204_724 = arith.constant 204 : index
    %c0_725 = arith.constant 0 : index
    %1029 = vector.load %arg40[%c204_724, %c0_725] : memref<216x256xf32, #tpu.memory_space<vmem>>, vector<12x16xf32>
    tpu.vector_store %arg40[%c204_724, %c0_725], %1028 {strides = array<i32>} : memref<216x256xf32, #tpu.memory_space<vmem>>, vector<12x16xf32>,
    %c0_726 = arith.constant 0 : index
    %c0_727 = arith.constant 0 : index
    %1030 = vector.load %arg23[%c0_726, %c0_727] : memref<12x216xf32, #tpu.memory_space<vmem>>, vector<12x216xf32>
    %c0_728 = arith.constant 0 : index
    %c0_729 = arith.constant 0 : index
    %1031 = vector.load %arg40[%c0_728, %c0_729] : memref<216x256xf32, #tpu.memory_space<vmem>>, vector<216x16xf32>
    %cst_730 = arith.constant dense<0.000000e+00> : vector<12x16xf32>
    %1032 = tpu.matmul %1030, %1031, %cst_730 {dimension_numbers = #tpu.dot_dimension_numbers<[1], [0], [0], [1], [0, 0, 1, 1], [], []>} : vector<12x216xf32>, vector<216x16xf32>, vector<12x16xf32> -> vector<12x16xf32>
    %c0_731 = arith.constant 0 : index
    %c0_732 = arith.constant 0 : index
    %1033 = vector.load %arg24[%c0_731, %c0_732] : memref<12x1xf32, #tpu.memory_space<vmem>>, vector<12x1xf32>
    %1034 = vector.broadcast %1033 : vector<12x1xf32> to vector<12x16xf32>
    %1035 = arith.mulf %1032, %1034 : vector<12x16xf32>
    %c0_733 = arith.constant 0 : index
    %c0_734 = arith.constant 0 : index
    %1036 = vector.load %arg25[%c0_733, %c0_734] : memref<12x1xf32, #tpu.memory_space<vmem>>, vector<12x1xf32>
    %1037 = vector.broadcast %1036 : vector<12x1xf32> to vector<12x16xf32>
    %1038 = arith.addf %1035, %1037 : vector<12x16xf32>
    %1039 = math.exp %1038 : vector<12x16xf32>
    %cst_735 = arith.constant 1.000000e+00 : f32
    %1040 = vector.broadcast %cst_735 : f32 to vector<12x16xf32>
    %1041 = arith.addf %1040, %1039 : vector<12x16xf32>
    %1042 = math.log %1041 : vector<12x16xf32>
    %1043 = math.tanh %1042 : vector<12x16xf32>
    %1044 = arith.mulf %1038, %1043 : vector<12x16xf32>
    %c0_736 = arith.constant 0 : index
    %c0_737 = arith.constant 0 : index
    %1045 = vector.load %arg36[%c0_736, %c0_737] : memref<16x64xf32, #tpu.memory_space<vmem>>, vector<16x64xf32>
    %cst_738 = arith.constant dense<0.000000e+00> : vector<12x64xf32>
    %1046 = tpu.matmul %1044, %1045, %cst_738 {dimension_numbers = #tpu.dot_dimension_numbers<[1], [0], [0], [1], [0, 0, 1, 1], [], []>} : vector<12x16xf32>, vector<16x64xf32>, vector<12x64xf32> -> vector<12x64xf32>
    %1047 = tpu.iota {dimensions = array<i32: 1>} : vector<1x64xi32>
    %c3_i32_739 = arith.constant 3 : i32
    %1048 = vector.broadcast %c3_i32_739 : i32 to vector<1x64xi32>
    %1049 = arith.shrsi %1047, %1048 : vector<1x64xi32>
    %c7_i32_740 = arith.constant 7 : i32
    %1050 = vector.broadcast %c7_i32_740 : i32 to vector<1x64xi32>
    %1051 = arith.andi %1047, %1050 : vector<1x64xi32>
    %c1_i32_741 = arith.constant 1 : i32
    %1052 = vector.broadcast %c1_i32_741 : i32 to vector<1x64xi32>
    %1053 = arith.cmpi sge, %1049, %1052 : vector<1x64xi32>
    %cst_742 = arith.constant 1.000000e+00 : f32
    %cst_743 = arith.constant 0.000000e+00 : f32
    %1054 = vector.broadcast %cst_742 : f32 to vector<1x64xf32>
    %1055 = vector.broadcast %cst_743 : f32 to vector<1x64xf32>
    %1056 = arith.select %1053, %1054, %1055 : vector<1x64xi1>, vector<1x64xf32>
    %c1_i32_744 = arith.constant 1 : i32
    %1057 = vector.broadcast %c1_i32_744 : i32 to vector<1x64xi32>
    %1058 = arith.cmpi sge, %1051, %1057 : vector<1x64xi32>
    %cst_745 = arith.constant 1.000000e+00 : f32
    %cst_746 = arith.constant 0.000000e+00 : f32
    %1059 = vector.broadcast %cst_745 : f32 to vector<1x64xf32>
    %1060 = vector.broadcast %cst_746 : f32 to vector<1x64xf32>
    %1061 = arith.select %1058, %1059, %1060 : vector<1x64xi1>, vector<1x64xf32>
    %1062 = arith.mulf %1056, %1061 : vector<1x64xf32>
    %c1_i32_747 = arith.constant 1 : i32
    %1063 = vector.broadcast %c1_i32_747 : i32 to vector<1x64xi32>
    %1064 = arith.cmpi sge, %1049, %1063 : vector<1x64xi32>
    %cst_748 = arith.constant 1.000000e+00 : f32
    %cst_749 = arith.constant 0.000000e+00 : f32
    %1065 = vector.broadcast %cst_748 : f32 to vector<1x64xf32>
    %1066 = vector.broadcast %cst_749 : f32 to vector<1x64xf32>
    %1067 = arith.select %1064, %1065, %1066 : vector<1x64xi1>, vector<1x64xf32>
    %c1_i32_750 = arith.constant 1 : i32
    %1068 = vector.broadcast %c1_i32_750 : i32 to vector<1x64xi32>
    %1069 = arith.cmpi sge, %1049, %1068 : vector<1x64xi32>
    %cst_751 = arith.constant 1.000000e+00 : f32
    %cst_752 = arith.constant 0.000000e+00 : f32
    %1070 = vector.broadcast %cst_751 : f32 to vector<1x64xf32>
    %1071 = vector.broadcast %cst_752 : f32 to vector<1x64xf32>
    %1072 = arith.select %1069, %1070, %1071 : vector<1x64xi1>, vector<1x64xf32>
    %c7_i32_753 = arith.constant 7 : i32
    %1073 = vector.broadcast %c7_i32_753 : i32 to vector<1x64xi32>
    %1074 = arith.cmpi slt, %1051, %1073 : vector<1x64xi32>
    %cst_754 = arith.constant 1.000000e+00 : f32
    %cst_755 = arith.constant 0.000000e+00 : f32
    %1075 = vector.broadcast %cst_754 : f32 to vector<1x64xf32>
    %1076 = vector.broadcast %cst_755 : f32 to vector<1x64xf32>
    %1077 = arith.select %1074, %1075, %1076 : vector<1x64xi1>, vector<1x64xf32>
    %1078 = arith.mulf %1072, %1077 : vector<1x64xf32>
    %c1_i32_756 = arith.constant 1 : i32
    %1079 = vector.broadcast %c1_i32_756 : i32 to vector<1x64xi32>
    %1080 = arith.cmpi sge, %1051, %1079 : vector<1x64xi32>
    %cst_757 = arith.constant 1.000000e+00 : f32
    %cst_758 = arith.constant 0.000000e+00 : f32
    %1081 = vector.broadcast %cst_757 : f32 to vector<1x64xf32>
    %1082 = vector.broadcast %cst_758 : f32 to vector<1x64xf32>
    %1083 = arith.select %1080, %1081, %1082 : vector<1x64xi1>, vector<1x64xf32>
    %c7_i32_759 = arith.constant 7 : i32
    %1084 = vector.broadcast %c7_i32_759 : i32 to vector<1x64xi32>
    %1085 = arith.cmpi slt, %1051, %1084 : vector<1x64xi32>
    %cst_760 = arith.constant 1.000000e+00 : f32
    %cst_761 = arith.constant 0.000000e+00 : f32
    %1086 = vector.broadcast %cst_760 : f32 to vector<1x64xf32>
    %1087 = vector.broadcast %cst_761 : f32 to vector<1x64xf32>
    %1088 = arith.select %1085, %1086, %1087 : vector<1x64xi1>, vector<1x64xf32>
    %c7_i32_762 = arith.constant 7 : i32
    %1089 = vector.broadcast %c7_i32_762 : i32 to vector<1x64xi32>
    %1090 = arith.cmpi slt, %1049, %1089 : vector<1x64xi32>
    %cst_763 = arith.constant 1.000000e+00 : f32
    %cst_764 = arith.constant 0.000000e+00 : f32
    %1091 = vector.broadcast %cst_763 : f32 to vector<1x64xf32>
    %1092 = vector.broadcast %cst_764 : f32 to vector<1x64xf32>
    %1093 = arith.select %1090, %1091, %1092 : vector<1x64xi1>, vector<1x64xf32>
    %c1_i32_765 = arith.constant 1 : i32
    %1094 = vector.broadcast %c1_i32_765 : i32 to vector<1x64xi32>
    %1095 = arith.cmpi sge, %1051, %1094 : vector<1x64xi32>
    %cst_766 = arith.constant 1.000000e+00 : f32
    %cst_767 = arith.constant 0.000000e+00 : f32
    %1096 = vector.broadcast %cst_766 : f32 to vector<1x64xf32>
    %1097 = vector.broadcast %cst_767 : f32 to vector<1x64xf32>
    %1098 = arith.select %1095, %1096, %1097 : vector<1x64xi1>, vector<1x64xf32>
    %1099 = arith.mulf %1093, %1098 : vector<1x64xf32>
    %c7_i32_768 = arith.constant 7 : i32
    %1100 = vector.broadcast %c7_i32_768 : i32 to vector<1x64xi32>
    %1101 = arith.cmpi slt, %1049, %1100 : vector<1x64xi32>
    %cst_769 = arith.constant 1.000000e+00 : f32
    %cst_770 = arith.constant 0.000000e+00 : f32
    %1102 = vector.broadcast %cst_769 : f32 to vector<1x64xf32>
    %1103 = vector.broadcast %cst_770 : f32 to vector<1x64xf32>
    %1104 = arith.select %1101, %1102, %1103 : vector<1x64xi1>, vector<1x64xf32>
    %c7_i32_771 = arith.constant 7 : i32
    %1105 = vector.broadcast %c7_i32_771 : i32 to vector<1x64xi32>
    %1106 = arith.cmpi slt, %1049, %1105 : vector<1x64xi32>
    %cst_772 = arith.constant 1.000000e+00 : f32
    %cst_773 = arith.constant 0.000000e+00 : f32
    %1107 = vector.broadcast %cst_772 : f32 to vector<1x64xf32>
    %1108 = vector.broadcast %cst_773 : f32 to vector<1x64xf32>
    %1109 = arith.select %1106, %1107, %1108 : vector<1x64xi1>, vector<1x64xf32>
    %c7_i32_774 = arith.constant 7 : i32
    %1110 = vector.broadcast %c7_i32_774 : i32 to vector<1x64xi32>
    %1111 = arith.cmpi slt, %1051, %1110 : vector<1x64xi32>
    %cst_775 = arith.constant 1.000000e+00 : f32
    %cst_776 = arith.constant 0.000000e+00 : f32
    %1112 = vector.broadcast %cst_775 : f32 to vector<1x64xf32>
    %1113 = vector.broadcast %cst_776 : f32 to vector<1x64xf32>
    %1114 = arith.select %1111, %1112, %1113 : vector<1x64xi1>, vector<1x64xf32>
    %1115 = arith.mulf %1109, %1114 : vector<1x64xf32>
    %c0_777 = arith.constant 0 : index
    %c17_778 = arith.constant 17 : index
    %1116 = vector.load %arg39[%c0_777, %c17_778] : memref<12x290xf32, #tpu.memory_space<vmem>>, vector<12x64xf32>
    tpu.vector_store %arg39[%c0_777, %c17_778], %1046 {strides = array<i32>} : memref<12x290xf32, #tpu.memory_space<vmem>>, vector<12x64xf32>,
    %c0_779 = arith.constant 0 : index
    %c8_780 = arith.constant 8 : index
    %1117 = vector.load %arg39[%c0_779, %c8_780] : memref<12x290xf32, #tpu.memory_space<vmem>>, vector<12x64xf32>
    %1118 = vector.broadcast %1062 : vector<1x64xf32> to vector<12x64xf32>
    %1119 = arith.mulf %1117, %1118 : vector<12x64xf32>
    %c0_781 = arith.constant 0 : index
    %c0_782 = arith.constant 0 : index
    %1120 = vector.load %arg40[%c0_781, %c0_782] : memref<216x256xf32, #tpu.memory_space<vmem>>, vector<12x64xf32>
    tpu.vector_store %arg40[%c0_781, %c0_782], %1119 {strides = array<i32>} : memref<216x256xf32, #tpu.memory_space<vmem>>, vector<12x64xf32>,
    %c0_783 = arith.constant 0 : index
    %c9_784 = arith.constant 9 : index
    %1121 = vector.load %arg39[%c0_783, %c9_784] : memref<12x290xf32, #tpu.memory_space<vmem>>, vector<12x64xf32>
    %1122 = vector.broadcast %1067 : vector<1x64xf32> to vector<12x64xf32>
    %1123 = arith.mulf %1121, %1122 : vector<12x64xf32>
    %c12_785 = arith.constant 12 : index
    %c0_786 = arith.constant 0 : index
    %1124 = vector.load %arg40[%c12_785, %c0_786] : memref<216x256xf32, #tpu.memory_space<vmem>>, vector<12x64xf32>
    tpu.vector_store %arg40[%c12_785, %c0_786], %1123 {strides = array<i32>} : memref<216x256xf32, #tpu.memory_space<vmem>>, vector<12x64xf32>,
    %c0_787 = arith.constant 0 : index
    %c10_788 = arith.constant 10 : index
    %1125 = vector.load %arg39[%c0_787, %c10_788] : memref<12x290xf32, #tpu.memory_space<vmem>>, vector<12x64xf32>
    %1126 = vector.broadcast %1078 : vector<1x64xf32> to vector<12x64xf32>
    %1127 = arith.mulf %1125, %1126 : vector<12x64xf32>
    %c24_789 = arith.constant 24 : index
    %c0_790 = arith.constant 0 : index
    %1128 = vector.load %arg40[%c24_789, %c0_790] : memref<216x256xf32, #tpu.memory_space<vmem>>, vector<12x64xf32>
    tpu.vector_store %arg40[%c24_789, %c0_790], %1127 {strides = array<i32>} : memref<216x256xf32, #tpu.memory_space<vmem>>, vector<12x64xf32>,
    %c0_791 = arith.constant 0 : index
    %c16_792 = arith.constant 16 : index
    %1129 = vector.load %arg39[%c0_791, %c16_792] : memref<12x290xf32, #tpu.memory_space<vmem>>, vector<12x64xf32>
    %1130 = vector.broadcast %1083 : vector<1x64xf32> to vector<12x64xf32>
    %1131 = arith.mulf %1129, %1130 : vector<12x64xf32>
    %c36_793 = arith.constant 36 : index
    %c0_794 = arith.constant 0 : index
    %1132 = vector.load %arg40[%c36_793, %c0_794] : memref<216x256xf32, #tpu.memory_space<vmem>>, vector<12x64xf32>
    tpu.vector_store %arg40[%c36_793, %c0_794], %1131 {strides = array<i32>} : memref<216x256xf32, #tpu.memory_space<vmem>>, vector<12x64xf32>,
    %c48_795 = arith.constant 48 : index
    %c0_796 = arith.constant 0 : index
    %1133 = vector.load %arg40[%c48_795, %c0_796] : memref<216x256xf32, #tpu.memory_space<vmem>>, vector<12x64xf32>
    tpu.vector_store %arg40[%c48_795, %c0_796], %1046 {strides = array<i32>} : memref<216x256xf32, #tpu.memory_space<vmem>>, vector<12x64xf32>,
    %c0_797 = arith.constant 0 : index
    %c18_798 = arith.constant 18 : index
    %1134 = vector.load %arg39[%c0_797, %c18_798] : memref<12x290xf32, #tpu.memory_space<vmem>>, vector<12x64xf32>
    %1135 = vector.broadcast %1088 : vector<1x64xf32> to vector<12x64xf32>
    %1136 = arith.mulf %1134, %1135 : vector<12x64xf32>
    %c60_799 = arith.constant 60 : index
    %c0_800 = arith.constant 0 : index
    %1137 = vector.load %arg40[%c60_799, %c0_800] : memref<216x256xf32, #tpu.memory_space<vmem>>, vector<12x64xf32>
    tpu.vector_store %arg40[%c60_799, %c0_800], %1136 {strides = array<i32>} : memref<216x256xf32, #tpu.memory_space<vmem>>, vector<12x64xf32>,
    %c0_801 = arith.constant 0 : index
    %c24_802 = arith.constant 24 : index
    %1138 = vector.load %arg39[%c0_801, %c24_802] : memref<12x290xf32, #tpu.memory_space<vmem>>, vector<12x64xf32>
    %1139 = vector.broadcast %1099 : vector<1x64xf32> to vector<12x64xf32>
    %1140 = arith.mulf %1138, %1139 : vector<12x64xf32>
    %c72_803 = arith.constant 72 : index
    %c0_804 = arith.constant 0 : index
    %1141 = vector.load %arg40[%c72_803, %c0_804] : memref<216x256xf32, #tpu.memory_space<vmem>>, vector<12x64xf32>
    tpu.vector_store %arg40[%c72_803, %c0_804], %1140 {strides = array<i32>} : memref<216x256xf32, #tpu.memory_space<vmem>>, vector<12x64xf32>,
    %c0_805 = arith.constant 0 : index
    %c25_806 = arith.constant 25 : index
    %1142 = vector.load %arg39[%c0_805, %c25_806] : memref<12x290xf32, #tpu.memory_space<vmem>>, vector<12x64xf32>
    %1143 = vector.broadcast %1104 : vector<1x64xf32> to vector<12x64xf32>
    %1144 = arith.mulf %1142, %1143 : vector<12x64xf32>
    %c84_807 = arith.constant 84 : index
    %c0_808 = arith.constant 0 : index
    %1145 = vector.load %arg40[%c84_807, %c0_808] : memref<216x256xf32, #tpu.memory_space<vmem>>, vector<12x64xf32>
    tpu.vector_store %arg40[%c84_807, %c0_808], %1144 {strides = array<i32>} : memref<216x256xf32, #tpu.memory_space<vmem>>, vector<12x64xf32>,
    %c0_809 = arith.constant 0 : index
    %c26_810 = arith.constant 26 : index
    %1146 = vector.load %arg39[%c0_809, %c26_810] : memref<12x290xf32, #tpu.memory_space<vmem>>, vector<12x64xf32>
    %1147 = vector.broadcast %1115 : vector<1x64xf32> to vector<12x64xf32>
    %1148 = arith.mulf %1146, %1147 : vector<12x64xf32>
    %c96_811 = arith.constant 96 : index
    %c0_812 = arith.constant 0 : index
    %1149 = vector.load %arg40[%c96_811, %c0_812] : memref<216x256xf32, #tpu.memory_space<vmem>>, vector<12x64xf32>
    tpu.vector_store %arg40[%c96_811, %c0_812], %1148 {strides = array<i32>} : memref<216x256xf32, #tpu.memory_space<vmem>>, vector<12x64xf32>,
    %c0_813 = arith.constant 0 : index
    %c17_814 = arith.constant 17 : index
    %1150 = vector.load %arg39[%c0_813, %c17_814] : memref<12x290xf32, #tpu.memory_space<vmem>>, vector<12x64xf32>
    tpu.vector_store %arg39[%c0_813, %c17_814], %366 {strides = array<i32>} : memref<12x290xf32, #tpu.memory_space<vmem>>, vector<12x64xf32>,
    %c0_815 = arith.constant 0 : index
    %c8_816 = arith.constant 8 : index
    %1151 = vector.load %arg39[%c0_815, %c8_816] : memref<12x290xf32, #tpu.memory_space<vmem>>, vector<12x64xf32>
    %1152 = vector.broadcast %1062 : vector<1x64xf32> to vector<12x64xf32>
    %1153 = arith.mulf %1151, %1152 : vector<12x64xf32>
    %c108_817 = arith.constant 108 : index
    %c0_818 = arith.constant 0 : index
    %1154 = vector.load %arg40[%c108_817, %c0_818] : memref<216x256xf32, #tpu.memory_space<vmem>>, vector<12x64xf32>
    tpu.vector_store %arg40[%c108_817, %c0_818], %1153 {strides = array<i32>} : memref<216x256xf32, #tpu.memory_space<vmem>>, vector<12x64xf32>,
    %c0_819 = arith.constant 0 : index
    %c9_820 = arith.constant 9 : index
    %1155 = vector.load %arg39[%c0_819, %c9_820] : memref<12x290xf32, #tpu.memory_space<vmem>>, vector<12x64xf32>
    %1156 = vector.broadcast %1067 : vector<1x64xf32> to vector<12x64xf32>
    %1157 = arith.mulf %1155, %1156 : vector<12x64xf32>
    %c120_821 = arith.constant 120 : index
    %c0_822 = arith.constant 0 : index
    %1158 = vector.load %arg40[%c120_821, %c0_822] : memref<216x256xf32, #tpu.memory_space<vmem>>, vector<12x64xf32>
    tpu.vector_store %arg40[%c120_821, %c0_822], %1157 {strides = array<i32>} : memref<216x256xf32, #tpu.memory_space<vmem>>, vector<12x64xf32>,
    %c0_823 = arith.constant 0 : index
    %c10_824 = arith.constant 10 : index
    %1159 = vector.load %arg39[%c0_823, %c10_824] : memref<12x290xf32, #tpu.memory_space<vmem>>, vector<12x64xf32>
    %1160 = vector.broadcast %1078 : vector<1x64xf32> to vector<12x64xf32>
    %1161 = arith.mulf %1159, %1160 : vector<12x64xf32>
    %c132_825 = arith.constant 132 : index
    %c0_826 = arith.constant 0 : index
    %1162 = vector.load %arg40[%c132_825, %c0_826] : memref<216x256xf32, #tpu.memory_space<vmem>>, vector<12x64xf32>
    tpu.vector_store %arg40[%c132_825, %c0_826], %1161 {strides = array<i32>} : memref<216x256xf32, #tpu.memory_space<vmem>>, vector<12x64xf32>,
    %c0_827 = arith.constant 0 : index
    %c16_828 = arith.constant 16 : index
    %1163 = vector.load %arg39[%c0_827, %c16_828] : memref<12x290xf32, #tpu.memory_space<vmem>>, vector<12x64xf32>
    %1164 = vector.broadcast %1083 : vector<1x64xf32> to vector<12x64xf32>
    %1165 = arith.mulf %1163, %1164 : vector<12x64xf32>
    %c144_829 = arith.constant 144 : index
    %c0_830 = arith.constant 0 : index
    %1166 = vector.load %arg40[%c144_829, %c0_830] : memref<216x256xf32, #tpu.memory_space<vmem>>, vector<12x64xf32>
    tpu.vector_store %arg40[%c144_829, %c0_830], %1165 {strides = array<i32>} : memref<216x256xf32, #tpu.memory_space<vmem>>, vector<12x64xf32>,
    %c156_831 = arith.constant 156 : index
    %c0_832 = arith.constant 0 : index
    %1167 = vector.load %arg40[%c156_831, %c0_832] : memref<216x256xf32, #tpu.memory_space<vmem>>, vector<12x64xf32>
    tpu.vector_store %arg40[%c156_831, %c0_832], %366 {strides = array<i32>} : memref<216x256xf32, #tpu.memory_space<vmem>>, vector<12x64xf32>,
    %c0_833 = arith.constant 0 : index
    %c18_834 = arith.constant 18 : index
    %1168 = vector.load %arg39[%c0_833, %c18_834] : memref<12x290xf32, #tpu.memory_space<vmem>>, vector<12x64xf32>
    %1169 = vector.broadcast %1088 : vector<1x64xf32> to vector<12x64xf32>
    %1170 = arith.mulf %1168, %1169 : vector<12x64xf32>
    %c168_835 = arith.constant 168 : index
    %c0_836 = arith.constant 0 : index
    %1171 = vector.load %arg40[%c168_835, %c0_836] : memref<216x256xf32, #tpu.memory_space<vmem>>, vector<12x64xf32>
    tpu.vector_store %arg40[%c168_835, %c0_836], %1170 {strides = array<i32>} : memref<216x256xf32, #tpu.memory_space<vmem>>, vector<12x64xf32>,
    %c0_837 = arith.constant 0 : index
    %c24_838 = arith.constant 24 : index
    %1172 = vector.load %arg39[%c0_837, %c24_838] : memref<12x290xf32, #tpu.memory_space<vmem>>, vector<12x64xf32>
    %1173 = vector.broadcast %1099 : vector<1x64xf32> to vector<12x64xf32>
    %1174 = arith.mulf %1172, %1173 : vector<12x64xf32>
    %c180_839 = arith.constant 180 : index
    %c0_840 = arith.constant 0 : index
    %1175 = vector.load %arg40[%c180_839, %c0_840] : memref<216x256xf32, #tpu.memory_space<vmem>>, vector<12x64xf32>
    tpu.vector_store %arg40[%c180_839, %c0_840], %1174 {strides = array<i32>} : memref<216x256xf32, #tpu.memory_space<vmem>>, vector<12x64xf32>,
    %c0_841 = arith.constant 0 : index
    %c25_842 = arith.constant 25 : index
    %1176 = vector.load %arg39[%c0_841, %c25_842] : memref<12x290xf32, #tpu.memory_space<vmem>>, vector<12x64xf32>
    %1177 = vector.broadcast %1104 : vector<1x64xf32> to vector<12x64xf32>
    %1178 = arith.mulf %1176, %1177 : vector<12x64xf32>
    %c192_843 = arith.constant 192 : index
    %c0_844 = arith.constant 0 : index
    %1179 = vector.load %arg40[%c192_843, %c0_844] : memref<216x256xf32, #tpu.memory_space<vmem>>, vector<12x64xf32>
    tpu.vector_store %arg40[%c192_843, %c0_844], %1178 {strides = array<i32>} : memref<216x256xf32, #tpu.memory_space<vmem>>, vector<12x64xf32>,
    %c0_845 = arith.constant 0 : index
    %c26_846 = arith.constant 26 : index
    %1180 = vector.load %arg39[%c0_845, %c26_846] : memref<12x290xf32, #tpu.memory_space<vmem>>, vector<12x64xf32>
    %1181 = vector.broadcast %1115 : vector<1x64xf32> to vector<12x64xf32>
    %1182 = arith.mulf %1180, %1181 : vector<12x64xf32>
    %c204_847 = arith.constant 204 : index
    %c0_848 = arith.constant 0 : index
    %1183 = vector.load %arg40[%c204_847, %c0_848] : memref<216x256xf32, #tpu.memory_space<vmem>>, vector<12x64xf32>
    tpu.vector_store %arg40[%c204_847, %c0_848], %1182 {strides = array<i32>} : memref<216x256xf32, #tpu.memory_space<vmem>>, vector<12x64xf32>,
    %c0_849 = arith.constant 0 : index
    %c0_850 = arith.constant 0 : index
    %1184 = vector.load %arg26[%c0_849, %c0_850] : memref<12x216xf32, #tpu.memory_space<vmem>>, vector<12x216xf32>
    %c0_851 = arith.constant 0 : index
    %c0_852 = arith.constant 0 : index
    %1185 = vector.load %arg40[%c0_851, %c0_852] : memref<216x256xf32, #tpu.memory_space<vmem>>, vector<216x64xf32>
    %cst_853 = arith.constant dense<0.000000e+00> : vector<12x64xf32>
    %1186 = tpu.matmul %1184, %1185, %cst_853 {dimension_numbers = #tpu.dot_dimension_numbers<[1], [0], [0], [1], [0, 0, 1, 1], [], []>} : vector<12x216xf32>, vector<216x64xf32>, vector<12x64xf32> -> vector<12x64xf32>
    %c0_854 = arith.constant 0 : index
    %c0_855 = arith.constant 0 : index
    %1187 = vector.load %arg27[%c0_854, %c0_855] : memref<12x1xf32, #tpu.memory_space<vmem>>, vector<12x1xf32>
    %1188 = vector.broadcast %1187 : vector<12x1xf32> to vector<12x64xf32>
    %1189 = arith.mulf %1186, %1188 : vector<12x64xf32>
    %c0_856 = arith.constant 0 : index
    %c0_857 = arith.constant 0 : index
    %1190 = vector.load %arg28[%c0_856, %c0_857] : memref<12x1xf32, #tpu.memory_space<vmem>>, vector<12x1xf32>
    %1191 = vector.broadcast %1190 : vector<12x1xf32> to vector<12x64xf32>
    %1192 = arith.addf %1189, %1191 : vector<12x64xf32>
    %1193 = math.exp %1192 : vector<12x64xf32>
    %cst_858 = arith.constant 1.000000e+00 : f32
    %1194 = vector.broadcast %cst_858 : f32 to vector<12x64xf32>
    %1195 = arith.addf %1194, %1193 : vector<12x64xf32>
    %1196 = math.log %1195 : vector<12x64xf32>
    %1197 = math.tanh %1196 : vector<12x64xf32>
    %1198 = arith.mulf %1192, %1197 : vector<12x64xf32>
    %c0_859 = arith.constant 0 : index
    %c0_860 = arith.constant 0 : index
    %1199 = vector.load %arg37[%c0_859, %c0_860] : memref<64x256xf32, #tpu.memory_space<vmem>>, vector<64x256xf32>
    %cst_861 = arith.constant dense<0.000000e+00> : vector<12x256xf32>
    %1200 = tpu.matmul %1198, %1199, %cst_861 {dimension_numbers = #tpu.dot_dimension_numbers<[1], [0], [0], [1], [0, 0, 1, 1], [], []>} : vector<12x64xf32>, vector<64x256xf32>, vector<12x256xf32> -> vector<12x256xf32>
    %1201 = tpu.iota {dimensions = array<i32: 1>} : vector<1x256xi32>
    %c4_i32_862 = arith.constant 4 : i32
    %1202 = vector.broadcast %c4_i32_862 : i32 to vector<1x256xi32>
    %1203 = arith.shrsi %1201, %1202 : vector<1x256xi32>
    %c15_i32_863 = arith.constant 15 : i32
    %1204 = vector.broadcast %c15_i32_863 : i32 to vector<1x256xi32>
    %1205 = arith.andi %1201, %1204 : vector<1x256xi32>
    %c1_i32_864 = arith.constant 1 : i32
    %1206 = vector.broadcast %c1_i32_864 : i32 to vector<1x256xi32>
    %1207 = arith.cmpi sge, %1203, %1206 : vector<1x256xi32>
    %cst_865 = arith.constant 1.000000e+00 : f32
    %cst_866 = arith.constant 0.000000e+00 : f32
    %1208 = vector.broadcast %cst_865 : f32 to vector<1x256xf32>
    %1209 = vector.broadcast %cst_866 : f32 to vector<1x256xf32>
    %1210 = arith.select %1207, %1208, %1209 : vector<1x256xi1>, vector<1x256xf32>
    %c1_i32_867 = arith.constant 1 : i32
    %1211 = vector.broadcast %c1_i32_867 : i32 to vector<1x256xi32>
    %1212 = arith.cmpi sge, %1205, %1211 : vector<1x256xi32>
    %cst_868 = arith.constant 1.000000e+00 : f32
    %cst_869 = arith.constant 0.000000e+00 : f32
    %1213 = vector.broadcast %cst_868 : f32 to vector<1x256xf32>
    %1214 = vector.broadcast %cst_869 : f32 to vector<1x256xf32>
    %1215 = arith.select %1212, %1213, %1214 : vector<1x256xi1>, vector<1x256xf32>
    %1216 = arith.mulf %1210, %1215 : vector<1x256xf32>
    %c1_i32_870 = arith.constant 1 : i32
    %1217 = vector.broadcast %c1_i32_870 : i32 to vector<1x256xi32>
    %1218 = arith.cmpi sge, %1203, %1217 : vector<1x256xi32>
    %cst_871 = arith.constant 1.000000e+00 : f32
    %cst_872 = arith.constant 0.000000e+00 : f32
    %1219 = vector.broadcast %cst_871 : f32 to vector<1x256xf32>
    %1220 = vector.broadcast %cst_872 : f32 to vector<1x256xf32>
    %1221 = arith.select %1218, %1219, %1220 : vector<1x256xi1>, vector<1x256xf32>
    %c1_i32_873 = arith.constant 1 : i32
    %1222 = vector.broadcast %c1_i32_873 : i32 to vector<1x256xi32>
    %1223 = arith.cmpi sge, %1203, %1222 : vector<1x256xi32>
    %cst_874 = arith.constant 1.000000e+00 : f32
    %cst_875 = arith.constant 0.000000e+00 : f32
    %1224 = vector.broadcast %cst_874 : f32 to vector<1x256xf32>
    %1225 = vector.broadcast %cst_875 : f32 to vector<1x256xf32>
    %1226 = arith.select %1223, %1224, %1225 : vector<1x256xi1>, vector<1x256xf32>
    %c15_i32_876 = arith.constant 15 : i32
    %1227 = vector.broadcast %c15_i32_876 : i32 to vector<1x256xi32>
    %1228 = arith.cmpi slt, %1205, %1227 : vector<1x256xi32>
    %cst_877 = arith.constant 1.000000e+00 : f32
    %cst_878 = arith.constant 0.000000e+00 : f32
    %1229 = vector.broadcast %cst_877 : f32 to vector<1x256xf32>
    %1230 = vector.broadcast %cst_878 : f32 to vector<1x256xf32>
    %1231 = arith.select %1228, %1229, %1230 : vector<1x256xi1>, vector<1x256xf32>
    %1232 = arith.mulf %1226, %1231 : vector<1x256xf32>
    %c1_i32_879 = arith.constant 1 : i32
    %1233 = vector.broadcast %c1_i32_879 : i32 to vector<1x256xi32>
    %1234 = arith.cmpi sge, %1205, %1233 : vector<1x256xi32>
    %cst_880 = arith.constant 1.000000e+00 : f32
    %cst_881 = arith.constant 0.000000e+00 : f32
    %1235 = vector.broadcast %cst_880 : f32 to vector<1x256xf32>
    %1236 = vector.broadcast %cst_881 : f32 to vector<1x256xf32>
    %1237 = arith.select %1234, %1235, %1236 : vector<1x256xi1>, vector<1x256xf32>
    %c15_i32_882 = arith.constant 15 : i32
    %1238 = vector.broadcast %c15_i32_882 : i32 to vector<1x256xi32>
    %1239 = arith.cmpi slt, %1205, %1238 : vector<1x256xi32>
    %cst_883 = arith.constant 1.000000e+00 : f32
    %cst_884 = arith.constant 0.000000e+00 : f32
    %1240 = vector.broadcast %cst_883 : f32 to vector<1x256xf32>
    %1241 = vector.broadcast %cst_884 : f32 to vector<1x256xf32>
    %1242 = arith.select %1239, %1240, %1241 : vector<1x256xi1>, vector<1x256xf32>
    %c15_i32_885 = arith.constant 15 : i32
    %1243 = vector.broadcast %c15_i32_885 : i32 to vector<1x256xi32>
    %1244 = arith.cmpi slt, %1203, %1243 : vector<1x256xi32>
    %cst_886 = arith.constant 1.000000e+00 : f32
    %cst_887 = arith.constant 0.000000e+00 : f32
    %1245 = vector.broadcast %cst_886 : f32 to vector<1x256xf32>
    %1246 = vector.broadcast %cst_887 : f32 to vector<1x256xf32>
    %1247 = arith.select %1244, %1245, %1246 : vector<1x256xi1>, vector<1x256xf32>
    %c1_i32_888 = arith.constant 1 : i32
    %1248 = vector.broadcast %c1_i32_888 : i32 to vector<1x256xi32>
    %1249 = arith.cmpi sge, %1205, %1248 : vector<1x256xi32>
    %cst_889 = arith.constant 1.000000e+00 : f32
    %cst_890 = arith.constant 0.000000e+00 : f32
    %1250 = vector.broadcast %cst_889 : f32 to vector<1x256xf32>
    %1251 = vector.broadcast %cst_890 : f32 to vector<1x256xf32>
    %1252 = arith.select %1249, %1250, %1251 : vector<1x256xi1>, vector<1x256xf32>
    %1253 = arith.mulf %1247, %1252 : vector<1x256xf32>
    %c15_i32_891 = arith.constant 15 : i32
    %1254 = vector.broadcast %c15_i32_891 : i32 to vector<1x256xi32>
    %1255 = arith.cmpi slt, %1203, %1254 : vector<1x256xi32>
    %cst_892 = arith.constant 1.000000e+00 : f32
    %cst_893 = arith.constant 0.000000e+00 : f32
    %1256 = vector.broadcast %cst_892 : f32 to vector<1x256xf32>
    %1257 = vector.broadcast %cst_893 : f32 to vector<1x256xf32>
    %1258 = arith.select %1255, %1256, %1257 : vector<1x256xi1>, vector<1x256xf32>
    %c15_i32_894 = arith.constant 15 : i32
    %1259 = vector.broadcast %c15_i32_894 : i32 to vector<1x256xi32>
    %1260 = arith.cmpi slt, %1203, %1259 : vector<1x256xi32>
    %cst_895 = arith.constant 1.000000e+00 : f32
    %cst_896 = arith.constant 0.000000e+00 : f32
    %1261 = vector.broadcast %cst_895 : f32 to vector<1x256xf32>
    %1262 = vector.broadcast %cst_896 : f32 to vector<1x256xf32>
    %1263 = arith.select %1260, %1261, %1262 : vector<1x256xi1>, vector<1x256xf32>
    %c15_i32_897 = arith.constant 15 : i32
    %1264 = vector.broadcast %c15_i32_897 : i32 to vector<1x256xi32>
    %1265 = arith.cmpi slt, %1205, %1264 : vector<1x256xi32>
    %cst_898 = arith.constant 1.000000e+00 : f32
    %cst_899 = arith.constant 0.000000e+00 : f32
    %1266 = vector.broadcast %cst_898 : f32 to vector<1x256xf32>
    %1267 = vector.broadcast %cst_899 : f32 to vector<1x256xf32>
    %1268 = arith.select %1265, %1266, %1267 : vector<1x256xi1>, vector<1x256xf32>
    %1269 = arith.mulf %1263, %1268 : vector<1x256xf32>
    %c0_900 = arith.constant 0 : index
    %c17_901 = arith.constant 17 : index
    %1270 = vector.load %arg39[%c0_900, %c17_901] : memref<12x290xf32, #tpu.memory_space<vmem>>, vector<12x256xf32>
    tpu.vector_store %arg39[%c0_900, %c17_901], %1200 {strides = array<i32>} : memref<12x290xf32, #tpu.memory_space<vmem>>, vector<12x256xf32>,
    %c0_902 = arith.constant 0 : index
    %c0_903 = arith.constant 0 : index
    %1271 = vector.load %arg39[%c0_902, %c0_903] : memref<12x290xf32, #tpu.memory_space<vmem>>, vector<12x256xf32>
    %1272 = vector.broadcast %1216 : vector<1x256xf32> to vector<12x256xf32>
    %1273 = arith.mulf %1271, %1272 : vector<12x256xf32>
    %c0_904 = arith.constant 0 : index
    %c0_905 = arith.constant 0 : index
    %1274 = vector.load %arg40[%c0_904, %c0_905] : memref<216x256xf32, #tpu.memory_space<vmem>>, vector<12x256xf32>
    tpu.vector_store %arg40[%c0_904, %c0_905], %1273 {strides = array<i32>} : memref<216x256xf32, #tpu.memory_space<vmem>>, vector<12x256xf32>,
    %c0_906 = arith.constant 0 : index
    %c1_907 = arith.constant 1 : index
    %1275 = vector.load %arg39[%c0_906, %c1_907] : memref<12x290xf32, #tpu.memory_space<vmem>>, vector<12x256xf32>
    %1276 = vector.broadcast %1221 : vector<1x256xf32> to vector<12x256xf32>
    %1277 = arith.mulf %1275, %1276 : vector<12x256xf32>
    %c12_908 = arith.constant 12 : index
    %c0_909 = arith.constant 0 : index
    %1278 = vector.load %arg40[%c12_908, %c0_909] : memref<216x256xf32, #tpu.memory_space<vmem>>, vector<12x256xf32>
    tpu.vector_store %arg40[%c12_908, %c0_909], %1277 {strides = array<i32>} : memref<216x256xf32, #tpu.memory_space<vmem>>, vector<12x256xf32>,
    %c0_910 = arith.constant 0 : index
    %c2_911 = arith.constant 2 : index
    %1279 = vector.load %arg39[%c0_910, %c2_911] : memref<12x290xf32, #tpu.memory_space<vmem>>, vector<12x256xf32>
    %1280 = vector.broadcast %1232 : vector<1x256xf32> to vector<12x256xf32>
    %1281 = arith.mulf %1279, %1280 : vector<12x256xf32>
    %c24_912 = arith.constant 24 : index
    %c0_913 = arith.constant 0 : index
    %1282 = vector.load %arg40[%c24_912, %c0_913] : memref<216x256xf32, #tpu.memory_space<vmem>>, vector<12x256xf32>
    tpu.vector_store %arg40[%c24_912, %c0_913], %1281 {strides = array<i32>} : memref<216x256xf32, #tpu.memory_space<vmem>>, vector<12x256xf32>,
    %c0_914 = arith.constant 0 : index
    %c16_915 = arith.constant 16 : index
    %1283 = vector.load %arg39[%c0_914, %c16_915] : memref<12x290xf32, #tpu.memory_space<vmem>>, vector<12x256xf32>
    %1284 = vector.broadcast %1237 : vector<1x256xf32> to vector<12x256xf32>
    %1285 = arith.mulf %1283, %1284 : vector<12x256xf32>
    %c36_916 = arith.constant 36 : index
    %c0_917 = arith.constant 0 : index
    %1286 = vector.load %arg40[%c36_916, %c0_917] : memref<216x256xf32, #tpu.memory_space<vmem>>, vector<12x256xf32>
    tpu.vector_store %arg40[%c36_916, %c0_917], %1285 {strides = array<i32>} : memref<216x256xf32, #tpu.memory_space<vmem>>, vector<12x256xf32>,
    %c48_918 = arith.constant 48 : index
    %c0_919 = arith.constant 0 : index
    %1287 = vector.load %arg40[%c48_918, %c0_919] : memref<216x256xf32, #tpu.memory_space<vmem>>, vector<12x256xf32>
    tpu.vector_store %arg40[%c48_918, %c0_919], %1200 {strides = array<i32>} : memref<216x256xf32, #tpu.memory_space<vmem>>, vector<12x256xf32>,
    %c0_920 = arith.constant 0 : index
    %c18_921 = arith.constant 18 : index
    %1288 = vector.load %arg39[%c0_920, %c18_921] : memref<12x290xf32, #tpu.memory_space<vmem>>, vector<12x256xf32>
    %1289 = vector.broadcast %1242 : vector<1x256xf32> to vector<12x256xf32>
    %1290 = arith.mulf %1288, %1289 : vector<12x256xf32>
    %c60_922 = arith.constant 60 : index
    %c0_923 = arith.constant 0 : index
    %1291 = vector.load %arg40[%c60_922, %c0_923] : memref<216x256xf32, #tpu.memory_space<vmem>>, vector<12x256xf32>
    tpu.vector_store %arg40[%c60_922, %c0_923], %1290 {strides = array<i32>} : memref<216x256xf32, #tpu.memory_space<vmem>>, vector<12x256xf32>,
    %c0_924 = arith.constant 0 : index
    %c32_925 = arith.constant 32 : index
    %1292 = vector.load %arg39[%c0_924, %c32_925] : memref<12x290xf32, #tpu.memory_space<vmem>>, vector<12x256xf32>
    %1293 = vector.broadcast %1253 : vector<1x256xf32> to vector<12x256xf32>
    %1294 = arith.mulf %1292, %1293 : vector<12x256xf32>
    %c72_926 = arith.constant 72 : index
    %c0_927 = arith.constant 0 : index
    %1295 = vector.load %arg40[%c72_926, %c0_927] : memref<216x256xf32, #tpu.memory_space<vmem>>, vector<12x256xf32>
    tpu.vector_store %arg40[%c72_926, %c0_927], %1294 {strides = array<i32>} : memref<216x256xf32, #tpu.memory_space<vmem>>, vector<12x256xf32>,
    %c0_928 = arith.constant 0 : index
    %c33_929 = arith.constant 33 : index
    %1296 = vector.load %arg39[%c0_928, %c33_929] : memref<12x290xf32, #tpu.memory_space<vmem>>, vector<12x256xf32>
    %1297 = vector.broadcast %1258 : vector<1x256xf32> to vector<12x256xf32>
    %1298 = arith.mulf %1296, %1297 : vector<12x256xf32>
    %c84_930 = arith.constant 84 : index
    %c0_931 = arith.constant 0 : index
    %1299 = vector.load %arg40[%c84_930, %c0_931] : memref<216x256xf32, #tpu.memory_space<vmem>>, vector<12x256xf32>
    tpu.vector_store %arg40[%c84_930, %c0_931], %1298 {strides = array<i32>} : memref<216x256xf32, #tpu.memory_space<vmem>>, vector<12x256xf32>,
    %c0_932 = arith.constant 0 : index
    %c34_933 = arith.constant 34 : index
    %1300 = vector.load %arg39[%c0_932, %c34_933] : memref<12x290xf32, #tpu.memory_space<vmem>>, vector<12x256xf32>
    %1301 = vector.broadcast %1269 : vector<1x256xf32> to vector<12x256xf32>
    %1302 = arith.mulf %1300, %1301 : vector<12x256xf32>
    %c96_934 = arith.constant 96 : index
    %c0_935 = arith.constant 0 : index
    %1303 = vector.load %arg40[%c96_934, %c0_935] : memref<216x256xf32, #tpu.memory_space<vmem>>, vector<12x256xf32>
    tpu.vector_store %arg40[%c96_934, %c0_935], %1302 {strides = array<i32>} : memref<216x256xf32, #tpu.memory_space<vmem>>, vector<12x256xf32>,
    %c0_936 = arith.constant 0 : index
    %c17_937 = arith.constant 17 : index
    %1304 = vector.load %arg39[%c0_936, %c17_937] : memref<12x290xf32, #tpu.memory_space<vmem>>, vector<12x256xf32>
    tpu.vector_store %arg39[%c0_936, %c17_937], %239 {strides = array<i32>} : memref<12x290xf32, #tpu.memory_space<vmem>>, vector<12x256xf32>,
    %c0_938 = arith.constant 0 : index
    %c0_939 = arith.constant 0 : index
    %1305 = vector.load %arg39[%c0_938, %c0_939] : memref<12x290xf32, #tpu.memory_space<vmem>>, vector<12x256xf32>
    %1306 = vector.broadcast %1216 : vector<1x256xf32> to vector<12x256xf32>
    %1307 = arith.mulf %1305, %1306 : vector<12x256xf32>
    %c108_940 = arith.constant 108 : index
    %c0_941 = arith.constant 0 : index
    %1308 = vector.load %arg40[%c108_940, %c0_941] : memref<216x256xf32, #tpu.memory_space<vmem>>, vector<12x256xf32>
    tpu.vector_store %arg40[%c108_940, %c0_941], %1307 {strides = array<i32>} : memref<216x256xf32, #tpu.memory_space<vmem>>, vector<12x256xf32>,
    %c0_942 = arith.constant 0 : index
    %c1_943 = arith.constant 1 : index
    %1309 = vector.load %arg39[%c0_942, %c1_943] : memref<12x290xf32, #tpu.memory_space<vmem>>, vector<12x256xf32>
    %1310 = vector.broadcast %1221 : vector<1x256xf32> to vector<12x256xf32>
    %1311 = arith.mulf %1309, %1310 : vector<12x256xf32>
    %c120_944 = arith.constant 120 : index
    %c0_945 = arith.constant 0 : index
    %1312 = vector.load %arg40[%c120_944, %c0_945] : memref<216x256xf32, #tpu.memory_space<vmem>>, vector<12x256xf32>
    tpu.vector_store %arg40[%c120_944, %c0_945], %1311 {strides = array<i32>} : memref<216x256xf32, #tpu.memory_space<vmem>>, vector<12x256xf32>,
    %c0_946 = arith.constant 0 : index
    %c2_947 = arith.constant 2 : index
    %1313 = vector.load %arg39[%c0_946, %c2_947] : memref<12x290xf32, #tpu.memory_space<vmem>>, vector<12x256xf32>
    %1314 = vector.broadcast %1232 : vector<1x256xf32> to vector<12x256xf32>
    %1315 = arith.mulf %1313, %1314 : vector<12x256xf32>
    %c132_948 = arith.constant 132 : index
    %c0_949 = arith.constant 0 : index
    %1316 = vector.load %arg40[%c132_948, %c0_949] : memref<216x256xf32, #tpu.memory_space<vmem>>, vector<12x256xf32>
    tpu.vector_store %arg40[%c132_948, %c0_949], %1315 {strides = array<i32>} : memref<216x256xf32, #tpu.memory_space<vmem>>, vector<12x256xf32>,
    %c0_950 = arith.constant 0 : index
    %c16_951 = arith.constant 16 : index
    %1317 = vector.load %arg39[%c0_950, %c16_951] : memref<12x290xf32, #tpu.memory_space<vmem>>, vector<12x256xf32>
    %1318 = vector.broadcast %1237 : vector<1x256xf32> to vector<12x256xf32>
    %1319 = arith.mulf %1317, %1318 : vector<12x256xf32>
    %c144_952 = arith.constant 144 : index
    %c0_953 = arith.constant 0 : index
    %1320 = vector.load %arg40[%c144_952, %c0_953] : memref<216x256xf32, #tpu.memory_space<vmem>>, vector<12x256xf32>
    tpu.vector_store %arg40[%c144_952, %c0_953], %1319 {strides = array<i32>} : memref<216x256xf32, #tpu.memory_space<vmem>>, vector<12x256xf32>,
    %c156_954 = arith.constant 156 : index
    %c0_955 = arith.constant 0 : index
    %1321 = vector.load %arg40[%c156_954, %c0_955] : memref<216x256xf32, #tpu.memory_space<vmem>>, vector<12x256xf32>
    tpu.vector_store %arg40[%c156_954, %c0_955], %239 {strides = array<i32>} : memref<216x256xf32, #tpu.memory_space<vmem>>, vector<12x256xf32>,
    %c0_956 = arith.constant 0 : index
    %c18_957 = arith.constant 18 : index
    %1322 = vector.load %arg39[%c0_956, %c18_957] : memref<12x290xf32, #tpu.memory_space<vmem>>, vector<12x256xf32>
    %1323 = vector.broadcast %1242 : vector<1x256xf32> to vector<12x256xf32>
    %1324 = arith.mulf %1322, %1323 : vector<12x256xf32>
    %c168_958 = arith.constant 168 : index
    %c0_959 = arith.constant 0 : index
    %1325 = vector.load %arg40[%c168_958, %c0_959] : memref<216x256xf32, #tpu.memory_space<vmem>>, vector<12x256xf32>
    tpu.vector_store %arg40[%c168_958, %c0_959], %1324 {strides = array<i32>} : memref<216x256xf32, #tpu.memory_space<vmem>>, vector<12x256xf32>,
    %c0_960 = arith.constant 0 : index
    %c32_961 = arith.constant 32 : index
    %1326 = vector.load %arg39[%c0_960, %c32_961] : memref<12x290xf32, #tpu.memory_space<vmem>>, vector<12x256xf32>
    %1327 = vector.broadcast %1253 : vector<1x256xf32> to vector<12x256xf32>
    %1328 = arith.mulf %1326, %1327 : vector<12x256xf32>
    %c180_962 = arith.constant 180 : index
    %c0_963 = arith.constant 0 : index
    %1329 = vector.load %arg40[%c180_962, %c0_963] : memref<216x256xf32, #tpu.memory_space<vmem>>, vector<12x256xf32>
    tpu.vector_store %arg40[%c180_962, %c0_963], %1328 {strides = array<i32>} : memref<216x256xf32, #tpu.memory_space<vmem>>, vector<12x256xf32>,
    %c0_964 = arith.constant 0 : index
    %c33_965 = arith.constant 33 : index
    %1330 = vector.load %arg39[%c0_964, %c33_965] : memref<12x290xf32, #tpu.memory_space<vmem>>, vector<12x256xf32>
    %1331 = vector.broadcast %1258 : vector<1x256xf32> to vector<12x256xf32>
    %1332 = arith.mulf %1330, %1331 : vector<12x256xf32>
    %c192_966 = arith.constant 192 : index
    %c0_967 = arith.constant 0 : index
    %1333 = vector.load %arg40[%c192_966, %c0_967] : memref<216x256xf32, #tpu.memory_space<vmem>>, vector<12x256xf32>
    tpu.vector_store %arg40[%c192_966, %c0_967], %1332 {strides = array<i32>} : memref<216x256xf32, #tpu.memory_space<vmem>>, vector<12x256xf32>,
    %c0_968 = arith.constant 0 : index
    %c34_969 = arith.constant 34 : index
    %1334 = vector.load %arg39[%c0_968, %c34_969] : memref<12x290xf32, #tpu.memory_space<vmem>>, vector<12x256xf32>
    %1335 = vector.broadcast %1269 : vector<1x256xf32> to vector<12x256xf32>
    %1336 = arith.mulf %1334, %1335 : vector<12x256xf32>
    %c204_970 = arith.constant 204 : index
    %c0_971 = arith.constant 0 : index
    %1337 = vector.load %arg40[%c204_970, %c0_971] : memref<216x256xf32, #tpu.memory_space<vmem>>, vector<12x256xf32>
    tpu.vector_store %arg40[%c204_970, %c0_971], %1336 {strides = array<i32>} : memref<216x256xf32, #tpu.memory_space<vmem>>, vector<12x256xf32>,
    %c0_972 = arith.constant 0 : index
    %c0_973 = arith.constant 0 : index
    %1338 = vector.load %arg29[%c0_972, %c0_973] : memref<3x216xf32, #tpu.memory_space<vmem>>, vector<3x216xf32>
    %c0_974 = arith.constant 0 : index
    %c0_975 = arith.constant 0 : index
    %1339 = vector.load %arg40[%c0_974, %c0_975] : memref<216x256xf32, #tpu.memory_space<vmem>>, vector<216x256xf32>
    %cst_976 = arith.constant dense<0.000000e+00> : vector<3x256xf32>
    %1340 = tpu.matmul %1338, %1339, %cst_976 {dimension_numbers = #tpu.dot_dimension_numbers<[1], [0], [0], [1], [0, 0, 1, 1], [], []>} : vector<3x216xf32>, vector<216x256xf32>, vector<3x256xf32> -> vector<3x256xf32>
    %c0_977 = arith.constant 0 : index
    %c0_978 = arith.constant 0 : index
    %1341 = vector.load %arg30[%c0_977, %c0_978] : memref<3x1xf32, #tpu.memory_space<vmem>>, vector<3x1xf32>
    %1342 = vector.broadcast %1341 : vector<3x1xf32> to vector<3x256xf32>
    %1343 = arith.mulf %1340, %1342 : vector<3x256xf32>
    %c0_979 = arith.constant 0 : index
    %c0_980 = arith.constant 0 : index
    %1344 = vector.load %arg31[%c0_979, %c0_980] : memref<3x1xf32, #tpu.memory_space<vmem>>, vector<3x1xf32>
    %1345 = vector.broadcast %1344 : vector<3x1xf32> to vector<3x256xf32>
    %1346 = arith.addf %1343, %1345 : vector<3x256xf32>
    %1347 = math.exp %1346 : vector<3x256xf32>
    %cst_981 = arith.constant 1.000000e+00 : f32
    %1348 = vector.broadcast %cst_981 : f32 to vector<3x256xf32>
    %1349 = arith.addf %1348, %1347 : vector<3x256xf32>
    %1350 = math.log %1349 : vector<3x256xf32>
    %1351 = math.tanh %1350 : vector<3x256xf32>
    %1352 = arith.mulf %1346, %1351 : vector<3x256xf32>
    %1353 = arith.addf %1352, %121 : vector<3x256xf32>
    %c0_982 = arith.constant 0 : index
    %c0_983 = arith.constant 0 : index
    %c0_984 = arith.constant 0 : index
    %1354 = vector.load %arg38[%c0_982, %c0_983, %c0_984] : memref<1x3x256xf32, #tpu.memory_space<vmem>>, vector<1x3x256xf32>
    %1355 = vector.shape_cast %1354 : vector<1x3x256xf32> to vector<3x256xf32>
    %1356 = vector.shape_cast %1353 : vector<3x256xf32> to vector<1x3x256xf32>
    tpu.vector_store %arg38[%c0_982, %c0_983, %c0_984], %1356 {strides = array<i32>} : memref<1x3x256xf32, #tpu.memory_space<vmem>>, vector<1x3x256xf32>,
    return
  }
  func.func @transform_0(%arg0: i32) -> (i32, i32, i32) {
    %c0_i32 = arith.constant 0 : i32
    %c0_i32_0 = arith.constant 0 : i32
    %c0_i32_1 = arith.constant 0 : i32
    return %arg0, %c0_i32, %c0_i32_0 : i32, i32, i32
  }
  func.func @transform_1(%arg0: i32) -> (i32, i32) {
    %c0_i32 = arith.constant 0 : i32
    %c0_i32_0 = arith.constant 0 : i32
    %c0_i32_1 = arith.constant 0 : i32
    return %c0_i32, %c0_i32_0 : i32, i32
  }
  func.func @transform_2(%arg0: i32) -> (i32, i32) {
    %c0_i32 = arith.constant 0 : i32
    %c0_i32_0 = arith.constant 0 : i32
    %c0_i32_1 = arith.constant 0 : i32
    return %c0_i32, %c0_i32_0 : i32, i32
  }
  func.func @transform_3(%arg0: i32) -> (i32, i32) {
    %c0_i32 = arith.constant 0 : i32
    %c0_i32_0 = arith.constant 0 : i32
    %c0_i32_1 = arith.constant 0 : i32
    return %c0_i32, %c0_i32_0 : i32, i32
  }
  func.func @transform_4(%arg0: i32) -> (i32, i32) {
    %c0_i32 = arith.constant 0 : i32
    %c0_i32_0 = arith.constant 0 : i32
    %c0_i32_1 = arith.constant 0 : i32
    return %c0_i32, %c0_i32_0 : i32, i32
  }
  func.func @transform_5(%arg0: i32) -> (i32, i32) {
    %c0_i32 = arith.constant 0 : i32
    %c0_i32_0 = arith.constant 0 : i32
    %c0_i32_1 = arith.constant 0 : i32
    return %c0_i32, %c0_i32_0 : i32, i32
  }
  func.func @transform_6(%arg0: i32) -> (i32, i32) {
    %c0_i32 = arith.constant 0 : i32
    %c0_i32_0 = arith.constant 0 : i32
    %c0_i32_1 = arith.constant 0 : i32
    return %c0_i32, %c0_i32_0 : i32, i32
  }
  func.func @transform_7(%arg0: i32) -> (i32, i32) {
    %c0_i32 = arith.constant 0 : i32
    %c0_i32_0 = arith.constant 0 : i32
    %c0_i32_1 = arith.constant 0 : i32
    return %c0_i32, %c0_i32_0 : i32, i32
  }
  func.func @transform_8(%arg0: i32) -> (i32, i32) {
    %c0_i32 = arith.constant 0 : i32
    %c0_i32_0 = arith.constant 0 : i32
    %c0_i32_1 = arith.constant 0 : i32
    return %c0_i32, %c0_i32_0 : i32, i32
  }
  func.func @transform_9(%arg0: i32) -> (i32, i32) {
    %c0_i32 = arith.constant 0 : i32
    %c0_i32_0 = arith.constant 0 : i32
    %c0_i32_1 = arith.constant 0 : i32
    return %c0_i32, %c0_i32_0 : i32, i32
  }
  func.func @transform_10(%arg0: i32) -> (i32, i32) {
    %c0_i32 = arith.constant 0 : i32
    %c0_i32_0 = arith.constant 0 : i32
    %c0_i32_1 = arith.constant 0 : i32
    return %c0_i32, %c0_i32_0 : i32, i32
  }
  func.func @transform_11(%arg0: i32) -> (i32, i32) {
    %c0_i32 = arith.constant 0 : i32
    %c0_i32_0 = arith.constant 0 : i32
    %c0_i32_1 = arith.constant 0 : i32
    return %c0_i32, %c0_i32_0 : i32, i32
  }
  func.func @transform_12(%arg0: i32) -> (i32, i32) {
    %c0_i32 = arith.constant 0 : i32
    %c0_i32_0 = arith.constant 0 : i32
    %c0_i32_1 = arith.constant 0 : i32
    return %c0_i32, %c0_i32_0 : i32, i32
  }
  func.func @transform_13(%arg0: i32) -> (i32, i32) {
    %c0_i32 = arith.constant 0 : i32
    %c0_i32_0 = arith.constant 0 : i32
    %c0_i32_1 = arith.constant 0 : i32
    return %c0_i32, %c0_i32_0 : i32, i32
  }
  func.func @transform_14(%arg0: i32) -> (i32, i32) {
    %c0_i32 = arith.constant 0 : i32
    %c0_i32_0 = arith.constant 0 : i32
    %c0_i32_1 = arith.constant 0 : i32
    return %c0_i32, %c0_i32_0 : i32, i32
  }
  func.func @transform_15(%arg0: i32) -> (i32, i32) {
    %c0_i32 = arith.constant 0 : i32
    %c0_i32_0 = arith.constant 0 : i32
    %c0_i32_1 = arith.constant 0 : i32
    return %c0_i32, %c0_i32_0 : i32, i32
  }
  func.func @transform_16(%arg0: i32) -> (i32, i32) {
    %c0_i32 = arith.constant 0 : i32
    %c0_i32_0 = arith.constant 0 : i32
    %c0_i32_1 = arith.constant 0 : i32
    return %c0_i32, %c0_i32_0 : i32, i32
  }
  func.func @transform_17(%arg0: i32) -> (i32, i32) {
    %c0_i32 = arith.constant 0 : i32
    %c0_i32_0 = arith.constant 0 : i32
    %c0_i32_1 = arith.constant 0 : i32
    return %c0_i32, %c0_i32_0 : i32, i32
  }
  func.func @transform_18(%arg0: i32) -> (i32, i32) {
    %c0_i32 = arith.constant 0 : i32
    %c0_i32_0 = arith.constant 0 : i32
    %c0_i32_1 = arith.constant 0 : i32
    return %c0_i32, %c0_i32_0 : i32, i32
  }
  func.func @transform_19(%arg0: i32) -> (i32, i32) {
    %c0_i32 = arith.constant 0 : i32
    %c0_i32_0 = arith.constant 0 : i32
    %c0_i32_1 = arith.constant 0 : i32
    return %c0_i32, %c0_i32_0 : i32, i32
  }
  func.func @transform_20(%arg0: i32) -> (i32, i32) {
    %c0_i32 = arith.constant 0 : i32
    %c0_i32_0 = arith.constant 0 : i32
    %c0_i32_1 = arith.constant 0 : i32
    return %c0_i32, %c0_i32_0 : i32, i32
  }
  func.func @transform_21(%arg0: i32) -> (i32, i32) {
    %c0_i32 = arith.constant 0 : i32
    %c0_i32_0 = arith.constant 0 : i32
    %c0_i32_1 = arith.constant 0 : i32
    return %c0_i32, %c0_i32_0 : i32, i32
  }
  func.func @transform_22(%arg0: i32) -> (i32, i32) {
    %c0_i32 = arith.constant 0 : i32
    %c0_i32_0 = arith.constant 0 : i32
    %c0_i32_1 = arith.constant 0 : i32
    return %c0_i32, %c0_i32_0 : i32, i32
  }
  func.func @transform_23(%arg0: i32) -> (i32, i32) {
    %c0_i32 = arith.constant 0 : i32
    %c0_i32_0 = arith.constant 0 : i32
    %c0_i32_1 = arith.constant 0 : i32
    return %c0_i32, %c0_i32_0 : i32, i32
  }
  func.func @transform_24(%arg0: i32) -> (i32, i32) {
    %c0_i32 = arith.constant 0 : i32
    %c0_i32_0 = arith.constant 0 : i32
    %c0_i32_1 = arith.constant 0 : i32
    return %c0_i32, %c0_i32_0 : i32, i32
  }
  func.func @transform_25(%arg0: i32) -> (i32, i32) {
    %c0_i32 = arith.constant 0 : i32
    %c0_i32_0 = arith.constant 0 : i32
    %c0_i32_1 = arith.constant 0 : i32
    return %c0_i32, %c0_i32_0 : i32, i32
  }
  func.func @transform_26(%arg0: i32) -> (i32, i32) {
    %c0_i32 = arith.constant 0 : i32
    %c0_i32_0 = arith.constant 0 : i32
    %c0_i32_1 = arith.constant 0 : i32
    return %c0_i32, %c0_i32_0 : i32, i32
  }
  func.func @transform_27(%arg0: i32) -> (i32, i32) {
    %c0_i32 = arith.constant 0 : i32
    %c0_i32_0 = arith.constant 0 : i32
    %c0_i32_1 = arith.constant 0 : i32
    return %c0_i32, %c0_i32_0 : i32, i32
  }
  func.func @transform_28(%arg0: i32) -> (i32, i32) {
    %c0_i32 = arith.constant 0 : i32
    %c0_i32_0 = arith.constant 0 : i32
    %c0_i32_1 = arith.constant 0 : i32
    return %c0_i32, %c0_i32_0 : i32, i32
  }
  func.func @transform_29(%arg0: i32) -> (i32, i32) {
    %c0_i32 = arith.constant 0 : i32
    %c0_i32_0 = arith.constant 0 : i32
    %c0_i32_1 = arith.constant 0 : i32
    return %c0_i32, %c0_i32_0 : i32, i32
  }
  func.func @transform_30(%arg0: i32) -> (i32, i32) {
    %c0_i32 = arith.constant 0 : i32
    %c0_i32_0 = arith.constant 0 : i32
    %c0_i32_1 = arith.constant 0 : i32
    return %c0_i32, %c0_i32_0 : i32, i32
  }
  func.func @transform_31(%arg0: i32) -> (i32, i32) {
    %c0_i32 = arith.constant 0 : i32
    %c0_i32_0 = arith.constant 0 : i32
    %c0_i32_1 = arith.constant 0 : i32
    return %c0_i32, %c0_i32_0 : i32, i32
  }
  func.func @transform_32(%arg0: i32) -> (i32, i32) {
    %c0_i32 = arith.constant 0 : i32
    %c0_i32_0 = arith.constant 0 : i32
    %c0_i32_1 = arith.constant 0 : i32
    return %c0_i32, %c0_i32_0 : i32, i32
  }
  func.func @transform_33(%arg0: i32) -> (i32, i32) {
    %c0_i32 = arith.constant 0 : i32
    %c0_i32_0 = arith.constant 0 : i32
    %c0_i32_1 = arith.constant 0 : i32
    return %c0_i32, %c0_i32_0 : i32, i32
  }
  func.func @transform_34(%arg0: i32) -> (i32, i32) {
    %c0_i32 = arith.constant 0 : i32
    %c0_i32_0 = arith.constant 0 : i32
    %c0_i32_1 = arith.constant 0 : i32
    return %c0_i32, %c0_i32_0 : i32, i32
  }
  func.func @transform_35(%arg0: i32) -> (i32, i32) {
    %c0_i32 = arith.constant 0 : i32
    %c0_i32_0 = arith.constant 0 : i32
    %c0_i32_1 = arith.constant 0 : i32
    return %c0_i32, %c0_i32_0 : i32, i32
  }
  func.func @transform_36(%arg0: i32) -> (i32, i32) {
    %c0_i32 = arith.constant 0 : i32
    %c0_i32_0 = arith.constant 0 : i32
    %c0_i32_1 = arith.constant 0 : i32
    return %c0_i32, %c0_i32_0 : i32, i32
  }
  func.func @transform_37(%arg0: i32) -> (i32, i32, i32) {
    %c0_i32 = arith.constant 0 : i32
    %c0_i32_0 = arith.constant 0 : i32
    %c0_i32_1 = arith.constant 0 : i32
    return %arg0, %c0_i32, %c0_i32_0 : i32, i32, i32
  }
}

</mosaic_0001>

<bundles_post_ra>
// kernel: tpu_custom_call.1
= control target key start
LH: loop header
LB: loop body
LE: loop exit
PB: predicated region body
PF: predicated region fallthrough
CT: control target
= control target key end

     0   :  { %s6000_s6 = smov 1   ;;  %s6001_s10 = smov 2   ;;  %s8236_s0 = inlined_call_operand.smem [shape: u32[38], index: -1, kind: input, shape index: {}] }
   0x1   :  { %s6094_s5 = sld [smem:[%s8236_s0]]   ;;  %s6002_s14 = smov 3  }
   0x2   :  { %s6099_s9 = sld [smem:[%s8236_s0 + %s6000_s6]]   ;;  %s6003_s18 = smov 4  }
   0x3   :  { %s6104_s13 = sld [smem:[%s8236_s0 + %s6001_s10]]   ;;  %s6004_s22 = smov 5  }
   0x4   :  { %s6109_s17 = sld [smem:[%s8236_s0 + %s6002_s14]]   ;;  %s6005_s26 = smov 6  }
   0x5   :  { %s6114_s21 = sld [smem:[%s8236_s0 + %s6003_s18]]   ;;  %s6006_s30 = smov 7  }
   0x6   :  { %s6119_s25 = sld [smem:[%s8236_s0 + %s6004_s22]]   ;;  %s6007_s4 = smov 8  }
   0x7   :  { %8382 = sst [smem:[#allocation4_spill]] %s6094_s5  ;;  %s6008_s10 = smov 9  }
   0x8   :  { %8383 = sst [smem:[#allocation5_spill]] %s6099_s9  ;;  %s6009_s15 = smov 10  }
   0x9   :  { %s6124_s29 = sld [smem:[%s8236_s0 + %s6005_s26]]   ;;  %s6010_s20 = smov 11  }
   0xa   :  { %s6129_s3 = sld [smem:[%s8236_s0 + %s6006_s30]]   ;;  %s6011_s26 = smov 12  }
   0xb   :  { %s6134_s8 = sld [smem:[%s8236_s0 + %s6007_s4]]   ;;  %s6012_s1 = smov 13  }
   0xc   :  { %s6139_s14 = sld [smem:[%s8236_s0 + %s6008_s10]]   ;;  %s6013_s7 = smov 14  }
   0xd   :  { %s6144_s19 = sld [smem:[%s8236_s0 + %s6009_s15]]   ;;  %s6014_s15 = smov 15  }
   0xe   :  { %s6149_s24 = sld [smem:[%s8236_s0 + %s6010_s20]]   ;;  %s6015_s22 = smov 16  }
   0xf   :  { %s6154_s30 = sld [smem:[%s8236_s0 + %s6011_s26]]   ;;  %s6016_s28 = smov 17  }
  0x10   :  { %8384 = sst [smem:[#allocation6_spill]] %s6129_s3 }
  0x11   :  { %8385 = sst [smem:[#allocation7_spill]] %s6134_s8 }
  0x12   :  { %s6159_s6 = sld [smem:[%s8236_s0 + %s6012_s1]]  }
  0x13   :  { %8386 = sst [smem:[#allocation8_spill]] %s6144_s19 }
  0x14   :  { %s6164_s12 = sld [smem:[%s8236_s0 + %s6013_s7]]   ;;  %s6017_s7 = smov 18  }
  0x15   :  { %8387 = sst [smem:[#allocation9_spill]] %s6154_s30 }
  0x16   :  { %s6169_s20 = sld [smem:[%s8236_s0 + %s6014_s15]]   ;;  %s6018_s15 = smov 19  }
  0x17   :  { %s6174_s27 = sld [smem:[%s8236_s0 + %s6015_s22]]   ;;  %s6019_s22 = smov 20  }
  0x18   :  { %8388 = sst [smem:[#allocation10_spill]] %s6159_s6 }
  0x19   :  { %s6179_s4 = sld [smem:[%s8236_s0 + %s6016_s28]]   ;;  %s6020_s28 = smov 21  }
  0x1a   :  { %8389 = sst [smem:[#allocation11_spill]] %s6164_s12 }
  0x1b   :  { %s6184_s6 = sld [smem:[%s8236_s0 + %s6017_s7]]   ;;  %s6021_s7 = smov 22  }
  0x1c   :  { %8390 = sst [smem:[#allocation12_spill]] %s6169_s20 }
  0x1d   :  { %8391 = sst [smem:[#allocation13_spill]] %s6174_s27 }
  0x1e   :  { %s6189_s20 = sld [smem:[%s8236_s0 + %s6018_s15]]   ;;  %s6022_s15 = smov 23  }
  0x1f   :  { %8392 = sst [smem:[#allocation14_spill]] %s6179_s4 }
  0x20   :  { %s6194_s27 = sld [smem:[%s8236_s0 + %s6019_s22]]   ;;  %s6023_s22 = smov 24  }
  0x21   :  { %8393 = sst [smem:[#allocation15_spill]] %s6184_s6 }
  0x22   :  { %s6199_s4 = sld [smem:[%s8236_s0 + %s6020_s28]]   ;;  %s6024_s28 = smov 25  }
  0x23   :  { %s6204_s6 = sld [smem:[%s8236_s0 + %s6021_s7]]   ;;  %s6025_s7 = smov 26  }
  0x24   :  { %8394 = sst [smem:[#allocation16_spill]] %s6189_s20 }
  0x25   :  { %s6209_s20 = sld [smem:[%s8236_s0 + %s6022_s15]]   ;;  %s6026_s15 = smov 27  }
  0x26   :  { %8395 = sst [smem:[#allocation17_spill]] %s6194_s27 }
  0x27   :  { %s6214_s27 = sld [smem:[%s8236_s0 + %s6023_s22]]   ;;  %s6027_s22 = smov 28  }
  0x28   :  { %8396 = sst [smem:[#allocation18_spill]] %s6199_s4 }
  0x29   :  { %8397 = sst [smem:[#allocation19_spill]] %s6204_s6 }
  0x2a   :  { %s6219_s4 = sld [smem:[%s8236_s0 + %s6024_s28]]   ;;  %s6028_s28 = smov 29  }
  0x2b   :  { %8398 = sst [smem:[#allocation20_spill]] %s6209_s20 }
  0x2c   :  { %s6224_s6 = sld [smem:[%s8236_s0 + %s6025_s7]]   ;;  %s6029_s7 = smov 30  }
  0x2d   :  { %8399 = sst [smem:[#allocation21_spill]] %s6214_s27 }
  0x2e   :  { %s6229_s20 = sld [smem:[%s8236_s0 + %s6026_s15]]   ;;  %s6030_s15 = smov 31  }
  0x2f   :  { %s6234_s27 = sld [smem:[%s8236_s0 + %s6027_s22]]   ;;  %s6031_s22 = smov 32  }
  0x30   :  { %8400 = sst [smem:[#allocation22_spill]] %s6219_s4 }
  0x31   :  { %s6239_s4 = sld [smem:[%s8236_s0 + %s6028_s28]]   ;;  %s6032_s28 = smov 33  }
  0x32   :  { %8401 = sst [smem:[#allocation23_spill]] %s6224_s6 }
  0x33   :  { %s6244_s6 = sld [smem:[%s8236_s0 + %s6029_s7]]   ;;  %s6033_s7 = smov 34  }
  0x34   :  { %8402 = sst [smem:[#allocation24_spill]] %s6229_s20 }
  0x35   :  { %s6249_s20 = sld [smem:[%s8236_s0 + %s6030_s15]]   ;;  %s6034_s15 = smov 35  }
  0x36   :  { %s6254_s12 = sld [smem:[%s8236_s0 + %s6031_s22]]   ;;  %s6035_s22 = smov 36  }
  0x37   :  { %8403 = sst [smem:[#allocation25_spill]] %s6239_s4 }
  0x38   :  { %s6259_s4 = sld [smem:[%s8236_s0 + %s6032_s28]]   ;;  %s6036_s28 = smov 37  }
  0x39   :  { %8404 = sst [smem:[#allocation26_spill]] %s6244_s6 }
  0x3a   :  { %s6264_s6 = sld [smem:[%s8236_s0 + %s6033_s7]]   ;;  %s6281_s7 = smov 0  }
  0x3b   :  { %s6269_s19 = sld [smem:[%s8236_s0 + %s6034_s15]]  }
  0x3c   :  { %s6274_s30 = sld [smem:[%s8236_s0 + %s6035_s22]]  }
  0x3e   :  { %8405 = sst [smem:[#allocation27_spill]] %s6259_s4 }
  0x3f   :  { %s6279_s4 = sld [smem:[%s8236_s0 + %s6036_s28]]  }
  0x40   :  { %8406 = sst [smem:[#allocation28_spill]] %s6264_s6 }
  0x41 LB: > { %s8407_s8 = sld [smem:[#allocation7_spill]]  ;;  %s5640_s10 = sadd.s32 4294967295, %s5998_s7   ;;  %s5998_s7 = sphi %s6281_s7, %s85_s7  }
  0x42   : > { %s8408_s3 = sld [smem:[#allocation6_spill]]  ;;  %p5644_p0 = scmp.ge.s32.totalorder %s5998_s7, 1 }
  0x43   : > { %p1025_p1 = scmp.lt.s32.totalorder %s5998_s7, 3 }
  0x45   : > { %p1026_p2 = pnand %p5644_p0, %p1025_p1 }
  0x47   : > { %1029 = sbr.rel (%p1026_p2) target bundleno = 6792 (0x1a88), region = 168 }
  0x4c   : > { %v1136_v0 = vlaneseq  ;;  %s8409_s5 = sld [smem:[#allocation4_spill]]  ;;  %p1117_p3 = scmp.lt.s32.totalorder %s5640_s10, 1  ;;  %v8288_v1 = vmov 0.0   ;;  %v5368_v25 = vld [vmem:[%s6234_s27] sm:$0x77]  ;;  %vm1129_vm8 = vcmask 277504  }
  0x4d   : > { %1127 = vst [vmem:[#allocation2] sm:$0xff] %v8288_v1  ;;  %s6038_s15 = smov 18   ;;  %s6039_s16 = smov 33   ;;  %vm1180_vm9 = vcmask 1042568   ;;  %vm8312_vm10 = vcmask 138240   ;;  %vm1183_vm11 = vcmask 133120  }
  0x4e   : > { %v6290_v2 = vand.u32 127, %v1136_v0  ;;  %1128 = vst [vmem:[#allocation2 + $0x8] sm:$0xff] %v8288_v1  ;;  %s8617_s10 = smov (!%p1117_p3, %s5640_s10), 1  ;;  %s8338_s18 = smov 17   ;;  %vm1356_vm12 = vcmask 261120   ;;  %vm1274_vm13 = vcmask 130048  }
  0x4f   : > { %1131 = vst [vmem:[#allocation2 + $0x18] sm:$0xf] %v8288_v1  ;;  %s8255_s0 = sshll.u32 %s8617_s10, 3  ;;  %s6041_s22 = smov 32   ;;  %vm1318_vm14 = vcmask 146432   ;;  %vm1392_vm15 = vcmask 269312  }
  0x50   : > { %v1138_v3 = vadd.s32 128, %v6290_v2  ;;  %v1141_v4 = vand.u32 15, %v6290_v2  ;;  %1132 = vst [vmem:[#allocation2 + $0x20] sm:$0xf] %v8288_v1  ;;  %v1139_v5 = vshra.s32 %v6290_v2, 4  ;;  %s6042_s23 = smov 34  }
  0x51   : > { %s6043_s26 = smov 2   ;;  %s6044_s28 = smov 16   ;;  %1130 = vst.msk [vmem:[#allocation2 + $0x10] sm:$0xff] %vm1129_vm8, %v8288_v1 }
  0x52   : > { %s1121_s11 = scalar_lea.vmem %s8409_s5, %s8255_s0  ;;  %v1142_v6 = vand.u32 15, %v1138_v3  ;;  %vm1153_vm0 = vcmp.lt.s32.totalorder %v1141_v4, 15  ;;  %vm1159_vm1 = vcmp.lt.s32.totalorder %v1139_v5, 15  ;;  %v1140_v9 = vshra.s32 %v1138_v3, 4  ;;  %s6045_s1 = smov 1  }
  0x53   : > { %v1135_v7 = vld [vmem:[%s1121_s11] sm:$0x77]  ;;  %v1155_v8 = vsel %vm1153_vm0, 1.0, %v8288_v1  ;;  %vm1147_vm3 = vcmp.ge.s32.totalorder %v1141_v4, 1  ;;  %v1161_v10 = vsel %vm1159_vm1, 1.0, %v8288_v1  ;;  %vm1143_vm5 = vcmp.ge.s32.totalorder %v1139_v5, 1 }
  0x54   : > { %1168 = vst [vmem:[#allocation1] ss:$2 sm:$0xff] %v1135_v7  ;;  %vm1154_vm2 = vcmp.lt.s32.totalorder %v1142_v6, 15  ;;  %vm1160_vm4 = vcmp.lt.s32.totalorder %v1140_v9, 15  ;;  %vm1148_vm6 = vcmp.ge.s32.totalorder %v1142_v6, 1  ;;  %v1149_v14 = vsel %vm1147_vm3, 1.0, %v8288_v1 }
  0x55   : > { %v1156_v11 = vsel %vm1154_vm2, 1.0, %v8288_v1  ;;  %v1162_v13 = vsel %vm1160_vm4, 1.0, %v8288_v1  ;;  %v1145_v16 = vsel %vm1143_vm5, 1.0, %v8288_v1  ;;  %vm1144_vm7 = vcmp.ge.s32.totalorder %v1140_v9, 1  ;;  %s8263_s2 = smov 94   ;;  %s8341_s11 = smov 110  }
  0x56   : > { %v5790_v12 = vpack.i.bf16 %v1156_v11, %v1155_v8  ;;  %v5795_v15 = vpack.i.bf16 %v1162_v13, %v1161_v10  ;;  %v6311_v17 = vmul.f32 %v1149_v14, %v1145_v16  ;;  %v1150_v18 = vsel %vm1148_vm6, 1.0, %v8288_v1  ;;  %s8428_s9 = sld [smem:[#allocation5_spill]]  ;;  %s6054_s0 = smov 26  }
  0x57   : > { %v1146_v19 = vsel %vm1144_vm7, 1.0, %v8288_v1  ;;  %v1163_v23 = vmul.f32 %v1161_v10, %v1149_v14  ;;  %v1164_v24 = vmul.f32 %v1162_v13, %v1150_v18  ;;  %v1166_v28 = vmul.f32 %v1162_v13, %v1156_v11  ;;  %s8453_s5 = sld [smem:[#allocation15_spill]] }
  0x58   : > { %5791 = vrot.lane.b32.xlu1 %v5790_v12, %s6038_s15  ;;  %5796 = vrot.lane.b32.xlu2 %v5795_v15, %s6039_s16  ;;  %v6315_v22 = vmul.f32 %v1150_v18, %v1146_v19  ;;  %v1157_v29 = vmul.f32 %v1155_v8, %v1145_v16  ;;  %v1165_v30 = vmul.f32 %v1161_v10, %v1155_v8  ;;  %s8258_s16 = smov 95   ;;  %vm1236_vm0 = vcmask 15360   ;;  %s8462_s6 = sld [smem:[#allocation28_spill]] }
  0x59   : > { %v5800_v31 = vpack.i.bf16 %v1150_v18, %v1149_v14  ;;  %v5805_v32 = vpack.i.bf16 %v1146_v19, %v1145_v16  ;;  %v1158_v33 = vmul.f32 %v1156_v11, %v1146_v19  ;;  %vm1200_vm1 = vcmask 7168  }
  0x5a   : > { %vm8273_vm2 = vcmask 769024   ;;  %vm8276_vm3 = vcmask 785408   ;;  %vm1464_vm4 = vcmask 1042432   ;;  %vm8268_vm5 = vcmask 916480  }
  0x5b   : > { %v1169_v20 = vld.sshfl [vmem:[#allocation1] sm:$0xff pattern:$0x75316420]  ;;  %v1170_v21 = vld.sshfl [vmem:[#allocation1 + $0x8] sm:$0xff pattern:$0x75316420] }
  0x5c   : > { %1171 = vrot.lane.b32.xlu0 %v1169_v20, %s8338_s18  ;;  %1302 = vst [vmem:[#allocation1 + $0x1] ss:$2 sm:$0xff] %v1135_v7  ;;  %vm8270_vm6 = vcmask 900096   ;;  %vm8262_vm7 = vcmask 777216  }
  0x60   : > { %1352 = vrot.lane.b32.xlu1 %v1163_v23, %s6041_s22  ;;  %1354 = vrot.lane.b32.xlu2 %v1164_v24, %s6041_s22  ;;  %s8260_s22 = smov 96  }
  0x63   : > { %v1303_v26 = vld.sshfl [vmem:[#allocation1] sm:$0xff pattern:$0x75316420]  ;;  %v1304_v27 = vld.sshfl [vmem:[#allocation1 + $0x8] sm:$0xff pattern:$0x75316420] }
  0x64   : > { %1173 = vrot.lane.b32.xlu0 %v1170_v21, %s8338_s18  ;;  %1307 = vst [vmem:[#allocation3 + $0x10] sm:$0x70] %v1303_v26 }
  0x65   : > { %1308 = vst [vmem:[#allocation3 + $0x18] sm:$0x70] %v1304_v27 }
  0x66   : > { %5424 = vst [vmem:[#allocation1] ss:$2 sm:$0xff] %v5368_v25 }
  0x68   : > { %1426 = vrot.lane.b32.xlu1 %v1166_v28, %s6042_s23  ;;  %1232 = vrot.lane.b32.xlu2 %v1157_v29, %s6043_s26 }
  0x6c   : > { %1424 = vrot.lane.b32.xlu0 %v1165_v30, %s6042_s23  ;;  %s8256_s23 = smov 126  }
  0x70   : > { %5801 = vrot.lane.b32.xlu1 %v5800_v31, %s6044_s28  ;;  %5806 = vrot.lane.b32.xlu2 %v5805_v32, %s6045_s1  ;;  %s8298_s1 = smov 112  }
  0x74   : > { %1234 = vrot.lane.b32.xlu0 %v1158_v33, %s6043_s26  ;;  %s8314_s26 = smov 127  }
  0xb2   : > { %v6323_v34 = vpop.permute.xlu2 %5796 }
  0xb3   : > { %v6342_v48 = vunpack.i.l.bf16 %v6323_v34  ;;  %v6388_v28 = vunpack.i.h.bf16 %v6323_v34 }
  0xb5   : > { %8414 = vst [vmem:[#allocation33_spill] sm:$0xff] %v6342_v48 }
  0xba   : > { %v6328_v37 = vpop.permute.xlu2 %1354 }
  0xbb   : > { %8410 = vst [vmem:[#allocation29_spill] sm:$0xff] %v6328_v37 }
  0xc2   : > { %v6335_v43 = vpop.permute.xlu2 %1232 }
  0xc3   : > { %8412 = vst [vmem:[#allocation31_spill] sm:$0xff] %v6335_v43 }
  0xca   : > { %v6325_v35 = vpop.permute.xlu1 %5791  ;;  %v5807_v62 = vpop.permute.xlu2 %5806 }
  0xcb   : > { %v6354_v58 = vunpack.i.l.bf16 %v6325_v35  ;;  %v6362_v3 = vunpack.i.l.bf16 %v5807_v62  ;;  %v6373_v20 = vunpack.i.h.bf16 %v6325_v35 }
  0xcd   : > { %8416 = vst [vmem:[#allocation35_spill] sm:$0xff] %v6354_v58 }
  0xce   : > { %v1172_v36 = vpop.permute.xlu0 %1171  ;;  %8417 = vst [vmem:[#allocation36_spill] sm:$0xff] %v6362_v3 }
  0xcf   : > { %1181 = vst.msk [vmem:[#allocation2] sm:$0x7] %vm1180_vm9, %v1172_v36 }
  0xd2   : > { %v6330_v38 = vpop.permute.xlu1 %1352 }
  0xd3   : > { %8411 = vst [vmem:[#allocation30_spill] sm:$0xff] %v6330_v38  ;;  %v6380_v23 = vsel %vm1356_vm12, %v6330_v38, %v6328_v37  ;;  %vm8267_vm12 = vcmask 1039360  }
  0xd4   : > { %8419 = vst [vmem:[#allocation38_spill] sm:$0xff] %v6380_v23 }
  0xd6   : > { %v1185_v39 = vld [vmem:[#allocation2] sm:$0x7]  ;;  %v1174_v40 = vpop.permute.xlu0 %1173 }
  0xd7   : > { %v1187_v41 = vmul.f32 %v1185_v39, %v6311_v17  ;;  %v1176_v42 = vsel %vm8312_vm10, %v1172_v36, %v1174_v40  ;;  %1184 = vst.msk [vmem:[#allocation2 + $0x10] sm:$0x7] %vm1183_vm11, %v1174_v40  ;;  %v1419_v47 = vld [vmem:[#allocation2] sm:$0x7]  ;;  %v6400_v36 = vsel %vm1318_vm14, %v6354_v58, %v6373_v20  ;;  %vm1460_vm14 = vcmask 220160  }
  0xd8   : > { %1182 = vst [vmem:[#allocation2 + $0x8] sm:$0x7] %v1176_v42  ;;  %v1309_v55 = vld [vmem:[#allocation2] sm:$0x7] }
  0xd9   : > { %1189 = vst [vmem:[#allocation3] sm:$0x7] %v1187_v41  ;;  %v1383_v56 = vld [vmem:[#allocation2] sm:$0x7]  ;;  %v1323_v60 = vmul.f32 %v6354_v58, %v1309_v55  ;;  %v6406_v41 = vsel %vm1392_vm15, %v6342_v48, %v6388_v28  ;;  %vm8311_vm15 = vcmask 1043592  }
  0xda   : > { %v6337_v44 = vpop.permute.xlu1 %1426  ;;  %v1347_v59 = vld [vmem:[#allocation2] sm:$0x7]  ;;  %v1397_v61 = vmul.f32 %v6342_v48, %v1383_v56  ;;  %8422 = vst [vmem:[#allocation41_spill] sm:$0xff] %v6400_v36 }
  0xdb   : > { %8413 = vst [vmem:[#allocation32_spill] sm:$0xff] %v6337_v44  ;;  %v1361_v63 = vmul.f32 %v6330_v38, %v1347_v59  ;;  %v1329_v4 = vrot.slane %v1323_v60, 1  ;;  %v1227_v8 = vld [vmem:[#allocation2] sm:$0x7] }
  0xdc   : > { %v1403_v5 = vrot.slane %v1397_v61, 3  ;;  %v1191_v9 = vld [vmem:[#allocation2] sm:$0x7]  ;;  %v1241_v10 = vmul.f32 %v6335_v43, %v1227_v8  ;;  %8423 = vst [vmem:[#allocation42_spill] sm:$0xff] %v6406_v41 }
  0xdd   : > { %v1367_v7 = vrot.slane %v1361_v63, 6  ;;  %v1205_v11 = vmul.f32 %v6362_v3, %v1191_v9  ;;  %v1265_v12 = vld [vmem:[#allocation2] sm:$0x7] }
  0xde   : > { %v6339_v45 = vpop.permute.xlu0 %1424  ;;  %v1421_v46 = vld [vmem:[#allocation2 + $0x10] sm:$0x7]  ;;  %v1247_v14 = vrot.slane %v1241_v10, 2 }
  0xdf   : > { %v1186_v49 = vld [vmem:[#allocation2 + $0x8] sm:$0x7]  ;;  %v1434_v50 = vmul.f32 %v6337_v44, %v1421_v46  ;;  %v1432_v51 = vmul.f32 %v6339_v45, %v1419_v47  ;;  %v6349_v53 = vsel %vm1129_vm8, %v6339_v45, %v6337_v44  ;;  %v1211_v15 = vrot.slane %v1205_v11, 5  ;;  %v1311_v19 = vld [vmem:[#allocation2 + $0x10] sm:$0x7] }
  0xe0   : > { %v1420_v52 = vld [vmem:[#allocation2 + $0x8] sm:$0x7]  ;;  %8415 = vst [vmem:[#allocation34_spill] sm:$0xff] %v6349_v53  ;;  %v1188_v57 = vmul.f32 %v1186_v49, %v6315_v22  ;;  %v1349_v21 = vld [vmem:[#allocation2 + $0x10] sm:$0x7]  ;;  %v1325_v25 = vmul.f32 %v6373_v20, %v1311_v19  ;;  %v6409_v46 = vunpack.i.h.bf16 %v5807_v62  ;;  %vm8269_vm8 = vcmask 1031168  }
  0xe1   : > { %v1433_v54 = vmul.f32 %v6349_v53, %v1420_v52  ;;  %1442 = vrot.lane.b32.xlu2 %v1434_v50, %s8263_s2  ;;  %1438 = vrot.lane.b32.xlu0 %v1432_v51, %s8263_s2  ;;  %v1348_v18 = vld [vmem:[#allocation2 + $0x8] sm:$0x7]  ;;  %v1363_v27 = vmul.f32 %v6328_v37, %v1349_v21  ;;  %v1385_v52 = vld [vmem:[#allocation2 + $0x10] sm:$0x7] }
  0xe2   : > { %1190 = vst [vmem:[#allocation3 + $0x8] sm:$0x7] %v1188_v57  ;;  %v5802_v0 = vpop.permute.xlu1 %5801  ;;  %v1362_v24 = vmul.f32 %v6380_v23, %v1348_v18  ;;  %v1331_v30 = vrot.slane %v1325_v25, 1  ;;  %v1310_v33 = vld [vmem:[#allocation2 + $0x8] sm:$0x7]  ;;  %v6421_v56 = vsel %vm1200_vm1, %v6362_v3, %v6409_v46  ;;  %v1399_v59 = vmul.f32 %v6388_v28, %v1385_v52 }
  0xe3   : > { %1440 = vrot.lane.b32.xlu1 %v1433_v54, %s8263_s2  ;;  %v6364_v6 = vunpack.i.l.bf16 %v5802_v0  ;;  %v6384_v26 = vunpack.i.h.bf16 %v5802_v0  ;;  %v1369_v31 = vrot.slane %v1363_v27, 6  ;;  %v1384_v35 = vld [vmem:[#allocation2 + $0x8] sm:$0x7]  ;;  %v1324_v40 = vmul.f32 %v6400_v36, %v1310_v33  ;;  %8424 = vst [vmem:[#allocation43_spill] sm:$0xff] %v6409_v46  ;;  %v1267_v9 = vld [vmem:[#allocation2 + $0x10] sm:$0x7] }
  0xe4   : > { %v1368_v29 = vrot.slane %v1362_v24, 6  ;;  %v1266_v34 = vld [vmem:[#allocation2 + $0x8] sm:$0x7]  ;;  %v1398_v42 = vmul.f32 %v6406_v41, %v1384_v35  ;;  %8427 = vst [vmem:[#allocation46_spill] sm:$0xff] %v6421_v56  ;;  %v1405_v62 = vrot.slane %v1399_v59, 3  ;;  %vm8313_vm1 = vcmask 134144  }
  0xe5   : > { %8418 = vst [vmem:[#allocation37_spill] sm:$0xff] %v6364_v6  ;;  %v1279_v13 = vmul.f32 %v6364_v6, %v1265_v12  ;;  %v6393_v32 = vsel %vm1274_vm13, %v6364_v6, %v6384_v26  ;;  %v1330_v50 = vrot.slane %v1324_v40, 1  ;;  %v1192_v55 = vld [vmem:[#allocation2 + $0x8] sm:$0x7]  ;;  %v1281_v10 = vmul.f32 %v6384_v26, %v1267_v9  ;;  %v1519_v52 = vld [vmem:[%s6109_s17] sm:$0x7] }
  0xe6   : > { %8420 = vst [vmem:[#allocation39_spill] sm:$0xff] %v6384_v26  ;;  %v1280_v39 = vmul.f32 %v6393_v32, %v1266_v34  ;;  %v6411_v47 = vpop.permute.xlu0 %1234  ;;  %v1404_v51 = vrot.slane %v1398_v42, 3  ;;  %v1228_v57 = vld [vmem:[#allocation2 + $0x8] sm:$0x7]  ;;  %v1206_v61 = vmul.f32 %v6421_v56, %v1192_v55 }
  0xe7   : > { %v1285_v16 = vrot.slane %v1279_v13, 7  ;;  %8421 = vst [vmem:[#allocation40_spill] sm:$0xff] %v6393_v32  ;;  %v6415_v54 = vsel %vm1236_vm0, %v6335_v43, %v6411_v47  ;;  %v1287_v13 = vrot.slane %v1281_v10, 7  ;;  %vm8316_vm0 = vcmask 1047688  }
  0xe8   : > { %8425 = vst [vmem:[#allocation44_spill] sm:$0xff] %v6411_v47  ;;  %v1286_v49 = vrot.slane %v1280_v39, 7  ;;  %v1242_v60 = vmul.f32 %v6415_v54, %v1228_v57  ;;  %v1212_v0 = vrot.slane %v1206_v61, 5  ;;  %v6053_v57 = vmov 0  }
  0xe9   : > { %1332 = vrot.lane.b32.xlu2 %v1329_v4, %s8341_s11  ;;  %1406 = vrot.lane.b32.xlu0 %v1403_v5, %s8258_s16  ;;  %8426 = vst [vmem:[#allocation45_spill] sm:$0xff] %v6415_v54  ;;  %v1193_v4 = vld [vmem:[#allocation2 + $0x10] sm:$0x7] }
  0xea   : > { %v1248_v63 = vrot.slane %v1242_v60, 2  ;;  %v1229_v5 = vld [vmem:[#allocation2 + $0x10] sm:$0x7]  ;;  %5810 = vset.pattern.permute.xlu0 %v6053_v57  ;;  %5811 = vset.pattern.permute.xlu1 %v6053_v57 }
  0xeb   : > { %1370 = vrot.lane.b32.xlu1 %v1367_v7, %s8260_s22  ;;  %v1207_v7 = vmul.f32 %v6409_v46, %v1193_v4  ;;  %v1243_v8 = vmul.f32 %v6411_v47, %v1229_v5  ;;  %5812 = vset.pattern.permute.xlu2 %v6053_v57 }
  0xed   : > { %v1213_v11 = vrot.slane %v1207_v7, 5  ;;  %v1249_v12 = vrot.slane %v1243_v8, 2 }
  0xf1   : > { %1250 = vrot.lane.b32.xlu2 %v1247_v14, %s8256_s23  ;;  %1214 = vrot.lane.b32.xlu0 %v1211_v15, %s8314_s26 }
  0xf3   : > { %1288 = vrot.lane.b32.xlu1 %v1285_v16, %s8298_s1 }
  0xf9   : > { %1372 = vrot.lane.b32.xlu2 %v1368_v29, %s8260_s22  ;;  %1336 = vrot.lane.b32.xlu0 %v1331_v30, %s8341_s11 }
  0xfb   : > { %1374 = vrot.lane.b32.xlu1 %v1369_v31, %s8260_s22 }
 0x101   : > { %1290 = vrot.lane.b32.xlu2 %v1286_v49, %s8298_s1  ;;  %1334 = vrot.lane.b32.xlu0 %v1330_v50, %s8341_s11 }
 0x103   : > { %1408 = vrot.lane.b32.xlu1 %v1404_v51, %s8258_s16  ;;  %v1511_v51 = vld [vmem:[%s6104_s13] sm:$0x7] }
 0x109   : > { %1410 = vrot.lane.b32.xlu2 %v1405_v62, %s8258_s16  ;;  %1252 = vrot.lane.b32.xlu0 %v1248_v63, %s8256_s23 }
 0x10b   : > { %1216 = vrot.lane.b32.xlu1 %v1212_v0, %s8314_s26 }
 0x111   : > { %1218 = vrot.lane.b32.xlu2 %v1213_v11, %s8314_s26  ;;  %1254 = vrot.lane.b32.xlu0 %v1249_v12, %s8256_s23 }
 0x113   : > { %1292 = vrot.lane.b32.xlu1 %v1287_v13, %s8298_s1 }
 0x119   : > { %1514 = vperm.xlu0 %5810, %v1511_v51  }
 0x11b   : > { %1522 = vperm.xlu1 %5811, %v1519_v52  }
 0x13b   : > { %v1443_v14 = vpop.permute.xlu2 %1442 }
 0x143   : > { %v1333_v15 = vpop.permute.xlu2 %1332 }
 0x14b   : > { %v1251_v16 = vpop.permute.xlu2 %1250 }
 0x153   : > { %v1439_v18 = vpop.permute.xlu0 %1438  ;;  %v1373_v25 = vpop.permute.xlu2 %1372 }
 0x155   : > { %v1441_v19 = vpop.permute.xlu1 %1440 }
 0x156   : > { %v1445_v21 = vsel %vm8273_vm2, %v1439_v18, %v1441_v19  ;;  %v1446_v24 = vsel %vm8273_vm2, %v1441_v19, %v1443_v14  ;;  %v1451_v18 = vld [vmem:[%s8428_s9] sm:$0x7]  ;;  %s6085_s9 = smov 117  }
 0x157   : > { %1449 = vst [vmem:[#allocation3 + $0x30] sm:$0x7] %v1445_v21 }
 0x158   : > { %1450 = vst [vmem:[#allocation3 + $0x38] sm:$0x7] %v1446_v24 }
 0x15b   : > { %v1407_v27 = vpop.permute.xlu0 %1406  ;;  %v1291_v35 = vpop.permute.xlu2 %1290 }
 0x15d   : > { %v1371_v29 = vpop.permute.xlu1 %1370 }
 0x15e   : > { %v1377_v30 = vsel %vm8276_vm3, %v1371_v29, %v1373_v25  ;;  %v1458_v31 = vld [vmem:[#allocation3 + $0x30] sm:$0x7] }
 0x15f   : > { %1381 = vst [vmem:[#allocation3 + $0x20] sm:$0x1c] %v1377_v30  ;;  %5649 = vmatpush.msk.msra.mxu1 %vm1464_vm4, %v1458_v31  ;;  %v1459_v19 = vld [vmem:[#allocation3 + $0x38] sm:$0x7] }
 0x163   : > { %v1215_v33 = vpop.permute.xlu0 %1214  ;;  %v1411_v50 = vpop.permute.xlu2 %1410 }
 0x165   : > { %v1289_v34 = vpop.permute.xlu1 %1288 }
 0x166   : > { %v1295_v39 = vsel %vm8268_vm5, %v1289_v34, %v1291_v35 }
 0x167   : > { %1299 = vst [vmem:[#allocation3 + $0x10] sm:$0xe] %v1295_v39 }
 0x16b   : > { %v1337_v40 = vpop.permute.xlu0 %1336  ;;  %v1219_v4 = vpop.permute.xlu2 %1218 }
 0x16d   : > { %v1375_v42 = vpop.permute.xlu1 %1374 }
 0x16e   : > { %v1378_v49 = vsel %vm8276_vm3, %v1373_v25, %v1375_v42 }
 0x16f   : > { %1382 = vst [vmem:[#allocation3 + $0x28] sm:$0x1c] %v1378_v49 }
 0x173   : > { %v1335_v55 = vpop.permute.xlu0 %1334 }
 0x174   : > { %v1339_v59 = vsel %vm8270_vm6, %v1333_v15, %v1335_v55  ;;  %v1340_v60 = vsel %vm8270_vm6, %v1335_v55, %v1337_v40 }
 0x175   : > { %v1409_v61 = vpop.permute.xlu1 %1408  ;;  %1343 = vst [vmem:[#allocation3 + $0x10] sm:$0x80] %v1339_v59 }
 0x176   : > { %1344 = vst [vmem:[#allocation3 + $0x18] sm:$0x80] %v1340_v60  ;;  %v1413_v62 = vsel %vm8262_vm7, %v1407_v27, %v1409_v61  ;;  %v1414_v63 = vsel %vm8262_vm7, %v1409_v61, %v1411_v50 }
 0x177   : > { %1345 = vst [vmem:[#allocation3 + $0x20] sm:$0x3] %v1339_v59 }
 0x178   : > { %1346 = vst [vmem:[#allocation3 + $0x28] sm:$0x3] %v1340_v60 }
 0x179   : > { %1417 = vst [vmem:[#allocation3 + $0x20] sm:$0xe0] %v1413_v62 }
 0x17a   : > { %1418 = vst [vmem:[#allocation3 + $0x28] sm:$0xe0] %v1414_v63 }
 0x17b   : > { %v1253_v0 = vpop.permute.xlu0 %1252 }
 0x17c   : > { %v1257_v5 = vsel %vm8269_vm8, %v1251_v16, %v1253_v0 }
 0x17d   : > { %v1217_v7 = vpop.permute.xlu1 %1216  ;;  %1261 = vst [vmem:[#allocation3] sm:$0xc0] %v1257_v5 }
 0x17e   : > { %v1221_v8 = vsel %vm8267_vm12, %v1215_v33, %v1217_v7  ;;  %v1222_v9 = vsel %vm8267_vm12, %v1217_v7, %v1219_v4  ;;  %1263 = vst [vmem:[#allocation3 + $0x10] sm:$0x1] %v1257_v5 }
 0x17f   : > { %1225 = vst [vmem:[#allocation3] sm:$0x38] %v1221_v8 }
 0x180   : > { %1226 = vst [vmem:[#allocation3 + $0x8] sm:$0x38] %v1222_v9  ;;  %v1456_v10 = vld [vmem:[#allocation3 + $0x20] sm:$0xff] }
 0x181   : > { %1484 = vmatpush.msra.mxu1 %v1456_v10  ;;  %v1457_v21 = vld [vmem:[#allocation3 + $0x28] sm:$0xff] }
 0x183   : > { %v1255_v11 = vpop.permute.xlu0 %1254 }
 0x184   : > { %v1258_v12 = vsel %vm8269_vm8, %v1253_v0, %v1255_v11 }
 0x185   : > { %v1293_v13 = vpop.permute.xlu1 %1292  ;;  %v1454_v14 = vld [vmem:[#allocation3 + $0x10] sm:$0xff]  ;;  %1262 = vst [vmem:[#allocation3 + $0x8] sm:$0xc0] %v1258_v12 }
 0x186   : > { %v1296_v15 = vsel %vm8268_vm5, %v1291_v35, %v1293_v13  ;;  %1264 = vst [vmem:[#allocation3 + $0x18] sm:$0x1] %v1258_v12  ;;  %1485 = vmatpush.msra.mxu1 %v1454_v14  ;;  %v1452_v16 = vld [vmem:[#allocation3] sm:$0xff] }
 0x187   : > { %1300 = vst [vmem:[#allocation3 + $0x18] sm:$0xe] %v1296_v15 }
 0x188   : > { %1486 = vmatpush.msra.mxu1 %v1452_v16 }
 0x189   : > { %5650 = vmatmul.msk.f32.vlgmr.msra.gmra.mxu1 %vm1460_vm14, %v1451_v18 }
 0x18a   : > { %5651 = vmatpush.msk.msrb.mxu1 %vm1464_vm4, %v1459_v19 }
 0x18b   : > { %v1515_v27 = vpop.permute.xlu0 %1514 }
 0x18c   : > { %1504 = vmatpush.msrb.mxu1 %v1457_v21  ;;  %v1453_v25 = vld [vmem:[#allocation3 + $0x8] sm:$0xff] }
 0x18d   : > { %v1523_v30 = vpop.permute.xlu1 %1522 }
 0x18e   : > { %v1455_v24 = vld [vmem:[#allocation3 + $0x18] sm:$0xff] }
 0x18f   : > { %1505 = vmatpush.msrb.mxu1 %v1455_v24 }
 0x191   : > { %1506 = vmatpush.msrb.mxu1 %v1453_v25 }
 0x192   : > { %5652 = vmatmul.msk.f32.vlgmr.msrb.gmra.mxu1 %vm1460_vm14, %v1451_v18 }
 0x206   : > { %v1488_v29 = vpop.f32.mrf.mxu1 }
 0x207   : > { %v1517_v31 = vmul.f32 %v1515_v27, %v1488_v29 }
 0x209   : > { %v1525_v33 = vadd.f32 %v1523_v30, %v1517_v31 }
 0x20b   : > { %v1527_v35 = vmul.f32 1.442695, %v1525_v33 }
 0x20d   : > { %5858 = vpow2.f32 %v1527_v35 }
 0x20f   : > { %v1508_v34 = vpop.f32.mrf.mxu1 }
 0x210   : > { %v1518_v39 = vmul.f32 %v1515_v27, %v1508_v34 }
 0x212   : > { %v1526_v40 = vadd.f32 %v1523_v30, %v1518_v39 }
 0x213   : > { %v5859_v42 = vpop.eup %5858 }
 0x214   : > { %v1531_v49 = vadd.f32 1.0, %v5859_v42  ;;  %v1529_v50 = vmul.f32 1.442695, %v1526_v40 }
 0x216   : > { %5860 = vlog2.f32 %v1531_v49 }
 0x217   : > { %5862 = vpow2.f32 %v1529_v50 }
 0x21c   : > { %v5861_v51 = vpop.eup %5860 }
 0x21d   : > { %v5863_v52 = vpop.eup %5862  ;;  %v1534_v55 = vmul.f32 0.6931472, %v5861_v51 }
 0x21e   : > { %v1532_v57 = vadd.f32 1.0, %v5863_v52 }
 0x21f   : > { %5864 = vtanh.f32 %v1534_v55 }
 0x220   : > { %5866 = vlog2.f32 %v1532_v57 }
 0x225   : > { %v5865_v59 = vpop.eup %5864 }
 0x226   : > { %v5867_v60 = vpop.eup %5866  ;;  %v6457_v61 = vmul.f32 %v5865_v59, %v1525_v33 }
 0x227   : > { %v1536_v62 = vmul.f32 0.6931472, %v5867_v60 }
 0x228   : > { %8429 = vst [vmem:[#allocation47_spill] sm:$0xff] %v6457_v61  ;;  %1543 = vrot.lane.b32.xlu2 %v6457_v61, %s8338_s18  ;;  %v1634_v63 = vrot.slane %v6457_v61, 4 }
 0x229   : > { %5868 = vtanh.f32 %v1536_v62 }
 0x22a   : > { %1638 = vst [vmem:[#allocation3 + $0x10] sm:$0x70] %v1634_v63 }
 0x22f   : > { %v5869_v0 = vpop.eup %5868 }
 0x230   : > { %v6462_v4 = vmul.f32 %v5869_v0, %v1526_v40 }
 0x232   : > { %8430 = vst [vmem:[#allocation48_spill] sm:$0xff] %v6462_v4  ;;  %1545 = vrot.lane.b32.xlu1 %v6462_v4, %s8338_s18  ;;  %v1635_v5 = vrot.slane %v6462_v4, 4 }
 0x234   : > { %1639 = vst [vmem:[#allocation3 + $0x18] sm:$0x70] %v1635_v5 }
 0x282   : > { %v1544_v7 = vpop.permute.xlu2 %1543 }
 0x283   : > { %1551 = vst.msk [vmem:[#allocation2] sm:$0x7] %vm1180_vm9, %v1544_v7  ;;  %vm2120_vm9 = vcmask 1043456  }
 0x28a   : > { %v1714_v8 = vld [vmem:[#allocation2] sm:$0x7] }
 0x28b   : > { %v1717_v9 = vmul.f32 %v1714_v8, %v6339_v45  ;;  %v1640_v10 = vld [vmem:[#allocation2] sm:$0x7] }
 0x28c   : > { %v1554_v11 = vld [vmem:[#allocation2] sm:$0x7]  ;;  %v1643_v13 = vmul.f32 %v6354_v58, %v1640_v10 }
 0x28d   : > { %1723 = vrot.lane.b32.xlu2 %v1717_v9, %s8263_s2  ;;  %v1556_v12 = vmul.f32 %v1554_v11, %v6311_v17  ;;  %v1666_v15 = vld [vmem:[#allocation2] sm:$0x7] }
 0x28e   : > { %v1649_v14 = vrot.slane %v1643_v13, 1  ;;  %v1669_v16 = vmul.f32 %v1666_v15, %v6330_v38  ;;  %v1690_v19 = vld [vmem:[#allocation2] sm:$0x7] }
 0x28f   : > { %1558 = vst [vmem:[#allocation3] sm:$0x7] %v1556_v12  ;;  %v1693_v21 = vmul.f32 %v6342_v48, %v1690_v19  ;;  %v1584_v27 = vld [vmem:[#allocation2] sm:$0x7] }
 0x290   : > { %v1675_v18 = vrot.slane %v1669_v16, 6  ;;  %v1587_v30 = vmul.f32 %v1584_v27, %v6335_v43  ;;  %v1610_v35 = vld [vmem:[#allocation2] sm:$0x7] }
 0x291   : > { %v1699_v24 = vrot.slane %v1693_v21, 3  ;;  %v1613_v49 = vmul.f32 %v6364_v6, %v1610_v35  ;;  %v1560_v60 = vld [vmem:[#allocation2] sm:$0x7] }
 0x292   : > { %v1593_v31 = vrot.slane %v1587_v30, 2  ;;  %v1563_v5 = vmul.f32 %v6362_v3, %v1560_v60 }
 0x293   : > { %v1619_v57 = vrot.slane %v1613_v49, 7 }
 0x294   : > { %v1569_v10 = vrot.slane %v1563_v5, 5 }
 0x295   : > { %1652 = vrot.lane.b32.xlu2 %v1649_v14, %s8341_s11 }
 0x29d   : > { %1678 = vrot.lane.b32.xlu2 %v1675_v18, %s8260_s22 }
 0x2a4   : > { %v1546_v25 = vpop.permute.xlu1 %1545 }
 0x2a5   : > { %v1547_v29 = vsel %vm8312_vm10, %v1544_v7, %v1546_v25  ;;  %1553 = vst.msk [vmem:[#allocation2 + $0x10] sm:$0x7] %vm1183_vm11, %v1546_v25  ;;  %1702 = vrot.lane.b32.xlu2 %v1699_v24, %s8258_s16  ;;  %vm1133_vm11 = vcmask 273408  }
 0x2a6   : > { %1552 = vst [vmem:[#allocation2 + $0x8] sm:$0x7] %v1547_v29 }
 0x2a7   : > { %1134 = vst.msk [vmem:[#allocation2 + $0x28] sm:$0xf] %vm1133_vm11, %v8288_v1 }
 0x2ac   : > { %v1716_v33 = vld [vmem:[#allocation2 + $0x10] sm:$0x7] }
 0x2ad   : > { %1596 = vrot.lane.b32.xlu2 %v1593_v31, %s8256_s23  ;;  %v1719_v34 = vmul.f32 %v1716_v33, %v6337_v44  ;;  %v1715_v39 = vld [vmem:[#allocation2 + $0x8] sm:$0x7]  ;;  %v1642_v42 = vld [vmem:[#allocation2 + $0x10] sm:$0x7] }
 0x2ae   : > { %v1718_v40 = vmul.f32 %v1715_v39, %v6349_v53  ;;  %v1641_v50 = vld [vmem:[#allocation2 + $0x8] sm:$0x7]  ;;  %v1645_v51 = vmul.f32 %v6373_v20, %v1642_v42  ;;  %v1668_v0 = vld [vmem:[#allocation2 + $0x10] sm:$0x7] }
 0x2af   : > { %1727 = vrot.lane.b32.xlu1 %v1719_v34, %s8263_s2  ;;  %v1555_v52 = vld [vmem:[#allocation2 + $0x8] sm:$0x7]  ;;  %v1644_v55 = vmul.f32 %v1641_v50, %v6400_v36  ;;  %v1671_v8 = vmul.f32 %v1668_v0, %v6328_v37  ;;  %v1692_v13 = vld [vmem:[#allocation2 + $0x10] sm:$0x7] }
 0x2b0   : > { %1725 = vrot.lane.b32.xlu0 %v1718_v40, %s8263_s2  ;;  %v1557_v59 = vmul.f32 %v1555_v52, %v6315_v22  ;;  %v1651_v62 = vrot.slane %v1645_v51, 1  ;;  %v1667_v7 = vld [vmem:[#allocation2 + $0x8] sm:$0x7]  ;;  %v1695_v15 = vmul.f32 %v6388_v28, %v1692_v13  ;;  %v1586_v21 = vld [vmem:[#allocation2 + $0x10] sm:$0x7]  ;;  %s8271_s2 = smov 120  }
 0x2b1   : > { %v1650_v63 = vrot.slane %v1644_v55, 1  ;;  %v1670_v9 = vmul.f32 %v1667_v7, %v6380_v23  ;;  %v1677_v11 = vrot.slane %v1671_v8, 6  ;;  %v1691_v14 = vld [vmem:[#allocation2 + $0x8] sm:$0x7]  ;;  %v1589_v25 = vmul.f32 %v1586_v21, %v6411_v47  ;;  %v1612_v31 = vld [vmem:[#allocation2 + $0x10] sm:$0x7] }
 0x2b2   : > { %1559 = vst [vmem:[#allocation3 + $0x8] sm:$0x7] %v1557_v59  ;;  %v1694_v16 = vmul.f32 %v1691_v14, %v6406_v41  ;;  %v1701_v18 = vrot.slane %v1695_v15, 3  ;;  %v1585_v24 = vld [vmem:[#allocation2 + $0x8] sm:$0x7]  ;;  %v1615_v35 = vmul.f32 %v6384_v26, %v1612_v31  ;;  %v1819_v59 = vld [vmem:[%s6124_s29] sm:$0xff] }
 0x2b3   : > { %v1676_v12 = vrot.slane %v1670_v9, 6  ;;  %v1588_v27 = vmul.f32 %v1585_v24, %v6415_v54  ;;  %v1595_v29 = vrot.slane %v1589_v25, 2  ;;  %v1611_v33 = vld [vmem:[#allocation2 + $0x8] sm:$0x7]  ;;  %v1562_v42 = vld [vmem:[#allocation2 + $0x10] sm:$0x7] }
 0x2b4   : > { %v1700_v19 = vrot.slane %v1694_v16, 3  ;;  %v1614_v34 = vmul.f32 %v1611_v33, %v6393_v32  ;;  %v1621_v39 = vrot.slane %v1615_v35, 7  ;;  %v1561_v49 = vld [vmem:[#allocation2 + $0x8] sm:$0x7]  ;;  %v1565_v50 = vmul.f32 %v6409_v46, %v1562_v42  ;;  %v1803_v42 = vld [vmem:[%s6119_s25] sm:$0xff] }
 0x2b5   : > { %1622 = vrot.lane.b32.xlu2 %v1619_v57, %s8298_s1  ;;  %v1594_v30 = vrot.slane %v1588_v27, 2  ;;  %v1564_v51 = vmul.f32 %v1561_v49, %v6421_v56  ;;  %v1804_v57 = vld [vmem:[%s6119_s25 + $0x8] sm:$0xf] }
 0x2b6   : > { %v1620_v40 = vrot.slane %v1614_v34, 7  ;;  %v1571_v52 = vrot.slane %v1565_v50, 5 }
 0x2b7   : > { %1656 = vrot.lane.b32.xlu1 %v1651_v62, %s8341_s11  ;;  %v1570_v55 = vrot.slane %v1564_v51, 5 }
 0x2b8   : > { %1654 = vrot.lane.b32.xlu0 %v1650_v63, %s8341_s11 }
 0x2bd   : > { %1572 = vrot.lane.b32.xlu2 %v1569_v10, %s8314_s26 }
 0x2bf   : > { %1682 = vrot.lane.b32.xlu1 %v1677_v11, %s8260_s22 }
 0x2c0   : > { %1680 = vrot.lane.b32.xlu0 %v1676_v12, %s8260_s22  ;;  %s6059_s22 = smov 8  }
 0x2c5   : > { %1807 = vperm.xlu2 %5812, %v1803_v42  }
 0x2c7   : > { %1706 = vrot.lane.b32.xlu1 %v1701_v18, %s8258_s16 }
 0x2c8   : > { %1704 = vrot.lane.b32.xlu0 %v1700_v19, %s8258_s16 }
 0x2cf   : > { %1600 = vrot.lane.b32.xlu1 %v1595_v29, %s8256_s23 }
 0x2d0   : > { %1598 = vrot.lane.b32.xlu0 %v1594_v30, %s8256_s23  ;;  %s6057_s23 = smov 25  }
 0x2d7   : > { %1626 = vrot.lane.b32.xlu1 %v1621_v39, %s8298_s1 }
 0x2d8   : > { %1624 = vrot.lane.b32.xlu0 %v1620_v40, %s8298_s1 }
 0x2df   : > { %1576 = vrot.lane.b32.xlu1 %v1571_v52, %s8314_s26 }
 0x2e0   : > { %1574 = vrot.lane.b32.xlu0 %v1570_v55, %s8314_s26 }
 0x2e7   : > { %1812 = vperm.xlu1 %5811, %v1804_v57   ;;  %v1724_v60 = vpop.permute.xlu2 %1723  ;;  %v1820_v57 = vld [vmem:[%s6124_s29 + $0x8] sm:$0xf] }
 0x2e8   : > { %1823 = vperm.xlu0 %5810, %v1819_v59   ;;  %1828 = vperm.xlu2 %5812, %v1820_v57  }
 0x2ef   : > { %v1653_v62 = vpop.permute.xlu2 %1652 }
 0x2f7   : > { %v1679_v9 = vpop.permute.xlu2 %1678 }
 0x2ff   : > { %v1703_v21 = vpop.permute.xlu2 %1702 }
 0x307   : > { %v1597_v30 = vpop.permute.xlu2 %1596 }
 0x30f   : > { %v1623_v49 = vpop.permute.xlu2 %1622 }
 0x321   : > { %v1728_v63 = vpop.permute.xlu1 %1727 }
 0x322   : > { %v1726_v0 = vpop.permute.xlu0 %1725 }
 0x323   : > { %v1729_v5 = vsel %vm8273_vm2, %v1724_v60, %v1726_v0  ;;  %v1730_v7 = vsel %vm8273_vm2, %v1726_v0, %v1728_v63  ;;  %v1573_v60 = vpop.permute.xlu2 %1572 }
 0x324   : > { %1733 = vst [vmem:[#allocation3 + $0x30] sm:$0x7] %v1729_v5 }
 0x325   : > { %1734 = vst [vmem:[#allocation3 + $0x38] sm:$0x7] %v1730_v7 }
 0x329   : > { %v1657_v8 = vpop.permute.xlu1 %1656 }
 0x32a   : > { %v1655_v10 = vpop.permute.xlu0 %1654 }
 0x32b   : > { %v1658_v11 = vsel %vm8270_vm6, %v1653_v62, %v1655_v10  ;;  %v1659_v12 = vsel %vm8270_vm6, %v1655_v10, %v1657_v8  ;;  %v1743_v13 = vld [vmem:[#allocation3 + $0x30] sm:$0x7]  ;;  %v1735_v8 = vld [vmem:[%s6114_s21] sm:$0xff] }
 0x32c   : > { %1662 = vst [vmem:[#allocation3 + $0x10] sm:$0x80] %v1658_v11  ;;  %5653 = vmatpush.msk.msra.mxu2 %vm1464_vm4, %v1743_v13  ;;  %v1744_v14 = vld [vmem:[#allocation3 + $0x38] sm:$0x7] }
 0x32d   : > { %1663 = vst [vmem:[#allocation3 + $0x18] sm:$0x80] %v1659_v12  ;;  %5656 = vmatpush.msk.msra.mxu3 %vm1464_vm4, %v1744_v14 }
 0x32e   : > { %1664 = vst [vmem:[#allocation3 + $0x20] sm:$0x3] %v1658_v11  ;;  %v1736_v11 = vld [vmem:[%s6114_s21 + $0x8] sm:$0xf] }
 0x32f   : > { %1665 = vst [vmem:[#allocation3 + $0x28] sm:$0x3] %v1659_v12  ;;  %v1808_v12 = vpop.permute.xlu2 %1807 }
 0x331   : > { %v1683_v15 = vpop.permute.xlu1 %1682 }
 0x332   : > { %v1681_v16 = vpop.permute.xlu0 %1680 }
 0x333   : > { %v1684_v18 = vsel %vm8276_vm3, %v1679_v9, %v1681_v16  ;;  %v1685_v19 = vsel %vm8276_vm3, %v1681_v16, %v1683_v15 }
 0x334   : > { %1688 = vst [vmem:[#allocation3 + $0x20] sm:$0x1c] %v1684_v18 }
 0x335   : > { %1689 = vst [vmem:[#allocation3 + $0x28] sm:$0x1c] %v1685_v19 }
 0x339   : > { %v1707_v24 = vpop.permute.xlu1 %1706 }
 0x33a   : > { %v1705_v25 = vpop.permute.xlu0 %1704 }
 0x33b   : > { %v1708_v27 = vsel %vm8262_vm7, %v1703_v21, %v1705_v25  ;;  %v1709_v29 = vsel %vm8262_vm7, %v1705_v25, %v1707_v24 }
 0x33c   : > { %1712 = vst [vmem:[#allocation3 + $0x20] sm:$0xe0] %v1708_v27 }
 0x33d   : > { %1713 = vst [vmem:[#allocation3 + $0x28] sm:$0xe0] %v1709_v29 }
 0x341   : > { %v1601_v31 = vpop.permute.xlu1 %1600 }
 0x342   : > { %v1599_v33 = vpop.permute.xlu0 %1598 }
 0x343   : > { %v1602_v35 = vsel %vm8269_vm8, %v1597_v30, %v1599_v33  ;;  %v1603_v34 = vsel %vm8269_vm8, %v1599_v33, %v1601_v31  ;;  %v1741_v39 = vld [vmem:[#allocation3 + $0x20] sm:$0xff]  ;;  %v1829_v33 = vpop.permute.xlu2 %1828 }
 0x344   : > { %1606 = vst [vmem:[#allocation3] sm:$0xc0] %v1602_v35  ;;  %1770 = vmatpush.msra.mxu2 %v1741_v39  ;;  %v1742_v40 = vld [vmem:[#allocation3 + $0x28] sm:$0xff] }
 0x345   : > { %1607 = vst [vmem:[#allocation3 + $0x8] sm:$0xc0] %v1603_v34  ;;  %1793 = vmatpush.msra.mxu3 %v1742_v40 }
 0x346   : > { %1608 = vst [vmem:[#allocation3 + $0x10] sm:$0x1] %v1602_v35 }
 0x347   : > { %1609 = vst [vmem:[#allocation3 + $0x18] sm:$0x1] %v1603_v34 }
 0x349   : > { %v1627_v50 = vpop.permute.xlu1 %1626 }
 0x34a   : > { %v1625_v51 = vpop.permute.xlu0 %1624 }
 0x34b   : > { %v1628_v52 = vsel %vm8268_vm5, %v1623_v49, %v1625_v51  ;;  %v1629_v55 = vsel %vm8268_vm5, %v1625_v51, %v1627_v50  ;;  %vm2268_vm5 = vcmask 883712  }
 0x34c   : > { %1632 = vst [vmem:[#allocation3 + $0x10] sm:$0xe] %v1628_v52 }
 0x34d   : > { %1633 = vst [vmem:[#allocation3 + $0x18] sm:$0xe] %v1629_v55 }
 0x351   : > { %v1577_v59 = vpop.permute.xlu1 %1576 }
 0x352   : > { %v1575_v62 = vpop.permute.xlu0 %1574 }
 0x353   : > { %v1739_v63 = vld [vmem:[#allocation3 + $0x10] sm:$0xff]  ;;  %v1578_v0 = vsel %vm8267_vm12, %v1573_v60, %v1575_v62  ;;  %v1579_v5 = vsel %vm8267_vm12, %v1575_v62, %v1577_v59 }
 0x354   : > { %1582 = vst [vmem:[#allocation3] sm:$0x38] %v1578_v0  ;;  %1771 = vmatpush.msra.mxu2 %v1739_v63  ;;  %v1740_v7 = vld [vmem:[#allocation3 + $0x18] sm:$0xff] }
 0x355   : > { %1583 = vst [vmem:[#allocation3 + $0x8] sm:$0x38] %v1579_v5  ;;  %1794 = vmatpush.msra.mxu3 %v1740_v7 }
 0x359   : > { %v1813_v27 = vpop.permute.xlu1 %1812 }
 0x35a   : > { %v1824_v16 = vpop.permute.xlu0 %1823 }
 0x35b   : > { %v1737_v9 = vld [vmem:[#allocation3] sm:$0xff] }
 0x35c   : > { %1772 = vmatpush.msra.mxu2 %v1737_v9  ;;  %v1738_v10 = vld [vmem:[#allocation3 + $0x8] sm:$0xff] }
 0x35d   : > { %1795 = vmatpush.msra.mxu3 %v1738_v10  ;;  %5654 = vmatmul.msk.f32.vlgmr.msra.gmra.mxu2 %vm1460_vm14, %v1735_v8 }
 0x35e   : > { %5657 = vmatmul.msk.f32.vlgmr.msra.gmra.mxu3 %vm1460_vm14, %v1735_v8 }
 0x365   : > { %5655 = vmatmul.msk.f32.gmra.mxu2 %vm1460_vm14, %v1736_v11 }
 0x366   : > { %5658 = vmatmul.msk.f32.gmra.mxu3 %vm1460_vm14, %v1736_v11 }
 0x3e0   : > { %v1774_v13 = vpop.f32.mrf.mxu2 }
 0x3e1   : > { %v1815_v14 = vmul.f32 %v1808_v12, %v1774_v13  ;;  %v1797_v15 = vpop.f32.mrf.mxu3 }
 0x3e2   : > { %v1816_v18 = vmul.f32 %v1808_v12, %v1797_v15 }
 0x3e3   : > { %v1831_v19 = vadd.f32 %v1824_v16, %v1815_v14 }
 0x3e4   : > { %v1832_v21 = vadd.f32 %v1824_v16, %v1816_v18 }
 0x3e5   : > { %v1835_v24 = vmul.f32 1.442695, %v1831_v19 }
 0x3e6   : > { %v1837_v25 = vmul.f32 1.442695, %v1832_v21 }
 0x3e7   : > { %5870 = vpow2.f32 %v1835_v24 }
 0x3e8   : > { %5872 = vpow2.f32 %v1837_v25  ;;  %v1777_v29 = vpop.f32.mrf.mxu2 }
 0x3e9   : > { %v1817_v30 = vmul.f32 %v1813_v27, %v1777_v29  ;;  %v1800_v31 = vpop.f32.mrf.mxu3 }
 0x3ea   : > { %v1818_v35 = vmul.f32 %v1813_v27, %v1800_v31 }
 0x3eb   : > { %v1833_v34 = vadd.f32 %v1829_v33, %v1817_v30 }
 0x3ec   : > { %v1834_v39 = vadd.f32 %v1829_v33, %v1818_v35 }
 0x3ed   : > { %v5871_v40 = vpop.eup %5870  ;;  %v1839_v42 = vmul.f32 1.442695, %v1833_v34 }
 0x3ee   : > { %v5873_v49 = vpop.eup %5872  ;;  %v1843_v50 = vadd.f32 1.0, %v5871_v40  ;;  %v1841_v51 = vmul.f32 1.442695, %v1834_v39 }
 0x3ef   : > { %v1844_v52 = vadd.f32 1.0, %v5873_v49  ;;  %5874 = vpow2.f32 %v1839_v42 }
 0x3f0   : > { %5876 = vlog2.f32 %v1843_v50 }
 0x3f1   : > { %5878 = vlog2.f32 %v1844_v52 }
 0x3f2   : > { %5880 = vpow2.f32 %v1841_v51 }
 0x3f5   : > { %v5875_v55 = vpop.eup %5874 }
 0x3f6   : > { %v5877_v57 = vpop.eup %5876  ;;  %v1845_v59 = vadd.f32 1.0, %v5875_v55 }
 0x3f7   : > { %v5879_v60 = vpop.eup %5878  ;;  %v1848_v62 = vmul.f32 0.6931472, %v5877_v57 }
 0x3f8   : > { %v5881_v63 = vpop.eup %5880  ;;  %v1850_v0 = vmul.f32 0.6931472, %v5879_v60  ;;  %5882 = vlog2.f32 %v1845_v59  ;;  %v2001_v59 = vld [vmem:[%s6249_s20 + $0x78] sm:$0xff]  ;;  %v2000_v60 = vld [vmem:[%s6249_s20 + $0x70] sm:$0xff] }
 0x3f9   : > { %5884 = vtanh.f32 %v1848_v62  ;;  %v1846_v5 = vadd.f32 1.0, %v5881_v63  ;;  %2018 = vmatpush.msra.mxu0 %v2001_v59  ;;  %v2017_v62 = vld [vmem:[%s6249_s20 + $0xf8] sm:$0xff]  ;;  %v1999_v63 = vld [vmem:[%s6249_s20 + $0x68] sm:$0xff]  ;;  %v2010_v59 = vld [vmem:[%s6249_s20 + $0xc0] sm:$0xff] }
 0x3fa   : > { %5886 = vtanh.f32 %v1850_v0  ;;  %2041 = vmatpush.msra.mxu1 %v2017_v62  ;;  %v2016_v0 = vld [vmem:[%s6249_s20 + $0xf0] sm:$0xff] }
 0x3fb   : > { %5888 = vlog2.f32 %v1846_v5  ;;  %2019 = vmatpush.msra.mxu0 %v2000_v60  ;;  %v2015_v5 = vld [vmem:[%s6249_s20 + $0xe8] sm:$0xff]  ;;  %v1993_v60 = vld [vmem:[%s6249_s20 + $0x38] sm:$0xff] }
 0x3fc   : > { %2042 = vmatpush.msra.mxu1 %v2016_v0  ;;  %v2009_v0 = vld [vmem:[%s6249_s20 + $0xb8] sm:$0xff] }
 0x3fd   : > { %2020 = vmatpush.msra.mxu0 %v1999_v63 }
 0x3fe   : > { %v5883_v7 = vpop.eup %5882  ;;  %2043 = vmatpush.msra.mxu1 %v2015_v5 }
 0x3ff   : > { %v5885_v8 = vpop.eup %5884  ;;  %v1852_v9 = vmul.f32 0.6931472, %v5883_v7  ;;  %v1998_v7 = vld [vmem:[%s6249_s20 + $0x60] sm:$0xff] }
 0x400   : > { %v5887_v10 = vpop.eup %5886  ;;  %v6540_v11 = vmul.f32 %v5885_v8, %v1831_v19  ;;  %v2014_v8 = vld [vmem:[%s6249_s20 + $0xe0] sm:$0xff]  ;;  %2021 = vmatpush.msra.mxu0 %v1998_v7 }
 0x401   : > { %v5889_v12 = vpop.eup %5888  ;;  %5890 = vtanh.f32 %v1852_v9  ;;  %v6542_v13 = vmul.f32 %v5887_v10, %v1832_v21  ;;  %v1997_v9 = vld [vmem:[%s6249_s20 + $0x58] sm:$0xff]  ;;  %2044 = vmatpush.msra.mxu1 %v2014_v8  ;;  %v1992_v8 = vld [vmem:[%s6249_s20 + $0x30] sm:$0xff] }
 0x402   : > { %v1854_v14 = vmul.f32 0.6931472, %v5889_v12  ;;  %1867 = vrot.lane.b32.xlu0 %v6540_v11, %s8338_s18  ;;  %v2013_v10 = vld [vmem:[%s6249_s20 + $0xd8] sm:$0xff]  ;;  %v1996_v12 = vld [vmem:[%s6249_s20 + $0x50] sm:$0xff]  ;;  %2022 = vmatpush.msra.mxu0 %v1997_v9 }
 0x403   : > { %1869 = vrot.lane.b32.xlu1 %v6542_v13, %s8338_s18  ;;  %v5169_v15 = vrot.slane %v6542_v13, 4  ;;  %2045 = vmatpush.msra.mxu1 %v2013_v10  ;;  %v1991_v10 = vld [vmem:[%s6249_s20 + $0x28] sm:$0xff] }
 0x404   : > { %5892 = vtanh.f32 %v1854_v14  ;;  %v2012_v14 = vld [vmem:[%s6249_s20 + $0xd0] sm:$0xff]  ;;  %2023 = vmatpush.msra.mxu0 %v1996_v12  ;;  %v1990_v12 = vld [vmem:[%s6249_s20 + $0x20] sm:$0xff] }
 0x405   : > { %5179 = vst [vmem:[#allocation3 + $0x138] sm:$0xf0] %v5169_v15  ;;  %2046 = vmatpush.msra.mxu1 %v2012_v14  ;;  %v1989_v14 = vld [vmem:[%s6249_s20 + $0x18] sm:$0xff] }
 0x407   : > { %v5891_v16 = vpop.eup %5890 }
 0x408   : > { %v6549_v18 = vmul.f32 %v5891_v16, %v1833_v34  ;;  %v1995_v16 = vld [vmem:[%s6249_s20 + $0x48] sm:$0xff] }
 0x409   : > { %2024 = vmatpush.msra.mxu0 %v1995_v16 }
 0x40a   : > { %v5893_v19 = vpop.eup %5892  ;;  %1871 = vrot.lane.b32.xlu2 %v6549_v18, %s8338_s18 }
 0x40b   : > { %v6553_v21 = vmul.f32 %v5893_v19, %v1834_v39  ;;  %v2011_v19 = vld [vmem:[%s6249_s20 + $0xc8] sm:$0xff] }
 0x40c   : > { %2047 = vmatpush.msra.mxu1 %v2011_v19 }
 0x40d   : > { %1873 = vrot.lane.b32.xlu0 %v6553_v21, %s8338_s18  ;;  %v5172_v24 = vrot.slane %v6553_v21, 4 }
 0x40e   : > { %2048 = vmatpush.msra.mxu1 %v2010_v59 }
 0x40f   : > { %v5173_v25 = vsel %vm2120_vm9, %v5169_v15, %v5172_v24 }
 0x410   : > { %5181 = vst [vmem:[#allocation3 + $0x148] sm:$0xff] %v5173_v25  ;;  %v1994_v25 = vld [vmem:[%s6249_s20 + $0x40] sm:$0xff]  ;;  %2049 = vmatpush.msra.mxu1 %v2009_v0  ;;  %v1987_v0 = vld [vmem:[%s6249_s20 + $0x8] sm:$0xff] }
 0x411   : > { %2025 = vmatpush.msra.mxu0 %v1994_v25 }
 0x413   : > { %2026 = vmatpush.msra.mxu0 %v1993_v60 }
 0x415   : > { %2027 = vmatpush.msra.mxu0 %v1992_v8  ;;  %v2002_v8 = vld [vmem:[%s6249_s20 + $0x80] sm:$0xff] }
 0x417   : > { %2028 = vmatpush.msra.mxu0 %v1991_v10 }
 0x419   : > { %2029 = vmatpush.msra.mxu0 %v1990_v12  ;;  %v2064_v12 = vshra.s32 %v6290_v2, 3 }
 0x41b   : > { %2030 = vmatpush.msra.mxu0 %v1989_v14  ;;  %v2065_v14 = vand.u32 7, %v6290_v2  ;;  %vm2074_vm14 = vcmp.lt.s32.totalorder %v2064_v12, 7  ;;  %vm2066_vm11 = vcmp.ge.s32.totalorder %v2064_v12, 1 }
 0x41d   : > { %vm2071_vm4 = vcmp.lt.s32.totalorder %v2065_v14, 7 }
 0x464   : > { %v6560_v27 = vpop.permute.xlu2 %1871 }
 0x465   : > { %8431 = vst [vmem:[#allocation49_spill] sm:$0xff] %v6560_v27 }
 0x466   : > { %1888 = vst.msk [vmem:[#allocation2 + $0x18] sm:$0xf] %vm8311_vm15, %v6560_v27 }
 0x46d   : > { %v6587_v39 = vld [vmem:[#allocation2 + $0x18] sm:$0xf] }
 0x474   : > { %v6564_v29 = vpop.permute.xlu0 %1867 }
 0x475   : > { %v6566_v30 = vpop.permute.xlu1 %1869  ;;  %1884 = vst.msk [vmem:[#allocation2] sm:$0xff] %vm8316_vm0, %v6564_v29  ;;  %vm2811_vm0 = vcmask 27648  }
 0x476   : > { %8432 = vst [vmem:[#allocation50_spill] sm:$0xff] %v6566_v30  ;;  %v6573_v31 = vsel %vm8312_vm10, %v6564_v29, %v6566_v30 }
 0x477   : > { %1886 = vst.msk [vmem:[#allocation2 + $0x10] sm:$0xff] %vm8312_vm10, %v6566_v30  ;;  %v6580_v33 = vmul.f32 %v6573_v31, %v6315_v22 }
 0x478   : > { %5002 = vst [vmem:[#allocation2 + $0x8] sm:$0xff] %v6573_v31 }
 0x479   : > { %8433 = vst [vmem:[#allocation51_spill] sm:$0xff] %v6580_v33  ;;  %v8287_v35 = vrot.slane %v6580_v33, 4 }
 0x47b   : > { %5030 = vst [vmem:[#allocation3 + $0xd8] sm:$0xf0] %v8287_v35 }
 0x47c   : > { %v6583_v34 = vld [vmem:[#allocation2] sm:$0xff] }
 0x47d   : > { %v5813_v42 = vpack.i.bf16 %v6573_v31, %v6583_v34 }
 0x47e   : > { %v6589_v40 = vld [vmem:[#allocation2 + $0x10] sm:$0xff] }
 0x47f   : > { %v5818_v49 = vpack.i.bf16 %v6587_v39, %v6589_v40  ;;  %v6595_v50 = vpop.permute.xlu0 %1873  ;;  %5814 = vrot.lane.b32.xlu1 %v5813_v42, %s8314_s26 }
 0x480   : > { %v6601_v51 = vsel %vm8312_vm10, %v6560_v27, %v6595_v50  ;;  %1891 = vst.msk [vmem:[#allocation2 + $0x28] sm:$0xf] %vm8313_vm1, %v6595_v50 }
 0x481   : > { %8434 = vst [vmem:[#allocation52_spill] sm:$0xff] %v6601_v51  ;;  %5819 = vrot.lane.b32.xlu2 %v5818_v49, %s8314_s26 }
 0x482   : > { %1889 = vst [vmem:[#allocation2 + $0x20] sm:$0xf] %v6601_v51 }
 0x487   : > { %5829 = vrot.lane.b32.xlu1 %v5813_v42, %s8341_s11  ;;  %v6608_v52 = vld [vmem:[#allocation2 + $0x28] sm:$0xf] }
 0x489   : > { %5834 = vrot.lane.b32.xlu2 %v5818_v49, %s8341_s11  ;;  %v6611_v55 = vld [vmem:[#allocation2 + $0x20] sm:$0xf] }
 0x48a   : > { %v5823_v57 = vpack.i.bf16 %v6608_v52, %v6611_v55 }
 0x48c   : > { %5824 = vrot.lane.b32.xlu0 %v5823_v57, %s8314_s26 }
 0x491   : > { %5849 = vrot.lane.b32.xlu2 %v5823_v57, %s8341_s11 }
 0x4db   : > { %v5820_v15 = vpop.permute.xlu2 %5819 }
 0x4dc   : > { %v5821_v42 = vunpack.i.l.bf16 %v5820_v15  ;;  %v5822_v19 = vunpack.i.h.bf16 %v5820_v15 }
 0x4e3   : > { %v5835_v10 = vpop.permute.xlu2 %5834 }
 0x4f1   : > { %v5815_v24 = vpop.permute.xlu1 %5814 }
 0x4f2   : > { %v5817_v49 = vunpack.i.h.bf16 %v5815_v24  ;;  %v5816_v57 = vunpack.i.l.bf16 %v5815_v24 }
 0x4f4   : > { %v1940_v62 = vsel %vm8267_vm12, %v5816_v57, %v5817_v49  ;;  %v1941_v63 = vsel %vm8267_vm12, %v5817_v49, %v5821_v42  ;;  %v1952_v57 = vmax.f32 %v6589_v40, %v5821_v42  ;;  %v2007_v40 = vld [vmem:[%s6249_s20 + $0xa8] sm:$0xff]  ;;  %v1986_v42 = vld [vmem:[%s6249_s20] sm:$0xff] }
 0x4f5   : > { %v1950_v5 = vmax.f32 %v6583_v34, %v1940_v62  ;;  %v1951_v7 = vmax.f32 %v6573_v31, %v1941_v63  ;;  %v2008_v63 = vld [vmem:[%s6249_s20 + $0xb0] sm:$0xff] }
 0x4f6   : > { %2050 = vmatpush.msra.mxu1 %v2008_v63 }
 0x4f7   : > { %v5838_v9 = vpack.i.bf16 %v1951_v7, %v1950_v5  ;;  %v2004_v5 = vld [vmem:[%s6249_s20 + $0x90] sm:$0xff]  ;;  %v2003_v7 = vld [vmem:[%s6249_s20 + $0x88] sm:$0xff] }
 0x4f8   : > { %2051 = vmatpush.msra.mxu1 %v2007_v40  ;;  %v5836_v40 = vunpack.i.l.bf16 %v5835_v10 }
 0x4f9   : > { %5839 = vrot.lane.b32.xlu0 %v5838_v9, %s8258_s16  ;;  %v5830_v9 = vpop.permute.xlu1 %5829 }
 0x4fe   : > { %v5825_v16 = vpop.permute.xlu0 %5824 }
 0x4ff   : > { %v5827_v34 = vunpack.i.h.bf16 %v5825_v16  ;;  %v5826_v31 = vunpack.i.l.bf16 %v5825_v16  ;;  %v5832_v16 = vunpack.i.h.bf16 %v5830_v9 }
 0x501   : > { %v1955_v24 = vmax.f32 %v6608_v52, %v5827_v34  ;;  %v1943_v25 = vsel %vm8267_vm12, %v5826_v31, %v5827_v34  ;;  %v1942_v49 = vsel %vm8267_vm12, %v5822_v19, %v5826_v31  ;;  %v1988_v52 = vld [vmem:[%s6249_s20 + $0x10] sm:$0xff]  ;;  %v5831_v19 = vunpack.i.l.bf16 %v5830_v9 }
 0x502   : > { %v1954_v59 = vmax.f32 %v6611_v55, %v1943_v25  ;;  %v1953_v60 = vmax.f32 %v6587_v39, %v1942_v49  ;;  %2031 = vmatpush.msra.mxu0 %v1988_v52  ;;  %v2006_v55 = vld [vmem:[%s6249_s20 + $0xa0] sm:$0xff]  ;;  %v2005_v39 = vld [vmem:[%s6249_s20 + $0x98] sm:$0xff]  ;;  %v2072_v34 = vsel %vm2071_vm4, 1.0, %v8288_v1  ;;  %v2075_v31 = vsel %vm2074_vm14, 1.0, %v8288_v1 }
 0x503   : > { %2052 = vmatpush.msra.mxu1 %v2006_v55  ;;  %v1916_v25 = vsel %vm8270_vm6, %v5831_v19, %v5832_v16  ;;  %v2067_v19 = vsel %vm2066_vm11, 1.0, %v8288_v1  ;;  %vm2106_vm4 = vcmask 523264   ;;  %vm2068_vm14 = vcmp.ge.s32.totalorder %v2065_v14, 1 }
 0x504   : > { %v5853_v15 = vpack.i.bf16 %v1955_v24, %v1954_v59  ;;  %v5843_v62 = vpack.i.bf16 %v1953_v60, %v1952_v57  ;;  %2032 = vmatpush.msra.mxu0 %v1987_v0  ;;  %v2077_v24 = vmul.f32 %v2075_v31, %v2072_v34  ;;  %v1924_v60 = vmax.f32 %v6540_v11, %v1916_v25 }
 0x505   : > { %2053 = vmatpush.msra.mxu1 %v2005_v39  ;;  %v5837_v0 = vunpack.i.h.bf16 %v5835_v10  ;;  %vm8346_vm11 = vcmask 519168   ;;  %vm2130_vm12 = vcmask 523268  }
 0x506   : > { %5854 = vrot.lane.b32.xlu0 %v5853_v15, %s8258_s16  ;;  %5844 = vrot.lane.b32.xlu1 %v5843_v62, %s8258_s16  ;;  %v5850_v62 = vpop.permute.xlu2 %5849  ;;  %s6058_s16 = smov 10  }
 0x507   : > { %2033 = vmatpush.msra.mxu0 %v1986_v42  ;;  %2054 = vmatpush.msra.mxu1 %v2004_v5  ;;  %v5851_v63 = vunpack.i.l.bf16 %v5850_v62  ;;  %v1917_v42 = vsel %vm8270_vm6, %v5832_v16, %v5836_v40 }
 0x509   : > { %2055 = vmatpush.msra.mxu1 %v2003_v7  ;;  %v1918_v55 = vsel %vm8270_vm6, %v5837_v0, %v5851_v63 }
 0x50a   : > { %v1926_v25 = vmax.f32 %v6549_v18, %v1918_v55 }
 0x50b   : > { %2056 = vmatpush.msra.mxu1 %v2002_v8 }
 0x50e   : > { %2237 = vrot.lane.b32.xlu0 %v2077_v24, %s6054_s0  ;;  %v1925_v24 = vmax.f32 %v6542_v13, %v1917_v42  ;;  %s6055_s0 = smov 9   ;;  %v2069_v42 = vsel %vm2068_vm14, 1.0, %v8288_v1  ;;  %vm8343_vm14 = vcmask 662664  }
 0x50f   : > { %v2076_v55 = vmul.f32 %v2075_v31, %v2069_v42  ;;  %v2070_v14 = vmul.f32 %v2069_v42, %v2067_v19 }
 0x516   : > { %2177 = vrot.lane.b32.xlu0 %v2072_v34, %s6038_s15 }
 0x51e   : > { %2113 = vrot.lane.b32.xlu0 %v2067_v19, %s6055_s0  ;;  %s6056_s0 = smov 24  }
 0x56b   : > { %v5840_v49 = vpop.permute.xlu0 %5839 }
 0x56c   : > { %v5842_v57 = vunpack.i.h.bf16 %v5840_v49  ;;  %v5841_v59 = vunpack.i.l.bf16 %v5840_v49  ;;  %v5852_v49 = vunpack.i.h.bf16 %v5850_v62 }
 0x56e   : > { %v1974_v15 = vsel %vm8262_vm7, %v5841_v59, %v5842_v57 }
 0x56f   : > { %v1982_v52 = vmax.f32 %v1924_v60, %v1974_v15  ;;  %v1919_v15 = vsel %vm8270_vm6, %v5851_v63, %v5852_v49 }
 0x570   : > { %v1927_v13 = vmax.f32 %v6553_v21, %v1919_v15  ;;  %v2073_v21 = vmul.f32 %v2072_v34, %v2067_v19 }
 0x571   : > { %2034 = vmatmul.f32.vlgmr.msra.gmra.mxu0 %v1982_v52 }
 0x578   : > { %v5855_v39 = vpop.permute.xlu0 %5854  ;;  %v5845_v5 = vpop.permute.xlu1 %5844 }
 0x579   : > { %v5856_v7 = vunpack.i.l.bf16 %v5855_v39  ;;  %v5847_v8 = vunpack.i.h.bf16 %v5845_v5  ;;  %v5846_v9 = vunpack.i.l.bf16 %v5845_v5  ;;  %v5857_v60 = vunpack.i.h.bf16 %v5855_v39 }
 0x57b   : > { %v1975_v59 = vsel %vm8262_vm7, %v5842_v57, %v5846_v9  ;;  %v1976_v10 = vsel %vm8262_vm7, %v5847_v8, %v5856_v7  ;;  %v1977_v52 = vsel %vm8262_vm7, %v5856_v7, %v5857_v60  ;;  %vm8340_vm7 = vcmask 658568  }
 0x57c   : > { %v1984_v12 = vmax.f32 %v1926_v25, %v1976_v10  ;;  %v1983_v16 = vmax.f32 %v1925_v24, %v1975_v59  ;;  %v1985_v0 = vmax.f32 %v1927_v13, %v1977_v52 }
 0x57e   : > { %2037 = vmatmul.f32.gmra.mxu0 %v1984_v12  ;;  %2057 = vmatmul.f32.vlgmr.msra.gmra.mxu1 %v1983_v16 }
 0x580   : > { %v6687_v8 = vpop.permute.xlu0 %2237 }
 0x586   : > { %2060 = vmatmul.f32.gmra.mxu1 %v1985_v0 }
 0x588   : > { %v6708_v52 = vpop.permute.xlu0 %2177 }
 0x5ee   : > { %v2035_v62 = vpop.f32.mrf.mxu0 }
 0x5fb   : > { %v2058_v40 = vpop.f32.mrf.mxu1  ;;  %v2038_v39 = vpop.f32.mrf.mxu0 }
 0x5fc   : > { %v2059_v57 = vadd.f32 %v2058_v40, %v2035_v62 }
 0x5fe   : > { %2172 = vst.msk [vmem:[#allocation3 + $0x60] sm:$0xff] %vm2106_vm4, %v2059_v57  ;;  %2080 = vrot.lane.b32.xlu2 %v2059_v57, %s8338_s18 }
 0x603   : > { %v2061_v63 = vpop.f32.mrf.mxu1 }
 0x604   : > { %v2062_v5 = vadd.f32 %v2061_v63, %v2038_v39 }
 0x606   : > { %2173 = vst.msk [vmem:[#allocation3 + $0x70] sm:$0xf] %vm8346_vm11, %v2062_v5  ;;  %2082 = vrot.lane.b32.xlu1 %v2062_v5, %s8338_s18  ;;  %2198 = vrot.lane.b32.xlu2 %v2076_v55, %s6056_s0  ;;  %s8265_s0 = smov 118  }
 0x60e   : > { %2216 = vrot.lane.b32.xlu1 %v2075_v31, %s6057_s23  ;;  %2136 = vrot.lane.b32.xlu2 %v2073_v21, %s6058_s16  ;;  %s8281_s16 = smov 102   ;;  %s8277_s23 = smov 103  }
 0x616   : > { %2154 = vrot.lane.b32.xlu1 %v2069_v42, %s6044_s28 }
 0x61e   : > { %2093 = vrot.lane.b32.xlu1 %v2070_v14, %s6059_s22  ;;  %s8279_s22 = smov 104  }
 0x658   : > { %v2081_v7 = vpop.permute.xlu2 %2080 }
 0x659   : > { %2087 = vst.msk [vmem:[#allocation2] sm:$0xff] %vm8343_vm14, %v2081_v7 }
 0x660   : > { %v6689_v9 = vpop.permute.xlu2 %2198  ;;  %v6691_v24 = vld [vmem:[#allocation2] sm:$0xff] }
 0x661   : > { %v2240_v34 = vmul.f32 %v6687_v8, %v6691_v24  ;;  %v2201_v31 = vmul.f32 %v6691_v24, %v6689_v9  ;;  %v2180_v0 = vmul.f32 %v6691_v24, %v6708_v52 }
 0x663   : > { %2244 = vrot.lane.b32.xlu0 %v2240_v34, %s8281_s16  ;;  %2205 = vrot.lane.b32.xlu1 %v2201_v31, %s8279_s22  ;;  %v2184_v42 = vrot.slane %v2180_v0, 4 }
 0x668   : > { %v6714_v40 = vpop.permute.xlu2 %2136 }
 0x669   : > { %v2139_v63 = vmul.f32 %v6691_v24, %v6714_v40 }
 0x678   : > { %v2083_v19 = vpop.permute.xlu1 %2082 }
 0x679   : > { %2089 = vst.msk [vmem:[#allocation2 + $0x18] sm:$0xf] %vm8340_vm7, %v2083_v19 }
 0x680   : > { %v6700_v25 = vpop.permute.xlu1 %2216  ;;  %v2214_v59 = vld [vmem:[#allocation2 + $0x18] sm:$0xf] }
 0x681   : > { %v2219_v49 = vmul.f32 %v6691_v24, %v6700_v25  ;;  %v2235_v10 = vld [vmem:[#allocation2 + $0x18] sm:$0xf]  ;;  %v2220_v60 = vmul.f32 %v6700_v25, %v2214_v59  ;;  %v6731_v59 = vpop.permute.xlu0 %2113 }
 0x682   : > { %v2241_v12 = vmul.f32 %v6687_v8, %v2235_v10  ;;  %v2196_v62 = vld [vmem:[#allocation2 + $0x18] sm:$0xf] }
 0x683   : > { %v2223_v16 = vrot.slane %v2219_v49, 4  ;;  %v2224_v15 = vrot.slane %v2220_v60, 4  ;;  %v2202_v57 = vmul.f32 %v6689_v9, %v2196_v62  ;;  %v2152_v39 = vld [vmem:[#allocation2 + $0x18] sm:$0xf] }
 0x684   : > { %2246 = vrot.lane.b32.xlu2 %v2241_v12, %s8281_s16  ;;  %v2134_v14 = vld [vmem:[#allocation2 + $0x18] sm:$0xf]  ;;  %s6071_s16 = smov 12  }
 0x685   : > { %2226 = vrot.lane.b32.xlu0 %v2223_v16, %s8277_s23  ;;  %v2225_v13 = vsel %vm2120_vm9, %v2223_v16, %v2224_v15  ;;  %v2175_v7 = vld [vmem:[#allocation2 + $0x18] sm:$0xf]  ;;  %v2140_v34 = vmul.f32 %v6714_v40, %v2134_v14  ;;  %v2316_v14 = vld [vmem:[%s6139_s14 + $0x8] sm:$0xf] }
 0x686   : > { %2228 = vrot.lane.b32.xlu1 %v2225_v13, %s8277_s23  ;;  %v2181_v49 = vmul.f32 %v6708_v52, %v2175_v7  ;;  %v2111_v60 = vld [vmem:[#allocation2 + $0x18] sm:$0xf]  ;;  %v2116_v13 = vmul.f32 %v6691_v24, %v6731_v59 }
 0x687   : > { %v2091_v15 = vld [vmem:[#allocation2 + $0x18] sm:$0xf] }
 0x688   : > { %v6717_v55 = vpop.permute.xlu1 %2154  ;;  %v2185_v16 = vrot.slane %v2181_v49, 4 }
 0x689   : > { %v2157_v5 = vmul.f32 %v6691_v24, %v6717_v55  ;;  %v2158_v21 = vmul.f32 %v6717_v55, %v2152_v39  ;;  %v2121_v39 = vrot.slane %v2116_v13, 4 }
 0x68a   : > { %v2186_v62 = vsel %vm2120_vm9, %v2184_v42, %v2185_v16 }
 0x68b   : > { %v2161_v31 = vrot.slane %v2157_v5, 4  ;;  %v2162_v19 = vrot.slane %v2158_v21, 4  ;;  %v2301_v5 = vld [vmem:[%s8407_s8] sm:$0xff] }
 0x68c   : > { %2207 = vrot.lane.b32.xlu2 %v2202_v57, %s8279_s22  ;;  %v2117_v57 = vmul.f32 %v6731_v59, %v2111_v60  ;;  %s8283_s22 = smov 21  }
 0x68d   : > { %2187 = vrot.lane.b32.xlu0 %v2184_v42, %s8341_s11  ;;  %v2163_v10 = vsel %vm2120_vm9, %v2161_v31, %v2162_v19  ;;  %v2315_v42 = vld [vmem:[%s6139_s14] sm:$0xff] }
 0x68e   : > { %2143 = vrot.lane.b32.xlu1 %v2139_v63, %s8265_s0  ;;  %v2122_v63 = vrot.slane %v2117_v57, 4 }
 0x690   : > { %v6734_v12 = vpop.permute.xlu1 %2093  ;;  %v2123_v21 = vsel %vm2120_vm9, %v2121_v39, %v2122_v63 }
 0x691   : > { %v2097_v0 = vmul.f32 %v6734_v12, %v2091_v15  ;;  %v2096_v7 = vmul.f32 %v6691_v24, %v6734_v12 }
 0x694   : > { %2145 = vrot.lane.b32.xlu2 %v2140_v34, %s8265_s0  ;;  %s8274_s0 = smov 119   ;;  %v2302_v34 = vld [vmem:[%s8407_s8 + $0x8] sm:$0xf]  ;;  %s8454_s8 = smov 115  }
 0x695   : > { %2164 = vrot.lane.b32.xlu0 %v2161_v31, %s8298_s1 }
 0x696   : > { %2166 = vrot.lane.b32.xlu1 %v2163_v10, %s8298_s1 }
 0x69c   : > { %2189 = vrot.lane.b32.xlu2 %v2186_v62, %s8341_s11 }
 0x69d   : > { %2102 = vrot.lane.b32.xlu0 %v2097_v0, %s8271_s2 }
 0x69e   : > { %2124 = vrot.lane.b32.xlu1 %v2121_v39, %s8274_s0 }
 0x6a4   : > { %2126 = vrot.lane.b32.xlu2 %v2123_v21, %s8274_s0  ;;  %s8284_s0 = smov 13  }
 0x6a5   : > { %2305 = vperm.xlu0 %5810, %v2301_v5  }
 0x6a6   : > { %2319 = vperm.xlu1 %5811, %v2315_v42  }
 0x6ac   : > { %2100 = vrot.lane.b32.xlu2 %v2096_v7, %s8271_s2  ;;  %s6066_s2 = smov 22  }
 0x6ad   : > { %2324 = vperm.xlu0 %5810, %v2316_v14  }
 0x6b4   : > { %2310 = vperm.xlu2 %5812, %v2302_v34  }
 0x6d5   : > { %v2245_v31 = vpop.permute.xlu0 %2244  ;;  %v2206_v19 = vpop.permute.xlu1 %2205 }
 0x6d6   : > { %2250 = vst.msk [vmem:[#allocation3 + $0xc0] sm:$0xff] %vm2106_vm4, %v2245_v31 }
 0x6d7   : > { %2211 = vst.msk [vmem:[#allocation3 + $0x90] sm:$0xff] %vm2106_vm4, %v2206_v19  ;;  %v2260_v19 = vld [vmem:[#allocation3 + $0x60] sm:$0xff] }
 0x6dd   : > { %v2266_v24 = vld [vmem:[#allocation3 + $0xc0] sm:$0xff] }
 0x6de   : > { %v2247_v49 = vpop.permute.xlu2 %2246  ;;  %v2263_v21 = vld [vmem:[#allocation3 + $0x90] sm:$0xff] }
 0x6df   : > { %2251 = vst.msk [vmem:[#allocation3 + $0xd0] sm:$0xf] %vm8346_vm11, %v2247_v49 }
 0x6e6   : > { %v2208_v10 = vpop.permute.xlu2 %2207  ;;  %v2267_v16 = vld [vmem:[#allocation3 + $0xd0] sm:$0xf] }
 0x6e7   : > { %2212 = vst.msk [vmem:[#allocation3 + $0xa0] sm:$0xf] %vm8346_vm11, %v2208_v10  ;;  %5659 = vmatpush.msk.msrb.mxu2 %vm2120_vm9, %v2267_v16 }
 0x6e9   : > { %2281 = vmatpush.msrb.mxu2 %v2266_v24 }
 0x6ee   : > { %v2146_v60 = vpop.permute.xlu2 %2145 }
 0x6ef   : > { %2150 = vst.msk [vmem:[#allocation3 + $0x40] sm:$0xf] %vm8346_vm11, %v2146_v60 }
 0x6f6   : > { %v2190_v15 = vpop.permute.xlu2 %2189 }
 0x6f7   : > { %v2227_v13 = vpop.permute.xlu0 %2226  ;;  %2194 = vst.msk [vmem:[#allocation3 + $0x80] sm:$0xff] %vm2106_vm4, %v2190_v15 }
 0x6f8   : > { %2232 = vst.msk [vmem:[#allocation3 + $0xa0] sm:$0xf0] %vm2130_vm12, %v2227_v13  ;;  %v2229_v0 = vpop.permute.xlu1 %2228 }
 0x6f9   : > { %2233 = vst.msk [vmem:[#allocation3 + $0xb0] sm:$0xff] %vm2106_vm4, %v2229_v0  ;;  %v2252_v0 = vld [vmem:[%s8408_s3] sm:$0xff] }
 0x6fe   : > { %v2127_v62 = vpop.permute.xlu2 %2126  ;;  %v2262_v34 = vld [vmem:[#allocation3 + $0x80] sm:$0xff] }
 0x6ff   : > { %v2188_v57 = vpop.permute.xlu0 %2187  ;;  %2132 = vst.msk [vmem:[#allocation3 + $0x20] sm:$0xff] %vm2106_vm4, %v2127_v62  ;;  %v2264_v5 = vld [vmem:[#allocation3 + $0xa0] sm:$0xff] }
 0x700   : > { %2193 = vst.msk [vmem:[#allocation3 + $0x70] sm:$0xf0] %vm2130_vm12, %v2188_v57  ;;  %v2144_v39 = vpop.permute.xlu1 %2143  ;;  %v2265_v63 = vld [vmem:[#allocation3 + $0xb0] sm:$0xff] }
 0x701   : > { %2149 = vst.msk [vmem:[#allocation3 + $0x30] sm:$0xff] %vm2106_vm4, %v2144_v39  ;;  %2282 = vmatpush.msrb.mxu2 %v2265_v63  ;;  %v2253_v57 = vld [vmem:[%s8408_s3 + $0x8] sm:$0xf]  ;;  %s8451_s3 = smov 107  }
 0x703   : > { %2283 = vmatpush.msrb.mxu2 %v2264_v5 }
 0x705   : > { %2284 = vmatpush.msrb.mxu2 %v2263_v21 }
 0x706   : > { %v2101_v42 = vpop.permute.xlu2 %2100  ;;  %v2256_v15 = vld [vmem:[#allocation3 + $0x20] sm:$0xff] }
 0x707   : > { %v2165_v14 = vpop.permute.xlu0 %2164  ;;  %v2261_v7 = vld [vmem:[#allocation3 + $0x70] sm:$0xff]  ;;  %2107 = vst.msk [vmem:[#allocation3] sm:$0xff] %vm2106_vm4, %v2101_v42  ;;  %2285 = vmatpush.msrb.mxu2 %v2262_v34 }
 0x708   : > { %2170 = vst.msk [vmem:[#allocation3 + $0x40] sm:$0xf0] %vm2130_vm12, %v2165_v14  ;;  %v2167_v31 = vpop.permute.xlu1 %2166  ;;  %v2257_v60 = vld [vmem:[#allocation3 + $0x30] sm:$0xff] }
 0x709   : > { %2171 = vst.msk [vmem:[#allocation3 + $0x50] sm:$0xff] %vm2106_vm4, %v2167_v31  ;;  %2286 = vmatpush.msrb.mxu2 %v2261_v7 }
 0x70b   : > { %2287 = vmatpush.msrb.mxu2 %v2260_v19 }
 0x70e   : > { %v2254_v62 = vld [vmem:[#allocation3] sm:$0xff]  ;;  %v2311_v7 = vpop.permute.xlu2 %2310 }
 0x70f   : > { %v2103_v49 = vpop.permute.xlu0 %2102  ;;  %v2258_v24 = vld [vmem:[#allocation3 + $0x40] sm:$0xff] }
 0x710   : > { %2109 = vst.msk [vmem:[#allocation3 + $0x10] sm:$0xf] %vm8346_vm11, %v2103_v49  ;;  %v2125_v10 = vpop.permute.xlu1 %2124  ;;  %v2259_v16 = vld [vmem:[#allocation3 + $0x50] sm:$0xff] }
 0x711   : > { %2131 = vst.msk [vmem:[#allocation3 + $0x10] sm:$0xf0] %vm2130_vm12, %v2125_v10  ;;  %2288 = vmatpush.msrb.mxu2 %v2259_v16 }
 0x713   : > { %2289 = vmatpush.msrb.mxu2 %v2258_v24 }
 0x715   : > { %2290 = vmatpush.msrb.mxu2 %v2257_v60 }
 0x717   : > { %2291 = vmatpush.msrb.mxu2 %v2256_v15  ;;  %v2306_v39 = vpop.permute.xlu0 %2305 }
 0x718   : > { %v2255_v13 = vld [vmem:[#allocation3 + $0x10] sm:$0xff]  ;;  %v2320_v21 = vpop.permute.xlu1 %2319 }
 0x719   : > { %2292 = vmatpush.msrb.mxu2 %v2255_v13 }
 0x71b   : > { %2293 = vmatpush.msrb.mxu2 %v2254_v62 }
 0x71c   : > { %5660 = vmatmul.msk.f32.vlgmr.msrb.gmra.mxu2 %vm2268_vm5, %v2252_v0 }
 0x71f   : > { %v2325_v19 = vpop.permute.xlu0 %2324 }
 0x724   : > { %5661 = vmatmul.msk.f32.gmra.mxu2 %vm2268_vm5, %v2253_v57 }
 0x79f   : > { %v2295_v63 = vpop.f32.mrf.mxu2 }
 0x7a0   : > { %v2313_v5 = vmul.f32 %v2306_v39, %v2295_v63 }
 0x7a2   : > { %v2327_v42 = vadd.f32 %v2320_v21, %v2313_v5 }
 0x7a4   : > { %v2329_v14 = vmul.f32 1.442695, %v2327_v42 }
 0x7a6   : > { %5894 = vpow2.f32 %v2329_v14 }
 0x7a7   : > { %v2298_v34 = vpop.f32.mrf.mxu2 }
 0x7a8   : > { %v2314_v31 = vmul.f32 %v2311_v7, %v2298_v34 }
 0x7aa   : > { %v2328_v49 = vadd.f32 %v2325_v19, %v2314_v31 }
 0x7ac   : > { %v5895_v10 = vpop.eup %5894  ;;  %v2331_v16 = vmul.f32 1.442695, %v2328_v49 }
 0x7ad   : > { %v2333_v24 = vadd.f32 1.0, %v5895_v10 }
 0x7ae   : > { %5896 = vpow2.f32 %v2331_v16  ;;  %v2390_v16 = vld [vmem:[%s6254_s12 + $0x38] sm:$0xff] }
 0x7af   : > { %5898 = vlog2.f32 %v2333_v24  ;;  %v2389_v24 = vld [vmem:[%s6254_s12 + $0x30] sm:$0xff]  ;;  %2405 = vmatpush.msrb.mxu3 %v2390_v16  ;;  %v2420_v16 = vshra.s32 %v6290_v2, 2 }
 0x7b1   : > { %2406 = vmatpush.msrb.mxu3 %v2389_v24  ;;  %v2421_v24 = vand.u32 3, %v6290_v2  ;;  %vm2430_vm8 = vcmp.lt.s32.totalorder %v2420_v16, 3  ;;  %vm2422_vm2 = vcmp.ge.s32.totalorder %v2420_v16, 1 }
 0x7b3   : > { %vm2427_vm6 = vcmp.lt.s32.totalorder %v2421_v24, 3  ;;  %vm2424_vm3 = vcmp.ge.s32.totalorder %v2421_v24, 1 }
 0x7b4   : > { %v5897_v60 = vpop.eup %5896 }
 0x7b5   : > { %v5899_v15 = vpop.eup %5898  ;;  %v2334_v13 = vadd.f32 1.0, %v5897_v60  ;;  %v2388_v60 = vld [vmem:[%s6254_s12 + $0x28] sm:$0xff] }
 0x7b6   : > { %v2336_v0 = vmul.f32 0.6931472, %v5899_v15  ;;  %v2387_v15 = vld [vmem:[%s6254_s12 + $0x20] sm:$0xff]  ;;  %2407 = vmatpush.msrb.mxu3 %v2388_v60  ;;  %v2431_v60 = vsel %vm2430_vm8, 1.0, %v8288_v1  ;;  %vm2484_vm8 = vcmask 130052  }
 0x7b7   : > { %5900 = vlog2.f32 %v2334_v13  ;;  %v2386_v13 = vld [vmem:[%s6254_s12 + $0x18] sm:$0xff] }
 0x7b8   : > { %5902 = vtanh.f32 %v2336_v0  ;;  %2408 = vmatpush.msrb.mxu3 %v2387_v15  ;;  %v2385_v0 = vld [vmem:[%s6254_s12 + $0x10] sm:$0xff]  ;;  %v2428_v15 = vsel %vm2427_vm6, 1.0, %v8288_v1  ;;  %vm2463_vm6 = vcmask 125952  }
 0x7ba   : > { %2409 = vmatpush.msrb.mxu3 %v2386_v13  ;;  %v2433_v13 = vmul.f32 %v2431_v60, %v2428_v15 }
 0x7bc   : > { %2410 = vmatpush.msrb.mxu3 %v2385_v0  ;;  %v2423_v0 = vsel %vm2422_vm2, 1.0, %v8288_v1  ;;  %vm2442_vm2 = vcmask 269448  }
 0x7bd   : > { %v5901_v62 = vpop.eup %5900 }
 0x7be   : > { %v5903_v57 = vpop.eup %5902  ;;  %v2338_v39 = vmul.f32 0.6931472, %v5901_v62  ;;  %v2384_v62 = vld [vmem:[%s6254_s12 + $0x8] sm:$0xff] }
 0x7bf   : > { %v6775_v63 = vmul.f32 %v5903_v57, %v2327_v42  ;;  %2411 = vmatpush.msrb.mxu3 %v2384_v62  ;;  %v2383_v57 = vld [vmem:[%s6254_s12] sm:$0xff] }
 0x7c0   : > { %5904 = vtanh.f32 %v2338_v39 }
 0x7c1   : > { %2345 = vrot.lane.b32.xlu1 %v6775_v63, %s8338_s18  ;;  %2412 = vmatpush.msrb.mxu3 %v2383_v57  ;;  %v2425_v57 = vsel %vm2424_vm3, 1.0, %v8288_v1  ;;  %vm2444_vm3 = vcmask 265352  }
 0x7c6   : > { %v5905_v5 = vpop.eup %5904 }
 0x7c7   : > { %v6779_v21 = vmul.f32 %v5905_v5, %v2328_v49 }
 0x7c9   : > { %2347 = vrot.lane.b32.xlu2 %v6779_v21, %s8338_s18 }
 0x823   : > { %v6783_v14 = vpop.permute.xlu2 %2347 }
 0x824   : > { %2352 = vst.msk [vmem:[#allocation2 + $0x18] sm:$0xf] %vm8340_vm7, %v6783_v14  ;;  %vm2832_vm7 = vcmask 31748  }
 0x82b   : > { %v2354_v7 = vld [vmem:[#allocation2 + $0x18] sm:$0xf] }
 0x82c   : > { %2367 = vrot.lane.b32.xlu1 %v2354_v7, %s8314_s26 }
 0x833   : > { %v6788_v42 = vpop.permute.xlu1 %2345 }
 0x834   : > { %2351 = vst.msk [vmem:[#allocation2] sm:$0xff] %vm8343_vm14, %v6788_v42  ;;  %2359 = vrot.lane.b32.xlu1 %v2354_v7, %s8341_s11 }
 0x83b   : > { %v2353_v34 = vld [vmem:[#allocation2] sm:$0xff] }
 0x83c   : > { %2365 = vrot.lane.b32.xlu0 %v2353_v34, %s8314_s26  ;;  %2357 = vrot.lane.b32.xlu2 %v2353_v34, %s8341_s11 }
 0x896   : > { %v2358_v39 = vpop.permute.xlu2 %2357 }
 0x897   : > { %v2363_v5 = vmax.f32 %v6775_v63, %v2358_v39  ;;  %v2432_v39 = vmul.f32 %v2431_v60, %v2425_v57 }
 0x89e   : > { %v2368_v31 = vpop.permute.xlu1 %2367 }
 0x89f   : > { %v2372_v19 = vmax.f32 %v2354_v7, %v2368_v31 }
 0x8a1   : > { %2377 = vrot.lane.b32.xlu2 %v2372_v19, %s8277_s23 }
 0x8a6   : > { %v2360_v31 = vpop.permute.xlu1 %2359 }
 0x8a9   : > { %2591 = vrot.lane.b32.xlu2 %v2433_v13, %s6066_s2  ;;  %s6068_s2 = smov 20  }
 0x8ae   : > { %v2366_v49 = vpop.permute.xlu0 %2365 }
 0x8af   : > { %v2371_v10 = vmax.f32 %v2353_v34, %v2366_v49  ;;  %v2364_v49 = vmax.f32 %v6779_v21, %v2360_v31 }
 0x8b1   : > { %2375 = vrot.lane.b32.xlu0 %v2371_v10, %s8277_s23  ;;  %2531 = vrot.lane.b32.xlu2 %v2428_v15, %s6038_s15  ;;  %s6069_s23 = smov 14  }
 0x8b9   : > { %2468 = vrot.lane.b32.xlu2 %v2423_v0, %s8284_s0  ;;  %s8330_s0 = smov 107  }
 0x8fb   : > { %v2378_v19 = vpop.permute.xlu2 %2377 }
 0x8fc   : > { %v2382_v10 = vmax.f32 %v2364_v49, %v2378_v19 }
 0x903   : > { %v6826_v19 = vpop.permute.xlu2 %2591 }
 0x923   : > { %v2376_v7 = vpop.permute.xlu0 %2375 }
 0x924   : > { %v2381_v34 = vmax.f32 %v2363_v5, %v2376_v7  ;;  %v2429_v7 = vmul.f32 %v2428_v15, %v2423_v0 }
 0x926   : > { %5662 = vmatmul.msk.f32.vlgmr.msrb.gmra.mxu3 %vm2106_vm4, %v2381_v34  ;;  %v2426_v34 = vmul.f32 %v2425_v57, %v2423_v0 }
 0x92e   : > { %5663 = vmatmul.msk.f32.gmra.mxu3 %vm2106_vm4, %v2382_v10 }
 0x9a9   : > { %v2414_v62 = vpop.f32.mrf.mxu3 }
 0x9aa   : > { %2526 = vst.msk [vmem:[#allocation3 + $0x60] sm:$0xff] %vm1274_vm13, %v2414_v62  ;;  %2436 = vrot.lane.b32.xlu1 %v2414_v62, %s8338_s18 }
 0x9b1   : > { %v2417_v5 = vpop.f32.mrf.mxu3 }
 0x9b2   : > { %2527 = vst.msk [vmem:[#allocation3 + $0x70] sm:$0xf] %vm2463_vm6, %v2417_v5  ;;  %2552 = vrot.lane.b32.xlu1 %v2432_v39, %s6068_s2  ;;  %2438 = vrot.lane.b32.xlu0 %v2417_v5, %s8338_s18 }
 0x9ba   : > { %2490 = vrot.lane.b32.xlu1 %v2429_v7, %s6069_s23  ;;  %2570 = vrot.lane.b32.xlu0 %v2431_v60, %s8283_s22  ;;  %s8285_s22 = smov 106  }
 0x9c2   : > { %2508 = vrot.lane.b32.xlu0 %v2425_v57, %s6044_s28 }
 0x9ca   : > { %2449 = vrot.lane.b32.xlu0 %v2426_v34, %s6071_s16  ;;  %s8294_s16 = smov 108  }
 0xa1c   : > { %v2437_v31 = vpop.permute.xlu1 %2436 }
 0xa1d   : > { %2443 = vst.msk [vmem:[#allocation2] sm:$0xff] %vm2442_vm2, %v2437_v31  ;;  %v6848_v31 = vpop.permute.xlu2 %2531 }
 0xa24   : > { %v6828_v49 = vpop.permute.xlu1 %2552  ;;  %v2439_v10 = vpop.permute.xlu0 %2438  ;;  %v6830_v16 = vld [vmem:[#allocation2] sm:$0xff] }
 0xa25   : > { %2445 = vst.msk [vmem:[#allocation2 + $0x18] sm:$0xf] %vm2444_vm3, %v2439_v10  ;;  %v2555_v24 = vmul.f32 %v6828_v49, %v6830_v16  ;;  %v2594_v60 = vmul.f32 %v6826_v19, %v6830_v16  ;;  %v6869_v61 = vpop.permute.xlu2 %2468 }
 0xa27   : > { %2559 = vrot.lane.b32.xlu0 %v2555_v24, %s8294_s16  ;;  %2598 = vrot.lane.b32.xlu2 %v2594_v60, %s8285_s22  ;;  %v2534_v24 = vmul.f32 %v6830_v16, %v6848_v31 }
 0xa2c   : > { %v6839_v15 = vpop.permute.xlu0 %2570  ;;  %v2589_v13 = vld [vmem:[#allocation2 + $0x18] sm:$0xf]  ;;  %v6853_v60 = vpop.permute.xlu1 %2490 }
 0xa2d   : > { %v2568_v0 = vld [vmem:[#allocation2 + $0x18] sm:$0xf]  ;;  %v2595_v62 = vmul.f32 %v6826_v19, %v2589_v13  ;;  %v2573_v57 = vmul.f32 %v6839_v15, %v6830_v16 }
 0xa2e   : > { %v2574_v39 = vmul.f32 %v6839_v15, %v2568_v0  ;;  %v2550_v10 = vld [vmem:[#allocation2 + $0x18] sm:$0xf] }
 0xa2f   : > { %2600 = vrot.lane.b32.xlu1 %v2595_v62, %s8285_s22  ;;  %v2577_v5 = vrot.slane %v2573_v57, 4  ;;  %v2556_v13 = vmul.f32 %v6828_v49, %v2550_v10  ;;  %v2538_v62 = vrot.slane %v2534_v24, 4  ;;  %v2493_v57 = vmul.f32 %v6830_v16, %v6853_v60  ;;  %s8296_s22 = smov 114   ;;  %v2529_v10 = vld [vmem:[#allocation2 + $0x18] sm:$0xf] }
 0xa30   : > { %v2578_v7 = vrot.slane %v2574_v39, 4  ;;  %v2506_v39 = vld [vmem:[#allocation2 + $0x18] sm:$0xf]  ;;  %v2535_v1 = vmul.f32 %v6848_v31, %v2529_v10 }
 0xa31   : > { %2580 = vrot.lane.b32.xlu2 %v2577_v5, %s8330_s0 }
 0xa32   : > { %v2579_v34 = vsel %vm2120_vm9, %v2577_v5, %v2578_v7 }
 0xa33   : > { %2582 = vrot.lane.b32.xlu0 %v2579_v34, %s8330_s0  ;;  %v2488_v34 = vld [vmem:[#allocation2 + $0x18] sm:$0xf] }
 0xa34   : > { %v6856_v0 = vpop.permute.xlu0 %2508  ;;  %v2494_v35 = vmul.f32 %v6853_v60, %v2488_v34 }
 0xa35   : > { %v2511_v5 = vmul.f32 %v6830_v16, %v6856_v0  ;;  %v2512_v7 = vmul.f32 %v6856_v0, %v2506_v39  ;;  %v2539_v39 = vrot.slane %v2535_v1, 4 }
 0xa37   : > { %2561 = vrot.lane.b32.xlu1 %v2556_v13, %s8294_s16  ;;  %v2515_v13 = vrot.slane %v2511_v5, 4  ;;  %v2516_v24 = vrot.slane %v2512_v7, 4  ;;  %s8435_s16 = sld [smem:[#allocation9_spill]]  ;;  %v2471_v5 = vmul.f32 %v6830_v16, %v6869_v61  ;;  %v2540_v7 = vsel %vm2120_vm9, %v2538_v62, %v2539_v39 }
 0xa39   : > { %2541 = vrot.lane.b32.xlu2 %v2538_v62, %s8341_s11  ;;  %v2517_v4 = vsel %vm2120_vm9, %v2515_v13, %v2516_v24  ;;  %v2654_v62 = vld [vmem:[%s6149_s24] sm:$0xff] }
 0xa3b   : > { %2497 = vrot.lane.b32.xlu0 %v2493_v57, %s8296_s22  ;;  %v2466_v57 = vld [vmem:[#allocation2 + $0x18] sm:$0xf] }
 0xa3c   : > { %v6874_v43 = vpop.permute.xlu0 %2449  ;;  %v2472_v34 = vmul.f32 %v6869_v61, %v2466_v57 }
 0xa3d   : > { %v2668_v24 = vld [vmem:[%s8435_s16] sm:$0xff]  ;;  %v2452_v39 = vmul.f32 %v6830_v16, %v6874_v43  ;;  %v2669_v57 = vld [vmem:[%s8435_s16 + $0x8] sm:$0xf] }
 0xa3e   : > { %v2476_v1 = vrot.slane %v2472_v34, 4 }
 0xa3f   : > { %2499 = vrot.lane.b32.xlu1 %v2494_v35, %s8296_s22  ;;  %v2447_v35 = vld [vmem:[#allocation2 + $0x18] sm:$0xf]  ;;  %s8300_s22 = smov 116  }
 0xa40   : > { %v2453_v10 = vmul.f32 %v6874_v43, %v2447_v35 }
 0xa41   : > { %2518 = vrot.lane.b32.xlu2 %v2515_v13, %s8298_s1 }
 0xa43   : > { %2520 = vrot.lane.b32.xlu0 %v2517_v4, %s8298_s1  ;;  %v2475_v4 = vrot.slane %v2471_v5, 4  ;;  %s8309_s1 = smov 115   ;;  %v2655_v5 = vld [vmem:[%s6149_s24 + $0x8] sm:$0xf] }
 0xa45   : > { %v2477_v13 = vsel %vm2120_vm9, %v2475_v4, %v2476_v1 }
 0xa47   : > { %2543 = vrot.lane.b32.xlu1 %v2540_v7, %s8341_s11 }
 0xa49   : > { %2458 = vrot.lane.b32.xlu2 %v2453_v10, %s8300_s22 }
 0xa4b   : > { %2478 = vrot.lane.b32.xlu0 %v2475_v4, %s8309_s1 }
 0xa4f   : > { %2480 = vrot.lane.b32.xlu1 %v2477_v13, %s8309_s1  ;;  %s8437_s1 = sld [smem:[#allocation27_spill]] }
 0xa51   : > { %2658 = vperm.xlu2 %5812, %v2654_v62  }
 0xa53   : > { %2672 = vperm.xlu0 %5810, %v2668_v24  }
 0xa57   : > { %2456 = vrot.lane.b32.xlu1 %v2452_v39, %s8300_s22  ;;  %s8436_s22 = sld [smem:[#allocation8_spill]] }
 0xa59   : > { %2677 = vperm.xlu2 %5812, %v2669_v57  }
 0xa5f   : > { %2663 = vperm.xlu1 %5811, %v2655_v5  }
 0xa81   : > { %v2599_v7 = vpop.permute.xlu2 %2598 }
 0xa82   : > { %2604 = vst.msk [vmem:[#allocation3 + $0xc0] sm:$0xff] %vm1274_vm13, %v2599_v7 }
 0xa89   : > { %v2620_v39 = vld [vmem:[#allocation3 + $0xc0] sm:$0xff] }
 0xa8b   : > { %v2581_v35 = vpop.permute.xlu2 %2580 }
 0xa8c   : > { %2586 = vst.msk [vmem:[#allocation3 + $0xa0] sm:$0xf0] %vm2484_vm8, %v2581_v35 }
 0xa93   : > { %v2542_v34 = vpop.permute.xlu2 %2541 }
 0xa94   : > { %2547 = vst.msk [vmem:[#allocation3 + $0x70] sm:$0xf0] %vm2484_vm8, %v2542_v34 }
 0xa99   : > { %v2560_v10 = vpop.permute.xlu0 %2559 }
 0xa9a   : > { %2565 = vst.msk [vmem:[#allocation3 + $0x90] sm:$0xff] %vm1274_vm13, %v2560_v10 }
 0xa9b   : > { %v2519_v16 = vpop.permute.xlu2 %2518 }
 0xa9c   : > { %2524 = vst.msk [vmem:[#allocation3 + $0x40] sm:$0xf0] %vm2484_vm8, %v2519_v16 }
 0xaa1   : > { %v2601_v4 = vpop.permute.xlu1 %2600  ;;  %v2617_v34 = vld [vmem:[#allocation3 + $0x90] sm:$0xff] }
 0xaa2   : > { %2605 = vst.msk [vmem:[#allocation3 + $0xd0] sm:$0xf] %vm2463_vm6, %v2601_v4 }
 0xaa3   : > { %v2459_v1 = vpop.permute.xlu2 %2458 }
 0xaa4   : > { %2464 = vst.msk [vmem:[#allocation3 + $0x10] sm:$0xf] %vm2463_vm6, %v2459_v1 }
 0xaa5   : > { %v2583_v13 = vpop.permute.xlu0 %2582 }
 0xaa6   : > { %2587 = vst.msk [vmem:[#allocation3 + $0xb0] sm:$0xff] %vm1274_vm13, %v2583_v13 }
 0xaa9   : > { %v2562_v62 = vpop.permute.xlu1 %2561  ;;  %v2621_v24 = vld [vmem:[#allocation3 + $0xd0] sm:$0xf] }
 0xaaa   : > { %2566 = vst.msk [vmem:[#allocation3 + $0xa0] sm:$0xf] %vm2463_vm6, %v2562_v62  ;;  %5664 = vmatpush.msk.msra.mxu3 %vm2120_vm9, %v2621_v24  ;;  %v2615_v62 = vld [vmem:[#allocation3 + $0x70] sm:$0xff]  ;;  %v2614_v24 = vld [vmem:[#allocation3 + $0x60] sm:$0xff] }
 0xaac   : > { %2634 = vmatpush.msra.mxu3 %v2620_v39 }
 0xaad   : > { %v2498_v57 = vpop.permute.xlu0 %2497  ;;  %v2619_v5 = vld [vmem:[#allocation3 + $0xb0] sm:$0xff] }
 0xaae   : > { %2503 = vst.msk [vmem:[#allocation3 + $0x30] sm:$0xff] %vm1274_vm13, %v2498_v57  ;;  %2635 = vmatpush.msra.mxu3 %v2619_v5 }
 0xab1   : > { %v2618_v7 = vld [vmem:[#allocation3 + $0xa0] sm:$0xff]  ;;  %v2500_v35 = vpop.permute.xlu1 %2499 }
 0xab2   : > { %2504 = vst.msk [vmem:[#allocation3 + $0x40] sm:$0xf] %vm2463_vm6, %v2500_v35  ;;  %2636 = vmatpush.msra.mxu3 %v2618_v7 }
 0xab4   : > { %2637 = vmatpush.msra.mxu3 %v2617_v34 }
 0xab5   : > { %v2521_v10 = vpop.permute.xlu0 %2520  ;;  %v2611_v7 = vld [vmem:[#allocation3 + $0x30] sm:$0xff] }
 0xab6   : > { %2525 = vst.msk [vmem:[#allocation3 + $0x50] sm:$0xff] %vm1274_vm13, %v2521_v10  ;;  %v2606_v10 = vld [vmem:[%s8436_s22] sm:$0xff] }
 0xab9   : > { %v2544_v16 = vpop.permute.xlu1 %2543  ;;  %v2612_v57 = vld [vmem:[#allocation3 + $0x40] sm:$0xff] }
 0xaba   : > { %2548 = vst.msk [vmem:[#allocation3 + $0x80] sm:$0xff] %vm1274_vm13, %v2544_v16 }
 0xabd   : > { %v2479_v4 = vpop.permute.xlu0 %2478  ;;  %v2613_v39 = vld [vmem:[#allocation3 + $0x50] sm:$0xff] }
 0xabe   : > { %2485 = vst.msk [vmem:[#allocation3 + $0x10] sm:$0xf0] %vm2484_vm8, %v2479_v4  ;;  %v2607_v4 = vld [vmem:[%s8436_s22 + $0x8] sm:$0xf] }
 0xac1   : > { %v2481_v1 = vpop.permute.xlu1 %2480  ;;  %v2616_v13 = vld [vmem:[#allocation3 + $0x80] sm:$0xff] }
 0xac2   : > { %2486 = vst.msk [vmem:[#allocation3 + $0x20] sm:$0xff] %vm1274_vm13, %v2481_v1  ;;  %2638 = vmatpush.msra.mxu3 %v2616_v13  ;;  %v2659_v1 = vpop.permute.xlu2 %2658 }
 0xac4   : > { %2639 = vmatpush.msra.mxu3 %v2615_v62 }
 0xac5   : > { %v2609_v34 = vld [vmem:[#allocation3 + $0x10] sm:$0xff] }
 0xac6   : > { %2640 = vmatpush.msra.mxu3 %v2614_v24  ;;  %v2673_v24 = vpop.permute.xlu0 %2672 }
 0xac8   : > { %2641 = vmatpush.msra.mxu3 %v2613_v39 }
 0xac9   : > { %v2457_v5 = vpop.permute.xlu1 %2456  ;;  %v2610_v35 = vld [vmem:[#allocation3 + $0x20] sm:$0xff] }
 0xaca   : > { %2462 = vst.msk [vmem:[#allocation3] sm:$0xff] %vm1274_vm13, %v2457_v5  ;;  %2642 = vmatpush.msra.mxu3 %v2612_v57  ;;  %v2678_v33 = vpop.permute.xlu2 %2677 }
 0xacc   : > { %2643 = vmatpush.msra.mxu3 %v2611_v7 }
 0xace   : > { %2644 = vmatpush.msra.mxu3 %v2610_v35 }
 0xad0   : > { %2645 = vmatpush.msra.mxu3 %v2609_v34 }
 0xad1   : > { %v2608_v16 = vld [vmem:[#allocation3] sm:$0xff]  ;;  %v2664_v5 = vpop.permute.xlu1 %2663 }
 0xad2   : > { %2646 = vmatpush.msra.mxu3 %v2608_v16 }
 0xad3   : > { %5665 = vmatmul.msk.f32.vlgmr.msra.gmra.mxu3 %vm2268_vm5, %v2606_v10 }
 0xadb   : > { %5666 = vmatmul.msk.f32.gmra.mxu3 %vm2268_vm5, %v2607_v4 }
 0xb56   : > { %v2648_v13 = vpop.f32.mrf.mxu3 }
 0xb57   : > { %v2666_v62 = vmul.f32 %v2659_v1, %v2648_v13 }
 0xb59   : > { %v2680_v39 = vadd.f32 %v2673_v24, %v2666_v62 }
 0xb5b   : > { %v2682_v57 = vmul.f32 1.442695, %v2680_v39 }
 0xb5d   : > { %5906 = vpow2.f32 %v2682_v57 }
 0xb5e   : > { %v2651_v7 = vpop.f32.mrf.mxu3 }
 0xb5f   : > { %v2667_v35 = vmul.f32 %v2664_v5, %v2651_v7  ;;  %v2737_v7 = vld [vmem:[%s8437_s1 + $0x8] sm:$0xff] }
 0xb60   : > { %2758 = vmatpush.msra.mxu2 %v2737_v7 }
 0xb61   : > { %v2681_v34 = vadd.f32 %v2678_v33, %v2667_v35 }
 0xb63   : > { %v5907_v51 = vpop.eup %5906  ;;  %v2684_v47 = vmul.f32 1.442695, %v2681_v34 }
 0xb64   : > { %v2686_v16 = vadd.f32 1.0, %v5907_v51 }
 0xb65   : > { %5908 = vpow2.f32 %v2684_v47 }
 0xb66   : > { %5910 = vlog2.f32 %v2686_v16  ;;  %v2736_v16 = vld [vmem:[%s8437_s1] sm:$0xff]  ;;  %s8448_s1 = smov 21  }
 0xb67   : > { %2759 = vmatpush.msra.mxu2 %v2736_v16 }
 0xb6b   : > { %v5909_v10 = vpop.eup %5908 }
 0xb6c   : > { %v5911_v27 = vpop.eup %5910  ;;  %v2687_v4 = vadd.f32 1.0, %v5909_v10 }
 0xb6d   : > { %v2689_v32 = vmul.f32 0.6931472, %v5911_v27 }
 0xb6e   : > { %5912 = vlog2.f32 %v2687_v4 }
 0xb6f   : > { %5914 = vtanh.f32 %v2689_v32 }
 0xb74   : > { %v5913_v1 = vpop.eup %5912 }
 0xb75   : > { %v5915_v13 = vpop.eup %5914  ;;  %v2691_v62 = vmul.f32 0.6931472, %v5913_v1 }
 0xb76   : > { %v6914_v24 = vmul.f32 %v5915_v13, %v2680_v39 }
 0xb77   : > { %5916 = vtanh.f32 %v2691_v62  ;;  %v6941_v62 = vshra.s32 %v6290_v2, 1 }
 0xb78   : > { %2698 = vrot.lane.b32.xlu0 %v6914_v24, %s8338_s18 }
 0xb79   : > { %vm2777_vm10 = vcmp.lt.s32.totalorder %v6941_v62, 1  ;;  %vm2769_vm1 = vcmp.ge.s32.totalorder %v6941_v62, 1  ;;  %vm3052_vm14 = vcmp.lt.s32.totalorder %v6941_v62, 0  ;;  %vm3044_vm11 = vcmp.ge.s32.totalorder %v6941_v62, 2 }
 0xb7d   : > { %v5917_v33 = vpop.eup %5916 }
 0xb7e   : > { %v6918_v51 = vmul.f32 %v5917_v33, %v2681_v34  ;;  %v2768_v33 = vand.u32 1, %v6290_v2 }
 0xb80   : > { %2700 = vrot.lane.b32.xlu1 %v6918_v51, %s8338_s18  ;;  %vm2774_vm15 = vcmp.lt.s32.totalorder %v2768_v33, 1 }
 0xbea   : > { %v6922_v47 = vpop.permute.xlu0 %2698 }
 0xbeb   : > { %2704 = vst.msk [vmem:[#allocation2] sm:$0xff] %vm2442_vm2, %v6922_v47 }
 0xbf2   : > { %v6926_v32 = vpop.permute.xlu1 %2700  ;;  %v2706_v27 = vld [vmem:[#allocation2] sm:$0xff] }
 0xbf3   : > { %2705 = vst.msk [vmem:[#allocation2 + $0x18] sm:$0xf] %vm2444_vm3, %v6926_v32  ;;  %2718 = vrot.lane.b32.xlu2 %v2706_v27, %s8314_s26  ;;  %2710 = vrot.lane.b32.xlu1 %v2706_v27, %s8341_s11 }
 0xbfa   : > { %v2707_v39 = vld [vmem:[#allocation2 + $0x18] sm:$0xf] }
 0xbfb   : > { %2720 = vrot.lane.b32.xlu0 %v2707_v39, %s8314_s26  ;;  %s8336_s26 = smov 15  }
 0xc03   : > { %2712 = vrot.lane.b32.xlu0 %v2707_v39, %s8341_s11 }
 0xc4d   : > { %v2719_v57 = vpop.permute.xlu2 %2718 }
 0xc4e   : > { %v2724_v5 = vmax.f32 %v2706_v27, %v2719_v57  ;;  %v8438_v27 = vmov 0.0  }
 0xc4f   : > { %v2778_v57 = vsel %vm2777_vm10, 1.0, %v8438_v27  ;;  %v2770_v2 = vsel %vm2769_vm1, 1.0, %v8438_v27  ;;  %vm2809_vm10 = vcmask 31744   ;;  %vm2789_vm1 = vcmask 171144  }
 0xc50   : > { %2728 = vrot.lane.b32.xlu2 %v2724_v5, %s8330_s0 }
 0xc65   : > { %v2711_v10 = vpop.permute.xlu1 %2710 }
 0xc66   : > { %v2716_v4 = vmax.f32 %v6914_v24, %v2711_v10 }
 0xc6d   : > { %v2721_v35 = vpop.permute.xlu0 %2720 }
 0xc6e   : > { %v2725_v34 = vmax.f32 %v2707_v39, %v2721_v35  ;;  %v2775_v39 = vsel %vm2774_vm15, 1.0, %v8438_v27  ;;  %vm2771_vm15 = vcmp.ge.s32.totalorder %v2768_v33, 1 }
 0xc6f   : > { %v2780_v5 = vmul.f32 %v2778_v57, %v2775_v39 }
 0xc70   : > { %2730 = vrot.lane.b32.xlu1 %v2725_v34, %s8330_s0  ;;  %s8441_s0 = sld [smem:[#allocation11_spill]] }
 0xc75   : > { %v2713_v7 = vpop.permute.xlu0 %2712 }
 0xc76   : > { %v2717_v35 = vmax.f32 %v6918_v51, %v2713_v7 }
 0xc78   : > { %2939 = vrot.lane.b32.xlu1 %v2780_v5, %s6068_s2  ;;  %s6079_s2 = smov 19  }
 0xc80   : > { %2879 = vrot.lane.b32.xlu1 %v2775_v39, %s6038_s15 }
 0xc88   : > { %2816 = vrot.lane.b32.xlu1 %v2770_v2, %s8336_s26  ;;  %s8443_s26 = smov 114  }
 0xcaa   : > { %v2729_v1 = vpop.permute.xlu2 %2728 }
 0xcab   : > { %v2734_v13 = vmax.f32 %v2716_v4, %v2729_v1  ;;  %v2772_v4 = vsel %vm2771_vm15, 1.0, %v8438_v27  ;;  %vm2791_vm15 = vcmask 167048  }
 0xcac   : > { %v2779_v1 = vmul.f32 %v2778_v57, %v2772_v4  ;;  %v2773_v33 = vmul.f32 %v2772_v4, %v2770_v2 }
 0xcad   : > { %5667 = vmatmul.msk.f32.vlgmr.msra.gmra.mxu2 %vm1274_vm13, %v2734_v13  ;;  %v2776_v13 = vmul.f32 %v2775_v39, %v2770_v2 }
 0xce2   : > { %v2731_v34 = vpop.permute.xlu1 %2730 }
 0xce3   : > { %v2735_v16 = vmax.f32 %v2717_v35, %v2731_v34 }
 0xce5   : > { %5668 = vmatmul.msk.f32.gmra.mxu2 %vm1274_vm13, %v2735_v16 }
 0xcea   : > { %v6965_v39 = vpop.permute.xlu1 %2939 }
 0xd30   : > { %v2761_v10 = vpop.f32.mrf.mxu2 }
 0xd31   : > { %2874 = vst.msk [vmem:[#allocation3 + $0x60] sm:$0xff] %vm2809_vm10, %v2761_v10  ;;  %2783 = vrot.lane.b32.xlu0 %v2761_v10, %s8338_s18 }
 0xd39   : > { %2900 = vrot.lane.b32.xlu0 %v2779_v1, %s6038_s15  ;;  %s8439_s15 = smov 108  }
 0xd41   : > { %2838 = vrot.lane.b32.xlu0 %v2776_v13, %s6044_s28 }
 0xd68   : > { %v2764_v5 = vpop.f32.mrf.mxu2 }
 0xd69   : > { %2875 = vst.msk [vmem:[#allocation3 + $0x70] sm:$0xf] %vm2811_vm0, %v2764_v5  ;;  %2785 = vrot.lane.b32.xlu2 %v2764_v5, %s8338_s18  ;;  %s8344_s18 = smov 113  }
 0xd71   : > { %2918 = vrot.lane.b32.xlu2 %v2778_v57, %s6079_s2 }
 0xd79   : > { %2856 = vrot.lane.b32.xlu2 %v2772_v4, %s6044_s28  ;;  %s8334_s28 = smov 109  }
 0xd81   : > { %2796 = vrot.lane.b32.xlu2 %v2773_v33, %s6069_s23  ;;  %s8440_s23 = smov 112  }
 0xda3   : > { %v2784_v7 = vpop.permute.xlu0 %2783 }
 0xda4   : > { %2790 = vst.msk [vmem:[#allocation2] sm:$0xff] %vm2789_vm1, %v2784_v7 }
 0xdab   : > { %v6967_v35 = vpop.permute.xlu0 %2900  ;;  %v6969_v34 = vld [vmem:[#allocation2] sm:$0xff] }
 0xdac   : > { %v2942_v16 = vmul.f32 %v6965_v39, %v6969_v34  ;;  %v2903_v57 = vmul.f32 %v6969_v34, %v6967_v35 }
 0xdae   : > { %2946 = vrot.lane.b32.xlu1 %v2942_v16, %s8439_s15  ;;  %2907 = vrot.lane.b32.xlu2 %v2903_v57, %s8341_s11 }
 0xdb3   : > { %v6992_v36 = vpop.permute.xlu0 %2838 }
 0xdc3   : > { %v2786_v2 = vpop.permute.xlu2 %2785 }
 0xdc4   : > { %2792 = vst.msk [vmem:[#allocation2 + $0x18] sm:$0xf] %vm2791_vm15, %v2786_v2  ;;  %v6987_v2 = vpop.permute.xlu1 %2879 }
 0xdcb   : > { %v6978_v10 = vpop.permute.xlu2 %2918  ;;  %v2937_v4 = vld [vmem:[#allocation2 + $0x18] sm:$0xf] }
 0xdcc   : > { %v2916_v1 = vld [vmem:[#allocation2 + $0x18] sm:$0xf]  ;;  %v2943_v13 = vmul.f32 %v6965_v39, %v2937_v4  ;;  %v2921_v5 = vmul.f32 %v6969_v34, %v6978_v10  ;;  %v2882_v4 = vmul.f32 %v6969_v34, %v6987_v2  ;;  %v7008_v30 = vpop.permute.xlu1 %2816 }
 0xdcd   : > { %v2922_v33 = vmul.f32 %v6978_v10, %v2916_v1  ;;  %v2898_v54 = vld [vmem:[#allocation2 + $0x18] sm:$0xf] }
 0xdce   : > { %2948 = vrot.lane.b32.xlu0 %v2943_v13, %s8439_s15  ;;  %v2925_v7 = vrot.slane %v2921_v5, 4  ;;  %v2904_v1 = vmul.f32 %v6967_v35, %v2898_v54  ;;  %v2886_v5 = vrot.slane %v2882_v4, 4  ;;  %v2836_v38 = vld [vmem:[#allocation2 + $0x18] sm:$0xf] }
 0xdcf   : > { %v2926_v16 = vrot.slane %v2922_v33, 4  ;;  %v2841_v33 = vmul.f32 %v6969_v34, %v6992_v36  ;;  %v2877_v54 = vld [vmem:[#allocation2 + $0x18] sm:$0xf]  ;;  %v2842_v53 = vmul.f32 %v6992_v36, %v2836_v38  ;;  %v2819_v38 = vmul.f32 %v6969_v34, %v7008_v30 }
 0xdd0   : > { %2928 = vrot.lane.b32.xlu1 %v2925_v7, %s8334_s28  ;;  %v2883_v4 = vmul.f32 %v6987_v2, %v2877_v54 }
 0xdd1   : > { %v2927_v57 = vsel %vm2120_vm9, %v2925_v7, %v2926_v16  ;;  %v2854_v7 = vld [vmem:[#allocation2 + $0x18] sm:$0xf] }
 0xdd2   : > { %2930 = vrot.lane.b32.xlu2 %v2927_v57, %s8334_s28  ;;  %s8442_s28 = sld [smem:[#allocation12_spill]] }
 0xdd3   : > { %v6995_v13 = vpop.permute.xlu2 %2856 }
 0xdd4   : > { %v2859_v16 = vmul.f32 %v6969_v34, %v6995_v13  ;;  %v2860_v57 = vmul.f32 %v6995_v13, %v2854_v7  ;;  %v2814_v7 = vld [vmem:[#allocation2 + $0x18] sm:$0xf] }
 0xdd6   : > { %2909 = vrot.lane.b32.xlu0 %v2904_v1, %s8341_s11  ;;  %v2863_v41 = vrot.slane %v2859_v16, 4  ;;  %v2864_v1 = vrot.slane %v2860_v57, 4  ;;  %v2820_v57 = vmul.f32 %v7008_v30, %v2814_v7 }
 0xdd8   : > { %2889 = vrot.lane.b32.xlu1 %v2886_v5, %s8341_s11  ;;  %v2865_v56 = vsel %vm2120_vm9, %v2863_v41, %v2864_v1  ;;  %v2824_v54 = vrot.slane %v2820_v57, 4  ;;  %v3016_v7 = vld [vmem:[%s8442_s28] sm:$0xff] }
 0xdda   : > { %2845 = vrot.lane.b32.xlu2 %v2841_v33, %s8440_s23  ;;  %v2887_v33 = vrot.slane %v2883_v4, 4  ;;  %v3003_v4 = vld [vmem:[%s8441_s0 + $0x8] sm:$0xf] }
 0xddb   : > { %v7013_v44 = vpop.permute.xlu2 %2796 }
 0xddc   : > { %v2888_v16 = vsel %vm2120_vm9, %v2886_v5, %v2887_v33  ;;  %v3002_v5 = vld [vmem:[%s8441_s0] sm:$0xff]  ;;  %v2799_v33 = vmul.f32 %v6969_v34, %v7013_v44  ;;  %s8445_s0 = smov 13  }
 0xdde   : > { %2847 = vrot.lane.b32.xlu0 %v2842_v53, %s8440_s23  ;;  %v2794_v53 = vld [vmem:[#allocation2 + $0x18] sm:$0xf] }
 0xde0   : > { %2866 = vrot.lane.b32.xlu1 %v2863_v41, %s8440_s23  ;;  %v2800_v41 = vmul.f32 %v7013_v44, %v2794_v53 }
 0xde2   : > { %2868 = vrot.lane.b32.xlu2 %v2865_v56, %s8440_s23  ;;  %v2823_v56 = vrot.slane %v2819_v38, 4  ;;  %v3017_v38 = vld [vmem:[%s8442_s28 + $0x8] sm:$0xf] }
 0xde4   : > { %v2825_v1 = vsel %vm2120_vm9, %v2823_v56, %v2824_v54 }
 0xde6   : > { %2891 = vrot.lane.b32.xlu0 %v2888_v16, %s8341_s11  ;;  %s8444_s11 = sld [smem:[#allocation10_spill]] }
 0xde8   : > { %2805 = vrot.lane.b32.xlu1 %v2800_v41, %s8443_s26 }
 0xdea   : > { %2826 = vrot.lane.b32.xlu2 %v2823_v56, %s8344_s18 }
 0xdee   : > { %2828 = vrot.lane.b32.xlu0 %v2825_v1, %s8344_s18  ;;  %s6082_s18 = smov 23  }
 0xdf0   : > { %3011 = vperm.xlu1 %5811, %v3003_v4  }
 0xdf2   : > { %3006 = vperm.xlu2 %5812, %v3002_v5  }
 0xdf6   : > { %2803 = vrot.lane.b32.xlu0 %v2799_v33, %s8443_s26 }
 0xdf8   : > { %3020 = vperm.xlu1 %5811, %v3016_v7  }
 0xdfe   : > { %3025 = vperm.xlu0 %5810, %v3017_v38  }
 0xe08   : > { %v2908_v16 = vpop.permute.xlu2 %2907 }
 0xe09   : > { %2913 = vst.msk [vmem:[#allocation3 + $0x90] sm:$0xff] %vm2809_vm10, %v2908_v16 }
 0xe20   : > { %v2947_v53 = vpop.permute.xlu1 %2946 }
 0xe21   : > { %2952 = vst.msk [vmem:[#allocation3 + $0xc0] sm:$0xff] %vm2809_vm10, %v2947_v53 }
 0xe28   : > { %v2968_v7 = vld [vmem:[#allocation3 + $0xc0] sm:$0xff] }
 0xe2c   : > { %v2931_v57 = vpop.permute.xlu2 %2930 }
 0xe2d   : > { %2935 = vst.msk [vmem:[#allocation3 + $0xb0] sm:$0xff] %vm2809_vm10, %v2931_v57 }
 0xe34   : > { %v2846_v41 = vpop.permute.xlu2 %2845  ;;  %v2967_v38 = vld [vmem:[#allocation3 + $0xb0] sm:$0xff] }
 0xe35   : > { %2851 = vst.msk [vmem:[#allocation3 + $0x30] sm:$0xff] %vm2809_vm10, %v2846_v41  ;;  %v2965_v41 = vld [vmem:[#allocation3 + $0x90] sm:$0xff] }
 0xe3c   : > { %v2869_v56 = vpop.permute.xlu2 %2868 }
 0xe3d   : > { %2873 = vst.msk [vmem:[#allocation3 + $0x50] sm:$0xff] %vm2809_vm10, %v2869_v56 }
 0xe40   : > { %v2949_v34 = vpop.permute.xlu0 %2948 }
 0xe41   : > { %2953 = vst.msk [vmem:[#allocation3 + $0xd0] sm:$0xf] %vm2811_vm0, %v2949_v34 }
 0xe42   : > { %v2929_v54 = vpop.permute.xlu1 %2928 }
 0xe43   : > { %2934 = vst.msk [vmem:[#allocation3 + $0xa0] sm:$0xf0] %vm2832_vm7, %v2929_v54 }
 0xe44   : > { %v2827_v1 = vpop.permute.xlu2 %2826 }
 0xe45   : > { %2833 = vst.msk [vmem:[#allocation3 + $0x10] sm:$0xf0] %vm2832_vm7, %v2827_v1 }
 0xe48   : > { %v2910_v4 = vpop.permute.xlu0 %2909  ;;  %v2969_v5 = vld [vmem:[#allocation3 + $0xd0] sm:$0xf] }
 0xe49   : > { %2914 = vst.msk [vmem:[#allocation3 + $0xa0] sm:$0xf] %vm2811_vm0, %v2910_v4  ;;  %5669 = vmatpush.msk.msrb.mxu0 %vm2120_vm9, %v2969_v5  ;;  %v2962_v5 = vld [vmem:[#allocation3 + $0x60] sm:$0xff] }
 0xe4a   : > { %v2890_v33 = vpop.permute.xlu1 %2889 }
 0xe4b   : > { %2895 = vst.msk [vmem:[#allocation3 + $0x70] sm:$0xf0] %vm2832_vm7, %v2890_v33  ;;  %2982 = vmatpush.msrb.mxu0 %v2968_v7  ;;  %v2961_v33 = vld [vmem:[#allocation3 + $0x50] sm:$0xff] }
 0xe4d   : > { %2983 = vmatpush.msrb.mxu0 %v2967_v38 }
 0xe50   : > { %v2848_v16 = vpop.permute.xlu0 %2847  ;;  %v2966_v53 = vld [vmem:[#allocation3 + $0xa0] sm:$0xff] }
 0xe51   : > { %2852 = vst.msk [vmem:[#allocation3 + $0x40] sm:$0xf] %vm2811_vm0, %v2848_v16  ;;  %2984 = vmatpush.msrb.mxu0 %v2966_v53  ;;  %v2959_v16 = vld [vmem:[#allocation3 + $0x30] sm:$0xff] }
 0xe52   : > { %v2867_v57 = vpop.permute.xlu1 %2866  ;;  %v2963_v4 = vld [vmem:[#allocation3 + $0x70] sm:$0xff] }
 0xe53   : > { %2872 = vst.msk [vmem:[#allocation3 + $0x40] sm:$0xf0] %vm2832_vm7, %v2867_v57  ;;  %2985 = vmatpush.msrb.mxu0 %v2965_v41  ;;  %v2954_v41 = vld [vmem:[%s8444_s11] sm:$0xff] }
 0xe58   : > { %v2892_v56 = vpop.permute.xlu0 %2891 }
 0xe59   : > { %2896 = vst.msk [vmem:[#allocation3 + $0x80] sm:$0xff] %vm2809_vm10, %v2892_v56 }
 0xe5a   : > { %v2806_v34 = vpop.permute.xlu1 %2805  ;;  %v2960_v38 = vld [vmem:[#allocation3 + $0x40] sm:$0xff] }
 0xe5b   : > { %2812 = vst.msk [vmem:[#allocation3 + $0x10] sm:$0xf] %vm2811_vm0, %v2806_v34  ;;  %v2955_v34 = vld [vmem:[%s8444_s11 + $0x8] sm:$0xf] }
 0xe60   : > { %v2829_v54 = vpop.permute.xlu0 %2828  ;;  %v2964_v1 = vld [vmem:[#allocation3 + $0x80] sm:$0xff] }
 0xe61   : > { %2834 = vst.msk [vmem:[#allocation3 + $0x20] sm:$0xff] %vm2809_vm10, %v2829_v54  ;;  %2986 = vmatpush.msrb.mxu0 %v2964_v1  ;;  %v3053_v54 = vsel %vm3052_vm14, 1.0, %v8438_v27 }
 0xe62   : > { %v2957_v57 = vld [vmem:[#allocation3 + $0x10] sm:$0xff]  ;;  %v3054_v1 = vmul.f32 0.0, %v3053_v54 }
 0xe63   : > { %2987 = vmatpush.msrb.mxu0 %v2963_v4  ;;  %v3012_v4 = vpop.permute.xlu1 %3011 }
 0xe64   : > { %3209 = vrot.lane.b32.xlu1 %v3054_v1, %s6082_s18  ;;  %s8446_s18 = smov 17  }
 0xe65   : > { %2988 = vmatpush.msrb.mxu0 %v2962_v5  ;;  %v3045_v5 = vsel %vm3044_vm11, 1.0, %v8438_v27  ;;  %vm8471_vm11 = vcmask 658568  }
 0xe66   : > { %vm8476_vm14 = vmmov %vm8471_vm11 }
 0xe67   : > { %2989 = vmatpush.msrb.mxu0 %v2961_v33  ;;  %v3007_v33 = vpop.permute.xlu2 %3006 }
 0xe68   : > { %v2804_v7 = vpop.permute.xlu0 %2803  ;;  %v2958_v53 = vld [vmem:[#allocation3 + $0x20] sm:$0xff] }
 0xe69   : > { %2810 = vst.msk [vmem:[#allocation3] sm:$0xff] %vm2809_vm10, %v2804_v7  ;;  %2990 = vmatpush.msrb.mxu0 %v2960_v38 }
 0xe6b   : > { %2991 = vmatpush.msrb.mxu0 %v2959_v16  ;;  %v3021_v16 = vpop.permute.xlu1 %3020 }
 0xe6c   : > { %3149 = vrot.lane.b32.xlu1 %v8438_v27, %s6079_s2 }
 0xe6d   : > { %2992 = vmatpush.msrb.mxu0 %v2958_v53 }
 0xe6f   : > { %2993 = vmatpush.msrb.mxu0 %v2957_v57 }
 0xe70   : > { %v2956_v56 = vld [vmem:[#allocation3] sm:$0xff] }
 0xe71   : > { %2994 = vmatpush.msrb.mxu0 %v2956_v56 }
 0xe72   : > { %5670 = vmatmul.msk.f32.vlgmr.msrb.gmra.mxu0 %vm2268_vm5, %v2954_v41 }
 0xe74   : > { %3087 = vrot.lane.b32.xlu1 %v3045_v5, %s8445_s0  ;;  %s8447_s0 = smov 15  }
 0xe7a   : > { %5671 = vmatmul.msk.f32.gmra.mxu0 %vm2268_vm5, %v2955_v34  ;;  %v3026_v34 = vpop.permute.xlu0 %3025 }
 0xeef   : > { %v2996_v7 = vpop.f32.mrf.mxu0 }
 0xef0   : > { %v3014_v38 = vmul.f32 %v3007_v33, %v2996_v7 }
 0xef2   : > { %v3028_v53 = vadd.f32 %v3021_v16, %v3014_v38 }
 0xef4   : > { %v3030_v57 = vmul.f32 1.442695, %v3028_v53 }
 0xef6   : > { %5918 = vpow2.f32 %v3030_v57  ;;  %v4368_v57 = vrot.slane %v6779_v21, 4 }
 0xef7   : > { %v2999_v41 = vpop.f32.mrf.mxu0 }
 0xef8   : > { %v3015_v56 = vmul.f32 %v3012_v4, %v2999_v41  ;;  %v5170_v41 = vrot.slane %v6549_v18, 4 }
 0xefa   : > { %v3029_v37 = vadd.f32 %v3026_v34, %v3015_v56  ;;  %v8363_v56 = vrot.slane %v6540_v11, 4 }
 0xefc   : > { %v5919_v58 = vpop.eup %5918  ;;  %v3032_v48 = vmul.f32 1.442695, %v3029_v37 }
 0xefd   : > { %v3034_v6 = vadd.f32 1.0, %v5919_v58 }
 0xefe   : > { %5920 = vpow2.f32 %v3032_v48 }
 0xeff   : > { %5922 = vlog2.f32 %v3034_v6 }
 0xf04   : > { %v5921_v62 = vpop.eup %5920 }
 0xf05   : > { %v5923_v46 = vpop.eup %5922  ;;  %v3035_v26 = vadd.f32 1.0, %v5921_v62  ;;  %v3210_v62 = vpop.permute.xlu1 %3209 }
 0xf06   : > { %v3037_v3 = vmul.f32 0.6931472, %v5923_v46  ;;  %v3943_v46 = vrot.slane %v6918_v51, 4 }
 0xf07   : > { %5924 = vlog2.f32 %v3035_v26  ;;  %v3048_v26 = vmul.f32 0.0, %v3045_v5  ;;  %v8364_v5 = vrot.slane %v6775_v63, 4 }
 0xf08   : > { %5926 = vtanh.f32 %v3037_v3 }
 0xf0d   : > { %v5925_v33 = vpop.eup %5924 }
 0xf0e   : > { %v5927_v7 = vpop.eup %5926  ;;  %v3039_v38 = vmul.f32 0.6931472, %v5925_v33 }
 0xf0f   : > { %v3042_v16 = vmul.f32 %v5927_v7, %v3028_v53  ;;  %v8365_v53 = vrot.slane %v6914_v24, 4 }
 0xf10   : > { %5928 = vtanh.f32 %v3039_v38 }
 0xf11   : > { %3144 = vst.msk [vmem:[#allocation3 + $0x60] sm:$0xff] %vm2809_vm10, %v3042_v16  ;;  %v3514_v4 = vrot.slane %v3042_v16, 4  ;;  %3058 = vrot.lane.b32.xlu0 %v3042_v16, %s8446_s18 }
 0xf13   : > { %3519 = vst.msk [vmem:[#allocation3 + $0x130] sm:$0xf0] %vm2832_vm7, %v3514_v4 }
 0xf16   : > { %v5929_v48 = vpop.eup %5928 }
 0xf17   : > { %v3043_v58 = vmul.f32 %v5929_v48, %v3029_v37 }
 0xf19   : > { %3145 = vst.msk [vmem:[#allocation3 + $0x70] sm:$0xf] %vm2811_vm0, %v3043_v58  ;;  %v3515_v6 = vrot.slane %v3043_v58, 4  ;;  %3170 = vrot.lane.b32.xlu0 %v3054_v1, %s6079_s2  ;;  %3060 = vrot.lane.b32.xlu2 %v3043_v58, %s8446_s18  ;;  %v3944_v1 = vsel %vm2120_vm9, %v8365_v53, %v3943_v46  ;;  %s6084_s2 = smov 105  }
 0xf1b   : > { %v3516_v3 = vsel %vm2120_vm9, %v3514_v4, %v3515_v6 }
 0xf1c   : > { %3520 = vst.msk [vmem:[#allocation3 + $0x140] sm:$0xff] %vm2809_vm10, %v3516_v3 }
 0xf21   : > { %3108 = vrot.lane.b32.xlu0 %v3048_v26, %s8447_s0  ;;  %3188 = vrot.lane.b32.xlu2 %v3053_v54, %s8448_s1  ;;  %v4369_v54 = vsel %vm2120_vm9, %v8364_v5, %v4368_v57  ;;  %s6083_s1 = smov 11  }
 0xf23   : > { %v7072_v37 = vld [vmem:[#allocation3 + $0x140] sm:$0xff] }
 0xf24   : > { %3948 = vst.msk [vmem:[#allocation3 + $0x140] sm:$0xff] %vm1274_vm13, %v3944_v1 }
 0xf29   : > { %3126 = vrot.lane.b32.xlu2 %v8438_v27, %s8447_s0  ;;  %v5171_v27 = vsel %vm2120_vm9, %v8363_v56, %v5170_v41  ;;  %s8449_s0 = smov 109  }
 0xf2b   : > { %v7082_v51 = vld [vmem:[#allocation3 + $0x140] sm:$0xff] }
 0xf2c   : > { %4373 = vst.msk [vmem:[#allocation3 + $0x140] sm:$0xff] %vm2106_vm4, %v4369_v54  ;;  %v3150_v54 = vpop.permute.xlu1 %3149 }
 0xf31   : > { %3069 = vrot.lane.b32.xlu2 %v3048_v26, %s6083_s1  ;;  %s8450_s1 = smov 113  }
 0xf33   : > { %v7090_v21 = vld [vmem:[#allocation3 + $0x140] sm:$0xff] }
 0xf34   : > { %5180 = vst [vmem:[#allocation3 + $0x140] sm:$0xff] %v5171_v27 }
 0xf73   : > { %v7095_v34 = vpop.permute.xlu2 %3060 }
 0xf74   : > { %3065 = vst.msk [vmem:[#allocation2 + $0x18] sm:$0xf] %vm2791_vm15, %v7095_v34 }
 0xf7b   : > { %v3207_v33 = vld [vmem:[#allocation2 + $0x18] sm:$0xf]  ;;  %v3189_v58 = vpop.permute.xlu2 %3188 }
 0xf7c   : > { %v3213_v7 = vmul.f32 %v3210_v62, %v3207_v33  ;;  %v3168_v4 = vld [vmem:[#allocation2 + $0x18] sm:$0xf] }
 0xf7d   : > { %v3186_v48 = vld [vmem:[#allocation2 + $0x18] sm:$0xf] }
 0xf7e   : > { %3218 = vrot.lane.b32.xlu0 %v3213_v7, %s6084_s2  ;;  %v3192_v1 = vmul.f32 %v3189_v58, %v3186_v48  ;;  %v3106_v33 = vld [vmem:[#allocation2 + $0x18] sm:$0xf]  ;;  %v3088_v48 = vpop.permute.xlu1 %3087 }
 0xf7f   : > { %v3147_v56 = vld [vmem:[#allocation2 + $0x18] sm:$0xf] }
 0xf80   : > { %v3196_v41 = vrot.slane %v3192_v1, 4 }
 0xf83   : > { %v7099_v18 = vpop.permute.xlu0 %3058 }
 0xf84   : > { %3064 = vst.msk [vmem:[#allocation2] sm:$0xff] %vm2789_vm1, %v7099_v18 }
 0xf8b   : > { %v3123_v38 = vld [vmem:[#allocation2] sm:$0xff]  ;;  %v3171_v16 = vpop.permute.xlu0 %3170 }
 0xf8c   : > { %v3173_v6 = vmul.f32 %v3171_v16, %v3123_v38  ;;  %v3174_v3 = vmul.f32 %v3171_v16, %v3168_v4  ;;  %v3212_v26 = vmul.f32 %v3210_v62, %v3123_v38  ;;  %v3191_v46 = vmul.f32 %v3189_v58, %v3123_v38  ;;  %v3085_v58 = vld [vmem:[#allocation2 + $0x18] sm:$0xf] }
 0xf8d   : > { %v3152_v53 = vmul.f32 %v3150_v54, %v3123_v38  ;;  %v3153_v62 = vmul.f32 %v3150_v54, %v3147_v56  ;;  %v3090_v1 = vmul.f32 %v3123_v38, %v3088_v48 }
 0xf8e   : > { %3177 = vrot.lane.b32.xlu2 %v3173_v6, %s8449_s0  ;;  %3179 = vrot.lane.b32.xlu0 %v3174_v3, %s8449_s0  ;;  %v3195_v57 = vrot.slane %v3191_v46, 4  ;;  %v3127_v6 = vpop.permute.xlu2 %3126 }
 0xf8f   : > { %3216 = vrot.lane.b32.xlu1 %v3212_v26, %s6084_s2  ;;  %v3156_v16 = vrot.slane %v3152_v53, 4  ;;  %v3157_v4 = vrot.slane %v3153_v62, 4  ;;  %v3129_v26 = vmul.f32 %v3127_v6, %v3123_v38  ;;  %v3094_v53 = vrot.slane %v3090_v1, 4  ;;  %s8452_s2 = sld [smem:[#allocation14_spill]] }
 0xf90   : > { %v3197_v5 = vsel %vm2120_vm9, %v3195_v57, %v3196_v41  ;;  %v3091_v41 = vmul.f32 %v3088_v48, %v3085_v58 }
 0xf91   : > { %v3158_v46 = vsel %vm2120_vm9, %v3156_v16, %v3157_v4  ;;  %v3133_v56 = vrot.slane %v3129_v26, 4  ;;  %v3287_v26 = vld [vmem:[%s8453_s5 + $0x8] sm:$0xf] }
 0xf93   : > { %v3109_v27 = vpop.permute.xlu0 %3108 }
 0xf94   : > { %v3112_v7 = vmul.f32 %v3109_v27, %v3106_v33  ;;  %v3111_v3 = vmul.f32 %v3123_v38, %v3109_v27  ;;  %v3124_v33 = vld [vmem:[#allocation2 + $0x18] sm:$0xf] }
 0xf95   : > { %v3273_v58 = vld [vmem:[%s8452_s2 + $0x8] sm:$0xf] }
 0xf96   : > { %3117 = vrot.lane.b32.xlu0 %v3112_v7, %s8450_s1  ;;  %3200 = vrot.lane.b32.xlu2 %v3197_v5, %s8451_s3  ;;  %v3130_v5 = vmul.f32 %v3127_v6, %v3124_v33  ;;  %v3070_v62 = vpop.permute.xlu2 %3069  ;;  %v3286_v6 = vld [vmem:[%s8453_s5] sm:$0xff]  ;;  %s8459_s5 = sld [smem:[#allocation17_spill]] }
 0xf97   : > { %3198 = vrot.lane.b32.xlu1 %v3195_v57, %s8451_s3  ;;  %v3095_v57 = vrot.slane %v3091_v41, 4  ;;  %v3072_v4 = vmul.f32 %v3123_v38, %v3070_v62 }
 0xf98   : > { %v3134_v54 = vrot.slane %v3130_v5, 4 }
 0xf99   : > { %v3096_v27 = vsel %vm2120_vm9, %v3094_v53, %v3095_v57 }
 0xf9a   : > { %v3135_v7 = vsel %vm2120_vm9, %v3133_v56, %v3134_v54 }
 0xf9e   : > { %3161 = vrot.lane.b32.xlu0 %v3158_v46, %s8449_s0  ;;  %3115 = vrot.lane.b32.xlu2 %v3111_v3, %s8450_s1  ;;  %v3272_v3 = vld [vmem:[%s8452_s2] sm:$0xff]  ;;  %s8456_s2 = smov 110  }
 0xf9f   : > { %3159 = vrot.lane.b32.xlu1 %v3156_v16, %s8449_s0  ;;  %v3067_v16 = vld [vmem:[#allocation2 + $0x18] sm:$0xf] }
 0xfa0   : > { %v3073_v48 = vmul.f32 %v3070_v62, %v3067_v16 }
 0xfa6   : > { %3099 = vrot.lane.b32.xlu0 %v3096_v27, %s8454_s8  ;;  %3138 = vrot.lane.b32.xlu2 %v3135_v7, %s8450_s1 }
 0xfa7   : > { %3136 = vrot.lane.b32.xlu1 %v3133_v56, %s8450_s1 }
 0xfae   : > { %3097 = vrot.lane.b32.xlu2 %v3094_v53, %s8454_s8  ;;  %3076 = vrot.lane.b32.xlu0 %v3072_v4, %s6085_s9 }
 0xfaf   : > { %3078 = vrot.lane.b32.xlu1 %v3073_v48, %s6085_s9  ;;  %s8455_s9 = sld [smem:[#allocation13_spill]] }
 0xfb6   : > { %3281 = vperm.xlu2 %5812, %v3273_v58   ;;  %3290 = vperm.xlu0 %5810, %v3286_v6  }
 0xfb7   : > { %3276 = vperm.xlu1 %5811, %v3272_v3  }
 0xfbf   : > { %3295 = vperm.xlu1 %5811, %v3287_v26  }
 0xfe8   : > { %v3178_v46 = vpop.permute.xlu2 %3177 }
 0xfe9   : > { %3183 = vst.msk [vmem:[#allocation3 + $0x90] sm:$0xff] %vm2809_vm10, %v3178_v46 }
 0xff0   : > { %v3219_v1 = vpop.permute.xlu0 %3218  ;;  %v3201_v33 = vpop.permute.xlu2 %3200  ;;  %v3235_v58 = vld [vmem:[#allocation3 + $0x90] sm:$0xff] }
 0xff1   : > { %3223 = vst.msk [vmem:[#allocation3 + $0xd0] sm:$0xf] %vm2811_vm0, %v3219_v1  ;;  %v3232_v1 = vld [vmem:[#allocation3 + $0x60] sm:$0xff] }
 0xff2   : > { %3205 = vst.msk [vmem:[#allocation3 + $0xb0] sm:$0xff] %vm2809_vm10, %v3201_v33 }
 0xff8   : > { %v3116_v38 = vpop.permute.xlu2 %3115  ;;  %v3239_v41 = vld [vmem:[#allocation3 + $0xd0] sm:$0xf] }
 0xff9   : > { %3121 = vst.msk [vmem:[#allocation3 + $0x30] sm:$0xff] %vm2809_vm10, %v3116_v38  ;;  %5672 = vmatpush.msk.msrb.mxu1 %vm2120_vm9, %v3239_v41  ;;  %v3237_v62 = vld [vmem:[#allocation3 + $0xb0] sm:$0xff] }
0x1000   : > { %v3180_v5 = vpop.permute.xlu0 %3179  ;;  %v3139_v56 = vpop.permute.xlu2 %3138 }
0x1001   : > { %v3217_v53 = vpop.permute.xlu1 %3216  ;;  %3184 = vst.msk [vmem:[#allocation3 + $0xa0] sm:$0xf] %vm2811_vm0, %v3180_v5 }
0x1002   : > { %3222 = vst.msk [vmem:[#allocation3 + $0xc0] sm:$0xff] %vm2809_vm10, %v3217_v53 }
0x1003   : > { %3143 = vst.msk [vmem:[#allocation3 + $0x50] sm:$0xff] %vm2809_vm10, %v3139_v56  ;;  %v3229_v56 = vld [vmem:[#allocation3 + $0x30] sm:$0xff] }
0x1008   : > { %v3118_v57 = vpop.permute.xlu0 %3117  ;;  %v3098_v54 = vpop.permute.xlu2 %3097 }
0x1009   : > { %3122 = vst.msk [vmem:[#allocation3 + $0x40] sm:$0xf] %vm2811_vm0, %v3118_v57  ;;  %v3199_v27 = vpop.permute.xlu1 %3198  ;;  %v3238_v7 = vld [vmem:[#allocation3 + $0xc0] sm:$0xff] }
0x100a   : > { %3204 = vst.msk [vmem:[#allocation3 + $0xa0] sm:$0xf0] %vm2832_vm7, %v3199_v27  ;;  %3252 = vmatpush.msrb.mxu1 %v3238_v7  ;;  %v3231_v33 = vld [vmem:[#allocation3 + $0x50] sm:$0xff] }
0x100b   : > { %3103 = vst.msk [vmem:[#allocation3 + $0x10] sm:$0xf0] %vm2832_vm7, %v3098_v54  ;;  %v3224_v54 = vld [vmem:[%s8455_s9] sm:$0xff]  ;;  %v3225_v7 = vld [vmem:[%s8455_s9 + $0x8] sm:$0xf] }
0x100c   : > { %3253 = vmatpush.msrb.mxu1 %v3237_v62 }
0x1010   : > { %v3162_v16 = vpop.permute.xlu0 %3161 }
0x1011   : > { %3166 = vst.msk [vmem:[#allocation3 + $0x80] sm:$0xff] %vm2809_vm10, %v3162_v16  ;;  %v3160_v4 = vpop.permute.xlu1 %3159  ;;  %v3236_v48 = vld [vmem:[#allocation3 + $0xa0] sm:$0xff] }
0x1012   : > { %3165 = vst.msk [vmem:[#allocation3 + $0x70] sm:$0xf0] %vm2832_vm7, %v3160_v4  ;;  %3254 = vmatpush.msrb.mxu1 %v3236_v48 }
0x1014   : > { %3255 = vmatpush.msrb.mxu1 %v3235_v58 }
0x1018   : > { %v3100_v6 = vpop.permute.xlu0 %3099  ;;  %v3234_v3 = vld [vmem:[#allocation3 + $0x80] sm:$0xff] }
0x1019   : > { %3104 = vst.msk [vmem:[#allocation3 + $0x20] sm:$0xff] %vm2809_vm10, %v3100_v6  ;;  %v3137_v26 = vpop.permute.xlu1 %3136  ;;  %3256 = vmatpush.msrb.mxu1 %v3234_v3  ;;  %v3233_v46 = vld [vmem:[#allocation3 + $0x70] sm:$0xff]  ;;  %v3282_v3 = vpop.permute.xlu2 %3281 }
0x101a   : > { %3142 = vst.msk [vmem:[#allocation3 + $0x40] sm:$0xf0] %vm2832_vm7, %v3137_v26 }
0x101b   : > { %3257 = vmatpush.msrb.mxu1 %v3233_v46 }
0x101d   : > { %3258 = vmatpush.msrb.mxu1 %v3232_v1 }
0x101f   : > { %3259 = vmatpush.msrb.mxu1 %v3231_v33 }
0x1020   : > { %v3077_v38 = vpop.permute.xlu0 %3076  ;;  %v3228_v53 = vld [vmem:[#allocation3 + $0x20] sm:$0xff] }
0x1021   : > { %v3079_v41 = vpop.permute.xlu1 %3078  ;;  %3082 = vst.msk [vmem:[#allocation3] sm:$0xff] %vm2809_vm10, %v3077_v38  ;;  %v3230_v5 = vld [vmem:[#allocation3 + $0x40] sm:$0xff] }
0x1022   : > { %3083 = vst.msk [vmem:[#allocation3 + $0x10] sm:$0xf] %vm2811_vm0, %v3079_v41  ;;  %3260 = vmatpush.msrb.mxu1 %v3230_v5 }
0x1024   : > { %3261 = vmatpush.msrb.mxu1 %v3229_v56 }
0x1026   : > { %3262 = vmatpush.msrb.mxu1 %v3228_v53 }
0x1028   : > { %v3226_v27 = vld [vmem:[#allocation3] sm:$0xff]  ;;  %v3291_v48 = vpop.permute.xlu0 %3290 }
0x1029   : > { %v3227_v57 = vld [vmem:[#allocation3 + $0x10] sm:$0xff]  ;;  %v3277_v62 = vpop.permute.xlu1 %3276 }
0x102a   : > { %3263 = vmatpush.msrb.mxu1 %v3227_v57 }
0x102c   : > { %3264 = vmatpush.msrb.mxu1 %v3226_v27 }
0x102d   : > { %5673 = vmatmul.msk.f32.vlgmr.msrb.gmra.mxu1 %vm2268_vm5, %v3224_v54 }
0x1031   : > { %v3296_v1 = vpop.permute.xlu1 %3295 }
0x1035   : > { %5674 = vmatmul.msk.f32.gmra.mxu1 %vm2268_vm5, %v3225_v7  ;;  %vm3614_vm5 = vcmask 719872  }
0x10aa   : > { %v3266_v16 = vpop.f32.mrf.mxu1 }
0x10ab   : > { %v3284_v4 = vmul.f32 %v3277_v62, %v3266_v16 }
0x10ad   : > { %v3298_v58 = vadd.f32 %v3291_v48, %v3284_v4 }
0x10af   : > { %v3300_v6 = vmul.f32 1.442695, %v3298_v58 }
0x10b1   : > { %5930 = vpow2.f32 %v3300_v6 }
0x10b2   : > { %v3269_v26 = vpop.f32.mrf.mxu1 }
0x10b3   : > { %v3285_v46 = vmul.f32 %v3282_v3, %v3269_v26 }
0x10b5   : > { %v3299_v33 = vadd.f32 %v3296_v1, %v3285_v46 }
0x10b7   : > { %v5931_v38 = vpop.eup %5930  ;;  %v3302_v41 = vmul.f32 1.442695, %v3299_v33 }
0x10b8   : > { %v3304_v5 = vadd.f32 1.0, %v5931_v38 }
0x10b9   : > { %5932 = vpow2.f32 %v3302_v41 }
0x10ba   : > { %5934 = vlog2.f32 %v3304_v5 }
0x10bf   : > { %v5933_v56 = vpop.eup %5932 }
0x10c0   : > { %v5935_v53 = vpop.eup %5934  ;;  %v3305_v57 = vadd.f32 1.0, %v5933_v56 }
0x10c1   : > { %v3307_v54 = vmul.f32 0.6931472, %v5935_v53 }
0x10c2   : > { %5936 = vlog2.f32 %v3305_v57 }
0x10c3   : > { %5938 = vtanh.f32 %v3307_v54 }
0x10c8   : > { %v5937_v27 = vpop.eup %5936 }
0x10c9   : > { %v5939_v7 = vpop.eup %5938  ;;  %v3309_v62 = vmul.f32 0.6931472, %v5937_v27 }
0x10ca   : > { %v3312_v16 = vmul.f32 %v5939_v7, %v3298_v58 }
0x10cb   : > { %5940 = vtanh.f32 %v3309_v62 }
0x10cc   : > { %3386 = vst.msk [vmem:[#allocation3 + $0x60] sm:$0xff] %vm2809_vm10, %v3312_v16  ;;  %3316 = vrot.lane.b32.xlu2 %v3312_v16, %s8446_s18 }
0x10d1   : > { %v5941_v4 = vpop.eup %5940 }
0x10d2   : > { %v3313_v48 = vmul.f32 %v5941_v4, %v3299_v33 }
0x10d4   : > { %3387 = vst.msk [vmem:[#allocation3 + $0x70] sm:$0xf] %vm2811_vm0, %v3313_v48  ;;  %3318 = vrot.lane.b32.xlu0 %v3313_v48, %s8446_s18 }
0x1126   : > { %v3317_v6 = vpop.permute.xlu2 %3316 }
0x1127   : > { %3322 = vst.msk [vmem:[#allocation2] sm:$0xff] %vm2789_vm1, %v3317_v6 }
0x112e   : > { %v7149_v3 = vld [vmem:[#allocation2] sm:$0xff] }
0x112f   : > { %v3438_v26 = vmul.f32 %v7149_v3, %v6965_v39  ;;  %v3407_v58 = vmul.f32 %v7149_v3, %v6967_v35  ;;  %v3390_v46 = vmul.f32 %v7149_v3, %v6987_v2  ;;  %3450 = vst.msk [vmem:[#allocation2] sm:$0xff] %vm2789_vm1, %v7099_v18  ;;  %v7164_v33 = vmul.f32 %v7149_v3, %v6978_v10 }
0x1130   : > { %v3371_v38 = vmul.f32 %v7149_v3, %v6995_v13 }
0x1131   : > { %3442 = vrot.lane.b32.xlu2 %v3438_v26, %s8439_s15  ;;  %3411 = vrot.lane.b32.xlu1 %v3407_v58, %s8456_s2  ;;  %v3394_v1 = vrot.slane %v3390_v46, 4  ;;  %v8369_v41 = vrot.slane %v7164_v33, 4 }
0x1132   : > { %v3375_v5 = vrot.slane %v3371_v38, 4 }
0x1133   : > { %3397 = vrot.lane.b32.xlu0 %v3394_v1, %s8456_s2 }
0x1136   : > { %v7173_v18 = vld [vmem:[#allocation2] sm:$0xff] }
0x1137   : > { %v3554_v56 = vmul.f32 %v7173_v18, %v6978_v10  ;;  %v3471_v53 = vmul.f32 %v7173_v18, %v7008_v30  ;;  %v3523_v54 = vmul.f32 %v7173_v18, %v6987_v2  ;;  %v3454_v38 = vmul.f32 %v7173_v18, %v7013_v44 }
0x1139   : > { %3428 = vrot.lane.b32.xlu2 %v8369_v41, %s8449_s0  ;;  %3378 = vrot.lane.b32.xlu1 %v3375_v5, %s8440_s23 }
0x1141   : > { %3558 = vrot.lane.b32.xlu2 %v3554_v56, %s8449_s0  ;;  %3475 = vrot.lane.b32.xlu1 %v3471_v53, %s8450_s1 }
0x1146   : > { %v3319_v57 = vpop.permute.xlu0 %3318 }
0x1147   : > { %3323 = vst.msk [vmem:[#allocation2 + $0x18] sm:$0xf] %vm2791_vm15, %v3319_v57  ;;  %v3458_v57 = vrot.slane %v3454_v38, 4 }
0x1149   : > { %3527 = vrot.lane.b32.xlu2 %v3523_v54, %s8456_s2 }
0x114e   : > { %v7185_v27 = vld [vmem:[#allocation2 + $0x18] sm:$0xf] }
0x114f   : > { %v3339_v7 = vld [vmem:[#allocation2 + $0x18] sm:$0xf] }
0x1150   : > { %v3370_v62 = vld [vmem:[#allocation2 + $0x18] sm:$0xf] }
0x1151   : > { %v3389_v16 = vld [vmem:[#allocation2 + $0x18] sm:$0xf] }
0x1152   : > { %v3420_v4 = vld [vmem:[#allocation2 + $0x18] sm:$0xf] }
0x1153   : > { %v3437_v48 = vld [vmem:[#allocation2 + $0x18] sm:$0xf] }
0x1154   : > { %v3439_v6 = vmul.f32 %v3437_v48, %v6965_v39  ;;  %v3406_v26 = vld [vmem:[#allocation2 + $0x18] sm:$0xf]  ;;  %v3391_v48 = vmul.f32 %v3389_v16, %v6987_v2 }
0x1155   : > { %v3356_v58 = vld [vmem:[#allocation2 + $0x18] sm:$0xf]  ;;  %v3408_v46 = vmul.f32 %v3406_v26, %v6967_v35 }
0x1156   : > { %3451 = vst.msk [vmem:[#allocation2 + $0x18] sm:$0xf] %vm2791_vm15, %v7095_v34  ;;  %3444 = vrot.lane.b32.xlu0 %v3439_v6, %s8439_s15  ;;  %v3358_v56 = vmul.f32 %v3356_v58, %v6992_v36  ;;  %v3568_v34 = vmul.f32 %v7173_v18, %v6965_v39  ;;  %v3395_v6 = vrot.slane %v3391_v48, 4 }
0x1157   : > { %3413 = vrot.lane.b32.xlu1 %v3408_v46, %s8456_s2 }
0x1158   : > { %v3572_v41 = vrot.slane %v3568_v34, 4  ;;  %v3396_v38 = vsel %vm2120_vm9, %v3394_v1, %v3395_v6  ;;  %v3341_v6 = vmul.f32 %v3339_v7, %v7008_v30 }
0x115d   : > { %v3553_v53 = vld [vmem:[#allocation2 + $0x18] sm:$0xf] }
0x115e   : > { %v3555_v54 = vmul.f32 %v3553_v53, %v6978_v10  ;;  %3363 = vrot.lane.b32.xlu0 %v3358_v56, %s8440_s23  ;;  %v3522_v26 = vld [vmem:[#allocation2 + $0x18] sm:$0xf]  ;;  %v3372_v56 = vmul.f32 %v3370_v62, %v6995_v13  ;;  %v3537_v53 = vmul.f32 %v7173_v18, %v6967_v35 }
0x115f   : > { %3461 = vrot.lane.b32.xlu1 %v3458_v57, %s8443_s26  ;;  %v3453_v46 = vld [vmem:[#allocation2 + $0x18] sm:$0xf]  ;;  %v3524_v58 = vmul.f32 %v3522_v26, %v6987_v2  ;;  %v3422_v2 = vmul.f32 %v3420_v4, %v6978_v10  ;;  %v3340_v26 = vmul.f32 %v7149_v3, %v7008_v30 }
0x1160   : > { %3560 = vrot.lane.b32.xlu2 %v3555_v54, %s8449_s0  ;;  %v3455_v16 = vmul.f32 %v3453_v46, %v7013_v44  ;;  %v3376_v54 = vrot.slane %v3372_v56, 4  ;;  %v3541_v34 = vrot.slane %v3537_v53, 4  ;;  %v3536_v56 = vld [vmem:[#allocation2 + $0x18] sm:$0xf] }
0x1161   : > { %v3426_v46 = vrot.slane %v3422_v2, 4  ;;  %v3344_v10 = vrot.slane %v3340_v26, 4  ;;  %v3538_v53 = vmul.f32 %v3536_v56, %v6967_v35  ;;  %v3485_v35 = vmul.f32 %v7173_v18, %v6992_v36  ;;  %v3668_v56 = vld [vmem:[%s8459_s5 + $0x8] sm:$0xf] }
0x1162   : > { %v3459_v48 = vrot.slane %v3455_v16, 4  ;;  %v3377_v1 = vsel %vm2120_vm9, %v3375_v5, %v3376_v54  ;;  %v8457_v5 = vrot.slane %v7164_v33, 4  ;;  %v3484_v33 = vld [vmem:[#allocation2 + $0x18] sm:$0xf] }
0x1164   : > { %v3460_v62 = vsel %vm2120_vm9, %v3458_v57, %v3459_v48  ;;  %v3427_v4 = vsel %vm2120_vm9, %v8457_v5, %v3426_v46  ;;  %v3357_v57 = vmul.f32 %v7149_v3, %v6992_v36  ;;  %v3542_v48 = vrot.slane %v3538_v53, 4 }
0x1165   : > { %v3489_v46 = vrot.slane %v3485_v35, 4 }
0x1166   : > { %3575 = vrot.lane.b32.xlu0 %v3572_v41, %s8439_s15 }
0x1167   : > { %3399 = vrot.lane.b32.xlu1 %v3396_v38, %s8456_s2  ;;  %v3567_v38 = vld [vmem:[#allocation2 + $0x18] sm:$0xf] }
0x1168   : > { %3529 = vrot.lane.b32.xlu2 %v3524_v58, %s8456_s2  ;;  %v3345_v58 = vrot.slane %v3341_v6, 4  ;;  %v3569_v7 = vmul.f32 %v3567_v38, %v6965_v39  ;;  %v3543_v39 = vsel %vm2120_vm9, %v3541_v34, %v3542_v48  ;;  %v3501_v6 = vld [vmem:[#allocation2 + $0x18] sm:$0xf] }
0x116a   : > { %v3346_v16 = vsel %vm2120_vm9, %v3344_v10, %v3345_v58  ;;  %v3573_v54 = vrot.slane %v3569_v7, 4  ;;  %v3470_v58 = vld [vmem:[#allocation2 + $0x18] sm:$0xf] }
0x116c   : > { %v3574_v2 = vsel %vm2120_vm9, %v3572_v41, %v3573_v54  ;;  %v3503_v41 = vmul.f32 %v3501_v6, %v6995_v13 }
0x116e   : > { %3544 = vrot.lane.b32.xlu0 %v3541_v34, %s8456_s2 }
0x116f   : > { %3380 = vrot.lane.b32.xlu1 %v3377_v1, %s8440_s23  ;;  %v3502_v1 = vmul.f32 %v7173_v18, %v6995_v13  ;;  %v3472_v18 = vmul.f32 %v3470_v58, %v7008_v30 }
0x1170   : > { %3463 = vrot.lane.b32.xlu2 %v3460_v62, %s8443_s26  ;;  %v3486_v62 = vmul.f32 %v3484_v33, %v6992_v36  ;;  %v3327_v36 = vmul.f32 %v7185_v27, %v7013_v44  ;;  %v3667_v27 = vld [vmem:[%s8459_s5] sm:$0xff]  ;;  %s8478_s5 = smov 118  }
0x1172   : > { %v3490_v26 = vrot.slane %v3486_v62, 4 }
0x1174   : > { %v3491_v34 = vsel %vm2120_vm9, %v3489_v46, %v3490_v26 }
0x1176   : > { %3430 = vrot.lane.b32.xlu0 %v3427_v4, %s8449_s0  ;;  %s8458_s0 = sld [smem:[#allocation18_spill]] }
0x1177   : > { %3349 = vrot.lane.b32.xlu1 %v3346_v16, %s8450_s1 }
0x1178   : > { %3361 = vrot.lane.b32.xlu2 %v3357_v57, %s8440_s23 }
0x117c   : > { %v3681_v38 = vld [vmem:[%s8458_s0] sm:$0xff]  ;;  %v3682_v4 = vld [vmem:[%s8458_s0 + $0x8] sm:$0xf]  ;;  %s8463_s0 = smov 106  }
0x117e   : > { %3577 = vrot.lane.b32.xlu0 %v3574_v2, %s8439_s15 }
0x117f   : > { %3546 = vrot.lane.b32.xlu1 %v3543_v39, %s8456_s2 }
0x1180   : > { %3506 = vrot.lane.b32.xlu2 %v3502_v1, %s8440_s23 }
0x1186   : > { %3508 = vrot.lane.b32.xlu0 %v3503_v41, %s8440_s23 }
0x1187   : > { %3347 = vrot.lane.b32.xlu1 %v3344_v10, %s8450_s1  ;;  %v3326_v10 = vmul.f32 %v7149_v3, %v7013_v44 }
0x1188   : > { %3494 = vrot.lane.b32.xlu2 %v3491_v34, %s8440_s23 }
0x118b   : > { %v3443_v13 = vpop.permute.xlu2 %3442 }
0x118c   : > { %3448 = vst.msk [vmem:[#allocation3 + $0xc0] sm:$0xff] %vm2809_vm10, %v3443_v13 }
0x118e   : > { %3332 = vrot.lane.b32.xlu0 %v3327_v36, %s8443_s26 }
0x118f   : > { %3477 = vrot.lane.b32.xlu1 %v3472_v18, %s8450_s1  ;;  %s8460_s1 = sld [smem:[#allocation16_spill]] }
0x1190   : > { %3492 = vrot.lane.b32.xlu2 %v3489_v46, %s8440_s23 }
0x1193   : > { %v3429_v30 = vpop.permute.xlu2 %3428  ;;  %v3599_v58 = vld [vmem:[#allocation3 + $0xc0] sm:$0xff] }
0x1194   : > { %3434 = vst.msk [vmem:[#allocation3 + $0xa0] sm:$0xf0] %vm2832_vm7, %v3429_v30 }
0x1196   : > { %3330 = vrot.lane.b32.xlu0 %v3326_v10, %s8443_s26 }
0x1197   : > { %3685 = vperm.xlu1 %5811, %v3681_v38  }
0x1198   : > { %3676 = vperm.xlu2 %5812, %v3668_v56  }
0x119b   : > { %v3559_v5 = vpop.permute.xlu2 %3558 }
0x119c   : > { %3564 = vst.msk [vmem:[#allocation3 + $0x180] sm:$0xff] %vm2809_vm10, %v3559_v5 }
0x119e   : > { %3671 = vperm.xlu0 %5810, %v3667_v27  }
0x11a3   : > { %v3412_v57 = vpop.permute.xlu1 %3411  ;;  %v3528_v7 = vpop.permute.xlu2 %3527 }
0x11a4   : > { %3417 = vst.msk [vmem:[#allocation3 + $0x90] sm:$0xff] %vm2809_vm10, %v3412_v57 }
0x11a5   : > { %3533 = vst.msk [vmem:[#allocation3 + $0x150] sm:$0xff] %vm2809_vm10, %v3528_v7  ;;  %v3398_v44 = vpop.permute.xlu0 %3397 }
0x11a6   : > { %3690 = vperm.xlu0 %5810, %v3682_v4   ;;  %3403 = vst.msk [vmem:[#allocation3 + $0x70] sm:$0xf0] %vm2832_vm7, %v3398_v44 }
0x11ab   : > { %v3379_v3 = vpop.permute.xlu1 %3378  ;;  %v3596_v57 = vld [vmem:[#allocation3 + $0x90] sm:$0xff] }
0x11ac   : > { %3384 = vst.msk [vmem:[#allocation3 + $0x40] sm:$0xf0] %vm2832_vm7, %v3379_v3 }
0x11ad   : > { %v3594_v3 = vld [vmem:[#allocation3 + $0x70] sm:$0xff] }
0x11b3   : > { %v3476_v16 = vpop.permute.xlu1 %3475 }
0x11b4   : > { %3481 = vst.msk [vmem:[#allocation3 + $0xf0] sm:$0xff] %vm2809_vm10, %v3476_v16 }
0x11ba   : > { %v3561_v53 = vpop.permute.xlu2 %3560 }
0x11bb   : > { %3565 = vst.msk [vmem:[#allocation3 + $0x190] sm:$0xf] %vm2811_vm0, %v3561_v53  ;;  %v3602_v54 = vld [vmem:[#allocation3 + $0xf0] sm:$0xff] }
0x11bc   : > { %3621 = vmatpush.msrb.mxu2 %v3602_v54  ;;  %v3593_v54 = vld [vmem:[#allocation3 + $0x60] sm:$0xff] }
0x11c2   : > { %v3530_v48 = vpop.permute.xlu2 %3529 }
0x11c3   : > { %3534 = vst.msk [vmem:[#allocation3 + $0x160] sm:$0xf] %vm2811_vm0, %v3530_v48 }
0x11c8   : > { %v3445_v33 = vpop.permute.xlu0 %3444 }
0x11c9   : > { %v3414_v2 = vpop.permute.xlu1 %3413  ;;  %3449 = vst.msk [vmem:[#allocation3 + $0xd0] sm:$0xf] %vm2811_vm0, %v3445_v33 }
0x11ca   : > { %v3464_v1 = vpop.permute.xlu2 %3463  ;;  %3418 = vst.msk [vmem:[#allocation3 + $0xa0] sm:$0xf] %vm2811_vm0, %v3414_v2  ;;  %v3611_v2 = vld [vmem:[#allocation3 + $0x180] sm:$0xff] }
0x11cb   : > { %3468 = vst.msk [vmem:[#allocation3 + $0xe0] sm:$0xff] %vm2809_vm10, %v3464_v1 }
0x11d0   : > { %v3364_v39 = vpop.permute.xlu0 %3363 }
0x11d1   : > { %v3462_v62 = vpop.permute.xlu1 %3461  ;;  %3368 = vst.msk [vmem:[#allocation3 + $0x40] sm:$0xf] %vm2811_vm0, %v3364_v39  ;;  %v3597_v4 = vld [vmem:[#allocation3 + $0xa0] sm:$0xff] }
0x11d2   : > { %v3362_v35 = vpop.permute.xlu2 %3361  ;;  %3467 = vst.msk [vmem:[#allocation3 + $0xd0] sm:$0xf0] %vm2832_vm7, %v3462_v62  ;;  %v3601_v6 = vld [vmem:[#allocation3 + $0xe0] sm:$0xff] }
0x11d3   : > { %3367 = vst.msk [vmem:[#allocation3 + $0x30] sm:$0xff] %vm2809_vm10, %v3362_v35  ;;  %3622 = vmatpush.msrb.mxu2 %v3601_v6 }
0x11d8   : > { %v3576_v26 = vpop.permute.xlu0 %3575  ;;  %v3591_v1 = vld [vmem:[#allocation3 + $0x40] sm:$0xff] }
0x11d9   : > { %v3400_v41 = vpop.permute.xlu1 %3399  ;;  %3581 = vst.msk [vmem:[#allocation3 + $0x190] sm:$0xf0] %vm2832_vm7, %v3576_v26  ;;  %v3600_v34 = vld [vmem:[#allocation3 + $0xd0] sm:$0xff] }
0x11da   : > { %v3507_v46 = vpop.permute.xlu2 %3506  ;;  %3404 = vst.msk [vmem:[#allocation3 + $0x80] sm:$0xff] %vm2809_vm10, %v3400_v41  ;;  %3623 = vmatpush.msrb.mxu2 %v3600_v34  ;;  %v3590_v35 = vld [vmem:[#allocation3 + $0x30] sm:$0xff] }
0x11db   : > { %3512 = vst.msk [vmem:[#allocation3 + $0x120] sm:$0xff] %vm2809_vm10, %v3507_v46  ;;  %v3608_v34 = vld [vmem:[#allocation3 + $0x150] sm:$0xff] }
0x11dc   : > { %3624 = vmatpush.msrb.mxu2 %v3599_v58  ;;  %v8461_v58 = vrot.slane %v6914_v24, 4 }
0x11e0   : > { %v3545_v36 = vpop.permute.xlu0 %3544  ;;  %v3612_v48 = vld [vmem:[#allocation3 + $0x190] sm:$0xff] }
0x11e1   : > { %v3381_v18 = vpop.permute.xlu1 %3380  ;;  %3550 = vst.msk [vmem:[#allocation3 + $0x160] sm:$0xf0] %vm2832_vm7, %v3545_v36  ;;  %v3595_v7 = vld [vmem:[#allocation3 + $0x80] sm:$0xff] }
0x11e2   : > { %v3495_v13 = vpop.permute.xlu2 %3494  ;;  %3385 = vst.msk [vmem:[#allocation3 + $0x50] sm:$0xff] %vm2809_vm10, %v3381_v18 }
0x11e3   : > { %3499 = vst.msk [vmem:[#allocation3 + $0x110] sm:$0xff] %vm2809_vm10, %v3495_v13  ;;  %v3605_v13 = vld [vmem:[#allocation3 + $0x120] sm:$0xff] }
0x11e8   : > { %v3431_v38 = vpop.permute.xlu0 %3430  ;;  %v3609_v6 = vld [vmem:[#allocation3 + $0x160] sm:$0xff] }
0x11e9   : > { %v3350_v56 = vpop.permute.xlu1 %3349  ;;  %3435 = vst.msk [vmem:[#allocation3 + $0xb0] sm:$0xff] %vm2809_vm10, %v3431_v38  ;;  %v3592_v33 = vld [vmem:[#allocation3 + $0x50] sm:$0xff] }
0x11ea   : > { %v3493_v10 = vpop.permute.xlu2 %3492  ;;  %3354 = vst.msk [vmem:[#allocation3 + $0x20] sm:$0xff] %vm2809_vm10, %v3350_v56  ;;  %v3604_v38 = vld [vmem:[#allocation3 + $0x110] sm:$0xff] }
0x11eb   : > { %3498 = vst.msk [vmem:[#allocation3 + $0x100] sm:$0xf0] %vm2832_vm7, %v3493_v10  ;;  %v3584_v56 = vld [vmem:[%s8460_s1 + $0x8] sm:$0xff] }
0x11f0   : > { %v3578_v30 = vpop.permute.xlu0 %3577  ;;  %v3598_v27 = vld [vmem:[#allocation3 + $0xb0] sm:$0xff] }
0x11f1   : > { %v3547_v5 = vpop.permute.xlu1 %3546  ;;  %3582 = vst.msk [vmem:[#allocation3 + $0x1a0] sm:$0xff] %vm2809_vm10, %v3578_v30  ;;  %3625 = vmatpush.msrb.mxu2 %v3598_v27  ;;  %v3589_v46 = vld [vmem:[#allocation3 + $0x20] sm:$0xff]  ;;  %v3585_v27 = vld [vmem:[%s8460_s1 + $0x10] sm:$0xf] }
0x11f2   : > { %3551 = vst.msk [vmem:[#allocation3 + $0x170] sm:$0xff] %vm2809_vm10, %v3547_v5  ;;  %v3586_v30 = vld [vmem:[%s8460_s1 + $0x18] sm:$0xf] }
0x11f3   : > { %3626 = vmatpush.msrb.mxu2 %v3597_v4 }
0x11f5   : > { %3627 = vmatpush.msrb.mxu2 %v3596_v57 }
0x11f7   : > { %3628 = vmatpush.msrb.mxu2 %v3595_v7 }
0x11f8   : > { %v3509_v44 = vpop.permute.xlu0 %3508  ;;  %v3613_v16 = vld [vmem:[#allocation3 + $0x1a0] sm:$0xff] }
0x11f9   : > { %v3348_v53 = vpop.permute.xlu1 %3347  ;;  %3513 = vst.msk [vmem:[#allocation3 + $0x130] sm:$0xf] %vm2811_vm0, %v3509_v44  ;;  %3629 = vmatpush.msrb.mxu2 %v3594_v3  ;;  %3649 = vmatpush.msrb.mxu3 %v3613_v16  ;;  %v3610_v39 = vld [vmem:[#allocation3 + $0x170] sm:$0xff]  ;;  %v3709_v44 = vld [vmem:[%s8462_s6] sm:$0xf]  ;;  %s8479_s6 = smov 120  }
0x11fa   : > { %3353 = vst.msk [vmem:[#allocation3 + $0x10] sm:$0xf0] %vm2832_vm7, %v3348_v53  ;;  %5677 = vmatpush.msk.msra.mxu0 %vm2120_vm9, %v3709_v44  ;;  %vm8469_vm7 = vcmask 519168  }
0x11fb   : > { %3630 = vmatpush.msrb.mxu2 %v3593_v54  ;;  %3650 = vmatpush.msrb.mxu3 %v3612_v48 }
0x11fd   : > { %3631 = vmatpush.msrb.mxu2 %v3592_v33  ;;  %3651 = vmatpush.msrb.mxu3 %v3611_v2 }
0x11ff   : > { %3632 = vmatpush.msrb.mxu2 %v3591_v1  ;;  %3652 = vmatpush.msrb.mxu3 %v3610_v39  ;;  %v3677_v1 = vpop.permute.xlu2 %3676 }
0x1200   : > { %v3333_v62 = vpop.permute.xlu0 %3332  ;;  %v3606_v26 = vld [vmem:[#allocation3 + $0x130] sm:$0xff] }
0x1201   : > { %v3478_v41 = vpop.permute.xlu1 %3477  ;;  %3337 = vst.msk [vmem:[#allocation3 + $0x10] sm:$0xf] %vm2811_vm0, %v3333_v62  ;;  %3633 = vmatpush.msrb.mxu2 %v3590_v35  ;;  %3653 = vmatpush.msrb.mxu3 %v3609_v6 }
0x1202   : > { %3482 = vst.msk [vmem:[#allocation3 + $0x100] sm:$0xf] %vm2811_vm0, %v3478_v41  ;;  %vm8470_vm0 = vcmask 662664  }
0x1203   : > { %3634 = vmatpush.msrb.mxu2 %v3589_v46  ;;  %3654 = vmatpush.msrb.mxu3 %v3608_v34  ;;  %3947 = vst.msk [vmem:[#allocation3 + $0x130] sm:$0xf0] %vm2484_vm8, %v8461_v58 }
0x1205   : > { %3655 = vmatpush.msrb.mxu3 %v7072_v37  ;;  %v3583_v37 = vld [vmem:[%s8460_s1] sm:$0xff]  ;;  %s8464_s1 = smov 116  }
0x1207   : > { %3656 = vmatpush.msrb.mxu3 %v3606_v26 }
0x1208   : > { %v3331_v36 = vpop.permute.xlu0 %3330  ;;  %v3588_v18 = vld [vmem:[#allocation3 + $0x10] sm:$0xff] }
0x1209   : > { %3336 = vst.msk [vmem:[#allocation3] sm:$0xff] %vm2809_vm10, %v3331_v36  ;;  %3635 = vmatpush.msrb.mxu2 %v3588_v18  ;;  %3657 = vmatpush.msrb.mxu3 %v3605_v13  ;;  %v3603_v24 = vld [vmem:[#allocation3 + $0x100] sm:$0xff]  ;;  %v3686_v16 = vpop.permute.xlu1 %3685 }
0x120b   : > { %3658 = vmatpush.msrb.mxu3 %v3604_v38 }
0x120d   : > { %3659 = vmatpush.msrb.mxu3 %v3603_v24 }
0x120e   : > { %5675 = vmatmul.msk.f32.vlgmr.msrb.gmra.mxu3 %vm3614_vm5, %v3584_v56 }
0x1210   : > { %v3587_v10 = vld [vmem:[#allocation3] sm:$0xff]  ;;  %v3672_v7 = vpop.permute.xlu0 %3671 }
0x1211   : > { %3636 = vmatpush.msrb.mxu2 %v3587_v10 }
0x1212   : > { %3637 = vmatmul.f32.vlgmr.msrb.gmra.mxu2 %v3583_v37 }
0x1216   : > { %5676 = vmatmul.msk.f32.gmra.mxu3 %vm3614_vm5, %v3586_v30 }
0x1218   : > { %v3691_v62 = vpop.permute.xlu0 %3690 }
0x121a   : > { %3640 = vmatmul.f32.gmra.mxu2 %v3585_v27 }
0x1291   : > { %v3661_v5 = vpop.f32.mrf.mxu3 }
0x1295   : > { %v3638_v4 = vpop.f32.mrf.mxu2 }
0x1296   : > { %v3662_v57 = vadd.f32 %v3661_v5, %v3638_v4 }
0x1298   : > { %v3679_v3 = vmul.f32 %v3672_v7, %v3662_v57 }
0x1299   : > { %v3664_v54 = vpop.f32.mrf.mxu3 }
0x129a   : > { %v3693_v53 = vadd.f32 %v3686_v16, %v3679_v3 }
0x129c   : > { %v3695_v48 = vmul.f32 1.442695, %v3693_v53 }
0x129d   : > { %v3641_v33 = vpop.f32.mrf.mxu2 }
0x129e   : > { %5942 = vpow2.f32 %v3695_v48  ;;  %v3665_v2 = vadd.f32 %v3664_v54, %v3641_v33 }
0x12a0   : > { %v3680_v39 = vmul.f32 %v3677_v1, %v3665_v2 }
0x12a2   : > { %v3694_v35 = vadd.f32 %v3691_v62, %v3680_v39 }
0x12a4   : > { %v5943_v6 = vpop.eup %5942  ;;  %v3697_v26 = vmul.f32 1.442695, %v3694_v35 }
0x12a5   : > { %v3699_v41 = vadd.f32 1.0, %v5943_v6 }
0x12a6   : > { %5944 = vpow2.f32 %v3697_v26 }
0x12a7   : > { %5946 = vlog2.f32 %v3699_v41 }
0x12ac   : > { %v5945_v46 = vpop.eup %5944 }
0x12ad   : > { %v5947_v34 = vpop.eup %5946  ;;  %v3700_v58 = vadd.f32 1.0, %v5945_v46 }
0x12ae   : > { %v3702_v36 = vmul.f32 0.6931472, %v5947_v34 }
0x12af   : > { %5948 = vlog2.f32 %v3700_v58 }
0x12b0   : > { %5950 = vtanh.f32 %v3702_v36 }
0x12b5   : > { %v5949_v18 = vpop.eup %5948 }
0x12b6   : > { %v5951_v13 = vpop.eup %5950  ;;  %v3704_v38 = vmul.f32 0.6931472, %v5949_v18 }
0x12b7   : > { %v3707_v56 = vmul.f32 %v5951_v13, %v3693_v53 }
0x12b8   : > { %5952 = vtanh.f32 %v3704_v38 }
0x12b9   : > { %5678 = vmatmul.msk.f32.vlgmr.msra.gmra.mxu0 %vm2809_vm10, %v3707_v56 }
0x12be   : > { %v5953_v24 = vpop.eup %5952 }
0x12bf   : > { %v3708_v37 = vmul.f32 %v5953_v24, %v3694_v35 }
0x12c1   : > { %5679 = vmatmul.msk.f32.gmra.mxu0 %vm2809_vm10, %v3708_v37 }
0x1336   : > { %v3736_v10 = vpop.f32.mrf.mxu0 }
0x1337   : > { %3814 = vst.msk [vmem:[#allocation3 + $0x60] sm:$0xff] %vm1274_vm13, %v3736_v10  ;;  %3744 = vrot.lane.b32.xlu1 %v3736_v10, %s8446_s18 }
0x133e   : > { %v3739_v30 = vpop.f32.mrf.mxu0 }
0x133f   : > { %3815 = vst.msk [vmem:[#allocation3 + $0x70] sm:$0xf] %vm2463_vm6, %v3739_v30  ;;  %3746 = vrot.lane.b32.xlu2 %v3739_v30, %s8446_s18 }
0x1399   : > { %v3747_v27 = vpop.permute.xlu2 %3746 }
0x139a   : > { %3751 = vst.msk [vmem:[#allocation2 + $0x18] sm:$0xf] %vm2444_vm3, %v3747_v27 }
0x13a1   : > { %v7311_v5 = vld [vmem:[#allocation2 + $0x18] sm:$0xf] }
0x13a2   : > { %v7313_v4 = vld [vmem:[#allocation2 + $0x18] sm:$0xf] }
0x13a3   : > { %v7315_v57 = vld [vmem:[#allocation2 + $0x18] sm:$0xf] }
0x13a4   : > { %v3798_v7 = vld [vmem:[#allocation2 + $0x18] sm:$0xf] }
0x13a5   : > { %v3834_v44 = vld [vmem:[#allocation2 + $0x18] sm:$0xf] }
0x13a6   : > { %v3865_v3 = vld [vmem:[#allocation2 + $0x18] sm:$0xf]  ;;  %v3836_v6 = vmul.f32 %v3834_v44, %v6828_v49 }
0x13a7   : > { %v3817_v16 = vld [vmem:[#allocation2 + $0x18] sm:$0xf]  ;;  %v3867_v41 = vmul.f32 %v3865_v3, %v6826_v19 }
0x13a8   : > { %v3848_v53 = vld [vmem:[#allocation2 + $0x18] sm:$0xf]  ;;  %v3819_v58 = vmul.f32 %v3817_v16, %v6848_v31 }
0x13a9   : > { %3879 = vst.msk [vmem:[#allocation2 + $0x18] sm:$0xf] %vm2444_vm3, %v6926_v32  ;;  %v3745_v54 = vpop.permute.xlu1 %3744  ;;  %v3850_v56 = vmul.f32 %v3848_v53, %v6839_v15  ;;  %v3800_v53 = vmul.f32 %v3798_v7, %v6856_v0 }
0x13aa   : > { %3750 = vst.msk [vmem:[#allocation2] sm:$0xff] %vm2442_vm2, %v3745_v54  ;;  %v3823_v36 = vrot.slane %v3819_v58, 4 }
0x13ab   : > { %v3854_v10 = vrot.slane %v3850_v56, 4 }
0x13b0   : > { %v3929_v24 = vld [vmem:[#allocation2 + $0x18] sm:$0xf] }
0x13b1   : > { %v7320_v48 = vld [vmem:[#allocation2] sm:$0xff]  ;;  %v3931_v30 = vmul.f32 %v3929_v24, %v6856_v0  ;;  %v3881_v27 = vld [vmem:[#allocation2 + $0x18] sm:$0xf] }
0x13b2   : > { %v3835_v33 = vmul.f32 %v7320_v48, %v6828_v49  ;;  %v3866_v2 = vmul.f32 %v7320_v48, %v6826_v19  ;;  %v3818_v1 = vmul.f32 %v7320_v48, %v6848_v31  ;;  %3878 = vst.msk [vmem:[#allocation2] sm:$0xff] %vm2442_vm2, %v6922_v47  ;;  %v3849_v39 = vmul.f32 %v7320_v48, %v6839_v15 }
0x13b3   : > { %v3799_v3 = vmul.f32 %v7320_v48, %v6856_v0  ;;  %v3883_v54 = vmul.f32 %v3881_v27, %v6874_v43 }
0x13b4   : > { %3839 = vrot.lane.b32.xlu1 %v3835_v33, %s8439_s15  ;;  %3870 = vrot.lane.b32.xlu2 %v3866_v2, %s8463_s0  ;;  %v3822_v32 = vrot.slane %v3818_v1, 4  ;;  %v3853_v35 = vrot.slane %v3849_v39, 4  ;;  %v3804_v1 = vrot.slane %v3800_v53, 4  ;;  %v3995_v39 = vld [vmem:[#allocation2 + $0x18] sm:$0xf] }
0x13b5   : > { %v3803_v33 = vrot.slane %v3799_v3, 4  ;;  %v3997_v7 = vmul.f32 %v3995_v39, %v6826_v19 }
0x13b6   : > { %3825 = vrot.lane.b32.xlu0 %v3822_v32, %s8456_s2  ;;  %v3824_v13 = vsel %vm2120_vm9, %v3822_v32, %v3823_v36  ;;  %v3855_v44 = vsel %vm2120_vm9, %v3853_v35, %v3854_v10  ;;  %v3887_v32 = vrot.slane %v3883_v54, 4  ;;  %v3769_v10 = vmul.f32 %v7313_v4, %v6869_v61 }
0x13b8   : > { %v3773_v27 = vrot.slane %v3769_v10, 4 }
0x13b9   : > { %v7335_v62 = vld [vmem:[#allocation2] sm:$0xff] }
0x13ba   : > { %v3899_v47 = vmul.f32 %v7335_v62, %v6869_v61  ;;  %v3996_v26 = vmul.f32 %v7335_v62, %v6826_v19  ;;  %v3982_v34 = vmul.f32 %v7335_v62, %v6839_v15  ;;  %v3951_v18 = vmul.f32 %v7335_v62, %v6848_v31 }
0x13bb   : > { %v3930_v38 = vmul.f32 %v7335_v62, %v6856_v0  ;;  %v3882_v37 = vmul.f32 %v7335_v62, %v6874_v43  ;;  %v3965_v2 = vmul.f32 %v7335_v62, %v6828_v49 }
0x13bc   : > { %3856 = vrot.lane.b32.xlu2 %v3853_v35, %s8451_s3  ;;  %3841 = vrot.lane.b32.xlu1 %v3836_v6, %s8439_s15  ;;  %v4000_v46 = vrot.slane %v3996_v26, 4  ;;  %v3805_v35 = vsel %vm2120_vm9, %v3803_v33, %v3804_v1  ;;  %v4001_v26 = vrot.slane %v3997_v7, 4 }
0x13bd   : > { %v3886_v16 = vrot.slane %v3882_v37, 4  ;;  %v3969_v0 = vrot.slane %v3965_v2, 4  ;;  %v3912_v37 = vld [vmem:[#allocation2 + $0x18] sm:$0xf] }
0x13be   : > { %3903 = vrot.lane.b32.xlu0 %v3899_v47, %s8454_s8  ;;  %v3950_v47 = vld [vmem:[#allocation2 + $0x18] sm:$0xf]  ;;  %v4002_v58 = vsel %vm2120_vm9, %v4000_v46, %v4001_v26 }
0x13bf   : > { %v3888_v6 = vsel %vm2120_vm9, %v3886_v16, %v3887_v32 }
0x13c4   : > { %3872 = vrot.lane.b32.xlu2 %v3867_v41, %s8463_s0  ;;  %4003 = vrot.lane.b32.xlu1 %v4000_v46, %s8463_s0  ;;  %v3981_v41 = vld [vmem:[#allocation2 + $0x18] sm:$0xf] }
0x13c5   : > { %v3983_v36 = vmul.f32 %v3981_v41, %v6839_v15  ;;  %v3898_v46 = vld [vmem:[#allocation2 + $0x18] sm:$0xf]  ;;  %v3913_v15 = vmul.f32 %v7335_v62, %v6853_v60 }
0x13c6   : > { %3986 = vrot.lane.b32.xlu0 %v3982_v34, %s8451_s3  ;;  %v3952_v34 = vmul.f32 %v3950_v47, %v6848_v31  ;;  %v3900_v56 = vmul.f32 %v3898_v46, %v6869_v61 }
0x13c7   : > { %v3917_v24 = vrot.slane %v3913_v15, 4  ;;  %v8467_v15 = vrot.slane %v6775_v63, 4 }
0x13cc   : > { %3955 = vrot.lane.b32.xlu2 %v3951_v18, %s8456_s2  ;;  %3827 = vrot.lane.b32.xlu1 %v3824_v13, %s8456_s2  ;;  %v3964_v18 = vld [vmem:[#allocation2 + $0x18] sm:$0xf]  ;;  %v3786_v13 = vmul.f32 %v7315_v57, %v6853_v60  ;;  %v3768_v57 = vmul.f32 %v7320_v48, %v6869_v61 }
0x13cd   : > { %v3966_v19 = vmul.f32 %v3964_v18, %v6828_v49  ;;  %v3785_v49 = vmul.f32 %v7320_v48, %v6853_v60 }
0x13ce   : > { %3934 = vrot.lane.b32.xlu0 %v3930_v38, %s8440_s23  ;;  %v3772_v62 = vrot.slane %v3768_v57, 4 }
0x13cf   : > { %v3970_v38 = vrot.slane %v3966_v19, 4 }
0x13d0   : > { %v3774_v3 = vsel %vm2120_vm9, %v3772_v62, %v3773_v27 }
0x13d1   : > { %v3971_v31 = vsel %vm2120_vm9, %v3969_v0, %v3970_v38 }
0x13d4   : > { %3858 = vrot.lane.b32.xlu2 %v3855_v44, %s8451_s3  ;;  %3936 = vrot.lane.b32.xlu1 %v3931_v30, %s8440_s23  ;;  %v3914_v30 = vmul.f32 %v3912_v37, %v6853_v60  ;;  %v3755_v44 = vmul.f32 %v7311_v5, %v6874_v43  ;;  %v3754_v60 = vmul.f32 %v7320_v48, %v6874_v43 }
0x13d6   : > { %3889 = vrot.lane.b32.xlu0 %v3886_v16, %s8464_s1  ;;  %v3918_v16 = vrot.slane %v3914_v30, 4 }
0x13d8   : > { %v3919_v61 = vsel %vm2120_vm9, %v3917_v24, %v3918_v16 }
0x13dc   : > { %3808 = vrot.lane.b32.xlu2 %v3805_v35, %s8440_s23  ;;  %3891 = vrot.lane.b32.xlu1 %v3888_v6, %s8464_s1 }
0x13de   : > { %3972 = vrot.lane.b32.xlu0 %v3969_v0, %s8439_s15 }
0x13e4   : > { %3957 = vrot.lane.b32.xlu2 %v3952_v34, %s8456_s2  ;;  %4005 = vrot.lane.b32.xlu1 %v4002_v58, %s8463_s0  ;;  %s8474_s0 = smov 104  }
0x13e6   : > { %3988 = vrot.lane.b32.xlu0 %v3983_v36, %s8451_s3  ;;  %s8465_s3 = sld [smem:[#allocation20_spill]] }
0x13ec   : > { %3806 = vrot.lane.b32.xlu2 %v3803_v33, %s8440_s23  ;;  %3791 = vrot.lane.b32.xlu1 %v3786_v13, %s8443_s26  ;;  %v4094_v4 = vld [vmem:[%s8465_s3] sm:$0xff]  ;;  %v4095_v5 = vld [vmem:[%s8465_s3 + $0x8] sm:$0xf]  ;;  %s8477_s3 = smov 119  }
0x13ee   : > { %3974 = vrot.lane.b32.xlu0 %v3971_v31, %s8439_s15  ;;  %s8466_s15 = sld [smem:[#allocation21_spill]] }
0x13f4   : > { %3905 = vrot.lane.b32.xlu2 %v3900_v56, %s8454_s8  ;;  %3789 = vrot.lane.b32.xlu1 %v3785_v49, %s8443_s26  ;;  %v4109_v53 = vld [vmem:[%s8466_s15 + $0x8] sm:$0xf]  ;;  %v4108_v54 = vld [vmem:[%s8466_s15] sm:$0xff] }
0x13f6   : > { %3920 = vrot.lane.b32.xlu0 %v3917_v24, %s8443_s26 }
0x13fc   : > { %3777 = vrot.lane.b32.xlu1 %v3774_v3, %s8454_s8  ;;  %3760 = vrot.lane.b32.xlu2 %v3755_v44, %s8464_s1 }
0x13fe   : > { %3922 = vrot.lane.b32.xlu0 %v3919_v61, %s8443_s26  ;;  %s8473_s26 = smov 102  }
0x1404   : > { %3758 = vrot.lane.b32.xlu1 %v3754_v60, %s8464_s1  ;;  %4098 = vperm.xlu2 %5812, %v4094_v4   ;;  %s8475_s1 = smov 103  }
0x1406   : > { %3775 = vrot.lane.b32.xlu0 %v3772_v62, %s8454_s8  ;;  %s8468_s8 = sld [smem:[#allocation19_spill]] }
0x140c   : > { %4103 = vperm.xlu1 %5811, %v4095_v5   ;;  %4117 = vperm.xlu2 %5812, %v4109_v53   ;;  %v4021_v53 = vld [vmem:[#allocation3 + $0x60] sm:$0xff] }
0x140e   : > { %4112 = vperm.xlu0 %5810, %v4108_v54   ;;  %v3871_v33 = vpop.permute.xlu2 %3870 }
0x140f   : > { %3876 = vst.msk [vmem:[#allocation3 + $0xc0] sm:$0xff] %vm1274_vm13, %v3871_v33 }
0x1416   : > { %v3857_v2 = vpop.permute.xlu2 %3856  ;;  %v4027_v10 = vld [vmem:[#allocation3 + $0xc0] sm:$0xff] }
0x1417   : > { %3862 = vst.msk [vmem:[#allocation3 + $0xa0] sm:$0xf0] %vm2484_vm8, %v3857_v2 }
0x141e   : > { %v3873_v1 = vpop.permute.xlu2 %3872 }
0x141f   : > { %3877 = vst.msk [vmem:[#allocation3 + $0xd0] sm:$0xf] %vm2463_vm6, %v3873_v1 }
0x1426   : > { %v3840_v43 = vpop.permute.xlu1 %3839  ;;  %v3956_v48 = vpop.permute.xlu2 %3955 }
0x1427   : > { %3845 = vst.msk [vmem:[#allocation3 + $0x90] sm:$0xff] %vm1274_vm13, %v3840_v43 }
0x1428   : > { %3961 = vst.msk [vmem:[#allocation3 + $0x150] sm:$0xff] %vm1274_vm13, %v3956_v48  ;;  %v3826_v32 = vpop.permute.xlu0 %3825 }
0x1429   : > { %3831 = vst.msk [vmem:[#allocation3 + $0x70] sm:$0xf0] %vm2484_vm8, %v3826_v32 }
0x142e   : > { %v3842_v39 = vpop.permute.xlu1 %3841  ;;  %v3859_v35 = vpop.permute.xlu2 %3858  ;;  %v4024_v3 = vld [vmem:[#allocation3 + $0x90] sm:$0xff] }
0x142f   : > { %3846 = vst.msk [vmem:[#allocation3 + $0xa0] sm:$0xf] %vm2463_vm6, %v3842_v39  ;;  %v4036_v48 = vld [vmem:[#allocation3 + $0x150] sm:$0xff] }
0x1430   : > { %3863 = vst.msk [vmem:[#allocation3 + $0xb0] sm:$0xff] %vm1274_vm13, %v3859_v35  ;;  %v3904_v6 = vpop.permute.xlu0 %3903  ;;  %v4022_v60 = vld [vmem:[#allocation3 + $0x70] sm:$0xff] }
0x1431   : > { %3909 = vst.msk [vmem:[#allocation3 + $0xf0] sm:$0xff] %vm1274_vm13, %v3904_v6 }
0x1436   : > { %v4004_v0 = vpop.permute.xlu1 %4003  ;;  %v3809_v7 = vpop.permute.xlu2 %3808  ;;  %v4025_v30 = vld [vmem:[#allocation3 + $0xa0] sm:$0xff] }
0x1437   : > { %4009 = vst.msk [vmem:[#allocation3 + $0x190] sm:$0xf0] %vm2484_vm8, %v4004_v0  ;;  %v4026_v62 = vld [vmem:[#allocation3 + $0xb0] sm:$0xff] }
0x1438   : > { %3813 = vst.msk [vmem:[#allocation3 + $0x50] sm:$0xff] %vm1274_vm13, %v3809_v7  ;;  %v3987_v47 = vpop.permute.xlu0 %3986  ;;  %v4030_v26 = vld [vmem:[#allocation3 + $0xf0] sm:$0xff] }
0x1439   : > { %3992 = vst.msk [vmem:[#allocation3 + $0x180] sm:$0xff] %vm1274_vm13, %v3987_v47  ;;  %4048 = vmatpush.msra.mxu1 %v4030_v26 }
0x143e   : > { %v3828_v41 = vpop.permute.xlu1 %3827  ;;  %v3958_v34 = vpop.permute.xlu2 %3957 }
0x143f   : > { %3832 = vst.msk [vmem:[#allocation3 + $0x80] sm:$0xff] %vm1274_vm13, %v3828_v41  ;;  %v4020_v33 = vld [vmem:[#allocation3 + $0x50] sm:$0xff] }
0x1440   : > { %3962 = vst.msk [vmem:[#allocation3 + $0x160] sm:$0xf] %vm2463_vm6, %v3958_v34  ;;  %v3935_v58 = vpop.permute.xlu0 %3934  ;;  %v4039_v4 = vld [vmem:[#allocation3 + $0x180] sm:$0xff] }
0x1441   : > { %3940 = vst.msk [vmem:[#allocation3 + $0x120] sm:$0xff] %vm1274_vm13, %v3935_v58  ;;  %v4011_v58 = vld [vmem:[%s8468_s8] sm:$0xff] }
0x1446   : > { %v3937_v36 = vpop.permute.xlu1 %3936  ;;  %v3807_v18 = vpop.permute.xlu2 %3806  ;;  %v4023_v61 = vld [vmem:[#allocation3 + $0x80] sm:$0xff] }
0x1447   : > { %3941 = vst.msk [vmem:[#allocation3 + $0x130] sm:$0xf] %vm2463_vm6, %v3937_v36  ;;  %v4014_v36 = vld [vmem:[%s8468_s8 + $0x18] sm:$0xf] }
0x1448   : > { %3812 = vst.msk [vmem:[#allocation3 + $0x40] sm:$0xf0] %vm2484_vm8, %v3807_v18  ;;  %v3890_v19 = vpop.permute.xlu0 %3889  ;;  %v4033_v6 = vld [vmem:[#allocation3 + $0x120] sm:$0xff] }
0x1449   : > { %3895 = vst.msk [vmem:[#allocation3 + $0xd0] sm:$0xf0] %vm2484_vm8, %v3890_v19  ;;  %v4013_v19 = vld [vmem:[%s8468_s8 + $0x10] sm:$0xf] }
0x144e   : > { %v3892_v13 = vpop.permute.xlu1 %3891  ;;  %v3906_v38 = vpop.permute.xlu2 %3905  ;;  %v4034_v31 = vld [vmem:[#allocation3 + $0x130] sm:$0xff] }
0x144f   : > { %3896 = vst.msk [vmem:[#allocation3 + $0xe0] sm:$0xff] %vm1274_vm13, %v3892_v13 }
0x1450   : > { %3910 = vst.msk [vmem:[#allocation3 + $0x100] sm:$0xf] %vm2463_vm6, %v3906_v38  ;;  %v3973_v46 = vpop.permute.xlu0 %3972  ;;  %v4028_v37 = vld [vmem:[#allocation3 + $0xd0] sm:$0xff] }
0x1451   : > { %3978 = vst.msk [vmem:[#allocation3 + $0x160] sm:$0xf0] %vm2484_vm8, %v3973_v46 }
0x1452   : > { %4372 = vst.msk [vmem:[#allocation3 + $0x130] sm:$0xf0] %vm2130_vm12, %v8467_v15  ;;  %v4137_v15 = vld [vmem:[%s6269_s19 + $0x8] sm:$0xff] }
0x1453   : > { %4158 = vmatpush.msrb.mxu0 %v4137_v15 }
0x1456   : > { %v4006_v56 = vpop.permute.xlu1 %4005  ;;  %v3761_v49 = vpop.permute.xlu2 %3760  ;;  %v4029_v57 = vld [vmem:[#allocation3 + $0xe0] sm:$0xff] }
0x1457   : > { %4010 = vst.msk [vmem:[#allocation3 + $0x1a0] sm:$0xff] %vm1274_vm13, %v4006_v56  ;;  %4049 = vmatpush.msra.mxu1 %v4029_v57  ;;  %v4136_v56 = vld [vmem:[%s6269_s19] sm:$0xff] }
0x1458   : > { %3765 = vst.msk [vmem:[#allocation3 + $0x10] sm:$0xf] %vm2463_vm6, %v3761_v49  ;;  %v3989_v24 = vpop.permute.xlu0 %3988  ;;  %v4037_v43 = vld [vmem:[#allocation3 + $0x160] sm:$0xff]  ;;  %4159 = vmatpush.msrb.mxu0 %v4136_v56 }
0x1459   : > { %3993 = vst.msk [vmem:[#allocation3 + $0x190] sm:$0xf] %vm2463_vm6, %v3989_v24  ;;  %4050 = vmatpush.msra.mxu1 %v4028_v37 }
0x145b   : > { %4051 = vmatpush.msra.mxu1 %v4027_v10 }
0x145d   : > { %4052 = vmatpush.msra.mxu1 %v4026_v62 }
0x145e   : > { %v3792_v63 = vpop.permute.xlu1 %3791  ;;  %v4041_v27 = vld [vmem:[#allocation3 + $0x1a0] sm:$0xff]  ;;  %v4099_v46 = vpop.permute.xlu2 %4098 }
0x145f   : > { %3796 = vst.msk [vmem:[#allocation3 + $0x40] sm:$0xf] %vm2463_vm6, %v3792_v63  ;;  %4053 = vmatpush.msra.mxu1 %v4025_v30  ;;  %4076 = vmatpush.msra.mxu3 %v4041_v27  ;;  %vm8482_vm6 = vmmov %vm8469_vm7 }
0x1460   : > { %v3975_v44 = vpop.permute.xlu0 %3974  ;;  %v4040_v16 = vld [vmem:[#allocation3 + $0x190] sm:$0xff]  ;;  %vm8483_vm2 = vmmov %vm8482_vm6 }
0x1461   : > { %3979 = vst.msk [vmem:[#allocation3 + $0x170] sm:$0xff] %vm1274_vm13, %v3975_v44  ;;  %4054 = vmatpush.msra.mxu1 %v4024_v3  ;;  %4077 = vmatpush.msra.mxu3 %v4040_v16  ;;  %vm8484_vm3 = vmmov %vm8483_vm2 }
0x1462   : > { %vm8486_vm10 = vmmov %vm8483_vm2 }
0x1463   : > { %4055 = vmatpush.msra.mxu1 %v4023_v61  ;;  %4078 = vmatpush.msra.mxu3 %v4039_v4  ;;  %vm8487_vm1 = vmmov %vm8483_vm2 }
0x1464   : > { %vm8488_vm15 = vmmov %vm8487_vm1 }
0x1465   : > { %4056 = vmatpush.msra.mxu1 %v4022_v60 }
0x1466   : > { %v3790_v5 = vpop.permute.xlu1 %3789  ;;  %v4019_v1 = vld [vmem:[#allocation3 + $0x40] sm:$0xff]  ;;  %v4118_v44 = vpop.permute.xlu2 %4117 }
0x1467   : > { %3795 = vst.msk [vmem:[#allocation3 + $0x30] sm:$0xff] %vm1274_vm13, %v3790_v5  ;;  %4057 = vmatpush.msra.mxu1 %v4021_v53 }
0x1468   : > { %v3921_v54 = vpop.permute.xlu0 %3920  ;;  %v4038_v2 = vld [vmem:[#allocation3 + $0x170] sm:$0xff] }
0x1469   : > { %3926 = vst.msk [vmem:[#allocation3 + $0x100] sm:$0xf0] %vm2484_vm8, %v3921_v54  ;;  %4058 = vmatpush.msra.mxu1 %v4020_v33  ;;  %4079 = vmatpush.msra.mxu3 %v4038_v2 }
0x146b   : > { %4059 = vmatpush.msra.mxu1 %v4019_v1  ;;  %4080 = vmatpush.msra.mxu3 %v4037_v43 }
0x146d   : > { %4081 = vmatpush.msra.mxu3 %v4036_v48 }
0x146e   : > { %v3778_v32 = vpop.permute.xlu1 %3777  ;;  %v4018_v39 = vld [vmem:[#allocation3 + $0x30] sm:$0xff] }
0x146f   : > { %3782 = vst.msk [vmem:[#allocation3 + $0x20] sm:$0xff] %vm1274_vm13, %v3778_v32  ;;  %4060 = vmatpush.msra.mxu1 %v4018_v39  ;;  %4082 = vmatpush.msra.mxu3 %v7082_v51  ;;  %v4012_v51 = vld [vmem:[%s8468_s8 + $0x8] sm:$0xff] }
0x1470   : > { %v3923_v35 = vpop.permute.xlu0 %3922  ;;  %v4031_v41 = vld [vmem:[#allocation3 + $0x100] sm:$0xff] }
0x1471   : > { %3927 = vst.msk [vmem:[#allocation3 + $0x110] sm:$0xff] %vm1274_vm13, %v3923_v35  ;;  %4083 = vmatpush.msra.mxu3 %v4034_v31 }
0x1473   : > { %4084 = vmatpush.msra.mxu3 %v4033_v6 }
0x1476   : > { %v3759_v0 = vpop.permute.xlu1 %3758  ;;  %v4017_v7 = vld [vmem:[#allocation3 + $0x20] sm:$0xff] }
0x1477   : > { %3764 = vst.msk [vmem:[#allocation3] sm:$0xff] %vm1274_vm13, %v3759_v0  ;;  %4061 = vmatpush.msra.mxu1 %v4017_v7 }
0x1478   : > { %v3776_v47 = vpop.permute.xlu0 %3775  ;;  %v4032_v26 = vld [vmem:[#allocation3 + $0x110] sm:$0xff] }
0x1479   : > { %3781 = vst.msk [vmem:[#allocation3 + $0x10] sm:$0xf0] %vm2484_vm8, %v3776_v47  ;;  %4085 = vmatpush.msra.mxu3 %v4032_v26  ;;  %vm8485_vm8 = vmmov %vm8483_vm2 }
0x147b   : > { %4086 = vmatpush.msra.mxu3 %v4031_v41 }
0x147c   : > { %5680 = vmatmul.msk.f32.vlgmr.msra.gmra.mxu3 %vm3614_vm5, %v4012_v51 }
0x147e   : > { %v4015_v18 = vld [vmem:[#allocation3] sm:$0xff]  ;;  %v4104_v30 = vpop.permute.xlu1 %4103 }
0x1480   : > { %v4016_v34 = vld [vmem:[#allocation3 + $0x10] sm:$0xff]  ;;  %v4113_v57 = vpop.permute.xlu0 %4112 }
0x1481   : > { %4062 = vmatpush.msra.mxu1 %v4016_v34 }
0x1483   : > { %4063 = vmatpush.msra.mxu1 %v4015_v18 }
0x1484   : > { %4064 = vmatmul.f32.vlgmr.msra.gmra.mxu1 %v4011_v58  ;;  %5681 = vmatmul.msk.f32.gmra.mxu3 %vm3614_vm5, %v4014_v36 }
0x148c   : > { %4067 = vmatmul.f32.gmra.mxu1 %v4013_v19 }
0x14ff   : > { %v4088_v13 = vpop.f32.mrf.mxu3 }
0x1501   : > { %v4065_v38 = vpop.f32.mrf.mxu1 }
0x1502   : > { %v4089_v31 = vadd.f32 %v4088_v13, %v4065_v38 }
0x1504   : > { %v4106_v49 = vmul.f32 %v4099_v46, %v4089_v31 }
0x1506   : > { %v4120_v24 = vadd.f32 %v4113_v57, %v4106_v49 }
0x1507   : > { %v4091_v37 = vpop.f32.mrf.mxu3 }
0x1508   : > { %v4122_v10 = vmul.f32 1.442695, %v4120_v24 }
0x1509   : > { %v4068_v62 = vpop.f32.mrf.mxu1 }
0x150a   : > { %5954 = vpow2.f32 %v4122_v10  ;;  %v4092_v63 = vadd.f32 %v4091_v37, %v4068_v62 }
0x150c   : > { %v4107_v27 = vmul.f32 %v4104_v30, %v4092_v63 }
0x150e   : > { %v4121_v3 = vadd.f32 %v4118_v44, %v4107_v27 }
0x1510   : > { %v5955_v16 = vpop.eup %5954  ;;  %v4124_v61 = vmul.f32 1.442695, %v4121_v3 }
0x1511   : > { %v4126_v4 = vadd.f32 1.0, %v5955_v16 }
0x1512   : > { %5956 = vpow2.f32 %v4124_v61 }
0x1513   : > { %5958 = vlog2.f32 %v4126_v4 }
0x1518   : > { %v5957_v60 = vpop.eup %5956 }
0x1519   : > { %v5959_v5 = vpop.eup %5958  ;;  %v4127_v53 = vadd.f32 1.0, %v5957_v60 }
0x151a   : > { %v4129_v54 = vmul.f32 0.6931472, %v5959_v5 }
0x151b   : > { %5960 = vlog2.f32 %v4127_v53 }
0x151c   : > { %5962 = vtanh.f32 %v4129_v54 }
0x1521   : > { %v5961_v33 = vpop.eup %5960 }
0x1522   : > { %v5963_v2 = vpop.eup %5962  ;;  %v4131_v1 = vmul.f32 0.6931472, %v5961_v33 }
0x1523   : > { %v4134_v43 = vmul.f32 %v5963_v2, %v4120_v24 }
0x1524   : > { %5964 = vtanh.f32 %v4131_v1 }
0x1525   : > { %5682 = vmatmul.msk.f32.vlgmr.msrb.gmra.mxu0 %vm1274_vm13, %v4134_v43 }
0x152a   : > { %v5965_v48 = vpop.eup %5964 }
0x152b   : > { %v4135_v32 = vmul.f32 %v5965_v48, %v4121_v3 }
0x152d   : > { %5683 = vmatmul.msk.f32.gmra.mxu0 %vm1274_vm13, %v4135_v32  ;;  %vm8472_vm13 = vmmov %vm8470_vm0 }
0x15a2   : > { %v4161_v39 = vpop.f32.mrf.mxu0 }
0x15a3   : > { %4239 = vst.msk [vmem:[#allocation3 + $0x60] sm:$0xff] %vm2106_vm4, %v4161_v39  ;;  %4169 = vrot.lane.b32.xlu0 %v4161_v39, %s8446_s18 }
0x15aa   : > { %v4164_v35 = vpop.f32.mrf.mxu0 }
0x15ab   : > { %4240 = vst.msk [vmem:[#allocation3 + $0x70] sm:$0xf] %vm8469_vm7, %v4164_v35  ;;  %4171 = vrot.lane.b32.xlu1 %v4164_v35, %s8446_s18  ;;  %vm8489_vm7 = vmmov %vm8487_vm1 }
0x1615   : > { %v4170_v6 = vpop.permute.xlu0 %4169 }
0x1616   : > { %4175 = vst.msk [vmem:[#allocation2] sm:$0xff] %vm8470_vm0, %v4170_v6 }
0x161d   : > { %v7472_v0 = vld [vmem:[#allocation2] sm:$0xff]  ;;  %v4172_v7 = vpop.permute.xlu1 %4171 }
0x161e   : > { %4176 = vst.msk [vmem:[#allocation2 + $0x18] sm:$0xf] %vm8471_vm11, %v4172_v7  ;;  %v4291_v47 = vmul.f32 %v7472_v0, %v6687_v8  ;;  %v4260_v26 = vmul.f32 %v7472_v0, %v6689_v9  ;;  %v4243_v51 = vmul.f32 %v7472_v0, %v6708_v52  ;;  %v4274_v34 = vmul.f32 %v7472_v0, %v6700_v25 }
0x161f   : > { %4303 = vst.msk [vmem:[#allocation2] sm:$0xff] %vm8472_vm13, %v6788_v42  ;;  %v4224_v58 = vmul.f32 %v7472_v0, %v6717_v55  ;;  %vm8498_vm13 = vcmask 138240  }
0x1620   : > { %4295 = vrot.lane.b32.xlu0 %v4291_v47, %s8473_s26  ;;  %4264 = vrot.lane.b32.xlu2 %v4260_v26, %s8474_s0  ;;  %v4247_v41 = vrot.slane %v4243_v51, 4  ;;  %v4278_v36 = vrot.slane %v4274_v34, 4 }
0x1621   : > { %v4228_v18 = vrot.slane %v4224_v58, 4 }
0x1622   : > { %4250 = vrot.lane.b32.xlu1 %v4247_v41, %s8456_s2 }
0x1625   : > { %v7490_v19 = vld [vmem:[#allocation2 + $0x18] sm:$0xf] }
0x1626   : > { %v4192_v13 = vld [vmem:[#allocation2 + $0x18] sm:$0xf]  ;;  %v7498_v57 = vld [vmem:[#allocation2] sm:$0xff] }
0x1627   : > { %v4223_v38 = vld [vmem:[#allocation2 + $0x18] sm:$0xf]  ;;  %v4407_v24 = vmul.f32 %v7498_v57, %v6700_v25  ;;  %v4324_v37 = vmul.f32 %v7498_v57, %v6731_v59  ;;  %v4376_v62 = vmul.f32 %v7498_v57, %v6708_v52  ;;  %v4307_v27 = vmul.f32 %v7498_v57, %v6734_v12 }
0x1628   : > { %v4242_v42 = vld [vmem:[#allocation2 + $0x18] sm:$0xf]  ;;  %4281 = vrot.lane.b32.xlu0 %v4278_v36, %s8475_s1  ;;  %4231 = vrot.lane.b32.xlu2 %v4228_v18, %s8440_s23  ;;  %v4390_v3 = vmul.f32 %v7498_v57, %v6689_v9  ;;  %v4225_v32 = vmul.f32 %v4223_v38, %v6717_v55  ;;  %v4194_v51 = vmul.f32 %v4192_v13, %v6731_v59 }
0x1629   : > { %v4273_v31 = vld [vmem:[#allocation2 + $0x18] sm:$0xf]  ;;  %v4311_v16 = vrot.slane %v4307_v27, 4  ;;  %v4244_v4 = vmul.f32 %v4242_v42, %v6708_v52 }
0x162a   : > { %v4290_v46 = vld [vmem:[#allocation2 + $0x18] sm:$0xf]  ;;  %v4394_v60 = vrot.slane %v4390_v3, 4  ;;  %v4275_v5 = vmul.f32 %v4273_v31, %v6700_v25  ;;  %v4229_v6 = vrot.slane %v4225_v32, 4  ;;  %v4198_v34 = vrot.slane %v4194_v51, 4 }
0x162b   : > { %v4209_v15 = vld [vmem:[#allocation2 + $0x18] sm:$0xf]  ;;  %v4292_v49 = vmul.f32 %v4290_v46, %v6687_v8  ;;  %v4248_v53 = vrot.slane %v4244_v4, 4 }
0x162c   : > { %v4259_v56 = vld [vmem:[#allocation2 + $0x18] sm:$0xf]  ;;  %v4211_v10 = vmul.f32 %v4209_v15, %v6714_v40  ;;  %v4279_v2 = vrot.slane %v4275_v5, 4  ;;  %v4230_v47 = vsel %vm2120_vm9, %v4228_v18, %v4229_v6  ;;  %v4210_v18 = vmul.f32 %v7472_v0, %v6714_v40 }
0x162d   : > { %4304 = vst.msk [vmem:[#allocation2 + $0x18] sm:$0xf] %vm8476_vm14, %v6783_v14  ;;  %4297 = vrot.lane.b32.xlu1 %v4292_v49, %s8473_s26  ;;  %v4421_v14 = vmul.f32 %v7498_v57, %v6687_v8  ;;  %v4261_v63 = vmul.f32 %v4259_v56, %v6689_v9  ;;  %v4249_v48 = vsel %vm2120_vm9, %v4247_v41, %v4248_v53  ;;  %vm8499_vm14 = vmmov %vm8498_vm13 }
0x162e   : > { %v4355_v56 = vmul.f32 %v7498_v57, %v6717_v55 }
0x162f   : > { %v4425_v30 = vrot.slane %v4421_v14, 4 }
0x1630   : > { %4411 = vrot.lane.b32.xlu0 %v4407_v24, %s8475_s1  ;;  %4328 = vrot.lane.b32.xlu2 %v4324_v37, %s8477_s3  ;;  %v4338_v37 = vmul.f32 %v7498_v57, %v6714_v40 }
0x1634   : > { %v4406_v44 = vld [vmem:[#allocation2 + $0x18] sm:$0xf] }
0x1635   : > { %4216 = vrot.lane.b32.xlu1 %v4211_v10, %s8478_s5  ;;  %v4408_v61 = vmul.f32 %v4406_v44, %v6700_v25  ;;  %v4375_v54 = vld [vmem:[#allocation2 + $0x18] sm:$0xf]  ;;  %v4280_v25 = vsel %vm2120_vm9, %v4278_v36, %v4279_v2  ;;  %v4342_v10 = vrot.slane %v4338_v37, 4  ;;  %v8490_v37 = vrot.slane %v6540_v11, 4 }
0x1636   : > { %v4306_v33 = vld [vmem:[#allocation2 + $0x18] sm:$0xf]  ;;  %v4377_v1 = vmul.f32 %v4375_v54, %v6708_v52 }
0x1637   : > { %v4420_v43 = vld [vmem:[#allocation2 + $0x18] sm:$0xf]  ;;  %v4308_v39 = vmul.f32 %v4306_v33, %v6734_v12 }
0x1638   : > { %4380 = vrot.lane.b32.xlu0 %v4376_v62, %s8456_s2  ;;  %4266 = vrot.lane.b32.xlu2 %v4261_v63, %s8474_s0  ;;  %v4422_v35 = vmul.f32 %v4420_v43, %v6687_v8  ;;  %v4193_v8 = vmul.f32 %v7472_v0, %v6731_v59  ;;  %v4389_v58 = vld [vmem:[#allocation2 + $0x18] sm:$0xf]  ;;  %v4179_v62 = vmul.f32 %v7472_v0, %v6734_v12 }
0x1639   : > { %v4312_v7 = vrot.slane %v4308_v39, 4  ;;  %v4354_v38 = vld [vmem:[#allocation2 + $0x18] sm:$0xf]  ;;  %v4391_v42 = vmul.f32 %v4389_v58, %v6689_v9  ;;  %v4180_v9 = vmul.f32 %v7490_v19, %v6734_v12 }
0x163a   : > { %v4426_v52 = vrot.slane %v4422_v35, 4  ;;  %v4197_v36 = vrot.slane %v4193_v8, 4  ;;  %v4356_v31 = vmul.f32 %v4354_v38, %v6717_v55  ;;  %v4337_v15 = vld [vmem:[#allocation2 + $0x18] sm:$0xf] }
0x163b   : > { %v4313_v26 = vsel %vm2120_vm9, %v4311_v16, %v4312_v7  ;;  %v4395_v46 = vrot.slane %v4391_v42, 4  ;;  %v4339_v24 = vmul.f32 %v4337_v15, %v6714_v40  ;;  %v4323_v19 = vld [vmem:[#allocation2 + $0x18] sm:$0xf] }
0x163c   : > { %v4427_v41 = vsel %vm2120_vm9, %v4425_v30, %v4426_v52  ;;  %v4199_v13 = vsel %vm2120_vm9, %v4197_v36, %v4198_v34  ;;  %v4325_v40 = vmul.f32 %v4323_v19, %v6731_v59 }
0x163d   : > { %4428 = vrot.lane.b32.xlu1 %v4425_v30, %s8473_s26  ;;  %v4396_v49 = vsel %vm2120_vm9, %v4394_v60, %v4395_v46  ;;  %v4343_v55 = vrot.slane %v4339_v24, 4 }
0x163f   : > { %v4344_v14 = vsel %vm2120_vm9, %v4342_v10, %v4343_v55 }
0x1640   : > { %4314 = vrot.lane.b32.xlu2 %v4311_v16, %s8479_s6  ;;  %4413 = vrot.lane.b32.xlu0 %v4408_v61, %s8475_s1 }
0x1645   : > { %4397 = vrot.lane.b32.xlu1 %v4394_v60, %s8474_s0 }
0x1648   : > { %4252 = vrot.lane.b32.xlu2 %v4249_v48, %s8456_s2  ;;  %4382 = vrot.lane.b32.xlu0 %v4377_v1, %s8456_s2 }
0x164d   : > { %4283 = vrot.lane.b32.xlu1 %v4280_v25, %s8475_s1  ;;  %s8481_s1 = sld [smem:[#allocation24_spill]] }
0x1650   : > { %4233 = vrot.lane.b32.xlu2 %v4230_v47, %s8440_s23  ;;  %4316 = vrot.lane.b32.xlu0 %v4313_v26, %s8479_s6 }
0x1653   : > { %v4533_v63 = vld [vmem:[%s8481_s1] sm:$0xff]  ;;  %v4534_v27 = vld [vmem:[%s8481_s1 + $0x8] sm:$0xf]  ;;  %s8535_s1 = smov 126  }
0x1655   : > { %4430 = vrot.lane.b32.xlu1 %v4427_v41, %s8473_s26  ;;  %s8480_s26 = sld [smem:[#allocation23_spill]] }
0x1658   : > { %4202 = vrot.lane.b32.xlu2 %v4199_v13, %s8477_s3  ;;  %4214 = vrot.lane.b32.xlu0 %v4210_v18, %s8478_s5 }
0x165b   : > { %v4519_v57 = vld [vmem:[%s8480_s26] sm:$0xff]  ;;  %v4520_v30 = vld [vmem:[%s8480_s26 + $0x8] sm:$0xf] }
0x165d   : > { %4361 = vrot.lane.b32.xlu1 %v4356_v31, %s8440_s23 }
0x1660   : > { %4399 = vrot.lane.b32.xlu2 %v4396_v49, %s8474_s0  ;;  %4359 = vrot.lane.b32.xlu0 %v4355_v56, %s8440_s23  ;;  %s8525_s0 = smov 95  }
0x1665   : > { %4185 = vrot.lane.b32.xlu1 %v4180_v9, %s8479_s6 }
0x1668   : > { %4200 = vrot.lane.b32.xlu2 %v4197_v36, %s8477_s3  ;;  %4347 = vrot.lane.b32.xlu0 %v4344_v14, %s8478_s5 }
0x166d   : > { %4183 = vrot.lane.b32.xlu1 %v4179_v62, %s8479_s6  ;;  %v4446_v62 = vld [vmem:[#allocation3 + $0x60] sm:$0xff]  ;;  %s8496_s6 = smov 94  }
0x1670   : > { %4330 = vrot.lane.b32.xlu2 %v4325_v40, %s8477_s3  ;;  %4345 = vrot.lane.b32.xlu0 %v4342_v10, %s8478_s5  ;;  %s8491_s5 = sld [smem:[#allocation22_spill]]  ;;  %s8515_s3 = smov 127  }
0x1675   : > { %4523 = vperm.xlu1 %5811, %v4519_v57  }
0x1678   : > { %4537 = vperm.xlu2 %5812, %v4533_v63   ;;  %4528 = vperm.xlu0 %5810, %v4520_v30  }
0x167a   : > { %v4265_v44 = vpop.permute.xlu2 %4264 }
0x167b   : > { %4270 = vst.msk [vmem:[#allocation3 + $0x90] sm:$0xff] %vm2106_vm4, %v4265_v44 }
0x167d   : > { %4542 = vperm.xlu1 %5811, %v4534_v27  }
0x1682   : > { %v4232_v12 = vpop.permute.xlu2 %4231  ;;  %v4449_v24 = vld [vmem:[#allocation3 + $0x90] sm:$0xff] }
0x1683   : > { %4237 = vst.msk [vmem:[#allocation3 + $0x40] sm:$0xf0] %vm2130_vm12, %v4232_v12  ;;  %v4436_v12 = vld [vmem:[%s8491_s5] sm:$0xff] }
0x168a   : > { %v4329_v0 = vpop.permute.xlu2 %4328 }
0x168b   : > { %4334 = vst.msk [vmem:[#allocation3 + $0xf0] sm:$0xff] %vm2106_vm4, %v4329_v0 }
0x1692   : > { %v4296_v59 = vpop.permute.xlu0 %4295  ;;  %v4267_v3 = vpop.permute.xlu2 %4266  ;;  %v4455_v16 = vld [vmem:[#allocation3 + $0xf0] sm:$0xff] }
0x1693   : > { %4301 = vst.msk [vmem:[#allocation3 + $0xc0] sm:$0xff] %vm2106_vm4, %v4296_v59  ;;  %4473 = vmatpush.msra.mxu2 %v4455_v16  ;;  %v4437_v59 = vld [vmem:[%s8491_s5 + $0x8] sm:$0xff]  ;;  %v4438_v16 = vld [vmem:[%s8491_s5 + $0x10] sm:$0xf] }
0x1694   : > { %4271 = vst.msk [vmem:[#allocation3 + $0xa0] sm:$0xf] %vm8482_vm6, %v4267_v3  ;;  %v4251_v61 = vpop.permute.xlu1 %4250  ;;  %vm8507_vm6 = vmmov %vm8498_vm13 }
0x1695   : > { %4256 = vst.msk [vmem:[#allocation3 + $0x70] sm:$0xf0] %vm2130_vm12, %v4251_v61  ;;  %v4439_v61 = vld [vmem:[%s8491_s5 + $0x18] sm:$0xf] }
0x169a   : > { %v4282_v4 = vpop.permute.xlu0 %4281  ;;  %v4315_v60 = vpop.permute.xlu2 %4314  ;;  %v4452_v38 = vld [vmem:[#allocation3 + $0xc0] sm:$0xff] }
0x169b   : > { %4287 = vst.msk [vmem:[#allocation3 + $0xa0] sm:$0xf0] %vm2130_vm12, %v4282_v4 }
0x169c   : > { %4320 = vst.msk [vmem:[#allocation3 + $0xd0] sm:$0xf0] %vm2130_vm12, %v4315_v60  ;;  %v4447_v10 = vld [vmem:[#allocation3 + $0x70] sm:$0xff]  ;;  %v4575_v60 = vld [vmem:[%s6274_s30 + $0x70] sm:$0xff] }
0x169d   : > { %4591 = vmatpush.msra.mxu0 %v4575_v60 }
0x169f   : > { %v4298_v5 = vpop.permute.xlu1 %4297 }
0x16a0   : > { %4302 = vst.msk [vmem:[#allocation3 + $0xd0] sm:$0xf] %vm8483_vm2, %v4298_v5  ;;  %v4576_v5 = vld [vmem:[%s6274_s30 + $0x78] sm:$0xff]  ;;  %vm8508_vm2 = vcmask 1043592  }
0x16a1   : > { %4614 = vmatpush.msrb.mxu1 %v4576_v5 }
0x16a2   : > { %v4412_v53 = vpop.permute.xlu0 %4411  ;;  %v4253_v54 = vpop.permute.xlu2 %4252  ;;  %v4450_v46 = vld [vmem:[#allocation3 + $0xa0] sm:$0xff] }
0x16a3   : > { %4417 = vst.msk [vmem:[#allocation3 + $0x180] sm:$0xff] %vm2106_vm4, %v4412_v53  ;;  %v4573_v53 = vld [vmem:[%s6274_s30 + $0x60] sm:$0xff] }
0x16a4   : > { %4257 = vst.msk [vmem:[#allocation3 + $0x80] sm:$0xff] %vm2106_vm4, %v4253_v54  ;;  %v4574_v54 = vld [vmem:[%s6274_s30 + $0x68] sm:$0xff]  ;;  %4592 = vmatpush.msra.mxu0 %v4573_v53 }
0x16a5   : > { %4615 = vmatpush.msrb.mxu1 %v4574_v54 }
0x16a7   : > { %v4217_v33 = vpop.permute.xlu1 %4216  ;;  %v4453_v58 = vld [vmem:[#allocation3 + $0xd0] sm:$0xff] }
0x16a8   : > { %4221 = vst.msk [vmem:[#allocation3 + $0x40] sm:$0xf] %vm8484_vm3, %v4217_v33  ;;  %vm8513_vm3 = vmmov %vm8507_vm6 }
0x16aa   : > { %v4381_v2 = vpop.permute.xlu0 %4380  ;;  %v4234_v1 = vpop.permute.xlu2 %4233  ;;  %v4464_v18 = vld [vmem:[#allocation3 + $0x180] sm:$0xff] }
0x16ab   : > { %4386 = vst.msk [vmem:[#allocation3 + $0x150] sm:$0xff] %vm2106_vm4, %v4381_v2  ;;  %v4448_v55 = vld [vmem:[#allocation3 + $0x80] sm:$0xff] }
0x16ac   : > { %4238 = vst.msk [vmem:[#allocation3 + $0x50] sm:$0xff] %vm2106_vm4, %v4234_v1  ;;  %v4571_v1 = vld [vmem:[%s6274_s30 + $0x50] sm:$0xff] }
0x16ad   : > { %4593 = vmatpush.msra.mxu0 %v4571_v1 }
0x16af   : > { %v4429_v43 = vpop.permute.xlu1 %4428  ;;  %v4444_v57 = vld [vmem:[#allocation3 + $0x40] sm:$0xff] }
0x16b0   : > { %4434 = vst.msk [vmem:[#allocation3 + $0x190] sm:$0xf0] %vm2130_vm12, %v4429_v43  ;;  %v4572_v43 = vld [vmem:[%s6274_s30 + $0x58] sm:$0xff] }
0x16b1   : > { %4616 = vmatpush.msrb.mxu1 %v4572_v43 }
0x16b2   : > { %v4203_v48 = vpop.permute.xlu2 %4202  ;;  %v4414_v32 = vpop.permute.xlu0 %4413  ;;  %v4461_v9 = vld [vmem:[#allocation3 + $0x150] sm:$0xff] }
0x16b3   : > { %4207 = vst.msk [vmem:[#allocation3 + $0x20] sm:$0xff] %vm2106_vm4, %v4203_v48  ;;  %v4445_v11 = vld [vmem:[#allocation3 + $0x50] sm:$0xff] }
0x16b4   : > { %4418 = vst.msk [vmem:[#allocation3 + $0x190] sm:$0xf] %vm8485_vm8, %v4414_v32  ;;  %v4569_v32 = vld [vmem:[%s6274_s30 + $0x40] sm:$0xff]  ;;  %vm8528_vm8 = vmmov %vm8508_vm2 }
0x16b5   : > { %4594 = vmatpush.msra.mxu0 %v4569_v32 }
0x16b7   : > { %v4398_v39 = vpop.permute.xlu1 %4397 }
0x16b8   : > { %4403 = vst.msk [vmem:[#allocation3 + $0x160] sm:$0xf0] %vm2130_vm12, %v4398_v39  ;;  %v4570_v39 = vld [vmem:[%s6274_s30 + $0x48] sm:$0xff] }
0x16b9   : > { %4617 = vmatpush.msrb.mxu1 %v4570_v39  ;;  %v8501_v39 = vld [vmem:[#allocation36_spill] sm:$0xff] }
0x16ba   : > { %v4400_v25 = vpop.permute.xlu2 %4399  ;;  %v4383_v35 = vpop.permute.xlu0 %4382  ;;  %v4442_v27 = vld [vmem:[#allocation3 + $0x20] sm:$0xff] }
0x16bb   : > { %4404 = vst.msk [vmem:[#allocation3 + $0x170] sm:$0xff] %vm2106_vm4, %v4400_v25  ;;  %v4465_v36 = vld [vmem:[#allocation3 + $0x190] sm:$0xff] }
0x16bc   : > { %4387 = vst.msk [vmem:[#allocation3 + $0x160] sm:$0xf] %vm8486_vm10, %v4383_v35  ;;  %v4567_v35 = vld [vmem:[%s6274_s30 + $0x30] sm:$0xff]  ;;  %vm8551_vm10 = vcmask 785408  }
0x16bd   : > { %4595 = vmatpush.msra.mxu0 %v4567_v35  ;;  %v8502_v35 = vld [vmem:[#allocation39_spill] sm:$0xff] }
0x16bf   : > { %v4284_v6 = vpop.permute.xlu1 %4283 }
0x16c0   : > { %4288 = vst.msk [vmem:[#allocation3 + $0xb0] sm:$0xff] %vm2106_vm4, %v4284_v6  ;;  %v4568_v6 = vld [vmem:[%s6274_s30 + $0x38] sm:$0xff] }
0x16c1   : > { %4618 = vmatpush.msrb.mxu1 %v4568_v6 }
0x16c2   : > { %v4201_v7 = vpop.permute.xlu2 %4200  ;;  %v4317_v52 = vpop.permute.xlu0 %4316  ;;  %v4463_v31 = vld [vmem:[#allocation3 + $0x170] sm:$0xff] }
0x16c3   : > { %4206 = vst.msk [vmem:[#allocation3 + $0x10] sm:$0xf0] %vm2130_vm12, %v4201_v7  ;;  %v4462_v56 = vld [vmem:[#allocation3 + $0x160] sm:$0xff] }
0x16c4   : > { %4321 = vst.msk [vmem:[#allocation3 + $0xe0] sm:$0xff] %vm2106_vm4, %v4317_v52 }
0x16c7   : > { %v4431_v47 = vpop.permute.xlu1 %4430  ;;  %v4451_v13 = vld [vmem:[#allocation3 + $0xb0] sm:$0xff] }
0x16c8   : > { %4435 = vst.msk [vmem:[#allocation3 + $0x1a0] sm:$0xff] %vm2106_vm4, %v4431_v47  ;;  %v4565_v47 = vld [vmem:[%s6274_s30 + $0x20] sm:$0xff] }
0x16c9   : > { %4596 = vmatpush.msra.mxu0 %v4565_v47 }
0x16ca   : > { %v4331_v26 = vpop.permute.xlu2 %4330  ;;  %v4215_v51 = vpop.permute.xlu0 %4214 }
0x16cb   : > { %4335 = vst.msk [vmem:[#allocation3 + $0x100] sm:$0xf] %vm8487_vm1, %v4331_v26  ;;  %v4454_v41 = vld [vmem:[#allocation3 + $0xe0] sm:$0xff]  ;;  %v4566_v26 = vld [vmem:[%s6274_s30 + $0x28] sm:$0xff]  ;;  %vm8554_vm1 = vcmask 769024  }
0x16cc   : > { %4220 = vst.msk [vmem:[#allocation3 + $0x30] sm:$0xff] %vm2106_vm4, %v4215_v51  ;;  %4474 = vmatpush.msra.mxu2 %v4454_v41  ;;  %4619 = vmatpush.msrb.mxu1 %v4566_v26 }
0x16ce   : > { %4475 = vmatpush.msra.mxu2 %v4453_v58 }
0x16cf   : > { %v4362_v8 = vpop.permute.xlu1 %4361  ;;  %v4466_v34 = vld [vmem:[#allocation3 + $0x1a0] sm:$0xff] }
0x16d0   : > { %4366 = vst.msk [vmem:[#allocation3 + $0x130] sm:$0xf] %vm8488_vm15, %v4362_v8  ;;  %4501 = vmatpush.msrb.mxu3 %v4466_v34  ;;  %4476 = vmatpush.msra.mxu2 %v4452_v38  ;;  %v4563_v8 = vld [vmem:[%s6274_s30 + $0x10] sm:$0xff]  ;;  %v4564_v34 = vld [vmem:[%s6274_s30 + $0x18] sm:$0xff]  ;;  %v4561_v38 = vld [vmem:[%s6274_s30] sm:$0xff] }
0x16d1   : > { %4597 = vmatpush.msra.mxu0 %v4563_v8  ;;  %4620 = vmatpush.msrb.mxu1 %v4564_v34  ;;  %v8505_v8 = vld [vmem:[#allocation33_spill] sm:$0xff]  ;;  %vm8555_vm15 = vmmov %vm8554_vm1 }
0x16d2   : > { %4502 = vmatpush.msrb.mxu3 %v4465_v36  ;;  %4477 = vmatpush.msra.mxu2 %v4451_v13  ;;  %v4360_v42 = vpop.permute.xlu0 %4359  ;;  %v4538_v7 = vpop.permute.xlu2 %4537 }
0x16d3   : > { %4365 = vst.msk [vmem:[#allocation3 + $0x120] sm:$0xff] %vm2106_vm4, %v4360_v42  ;;  %v4443_v63 = vld [vmem:[#allocation3 + $0x30] sm:$0xff]  ;;  %4598 = vmatpush.msra.mxu0 %v4561_v38 }
0x16d4   : > { %4503 = vmatpush.msrb.mxu3 %v4464_v18  ;;  %4478 = vmatpush.msra.mxu2 %v4450_v46  ;;  %v4562_v18 = vld [vmem:[%s6274_s30 + $0x8] sm:$0xff] }
0x16d5   : > { %4621 = vmatpush.msrb.mxu1 %v4562_v18 }
0x16d6   : > { %4504 = vmatpush.msrb.mxu3 %v4463_v31  ;;  %4479 = vmatpush.msra.mxu2 %v4449_v24 }
0x16d7   : > { %v4186_v15 = vpop.permute.xlu1 %4185  ;;  %v4459_v49 = vld [vmem:[#allocation3 + $0x130] sm:$0xff] }
0x16d8   : > { %4190 = vst.msk [vmem:[#allocation3 + $0x10] sm:$0xf] %vm8489_vm7, %v4186_v15  ;;  %4505 = vmatpush.msrb.mxu3 %v4462_v56  ;;  %4480 = vmatpush.msra.mxu2 %v4448_v55  ;;  %vm8556_vm7 = vmmov %vm8551_vm10 }
0x16d9   : > { %5178 = vst [vmem:[#allocation3 + $0x130] sm:$0xf0] %v8490_v37 }
0x16da   : > { %4506 = vmatpush.msrb.mxu3 %v4461_v9  ;;  %4481 = vmatpush.msra.mxu2 %v4447_v10  ;;  %v4348_v14 = vpop.permute.xlu0 %4347  ;;  %v4458_v40 = vld [vmem:[#allocation3 + $0x120] sm:$0xff] }
0x16db   : > { %4352 = vst.msk [vmem:[#allocation3 + $0x110] sm:$0xff] %vm2106_vm4, %v4348_v14 }
0x16dc   : > { %4507 = vmatpush.msrb.mxu3 %v7090_v21  ;;  %4482 = vmatpush.msra.mxu2 %v4446_v62 }
0x16de   : > { %4508 = vmatpush.msrb.mxu3 %v4459_v49  ;;  %4483 = vmatpush.msra.mxu2 %v4445_v11 }
0x16df   : > { %v4184_v19 = vpop.permute.xlu1 %4183  ;;  %v4441_v44 = vld [vmem:[#allocation3 + $0x10] sm:$0xff] }
0x16e0   : > { %4189 = vst.msk [vmem:[#allocation3] sm:$0xff] %vm2106_vm4, %v4184_v19  ;;  %4509 = vmatpush.msrb.mxu3 %v4458_v40  ;;  %4484 = vmatpush.msra.mxu2 %v4444_v57 }
0x16e2   : > { %4485 = vmatpush.msra.mxu2 %v4443_v63  ;;  %v4346_v21 = vpop.permute.xlu0 %4345  ;;  %v4457_v30 = vld [vmem:[#allocation3 + $0x110] sm:$0xff] }
0x16e3   : > { %4351 = vst.msk [vmem:[#allocation3 + $0x100] sm:$0xf0] %vm2130_vm12, %v4346_v21  ;;  %4510 = vmatpush.msrb.mxu3 %v4457_v30  ;;  %vm8492_vm12 = vcmask 1047688  }
0x16e4   : > { %4486 = vmatpush.msra.mxu2 %v4442_v27  ;;  %vm8495_vm0 = vmmov %vm8492_vm12 }
0x16e6   : > { %4487 = vmatpush.msra.mxu2 %v4441_v44 }
0x16e7   : > { %v4440_v0 = vld [vmem:[#allocation3] sm:$0xff]  ;;  %v4524_v48 = vpop.permute.xlu1 %4523 }
0x16e8   : > { %4488 = vmatpush.msra.mxu2 %v4440_v0 }
0x16e9   : > { %4489 = vmatmul.f32.vlgmr.msra.gmra.mxu2 %v4436_v12 }
0x16ea   : > { %v4456_v3 = vld [vmem:[#allocation3 + $0x100] sm:$0xff]  ;;  %v4529_v13 = vpop.permute.xlu0 %4528 }
0x16eb   : > { %4511 = vmatpush.msrb.mxu3 %v4456_v3 }
0x16ec   : > { %5684 = vmatmul.msk.f32.vlgmr.msrb.gmra.mxu3 %vm3614_vm5, %v4437_v59 }
0x16ef   : > { %v4543_v31 = vpop.permute.xlu1 %4542 }
0x16f1   : > { %4492 = vmatmul.f32.gmra.mxu2 %v4438_v16 }
0x16f4   : > { %5685 = vmatmul.msk.f32.gmra.mxu3 %vm3614_vm5, %v4439_v61 }
0x176c   : > { %v4490_v4 = vpop.f32.mrf.mxu2 }
0x176f   : > { %v4513_v33 = vpop.f32.mrf.mxu3 }
0x1770   : > { %v4514_v2 = vadd.f32 %v4513_v33, %v4490_v4 }
0x1772   : > { %v4531_v25 = vmul.f32 %v4524_v48, %v4514_v2 }
0x1774   : > { %v4545_v52 = vadd.f32 %v4538_v7, %v4531_v25  ;;  %v4493_v51 = vpop.f32.mrf.mxu2  ;;  %v8503_v7 = vld [vmem:[#allocation43_spill] sm:$0xff] }
0x1776   : > { %v4547_v41 = vmul.f32 1.442695, %v4545_v52 }
0x1777   : > { %v4516_v58 = vpop.f32.mrf.mxu3 }
0x1778   : > { %5966 = vpow2.f32 %v4547_v41  ;;  %v4517_v36 = vadd.f32 %v4516_v58, %v4493_v51  ;;  %v8504_v51 = vld [vmem:[#allocation37_spill] sm:$0xff]  ;;  %v8506_v58 = vld [vmem:[#allocation35_spill] sm:$0xff] }
0x177a   : > { %v4532_v42 = vmul.f32 %v4529_v13, %v4517_v36  ;;  %v8509_v13 = vld [vmem:[#allocation29_spill] sm:$0xff] }
0x177c   : > { %v4546_v46 = vadd.f32 %v4543_v31, %v4532_v42  ;;  %v8510_v31 = vld [vmem:[#allocation32_spill] sm:$0xff] }
0x177e   : > { %v5967_v15 = vpop.eup %5966  ;;  %v4549_v56 = vmul.f32 1.442695, %v4546_v46 }
0x177f   : > { %v4551_v49 = vadd.f32 1.0, %v5967_v15 }
0x1780   : > { %5968 = vpow2.f32 %v4549_v56 }
0x1781   : > { %5970 = vlog2.f32 %v4551_v49 }
0x1786   : > { %v5969_v24 = vpop.eup %5968 }
0x1787   : > { %v5971_v9 = vpop.eup %5970  ;;  %v4552_v37 = vadd.f32 1.0, %v5969_v24 }
0x1788   : > { %v4554_v55 = vmul.f32 0.6931472, %v5971_v9 }
0x1789   : > { %5972 = vlog2.f32 %v4552_v37 }
0x178a   : > { %5974 = vtanh.f32 %v4554_v55  ;;  %v8511_v55 = vld [vmem:[#allocation46_spill] sm:$0xff] }
0x178f   : > { %v5973_v10 = vpop.eup %5972 }
0x1790   : > { %v5975_v14 = vpop.eup %5974  ;;  %v4556_v62 = vmul.f32 0.6931472, %v5973_v10 }
0x1791   : > { %v4559_v19 = vmul.f32 %v5975_v14, %v4545_v52  ;;  %v8512_v14 = vld [vmem:[#allocation50_spill] sm:$0xff] }
0x1792   : > { %5976 = vtanh.f32 %v4556_v62 }
0x1793   : > { %5686 = vmatmul.msk.f32.vlgmr.msra.gmra.mxu0 %vm2106_vm4, %v4559_v19  ;;  %5688 = vmatmul.msk.f32.vlgmr.msrb.gmra.mxu1 %vm2106_vm4, %v4559_v19 }
0x1798   : > { %v5977_v40 = vpop.eup %5976 }
0x1799   : > { %v4560_v11 = vmul.f32 %v5977_v40, %v4546_v46 }
0x179b   : > { %5687 = vmatmul.msk.f32.gmra.mxu0 %vm2106_vm4, %v4560_v11  ;;  %5689 = vmatmul.msk.f32.gmra.mxu1 %vm2106_vm4, %v4560_v11  ;;  %vm8494_vm4 = vcmask 134144  }
0x179c   : > { %vm8497_vm11 = vmmov %vm8494_vm4 }
0x1810   : > { %v4600_v57 = vpop.f32.mrf.mxu0  ;;  %v4623_v63 = vpop.f32.mrf.mxu1 }
0x1811   : > { %4811 = vst [vmem:[#allocation3 + $0x60] sm:$0xff] %v4600_v57  ;;  %4635 = vrot.lane.b32.xlu0 %v4623_v63, %s8446_s18  ;;  %4633 = vrot.lane.b32.xlu2 %v4600_v57, %s8446_s18 }
0x1812   : > { %4812 = vst [vmem:[#allocation3 + $0x68] sm:$0xff] %v4623_v63  ;;  %v8514_v63 = vld [vmem:[#allocation42_spill] sm:$0xff] }
0x1818   : > { %v4603_v21 = vpop.f32.mrf.mxu0  ;;  %v4626_v30 = vpop.f32.mrf.mxu1 }
0x1819   : > { %4813 = vst [vmem:[#allocation3 + $0x70] sm:$0xf] %v4603_v21  ;;  %4639 = vrot.lane.b32.xlu2 %v4626_v30, %s8446_s18  ;;  %4637 = vrot.lane.b32.xlu1 %v4603_v21, %s8446_s18  ;;  %s8500_s18 = smov 96  }
0x181a   : > { %4814 = vst [vmem:[#allocation3 + $0x78] sm:$0xf] %v4626_v30 }
0x186b   : > { %v4634_v27 = vpop.permute.xlu2 %4633 }
0x186c   : > { %4649 = vst.msk [vmem:[#allocation2] sm:$0xff] %vm8492_vm12, %v4634_v27  ;;  %vm8557_vm12 = vcmask 900096  }
0x1873   : > { %v7642_v44 = vld [vmem:[#allocation2] sm:$0xff]  ;;  %v4640_v12 = vpop.permute.xlu2 %4639 }
0x1874   : > { %8493 = vst [vmem:[#allocation53_spill] sm:$0xff] %v7642_v44  ;;  %v4965_v0 = vmul.f32 %v7642_v44, %v6339_v45  ;;  %v4659_v59 = vmul.f32 %v7642_v44, %v6311_v17  ;;  %v7682_v25 = vmul.f32 %v8501_v39, %v7642_v44  ;;  %v7690_v41 = vmul.f32 %v8504_v51, %v7642_v44 }
0x1875   : > { %4654 = vst.msk [vmem:[#allocation2 + $0x28] sm:$0xf] %vm8494_vm4, %v4640_v12  ;;  %v7694_v34 = vmul.f32 %v8505_v8, %v7642_v44  ;;  %v7698_v36 = vmul.f32 %v8506_v58, %v7642_v44  ;;  %vm8559_vm4 = vcmask 1031168  }
0x1876   : > { %5001 = vst.msk [vmem:[#allocation2] sm:$0xff] %vm8495_vm0, %v6564_v29  ;;  %4977 = vrot.lane.b32.xlu2 %v4965_v0, %s8496_s6  ;;  %vm8560_vm0 = vcmask 916480  }
0x1877   : > { %4663 = vst [vmem:[#allocation3] sm:$0xff] %v4659_v59 }
0x187c   : > { %v7652_v3 = vld [vmem:[#allocation2 + $0x28] sm:$0xf] }
0x187d   : > { %v7654_v16 = vld [vmem:[#allocation2 + $0x28] sm:$0xf]  ;;  %v7658_v4 = vld [vmem:[#allocation2] sm:$0xff] }
0x187e   : > { %v7656_v61 = vld [vmem:[#allocation2 + $0x28] sm:$0xf]  ;;  %v7664_v29 = vmul.f32 %v7658_v4, %v6311_v17 }
0x187f   : > { %v4913_v60 = vld [vmem:[#allocation2 + $0x28] sm:$0xf] }
0x1880   : > { %v4820_v5 = vld [vmem:[#allocation2 + $0x28] sm:$0xf]  ;;  %v8377_v33 = vrot.slane %v7664_v29, 4  ;;  %v4919_v48 = vmul.f32 %v6388_v28, %v4913_v60 }
0x1881   : > { %v4765_v53 = vld [vmem:[#allocation2 + $0x28] sm:$0xf]  ;;  %v4826_v32 = vmul.f32 %v6373_v20, %v4820_v5 }
0x1882   : > { %v4672_v54 = vld [vmem:[#allocation2 + $0x28] sm:$0xf]  ;;  %5029 = vst [vmem:[#allocation3 + $0xd0] sm:$0xf0] %v8377_v33  ;;  %v4771_v6 = vmul.f32 %v8502_v35, %v4765_v53  ;;  %v4933_v38 = vrot.slane %v4919_v48, 4  ;;  %v4926_v53 = vrot.slane %v7694_v34, 4 }
0x1883   : > { %5006 = vst.msk [vmem:[#allocation2 + $0x28] sm:$0xf] %vm8497_vm11, %v6595_v50  ;;  %v4636_v2 = vpop.permute.xlu0 %4635  ;;  %v4678_v52 = vmul.f32 %v8503_v7, %v4672_v54  ;;  %v4840_v9 = vrot.slane %v4826_v32, 4  ;;  %v8520_v48 = vld [vmem:[#allocation34_spill] sm:$0xff]  ;;  %vm8561_vm11 = vmmov %vm8557_vm12 }
0x1884   : > { %v7670_v1 = vsel %vm8498_vm13, %v4634_v27, %v4636_v2  ;;  %4651 = vst.msk [vmem:[#allocation2 + $0x10] sm:$0xff] %vm8499_vm14, %v4636_v2  ;;  %v4785_v62 = vrot.slane %v4771_v6, 4  ;;  %v8521_v6 = vld [vmem:[#allocation30_spill] sm:$0xff]  ;;  %vm8562_vm13 = vcmask 1039360  }
0x1885   : > { %v4660_v43 = vmul.f32 %v7670_v1, %v6315_v22  ;;  %v4873_v50 = vmul.f32 %v7670_v1, %v6380_v23  ;;  %v7722_v10 = vmul.f32 %v7670_v1, %v8511_v55  ;;  %v4692_v19 = vrot.slane %v4678_v52, 4  ;;  %vm8563_vm14 = vmmov %vm8562_vm13 }
0x1886   : > { %v7730_v21 = vmul.f32 %v7670_v1, %v8514_v63  ;;  %v4966_v32 = vmul.f32 %v7670_v1, %v8520_v48  ;;  %v4872_v52 = vmul.f32 %v7642_v44, %v8521_v6 }
0x1887   : > { %4664 = vst [vmem:[#allocation3 + $0x8] sm:$0xff] %v4660_v43  ;;  %4886 = vrot.lane.b32.xlu2 %v4873_v50, %s8500_s18  ;;  %v8526_v43 = vld [vmem:[#allocation40_spill] sm:$0xff] }
0x1888   : > { %v4767_v54 = vmul.f32 %v7670_v1, %v8526_v43 }
0x188b   : > { %v4638_v47 = vpop.permute.xlu1 %4637  ;;  %v7686_v26 = vld [vmem:[#allocation2 + $0x10] sm:$0xff] }
0x188c   : > { %v4642_v18 = vsel %vm8507_vm6, %v4638_v47, %v4640_v12  ;;  %4652 = vst.msk [vmem:[#allocation2 + $0x18] sm:$0xf] %vm8508_vm2, %v4638_v47  ;;  %v4874_v42 = vmul.f32 %v7686_v26, %v8509_v13  ;;  %v4967_v46 = vmul.f32 %v7686_v26, %v8510_v31  ;;  %v4675_v15 = vmul.f32 %v8503_v7, %v7686_v26  ;;  %vm8564_vm6 = vmmov %vm8560_vm0 }
0x188d   : > { %4653 = vst [vmem:[#allocation2 + $0x20] sm:$0xf] %v4642_v18  ;;  %v4916_v56 = vmul.f32 %v6388_v28, %v7686_v26  ;;  %v7712_v49 = vmul.f32 %v6373_v20, %v7686_v26  ;;  %v7716_v24 = vmul.f32 %v8502_v35, %v7686_v26  ;;  %vm8565_vm2 = vcmask 777216  }
0x188e   : > { %4888 = vrot.lane.b32.xlu0 %v4874_v42, %s8500_s18  ;;  %4981 = vrot.lane.b32.xlu1 %v4967_v46, %s8496_s6  ;;  %v4687_v37 = vrot.slane %v4675_v15, 4  ;;  %5003 = vst.msk [vmem:[#allocation2 + $0x10] sm:$0xff] %vm8513_vm3, %v8512_v14  ;;  %v8522_v42 = vld [vmem:[#allocation41_spill] sm:$0xff]  ;;  %vm8566_vm3 = vmmov %vm8565_vm2 }
0x188f   : > { %v4928_v40 = vrot.slane %v4916_v56, 4  ;;  %v8376_v11 = vrot.slane %v7712_v49, 4  ;;  %v8375_v57 = vrot.slane %v7716_v24, 4  ;;  %v7768_v46 = vmul.f32 %v7670_v1, %v8522_v42 }
0x1890   : > { %4698 = vrot.lane.b32.xlu2 %v4687_v37, %s8515_s3  ;;  %v7734_v30 = vsel %vm2120_vm9, %v4687_v37, %v4692_v19  ;;  %v8524_v19 = vld [vmem:[#allocation45_spill] sm:$0xff] }
0x1891   : > { %8516 = vst [vmem:[#allocation36_spill] sm:$0xff] %v7734_v30  ;;  %v7737_v27 = vsel %vm2120_vm9, %v4928_v40, %v4933_v38  ;;  %v7742_v12 = vsel %vm2120_vm9, %v8376_v11, %v4840_v9  ;;  %v7747_v0 = vsel %vm2120_vm9, %v8375_v57, %v4785_v62  ;;  %v4834_v44 = vrot.slane %v7768_v46, 4 }
0x1892   : > { %8517 = vst [vmem:[#allocation39_spill] sm:$0xff] %v7737_v27  ;;  %v8530_v27 = vld [vmem:[#allocation52_spill] sm:$0xff] }
0x1893   : > { %8518 = vst [vmem:[#allocation43_spill] sm:$0xff] %v7742_v12  ;;  %v4657_v5 = vld [vmem:[#allocation2 + $0x18] sm:$0xf] }
0x1894   : > { %8519 = vst [vmem:[#allocation37_spill] sm:$0xff] %v7747_v0  ;;  %v4658_v50 = vld [vmem:[#allocation2 + $0x20] sm:$0xf]  ;;  %v7759_v47 = vld [vmem:[#allocation2 + $0x18] sm:$0xf]  ;;  %v4661_v33 = vmul.f32 %v4657_v5, %v6311_v17 }
0x1895   : > { %v7761_v38 = vld [vmem:[#allocation2 + $0x18] sm:$0xf]  ;;  %v4662_v34 = vmul.f32 %v4658_v50, %v6315_v22  ;;  %v7770_v15 = vld [vmem:[#allocation2 + $0x20] sm:$0xf]  ;;  %v4725_v50 = vmul.f32 %v7670_v1, %v8524_v19 }
0x1896   : > { %v7763_v18 = vld [vmem:[#allocation2 + $0x18] sm:$0xf]  ;;  %v7772_v56 = vld [vmem:[#allocation2 + $0x20] sm:$0xf]  ;;  %4979 = vrot.lane.b32.xlu0 %v4966_v32, %s8496_s6  ;;  %4884 = vrot.lane.b32.xlu1 %v4872_v52, %s8500_s18  ;;  %4665 = vst [vmem:[#allocation3 + $0x10] sm:$0xf] %v4661_v33 }
0x1897   : > { %v7774_v9 = vld [vmem:[#allocation2 + $0x20] sm:$0xf]  ;;  %v4670_v37 = vld [vmem:[#allocation2 + $0x18] sm:$0xf]  ;;  %4666 = vst [vmem:[#allocation3 + $0x18] sm:$0xf] %v4662_v34 }
0x1898   : > { %8523 = vst [vmem:[#allocation33_spill] sm:$0xff] %v7774_v9  ;;  %v4911_v14 = vld [vmem:[#allocation2 + $0x18] sm:$0xf]  ;;  %v4819_v57 = vld [vmem:[#allocation2 + $0x20] sm:$0xf]  ;;  %4939 = vrot.lane.b32.xlu2 %v4928_v40, %s8525_s0  ;;  %v4676_v32 = vmul.f32 %v8501_v39, %v4670_v37  ;;  %v8533_v33 = vrot.slane %v7690_v41, 4 }
0x1899   : > { %v4818_v62 = vld [vmem:[#allocation2 + $0x18] sm:$0xf]  ;;  %v4917_v52 = vmul.f32 %v8505_v8, %v4911_v14  ;;  %v4671_v2 = vld [vmem:[#allocation2 + $0x20] sm:$0xf]  ;;  %v4825_v30 = vmul.f32 %v4819_v57, %v8522_v42  ;;  %v8543_v41 = vrot.slane %v7712_v49, 4 }
0x189a   : > { %v4763_v11 = vld [vmem:[#allocation2 + $0x18] sm:$0xf]  ;;  %v4824_v60 = vmul.f32 %v8506_v58, %v4818_v62  ;;  %v4912_v34 = vld [vmem:[#allocation2 + $0x20] sm:$0xf]  ;;  %v4677_v1 = vmul.f32 %v4671_v2, %v8511_v55  ;;  %v4688_v14 = vrot.slane %v4676_v32, 4 }
0x189b   : > { %v4764_v59 = vld [vmem:[#allocation2 + $0x20] sm:$0xf]  ;;  %v4769_v5 = vmul.f32 %v8504_v51, %v4763_v11  ;;  %v8529_v40 = vld [vmem:[#allocation44_spill] sm:$0xff]  ;;  %v4929_v12 = vrot.slane %v4917_v52, 4  ;;  %v4838_v9 = vrot.slane %v4825_v30, 4  ;;  %v4918_v57 = vmul.f32 %v4912_v34, %v8514_v63 }
0x189c   : > { %v8527_v0 = vld [vmem:[#allocation49_spill] sm:$0xff]  ;;  %v4726_v37 = vmul.f32 %v7686_v26, %v8529_v40  ;;  %v4836_v62 = vrot.slane %v4824_v60, 4  ;;  %5005 = vst [vmem:[#allocation2 + $0x20] sm:$0xf] %v8530_v27  ;;  %v4690_v46 = vrot.slane %v4677_v1, 4  ;;  %v8531_v11 = vrot.slane %v7682_v25, 4 }
0x189d   : > { %5004 = vst.msk [vmem:[#allocation2 + $0x18] sm:$0xf] %vm8528_vm8, %v8527_v0  ;;  %v4781_v23 = vrot.slane %v4769_v5, 4  ;;  %v7803_v2 = vsel %vm2120_vm9, %v4926_v53, %v4929_v12  ;;  %v8532_v26 = vrot.slane %v7698_v36, 4  ;;  %v4770_v30 = vmul.f32 %v4764_v59, %v8526_v43  ;;  %vm8567_vm8 = vmmov %vm8562_vm13 }
0x189e   : > { %v7800_v0 = vsel %vm2120_vm9, %v8531_v11, %v4688_v14  ;;  %v7812_v27 = vsel %vm2120_vm9, %v4834_v44, %v4838_v9  ;;  %v8534_v52 = vrot.slane %v7722_v10, 4  ;;  %v4931_v34 = vrot.slane %v4918_v57, 4  ;;  %4738 = vrot.lane.b32.xlu0 %v4725_v50, %s8535_s1  ;;  %4740 = vrot.lane.b32.xlu1 %v4726_v37, %s8535_s1 }
0x189f   : > { %v7808_v60 = vsel %vm2120_vm9, %v8532_v26, %v4836_v62  ;;  %v7817_v32 = vsel %vm2120_vm9, %v8533_v33, %v4781_v23  ;;  %v4779_v5 = vrot.slane %v4767_v54, 4  ;;  %v4783_v59 = vrot.slane %v4770_v30, 4 }
0x18a0   : > { %v7822_v12 = vsel %vm2120_vm9, %v8534_v52, %v4690_v46  ;;  %v8536_v9 = vrot.slane %v7730_v21, 4  ;;  %4935 = vrot.lane.b32.xlu2 %v4926_v53, %s8525_s0  ;;  %v8537_v54 = vmov %v8531_v11  ;;  %v8538_v37 = vmov %v8533_v33 }
0x18a1   : > { %v7833_v23 = vsel %vm2120_vm9, %v4779_v5, %v4783_v59  ;;  %v8539_v53 = vmov %v8532_v26  ;;  %v8540_v26 = vrot.slane %v7664_v29, 4  ;;  %v8544_v36 = vmov %v8534_v52  ;;  %v7871_v52 = vld [vmem:[#allocation2 + $0x10] sm:$0xff] }
0x18a2   : > { %v7829_v1 = vsel %vm2120_vm9, %v8536_v9, %v4931_v34  ;;  %v8545_v29 = vrot.slane %v7716_v24, 4  ;;  %v8546_v33 = vmov %v8536_v9  ;;  %v5041_v49 = vmul.f32 %v8503_v7, %v7871_v52  ;;  %v8547_v59 = vld [vmem:[#allocation31_spill] sm:$0xff] }
0x18a3   : > { %v5010_v46 = vld [vmem:[#allocation2 + $0x20] sm:$0xf]  ;;  %v5039_v10 = vmul.f32 %v8501_v39, %v7658_v4  ;;  %v4877_v24 = vmul.f32 %v7652_v3, %v8509_v13  ;;  %v4968_v21 = vmul.f32 %v7759_v47, %v6339_v45  ;;  %v5281_v34 = vmul.f32 %v8505_v8, %v7658_v4 }
0x18a4   : > { %v5009_v14 = vld [vmem:[#allocation2 + $0x18] sm:$0xf]  ;;  %v5014_v50 = vmul.f32 %v5010_v46, %v6315_v22  ;;  %v8541_v22 = vld [vmem:[#allocation51_spill] sm:$0xff]  ;;  %v5134_v3 = vmul.f32 %v8502_v35, %v7871_v52  ;;  %v4875_v47 = vmul.f32 %v7761_v38, %v8521_v6  ;;  %v4727_v9 = vmul.f32 %v7763_v18, %v8547_v59 }
0x18a5   : > { %v5013_v62 = vmul.f32 %v5009_v14, %v6311_v17  ;;  %v8542_v25 = vrot.slane %v8541_v22, 4  ;;  %v5188_v14 = vmul.f32 %v8506_v58, %v7658_v4  ;;  %v4729_v46 = vmul.f32 %v7656_v61, %v8529_v40 }
0x18a6   : > { %4694 = vrot.lane.b32.xlu0 %v8537_v54, %s8515_s3  ;;  %4787 = vrot.lane.b32.xlu1 %v8538_v37, %s8440_s23  ;;  %v5023_v11 = vrot.slane %v5014_v50, 4  ;;  %v7911_v50 = vld [vmem:[#allocation2 + $0x8] sm:$0xff]  ;;  %v4969_v37 = vmul.f32 %v7770_v15, %v8520_v48  ;;  %v4728_v61 = vmul.f32 %v7772_v56, %v8524_v19 }
0x18a7   : > { %v5021_v57 = vrot.slane %v5013_v62, 4  ;;  %v5282_v38 = vmul.f32 %v7911_v50, %v8514_v63  ;;  %v5040_v18 = vmul.f32 %v7911_v50, %v8511_v55  ;;  %v5133_v15 = vmul.f32 %v7911_v50, %v8526_v43 }
0x18a8   : > { %4842 = vrot.lane.b32.xlu2 %v8539_v53, %s8456_s2  ;;  %v7855_v30 = vsel %vm2120_vm9, %v8542_v25, %v5023_v11  ;;  %v8549_v11 = vld [vmem:[#allocation33_spill] sm:$0xff]  ;;  %v5189_v25 = vmul.f32 %v7911_v50, %v8522_v42 }
0x18a9   : > { %v7849_v17 = vsel %vm2120_vm9, %v8540_v26, %v5021_v57  ;;  %v8548_v57 = vld [vmem:[#allocation38_spill] sm:$0xff]  ;;  %v7930_v26 = vmul.f32 %v7871_v52, %v8509_v13 }
0x18aa   : > { %5031 = vst [vmem:[#allocation3 + $0xe0] sm:$0xff] %v7849_v17  ;;  %v4876_v53 = vmul.f32 %v8549_v11, %v8548_v57 }
0x18ab   : > { %v5244_v56 = vrot.slane %v7930_v26, 4 }
0x18ae   : > { %4846 = vrot.lane.b32.xlu0 %v8543_v41, %s8456_s2  ;;  %4696 = vrot.lane.b32.xlu1 %v8544_v36, %s8515_s3  ;;  %v7946_v41 = vmul.f32 %v7658_v4, %v8521_v6 }
0x18b0   : > { %4844 = vrot.lane.b32.xlu2 %v4834_v44, %s8456_s2  ;;  %v4970_v44 = vmul.f32 %v7654_v16, %v8510_v31  ;;  %v5190_v16 = vmul.f32 %v6373_v20, %v7871_v52 }
0x18b6   : > { %4791 = vrot.lane.b32.xlu0 %v8545_v29, %s8440_s23  ;;  %4937 = vrot.lane.b32.xlu1 %v8546_v33, %s8525_s0  ;;  %v7953_v29 = vmul.f32 %v7871_v52, %v8510_v31  ;;  %v5242_v33 = vrot.slane %v7946_v41, 4 }
0x18b8   : > { %4789 = vrot.lane.b32.xlu2 %v4779_v5, %s8440_s23  ;;  %v5283_v5 = vmul.f32 %v6388_v28, %v7871_v52 }
0x18be   : > { %5055 = vrot.lane.b32.xlu0 %v5041_v49, %s8515_s3  ;;  %5051 = vrot.lane.b32.xlu1 %v5039_v10, %s8515_s3  ;;  %v5337_v49 = vrot.slane %v7953_v29, 4  ;;  %v7964_v10 = vmul.f32 %v7911_v50, %v8520_v48 }
0x18c0   : > { %4987 = vrot.lane.b32.xlu2 %v4970_v44, %s8496_s6 }
0x18c6   : > { %4894 = vrot.lane.b32.xlu0 %v4877_v24, %s8500_s18  ;;  %4983 = vrot.lane.b32.xlu1 %v4968_v21, %s8496_s6  ;;  %v7973_v24 = vmul.f32 %v7658_v4, %v6339_v45  ;;  %v5336_v21 = vrot.slane %v7964_v10, 4 }
0x18c8   : > { %5293 = vrot.lane.b32.xlu2 %v5281_v34, %s8525_s0  ;;  %v5335_v34 = vrot.slane %v7973_v24, 4  ;;  %v5038_v24 = vld [vmem:[#allocation2 + $0x28] sm:$0xf] }
0x18ce   : > { %5204 = vrot.lane.b32.xlu0 %v5190_v16, %s8456_s2  ;;  %5297 = vrot.lane.b32.xlu1 %v5283_v5, %s8525_s0 }
0x18d0   : > { %5148 = vrot.lane.b32.xlu2 %v5134_v3, %s8440_s23  ;;  %v4978_v62 = vpop.permute.xlu2 %4977 }
0x18d6   : > { %4890 = vrot.lane.b32.xlu1 %v4875_v47, %s8500_s18  ;;  %4742 = vrot.lane.b32.xlu0 %v4727_v9, %s8535_s1  ;;  %v7990_v9 = vmul.f32 %v7911_v50, %v8548_v57 }
0x18d8   : > { %5200 = vrot.lane.b32.xlu2 %v5188_v14, %s8456_s2  ;;  %v8552_v14 = vld [vmem:[#allocation43_spill] sm:$0xff] }
0x18de   : > { %4746 = vrot.lane.b32.xlu1 %v4729_v46, %s8535_s1  ;;  %5295 = vrot.lane.b32.xlu0 %v5282_v38, %s8525_s0  ;;  %v8553_v46 = vld [vmem:[#allocation37_spill] sm:$0xff]  ;;  %v5243_v38 = vrot.slane %v7990_v9, 4  ;;  %v5080_v9 = vld [vmem:[#allocation2 + $0x28] sm:$0xf] }
0x18e0   : > { %5053 = vrot.lane.b32.xlu2 %v5040_v18, %s8515_s3 }
0x18e1   : > { %v4887_v54 = vpop.permute.xlu2 %4886 }
0x18e6   : > { %4985 = vrot.lane.b32.xlu1 %v4969_v37, %s8496_s6  ;;  %4744 = vrot.lane.b32.xlu0 %v4728_v61, %s8535_s1 }
0x18e8   : > { %4892 = vrot.lane.b32.xlu2 %v4876_v53, %s8500_s18 }
0x18ea   : > { %v7933_v22 = vpop.permute.xlu2 %4698 }
0x18ee   : > { %5146 = vrot.lane.b32.xlu1 %v5133_v15, %s8440_s23  ;;  %5255 = vrot.lane.b32.xlu0 %v5244_v56, %s8500_s18 }
0x18f0   : > { %5202 = vrot.lane.b32.xlu2 %v5189_v25, %s8456_s2 }
0x18f2   : > { %v7949_v36 = vpop.permute.xlu2 %4939 }
0x18f6   : > { %5251 = vrot.lane.b32.xlu1 %v5242_v33, %s8500_s18  ;;  %4700 = vrot.lane.b32.xlu0 %v7800_v0, %s8515_s3  ;;  %v8550_v0 = vld [vmem:[#allocation39_spill] sm:$0xff] }
0x18f8   : > { %5348 = vrot.lane.b32.xlu2 %v5337_v49, %s8496_s6 }
0x18fa   : > { %v7969_v44 = vpop.permute.xlu2 %4935 }
0x18fe   : > { %5346 = vrot.lane.b32.xlu1 %v5336_v21, %s8496_s6  ;;  %4945 = vrot.lane.b32.xlu0 %v8550_v0, %s8525_s0 }
0x1900   : > { %v4889_v16 = vpop.permute.xlu0 %4888  ;;  %v4982_v5 = vpop.permute.xlu1 %4981  ;;  %5344 = vrot.lane.b32.xlu2 %v5335_v34, %s8496_s6 }
0x1901   : > { %v7986_v3 = vsel %vm8551_vm10, %v4887_v54, %v4889_v16  ;;  %vm8568_vm10 = vmmov %vm8567_vm8 }
0x1902   : > { %v4843_v47 = vpop.permute.xlu2 %4842 }
0x1906   : > { %4852 = vrot.lane.b32.xlu1 %v8552_v14, %s8456_s2  ;;  %4797 = vrot.lane.b32.xlu0 %v8553_v46, %s8440_s23  ;;  %v5280_v14 = vld [vmem:[#allocation2 + $0x28] sm:$0xf] }
0x1908   : > { %v4980_v18 = vpop.permute.xlu0 %4979  ;;  %v4885_v37 = vpop.permute.xlu1 %4884  ;;  %5253 = vrot.lane.b32.xlu2 %v5243_v38, %s8500_s18 }
0x1909   : > { %v8001_v61 = vsel %vm8554_vm1, %v4978_v62, %v4980_v18  ;;  %v8004_v11 = vsel %vm8555_vm15, %v4980_v18, %v4982_v5  ;;  %v8007_v53 = vsel %vm8556_vm7, %v4885_v37, %v4887_v54  ;;  %v8558_v62 = vld [vmem:[#allocation36_spill] sm:$0xff]  ;;  %v5286_v18 = vmul.f32 %v6388_v28, %v5280_v14  ;;  %vm8569_vm1 = vmmov %vm8556_vm7 }
0x190a   : > { %4997 = vst [vmem:[#allocation3 + $0xc0] sm:$0xff] %v8001_v61  ;;  %v4845_v15 = vpop.permute.xlu2 %4844  ;;  %vm8570_vm15 = vmmov %vm8569_vm1 }
0x190b   : > { %v4854_v25 = vsel %vm8557_vm12, %v4843_v47, %v4845_v15  ;;  %4904 = vst [vmem:[#allocation3 + $0x90] sm:$0xff] %v8007_v53  ;;  %vm8571_vm7 = vmmov %vm8561_vm11 }
0x190c   : > { %4862 = vst [vmem:[#allocation3 + $0x70] sm:$0xf0] %v4854_v25  ;;  %vm8572_vm12 = vmmov %vm8571_vm7 }
0x190e   : > { %4941 = vrot.lane.b32.xlu1 %v7803_v2, %s8525_s0  ;;  %4704 = vrot.lane.b32.xlu0 %v8558_v62, %s8515_s3  ;;  %v5185_v62 = vld [vmem:[#allocation2 + $0x18] sm:$0xf] }
0x1910   : > { %v8016_v0 = vpop.permute.xlu0 %4738  ;;  %v4741_v16 = vpop.permute.xlu1 %4740  ;;  %4793 = vrot.lane.b32.xlu2 %v7817_v32, %s8440_s23 }
0x1911   : > { %v8022_v54 = vsel %vm8559_vm4, %v8016_v0, %v4741_v16  ;;  %v5187_v16 = vld [vmem:[#allocation2 + $0x28] sm:$0xf]  ;;  %vm8573_vm4 = vmmov %vm8565_vm2 }
0x1912   : > { %4757 = vst [vmem:[#allocation3 + $0x38] sm:$0xff] %v8022_v54  ;;  %v4790_v5 = vpop.permute.xlu2 %4789 }
0x1916   : > { %4848 = vrot.lane.b32.xlu1 %v7808_v60, %s8456_s2  ;;  %4850 = vrot.lane.b32.xlu0 %v7812_v27, %s8456_s2 }
0x1918   : > { %v4695_v2 = vpop.permute.xlu0 %4694  ;;  %v4788_v47 = vpop.permute.xlu1 %4787  ;;  %4943 = vrot.lane.b32.xlu2 %v7829_v1, %s8525_s0 }
0x1919   : > { %v4799_v32 = vsel %vm8560_vm0, %v4788_v47, %v4790_v5  ;;  %v5279_v47 = vld [vmem:[#allocation2 + $0x20] sm:$0xf]  ;;  %vm8574_vm0 = vmmov %vm8565_vm2 }
0x191a   : > { %4807 = vst [vmem:[#allocation3 + $0x40] sm:$0xf0] %v4799_v32  ;;  %v8032_v46 = vpop.permute.xlu2 %4987  ;;  %v5193_v32 = vmul.f32 %v6373_v20, %v5187_v16  ;;  %v5186_v20 = vld [vmem:[#allocation2 + $0x20] sm:$0xf] }
0x191b   : > { %v5130_v16 = vld [vmem:[#allocation2 + $0x20] sm:$0xf] }
0x191e   : > { %5303 = vrot.lane.b32.xlu0 %v5286_v18, %s8525_s0  ;;  %4702 = vrot.lane.b32.xlu1 %v7822_v12, %s8515_s3  ;;  %v5191_v12 = vmul.f32 %v8506_v58, %v5185_v62  ;;  %v5278_v18 = vld [vmem:[#allocation2 + $0x18] sm:$0xf]  ;;  %v5131_v62 = vld [vmem:[#allocation2 + $0x28] sm:$0xf] }
0x1920   : > { %v4847_v60 = vpop.permute.xlu0 %4846  ;;  %v4697_v27 = vpop.permute.xlu1 %4696  ;;  %4795 = vrot.lane.b32.xlu2 %v7833_v23, %s8440_s23  ;;  %v5285_v23 = vmul.f32 %v5279_v47, %v8514_v63  ;;  %v5284_v63 = vmul.f32 %v8505_v8, %v5278_v18  ;;  %v5320_v18 = vld [vmem:[#allocation2 + $0x18] sm:$0xf] }
0x1921   : > { %v4855_v1 = vsel %vm8561_vm11, %v4845_v15, %v4847_v60  ;;  %v4706_v37 = vsel %vm8562_vm13, %v4695_v2, %v4697_v27  ;;  %v4707_v25 = vsel %vm8563_vm14, %v4697_v27, %v7933_v22  ;;  %v5037_v27 = vld [vmem:[#allocation2 + $0x20] sm:$0xf]  ;;  %vm8576_vm11 = vcmask 1031168  }
0x1922   : > { %4863 = vst [vmem:[#allocation3 + $0x78] sm:$0xf0] %v4855_v1  ;;  %v8044_v28 = vpop.permute.xlu2 %5293  ;;  %v5192_v1 = vmul.f32 %v5186_v20, %v8522_v42  ;;  %v5137_v42 = vmul.f32 %v8502_v35, %v5131_v62  ;;  %v5321_v20 = vld [vmem:[#allocation2 + $0x20] sm:$0xf]  ;;  %vm8577_vm13 = vmmov %vm8576_vm11  ;;  %vm8578_vm14 = vcmask 769024  }
0x1923   : > { %4714 = vst [vmem:[#allocation3 + $0x10] sm:$0xf0] %v4706_v37  ;;  %v5227_v37 = vld [vmem:[#allocation2 + $0x18] sm:$0xf] }
0x1924   : > { %4715 = vst [vmem:[#allocation3 + $0x18] sm:$0xf0] %v4707_v25 }
0x1926   : > { %5206 = vrot.lane.b32.xlu0 %v5191_v12, %s8456_s2  ;;  %5210 = vrot.lane.b32.xlu1 %v5193_v32, %s8456_s2  ;;  %v5322_v12 = vld [vmem:[#allocation2 + $0x28] sm:$0xf]  ;;  %v5136_v32 = vmul.f32 %v5130_v16, %v8526_v43  ;;  %v5044_v16 = vmul.f32 %v8503_v7, %v5038_v24 }
0x1928   : > { %v4792_v15 = vpop.permute.xlu0 %4791  ;;  %v4938_v22 = vpop.permute.xlu1 %4937  ;;  %5301 = vrot.lane.b32.xlu2 %v5285_v23, %s8525_s0  ;;  %v5229_v23 = vld [vmem:[#allocation2 + $0x28] sm:$0xf] }
0x1929   : > { %v4800_v2 = vsel %vm8564_vm6, %v4790_v5, %v4792_v15  ;;  %v4947_v14 = vsel %vm8565_vm2, %v7969_v44, %v4938_v22  ;;  %v4948_v58 = vsel %vm8566_vm3, %v4938_v22, %v7949_v36  ;;  %v5043_v44 = vmul.f32 %v5037_v27, %v8511_v55  ;;  %v5228_v15 = vld [vmem:[#allocation2 + $0x20] sm:$0xf]  ;;  %vm8579_vm6 = vmmov %vm8578_vm14 }
0x192a   : > { %4808 = vst [vmem:[#allocation3 + $0x48] sm:$0xf0] %v4800_v2  ;;  %v8057_v60 = vpop.permute.xlu2 %5148  ;;  %v5233_v36 = vmul.f32 %v5227_v37, %v8521_v6  ;;  %v5328_v55 = vmul.f32 %v5322_v12, %v8510_v31  ;;  %v5235_v6 = vmul.f32 %v5229_v23, %v8509_v13  ;;  %v5234_v2 = vmul.f32 %v5228_v15, %v8548_v57  ;;  %v5079_v15 = vld [vmem:[#allocation2 + $0x20] sm:$0xf]  ;;  %vm8581_vm3 = vmmov %vm8569_vm1 }
0x192b   : > { %4955 = vst [vmem:[#allocation3 + $0xa0] sm:$0xf0] %v4947_v14  ;;  %v5132_v12 = vmul.f32 %v8504_v51, %v7658_v4  ;;  %vm8580_vm2 = vcmask 916480  }
0x192c   : > { %4956 = vst [vmem:[#allocation3 + $0xa8] sm:$0xf0] %v4948_v58  ;;  %v5245_v8 = vrot.slane %v5233_v36, 4  ;;  %v5342_v43 = vrot.slane %v5328_v55, 4  ;;  %v5249_v27 = vrot.slane %v5235_v6, 4  ;;  %v5086_v36 = vmul.f32 %v5080_v9, %v8529_v40 }
0x192d   : > { %v5081_v55 = vmul.f32 %v7658_v4, %v8547_v59 }
0x192e   : > { %5299 = vrot.lane.b32.xlu1 %v5284_v63, %s8525_s0  ;;  %5208 = vrot.lane.b32.xlu0 %v5192_v1, %s8456_s2  ;;  %v5246_v22 = vsel %vm2120_vm9, %v5242_v33, %v5245_v8  ;;  %v5247_v63 = vrot.slane %v5234_v2, 4  ;;  %v5343_v57 = vsel %vm2120_vm9, %v5337_v49, %v5342_v43  ;;  %v5250_v41 = vsel %vm2120_vm9, %v5244_v56, %v5249_v27  ;;  %s8582_s2 = sld [smem:[#allocation26_spill]] }
0x192f   : > { %v5326_v33 = vmul.f32 %v5320_v18, %v6339_v45  ;;  %v5327_v1 = vmul.f32 %v5321_v20, %v8520_v48  ;;  %v5083_v48 = vmul.f32 %v7871_v52, %v8529_v40  ;;  %v5100_v62 = vrot.slane %v5086_v36, 4  ;;  %v5129_v20 = vld [vmem:[#allocation2 + $0x18] sm:$0xf] }
0x1930   : > { %v5056_v5 = vpop.permute.xlu0 %5055  ;;  %v5052_v25 = vpop.permute.xlu1 %5051  ;;  %5059 = vrot.lane.b32.xlu2 %v5043_v44, %s8515_s3  ;;  %v5248_v37 = vsel %vm2120_vm9, %v5243_v38, %v5247_v63  ;;  %v5085_v2 = vmul.f32 %v5079_v15, %v8524_v19  ;;  %v5135_v63 = vmul.f32 %v8504_v51, %v5129_v20 }
0x1931   : > { %v5338_v56 = vrot.slane %v5326_v33, 4  ;;  %v5340_v45 = vrot.slane %v5327_v1, 4  ;;  %v5095_v38 = vrot.slane %v5083_v48, 4  ;;  %v5036_v1 = vld [vmem:[#allocation2 + $0x18] sm:$0xf] }
0x1932   : > { %v5201_v47 = vpop.permute.xlu2 %5200  ;;  %v5098_v27 = vrot.slane %v5085_v2, 4  ;;  %v5382_v2 = vld [vmem:[#allocation3 + $0x68] sm:$0xff] }
0x1933   : > { %v5101_v40 = vsel %vm2120_vm9, %v5095_v38, %v5100_v62 }
0x1934   : > { %v5518_v9 = vld [vmem:[%s8582_s2] sm:$0x7] }
0x1936   : > { %5154 = vrot.lane.b32.xlu1 %v5137_v42, %s8440_s23  ;;  %5152 = vrot.lane.b32.xlu0 %v5136_v32, %s8440_s23 }
0x1938   : > { %v4895_v14 = vpop.permute.xlu0 %4894  ;;  %v8076_v35 = vpop.permute.xlu1 %4983  ;;  %5257 = vrot.lane.b32.xlu2 %v5246_v22, %s8500_s18  ;;  %v8575_v22 = vld [vmem:[#allocation53_spill] sm:$0xff] }
0x193a   : > { %v5054_v58 = vpop.permute.xlu2 %5053 }
0x193b   : > { %v5063_v31 = vsel %vm8567_vm8, %v5052_v25, %v5054_v58  ;;  %v5064_v13 = vsel %vm8568_vm10, %v5054_v58, %v5056_v5  ;;  %vm8584_vm8 = vmmov %vm8569_vm1 }
0x193c   : > { %5071 = vst [vmem:[#allocation3 + $0xf0] sm:$0xff] %v5063_v31  ;;  %5430 = vmatpush.msrb.mxu0 %v5063_v31  ;;  %5470 = vmatpush.msrb.mxu2 %v5064_v13  ;;  %v5078_v13 = vld [vmem:[#allocation2 + $0x18] sm:$0xf]  ;;  %vm8585_vm10 = vmmov %vm8579_vm6 }
0x193e   : > { %5354 = vrot.lane.b32.xlu1 %v5343_v57, %s8496_s6  ;;  %5261 = vrot.lane.b32.xlu0 %v5250_v41, %s8500_s18 }
0x193f   : > { %5431 = vmatpush.msrb.mxu0 %v7849_v17  ;;  %5471 = vmatpush.msrb.mxu2 %v7855_v30  ;;  %v5339_v17 = vsel %vm2120_vm9, %v5335_v34, %v5338_v56  ;;  %v5341_v30 = vsel %vm2120_vm9, %v5336_v21, %v5340_v45 }
0x1940   : > { %v5205_v29 = vpop.permute.xlu0 %5204  ;;  %v5298_v26 = vpop.permute.xlu1 %5297  ;;  %5259 = vrot.lane.b32.xlu2 %v5248_v37, %s8500_s18 }
0x1942   : > { %v4893_v49 = vpop.permute.xlu2 %4892 }
0x1943   : > { %v4899_v44 = vsel %vm8569_vm1, %v4893_v49, %v4895_v14  ;;  %vm8586_vm1 = vmmov %vm8579_vm6 }
0x1944   : > { %4907 = vst [vmem:[#allocation3 + $0xa8] sm:$0xf] %v4899_v44 }
0x1946   : > { %5350 = vrot.lane.b32.xlu1 %v5339_v17, %s8496_s6  ;;  %5352 = vrot.lane.b32.xlu0 %v5341_v30, %s8496_s6 }
0x1948   : > { %v4743_v52 = vpop.permute.xlu0 %4742  ;;  %v4891_v5 = vpop.permute.xlu1 %4890  ;;  %5106 = vrot.lane.b32.xlu2 %v5095_v38, %s8535_s1 }
0x1949   : > { %v4898_v25 = vsel %vm8570_vm15, %v4891_v5, %v4893_v49  ;;  %vm8587_vm15 = vmmov %vm8574_vm0 }
0x194a   : > { %4906 = vst [vmem:[#allocation3 + $0xa0] sm:$0xf] %v4898_v25  ;;  %v5203_v34 = vpop.permute.xlu2 %5202 }
0x194b   : > { %v8112_v10 = vsel %vm8571_vm7, %v5201_v47, %v5203_v34  ;;  %v8115_v21 = vsel %vm8572_vm12, %v5203_v34, %v5205_v29  ;;  %v5082_v47 = vmul.f32 %v7911_v50, %v8524_v19  ;;  %v4724_v50 = vmul.f32 %v8575_v22, %v8547_v59  ;;  %vm8588_vm7 = vmmov %vm8580_vm2  ;;  %v5384_v22 = vld [vmem:[#allocation3 + $0x78] sm:$0xff] }
0x194c   : > { %5220 = vst [vmem:[#allocation3 + $0x150] sm:$0xff] %v8112_v10  ;;  %vm8589_vm12 = vmmov %vm8580_vm2 }
0x194d   : > { %v5094_v6 = vrot.slane %v5082_v47, 4 }
0x194e   : > { %5112 = vrot.lane.b32.xlu1 %v5101_v40, %s8535_s1  ;;  %5061 = vrot.lane.b32.xlu0 %v5044_v16, %s8515_s3 }
0x194f   : > { %v5099_v57 = vsel %vm2120_vm9, %v5094_v6, %v5098_v27  ;;  %v5372_v27 = vld [vmem:[#allocation3 + $0x18] sm:$0xff] }
0x1950   : > { %v5296_v8 = vpop.permute.xlu0 %5295  ;;  %v4747_v42 = vpop.permute.xlu1 %4746  ;;  %5144 = vrot.lane.b32.xlu2 %v5132_v12, %s8440_s23 }
0x1951   : > { %v8129_v7 = vsel %vm8573_vm4, %v8044_v28, %v5296_v8  ;;  %v8132_v32 = vsel %vm8574_vm0, %v5296_v8, %v5298_v26  ;;  %v5093_v28 = vrot.slane %v5081_v55, 4  ;;  %vm8590_vm4 = vmmov %vm8574_vm0  ;;  %vm8591_vm0 = vcmask 900096  }
0x1952   : > { %5313 = vst [vmem:[#allocation3 + $0x180] sm:$0xff] %v8129_v7  ;;  %v5349_v23 = vpop.permute.xlu2 %5348 }
0x1956   : > { %5104 = vrot.lane.b32.xlu1 %v5094_v6, %s8535_s1  ;;  %4736 = vrot.lane.b32.xlu0 %v4724_v50, %s8535_s1  ;;  %v5383_v6 = vld [vmem:[#allocation3 + $0x70] sm:$0xff]  ;;  %v5381_v50 = vld [vmem:[#allocation3 + $0x60] sm:$0xff] }
0x1958   : > { %v4745_v14 = vpop.permute.xlu0 %4744  ;;  %v4986_v43 = vpop.permute.xlu1 %4985  ;;  %5102 = vrot.lane.b32.xlu2 %v5093_v28, %s8535_s1 }
0x1959   : > { %v4750_v58 = vsel %vm8576_vm11, %v4743_v52, %v4745_v14  ;;  %v4751_v18 = vsel %vm8577_vm13, %v4745_v14, %v4747_v42  ;;  %v4991_v4 = vsel %vm8578_vm14, %v8076_v35, %v4986_v43  ;;  %v4992_v19 = vsel %vm8579_vm6, %v4986_v43, %v8032_v46  ;;  %v5390_v52 = vld [vmem:[#allocation3 + $0xa8] sm:$0xff]  ;;  %v5389_v42 = vld [vmem:[#allocation3 + $0xa0] sm:$0xff]  ;;  %vm8592_vm11 = vmmov %vm8591_vm0 }
0x195a   : > { %4758 = vst [vmem:[#allocation3 + $0x40] sm:$0xf] %v4750_v58  ;;  %v5345_v31 = vpop.permute.xlu2 %5344  ;;  %v5084_v35 = vmul.f32 %v5078_v13, %v8547_v59  ;;  %v5042_v59 = vmul.f32 %v8501_v39, %v5036_v1  ;;  %vm8593_vm13 = vmmov %vm8590_vm4  ;;  %vm8594_vm14 = vcmask 1039360   ;;  %v5370_v13 = vld [vmem:[#allocation3 + $0x8] sm:$0xff] }
0x195b   : > { %4759 = vst [vmem:[#allocation3 + $0x48] sm:$0xf] %v4751_v18  ;;  %vm8595_vm6 = vmmov %vm8594_vm14 }
0x195c   : > { %4999 = vst [vmem:[#allocation3 + $0xd0] sm:$0xf] %v4991_v4  ;;  %v5096_v37 = vrot.slane %v5084_v35, 4 }
0x195d   : > { %5000 = vst [vmem:[#allocation3 + $0xd8] sm:$0xf] %v4992_v19 }
0x195e   : > { %5150 = vrot.lane.b32.xlu1 %v5135_v63, %s8440_s23  ;;  %5110 = vrot.lane.b32.xlu0 %v5099_v57, %s8535_s1  ;;  %s8583_s23 = sld [smem:[#allocation25_spill]] }
0x1960   : > { %v5256_v41 = vpop.permute.xlu0 %5255  ;;  %v8154_v33 = vpop.permute.xlu1 %5146 }
0x1961   : > { %v8159_v46 = vsel %vm8580_vm2, %v8154_v33, %v8057_v60  ;;  %v5097_v60 = vsel %vm2120_vm9, %v5093_v28, %v5096_v37  ;;  %v5377_v18 = vld [vmem:[#allocation3 + $0x40] sm:$0xff]  ;;  %vm8596_vm2 = vmmov %vm8581_vm3 }
0x1962   : > { %v5254_v51 = vpop.permute.xlu2 %5253  ;;  %v5378_v4 = vld [vmem:[#allocation3 + $0x48] sm:$0xff] }
0x1963   : > { %v5395_v29 = vld [vmem:[#allocation3 + $0xd0] sm:$0xff]  ;;  %v5264_v26 = vsel %vm8581_vm3, %v5254_v51, %v5256_v41  ;;  %vm8597_vm3 = vmmov %vm8591_vm0 }
0x1964   : > { %5432 = vmatpush.msrb.mxu0 %v5395_v29  ;;  %v5396_v56 = vld [vmem:[#allocation3 + $0xd8] sm:$0xff]  ;;  %5272 = vst [vmem:[#allocation3 + $0x168] sm:$0xf0] %v5264_v26  ;;  %v5510_v39 = vld [vmem:[%s8583_s23] sm:$0x7] }
0x1965   : > { %5472 = vmatpush.msrb.mxu2 %v5396_v56 }
0x1966   : > { %5433 = vmatpush.msrb.mxu0 %v8001_v61  ;;  %5057 = vrot.lane.b32.xlu1 %v5042_v59, %s8515_s3 }
0x1967   : > { %5473 = vmatpush.msrb.mxu2 %v8004_v11  ;;  %5108 = vrot.lane.b32.xlu0 %v5097_v60, %s8535_s1  ;;  %s8614_s1 = sshll.u32 %s8617_s10, 3 }
0x1968   : > { %v4701_v45 = vpop.permute.xlu0 %4700  ;;  %v5252_v49 = vpop.permute.xlu1 %5251  ;;  %s1126_s6 = scalar_lea.vmem %s6279_s4, %s8614_s1 }
0x1969   : > { %v5263_v48 = vsel %vm8584_vm8, %v5252_v49, %v5254_v51  ;;  %vm8598_vm8 = vmmov %vm8591_vm0 }
0x196a   : > { %5271 = vst [vmem:[#allocation3 + $0x160] sm:$0xf0] %v5263_v48  ;;  %v4794_v44 = vpop.permute.xlu2 %4793 }
0x196e   : > { %5521 = vperm.xlu1 %5811, %v5518_v9  }
0x196f   : > { %5513 = vperm.xlu0 %5810, %v5510_v39  }
0x1970   : > { %v4946_v17 = vpop.permute.xlu0 %4945  ;;  %v5347_v61 = vpop.permute.xlu1 %5346 }
0x1971   : > { %v5356_v30 = vsel %vm8585_vm10, %v5345_v31, %v5347_v61  ;;  %v5357_v38 = vsel %vm8586_vm1, %v5347_v61, %v5349_v23  ;;  %vm8599_vm10 = vmmov %vm8590_vm4 }
0x1972   : > { %5364 = vst [vmem:[#allocation3 + $0x190] sm:$0xf0] %v5356_v30  ;;  %v4944_v11 = vpop.permute.xlu2 %4943  ;;  %vm8600_vm1 = vmmov %vm8588_vm7 }
0x1973   : > { %5365 = vst [vmem:[#allocation3 + $0x198] sm:$0xf0] %v5357_v38  ;;  %v4950_v36 = vsel %vm8587_vm15, %v4944_v11, %v4946_v17  ;;  %vm8601_vm15 = vmmov %vm8600_vm1 }
0x1974   : > { %5474 = vmatpush.msrb.mxu2 %v4950_v36 }
0x1976   : > { %5475 = vmatpush.msrb.mxu2 %v5390_v52 }
0x1978   : > { %v4798_v5 = vpop.permute.xlu0 %4797  ;;  %v4853_v25 = vpop.permute.xlu1 %4852  ;;  %5476 = vmatpush.msrb.mxu2 %v7986_v3 }
0x197a   : > { %v4796_v24 = vpop.permute.xlu2 %4795 }
0x197b   : > { %v4801_v34 = vsel %vm8588_vm7, %v4794_v44, %v4796_v24  ;;  %v4802_v62 = vsel %vm8589_vm12, %v4796_v24, %v4798_v5  ;;  %vm8602_vm7 = vmmov %vm8596_vm2  ;;  %vm8603_vm12 = vcmask 769024  }
0x197c   : > { %4809 = vst [vmem:[#allocation3 + $0x50] sm:$0xff] %v4801_v34 }
0x1980   : > { %v4705_v16 = vpop.permute.xlu0 %4704  ;;  %v4942_v40 = vpop.permute.xlu1 %4941 }
0x1981   : > { %v4949_v12 = vsel %vm8590_vm4, %v4942_v40, %v4944_v11  ;;  %vm8604_vm4 = vmmov %vm8603_vm12 }
0x1982   : > { %4957 = vst [vmem:[#allocation3 + $0xb0] sm:$0xff] %v4949_v12  ;;  %v5302_v8 = vpop.permute.xlu2 %5301  ;;  %5434 = vmatpush.msrb.mxu0 %v4949_v12 }
0x1984   : > { %5435 = vmatpush.msrb.mxu0 %v5389_v42  ;;  %v5991_v42 = vld [vmem:[#allocation3] sm:$0xff] }
0x1986   : > { %5436 = vmatpush.msrb.mxu0 %v8007_v53 }
0x1988   : > { %v4851_v47 = vpop.permute.xlu0 %4850  ;;  %v4849_v23 = vpop.permute.xlu1 %4848 }
0x1989   : > { %v4857_v3 = vsel %vm8591_vm0, %v4851_v47, %v4853_v25  ;;  %v4856_v15 = vsel %vm8592_vm11, %v4849_v23, %v4851_v47  ;;  %vm8605_vm0 = vmmov %vm8595_vm6  ;;  %v5410_v25 = vld [vmem:[#allocation3 + $0x148] sm:$0xff]  ;;  %vm8606_vm11 = vcmask 1031168   ;;  %v5426_v23 = vld.sshfl [vmem:[#allocation1 + $0x8] sm:$0xff pattern:$0x75316420] }
0x198a   : > { %v8181_v55 = vpop.permute.xlu2 %5059  ;;  %5437 = vmatpush.msrb.mxu0 %v4856_v15  ;;  %5477 = vmatpush.msrb.mxu2 %v4857_v3  ;;  %4864 = vst [vmem:[#allocation3 + $0x80] sm:$0xff] %v4856_v15 }
0x198c   : > { %5438 = vmatpush.msrb.mxu0 %v5383_v6  ;;  %5478 = vmatpush.msrb.mxu2 %v5384_v22 }
0x198e   : > { %5439 = vmatpush.msrb.mxu0 %v5381_v50  ;;  %5479 = vmatpush.msrb.mxu2 %v5382_v2 }
0x1990   : > { %v5304_v53 = vpop.permute.xlu0 %5303  ;;  %v4703_v28 = vpop.permute.xlu1 %4702  ;;  %5480 = vmatpush.msrb.mxu2 %v4802_v62  ;;  %5440 = vmatpush.msrb.mxu0 %v4801_v34 }
0x1991   : > { %v5308_v14 = vsel %vm8593_vm13, %v5302_v8, %v5304_v53  ;;  %v8185_v43 = vsel %vm8594_vm14, %v4701_v45, %v4703_v28  ;;  %v4709_v58 = vsel %vm8595_vm6, %v4703_v28, %v4705_v16  ;;  %vm8607_vm13 = vmmov %vm8606_vm11 }
0x1992   : > { %5316 = vst [vmem:[#allocation3 + $0x198] sm:$0xf] %v5308_v14  ;;  %v5258_v20 = vpop.permute.xlu2 %5257  ;;  %5441 = vmatpush.msrb.mxu0 %v5377_v18  ;;  %5481 = vmatpush.msrb.mxu2 %v5378_v4  ;;  %vm8608_vm14 = vmmov %vm8606_vm11 }
0x1993   : > { %4716 = vst [vmem:[#allocation3 + $0x20] sm:$0xff] %v8185_v43  ;;  %vm8609_vm6 = vmmov %vm8606_vm11 }
0x1994   : > { %4717 = vst [vmem:[#allocation3 + $0x28] sm:$0xff] %v4709_v58  ;;  %5482 = vmatpush.msrb.mxu2 %v8022_v54 }
0x1996   : > { %5483 = vmatpush.msrb.mxu2 %v4709_v58 }
0x1998   : > { %v5207_v19 = vpop.permute.xlu0 %5206  ;;  %v5211_v31 = vpop.permute.xlu1 %5210  ;;  %5484 = vmatpush.msrb.mxu2 %v5372_v27 }
0x1999   : > { %v5420_v30 = vld [vmem:[#allocation3 + $0x198] sm:$0xff] }
0x199a   : > { %v5260_v63 = vpop.permute.xlu2 %5259  ;;  %5485 = vmatpush.msrb.mxu2 %v5370_v13 }
0x199b   : > { %v5265_v57 = vsel %vm8596_vm2, %v5258_v20, %v5260_v63  ;;  %vm8610_vm2 = vmmov %vm8600_vm1 }
0x199c   : > { %5273 = vst [vmem:[#allocation3 + $0x170] sm:$0xff] %v5265_v57 }
0x19a0   : > { %v5209_v35 = vpop.permute.xlu0 %5208  ;;  %v5300_v41 = vpop.permute.xlu1 %5299 }
0x19a1   : > { %v5214_v1 = vsel %vm8597_vm3, %v5207_v19, %v5209_v35  ;;  %v5215_v37 = vsel %vm8598_vm8, %v5209_v35, %v5211_v31  ;;  %v5307_v51 = vsel %vm8599_vm10, %v5300_v41, %v5302_v8  ;;  %vm8611_vm3 = vmmov %vm8605_vm0 }
0x19a2   : > { %5222 = vst [vmem:[#allocation3 + $0x160] sm:$0xf] %v5214_v1  ;;  %v5107_v54 = vpop.permute.xlu2 %5106  ;;  %vm8612_vm8 = vmmov %vm8609_vm6 }
0x19a3   : > { %5223 = vst [vmem:[#allocation3 + $0x168] sm:$0xf] %v5215_v37 }
0x19a4   : > { %5315 = vst [vmem:[#allocation3 + $0x190] sm:$0xf] %v5307_v51 }
0x19a8   : > { %v8194_v29 = vpop.permute.xlu0 %5152  ;;  %v5155_v26 = vpop.permute.xlu1 %5154 }
0x19a9   : > { %v5159_v56 = vsel %vm8600_vm1, %v8194_v29, %v5155_v26  ;;  %v5413_v52 = vld [vmem:[#allocation3 + $0x160] sm:$0xff] }
0x19aa   : > { %5167 = vst [vmem:[#allocation3 + $0x138] sm:$0xf] %v5159_v56  ;;  %v5145_v59 = vpop.permute.xlu2 %5144  ;;  %v5414_v5 = vld [vmem:[#allocation3 + $0x168] sm:$0xff] }
0x19ab   : > { %v8200_v60 = vsel %vm8601_vm15, %v5145_v59, %v8154_v33  ;;  %v5419_v61 = vld [vmem:[#allocation3 + $0x190] sm:$0xff]  ;;  %v5425_v33 = vld.sshfl [vmem:[#allocation1] sm:$0xff pattern:$0x75316420] }
0x19ac   : > { %5164 = vst [vmem:[#allocation3 + $0x120] sm:$0xff] %v8200_v60  ;;  %5486 = vmatmul.f32.vlgmr.msrb.gmra.mxu2 %v5425_v33  ;;  %v8613_v59 = vld [vmem:[#allocation48_spill] sm:$0xff] }
0x19b0   : > { %v5262_v45 = vpop.permute.xlu0 %5261  ;;  %v5355_v49 = vpop.permute.xlu1 %5354 }
0x19b1   : > { %v5266_v48 = vsel %vm8602_vm7, %v5260_v63, %v5262_v45  ;;  %v5408_v24 = vld [vmem:[#allocation3 + $0x138] sm:$0xff] }
0x19b8   : > { %v5353_v44 = vpop.permute.xlu0 %5352  ;;  %v5351_v9 = vpop.permute.xlu1 %5350 }
0x19b9   : > { %v5359_v39 = vsel %vm8603_vm12, %v5353_v44, %v5355_v49  ;;  %v5358_v17 = vsel %vm8604_vm4, %v5351_v9, %v5353_v44  ;;  %v8615_v44 = vld [vmem:[#allocation47_spill] sm:$0xff] }
0x19ba   : > { %5455 = vmatpush.msra.mxu1 %v5358_v17  ;;  %5495 = vmatpush.msra.mxu3 %v5359_v39  ;;  %5366 = vst [vmem:[#allocation3 + $0x1a0] sm:$0xff] %v5358_v17 }
0x19bc   : > { %5456 = vmatpush.msra.mxu1 %v5419_v61  ;;  %5496 = vmatpush.msra.mxu3 %v5420_v30 }
0x19be   : > { %5457 = vmatpush.msra.mxu1 %v8129_v7  ;;  %5497 = vmatpush.msra.mxu3 %v8132_v32  ;;  %v5409_v7 = vld [vmem:[#allocation3 + $0x140] sm:$0xff]  ;;  %v5103_v32 = vpop.permute.xlu2 %5102 }
0x19c0   : > { %v5062_v38 = vpop.permute.xlu0 %5061  ;;  %v5113_v11 = vpop.permute.xlu1 %5112  ;;  %5458 = vmatpush.msra.mxu1 %v5265_v57  ;;  %5498 = vmatpush.msra.mxu3 %v5266_v48 }
0x19c1   : > { %v5066_v36 = vsel %vm8605_vm0, %v8181_v55, %v5062_v38 }
0x19c2   : > { %5074 = vst [vmem:[#allocation3 + $0x108] sm:$0xf] %v5066_v36  ;;  %5459 = vmatpush.msra.mxu1 %v5413_v52  ;;  %5499 = vmatpush.msra.mxu3 %v5414_v5 }
0x19c4   : > { %5460 = vmatpush.msra.mxu1 %v8112_v10  ;;  %5500 = vmatpush.msra.mxu3 %v8115_v21  ;;  %v5371_v10 = vld [vmem:[#allocation3 + $0x10] sm:$0xff] }
0x19c6   : > { %5461 = vmatpush.msra.mxu1 %v5409_v7  ;;  %5501 = vmatpush.msra.mxu3 %v5410_v25 }
0x19c8   : > { %v4737_v34 = vpop.permute.xlu0 %4736  ;;  %v5105_v62 = vpop.permute.xlu1 %5104  ;;  %5502 = vmatpush.msra.mxu3 %v5408_v24 }
0x19c9   : > { %v4748_v16 = vsel %vm8606_vm11, %v4737_v34, %v8016_v0  ;;  %v5114_v40 = vsel %vm8607_vm13, %v5103_v32, %v5105_v62  ;;  %v5115_v12 = vsel %vm8608_vm14, %v5105_v62, %v5107_v54 }
0x19ca   : > { %4756 = vst [vmem:[#allocation3 + $0x30] sm:$0xff] %v4748_v16  ;;  %5442 = vmatpush.msrb.mxu0 %v4748_v16  ;;  %5503 = vmatpush.msra.mxu3 %v8159_v46 }
0x19cb   : > { %5122 = vst [vmem:[#allocation3 + $0x100] sm:$0xf0] %v5114_v40 }
0x19cc   : > { %5123 = vst [vmem:[#allocation3 + $0x108] sm:$0xf0] %v5115_v12  ;;  %5443 = vmatpush.msrb.mxu0 %v8185_v43 }
0x19ce   : > { %5444 = vmatpush.msrb.mxu0 %v5371_v10 }
0x19d0   : > { %v5111_v21 = vpop.permute.xlu0 %5110  ;;  %v5151_v8 = vpop.permute.xlu1 %5150  ;;  %5445 = vmatpush.msrb.mxu0 %v5991_v42 }
0x19d1   : > { %v5117_v0 = vsel %vm8609_vm6, %v5111_v21, %v5113_v11  ;;  %v5158_v47 = vsel %vm8610_vm2, %v5151_v8, %v8194_v29  ;;  %5446 = vmatmul.f32.vlgmr.msrb.gmra.mxu0 %v5425_v33 }
0x19d2   : > { %5504 = vmatpush.msra.mxu3 %v5117_v0  ;;  %5166 = vst [vmem:[#allocation3 + $0x130] sm:$0xf] %v5158_v47 }
0x19d3   : > { %v5402_v46 = vld [vmem:[#allocation3 + $0x108] sm:$0xff] }
0x19d4   : > { %5505 = vmatpush.msra.mxu3 %v5402_v46 }
0x19d5   : > { %5691 = vmatmul.msk.f32.vlgmr.msra.gmra.mxu3 %vm3614_vm5, %v5426_v23 }
0x19d8   : > { %v5058_v3 = vpop.permute.xlu1 %5057 }
0x19d9   : > { %v5109_v15 = vpop.permute.xlu0 %5108  ;;  %v5065_v6 = vsel %vm8611_vm3, %v5058_v3, %v8181_v55  ;;  %v5407_v50 = vld [vmem:[#allocation3 + $0x130] sm:$0xff] }
0x19da   : > { %v5116_v22 = vsel %vm8612_vm8, %v5109_v15, %v5111_v21  ;;  %5073 = vst [vmem:[#allocation3 + $0x100] sm:$0xf] %v5065_v6  ;;  %5462 = vmatpush.msra.mxu1 %v5407_v50 }
0x19db   : > { %5124 = vst [vmem:[#allocation3 + $0x110] sm:$0xff] %v5116_v22 }
0x19dc   : > { %5463 = vmatpush.msra.mxu1 %v8200_v60 }
0x19de   : > { %5464 = vmatpush.msra.mxu1 %v5116_v22 }
0x19e0   : > { %v5522_v18 = vpop.permute.xlu1 %5521 }
0x19e1   : > { %v5401_v2 = vld [vmem:[#allocation3 + $0x100] sm:$0xff]  ;;  %v5514_v43 = vpop.permute.xlu0 %5513 }
0x19e2   : > { %5465 = vmatpush.msra.mxu1 %v5401_v2 }
0x19e3   : > { %5690 = vmatmul.msk.f32.vlgmr.msra.gmra.mxu1 %vm3614_vm5, %v5426_v23 }
0x1a2f   : > { %v5487_v53 = vpop.f32.mrf.mxu2 }
0x1a4e   : > { %v5447_v4 = vpop.f32.mrf.mxu0 }
0x1a58   : > { %v5507_v28 = vpop.f32.mrf.mxu3 }
0x1a59   : > { %v5508_v14 = vadd.f32 %v5507_v28, %v5487_v53 }
0x1a5b   : > { %v5517_v58 = vmul.f32 %v5514_v43, %v5508_v14 }
0x1a5d   : > { %v5525_v55 = vadd.f32 %v5522_v18, %v5517_v58 }
0x1a5f   : > { %v5528_v20 = vmul.f32 1.442695, %v5525_v55 }
0x1a60   : > { %v5467_v27 = vpop.f32.mrf.mxu1 }
0x1a61   : > { %5978 = vpow2.f32 %v5528_v20  ;;  %v5468_v19 = vadd.f32 %v5467_v27, %v5447_v4 }
0x1a63   : > { %v5516_v31 = vmul.f32 %v5514_v43, %v5468_v19 }
0x1a65   : > { %v5524_v13 = vadd.f32 %v5522_v18, %v5516_v31 }
0x1a67   : > { %v5979_v63 = vpop.eup %5978  ;;  %v5526_v57 = vmul.f32 1.442695, %v5524_v13 }
0x1a68   : > { %v5531_v35 = vadd.f32 1.0, %v5979_v63 }
0x1a69   : > { %5980 = vpow2.f32 %v5526_v57 }
0x1a6a   : > { %5982 = vlog2.f32 %v5531_v35 }
0x1a6f   : > { %v5981_v41 = vpop.eup %5980 }
0x1a70   : > { %v5983_v1 = vpop.eup %5982  ;;  %v5530_v37 = vadd.f32 1.0, %v5981_v41 }
0x1a71   : > { %v5535_v51 = vmul.f32 0.6931472, %v5983_v1 }
0x1a72   : > { %5984 = vlog2.f32 %v5530_v37 }
0x1a73   : > { %5986 = vtanh.f32 %v5535_v51 }
0x1a78   : > { %v5985_v54 = vpop.eup %5984 }
0x1a79   : > { %v5987_v29 = vpop.eup %5986  ;;  %v5533_v26 = vmul.f32 0.6931472, %v5985_v54 }
0x1a7a   : > { %v5539_v56 = vmul.f32 %v5987_v29, %v5525_v55 }
0x1a7b   : > { %5988 = vtanh.f32 %v5533_v26 }
0x1a7c   : > { %v5541_v60 = vadd.f32 %v5539_v56, %v8613_v59 }
0x1a7e   : > { %v5544_v48 = vrot.slane %v5541_v60, 4 }
0x1a81   : > { %v5989_v45 = vpop.eup %5988 }
0x1a82   : > { %v5538_v49 = vmul.f32 %v5989_v45, %v5524_v13 }
0x1a84   : > { %v5540_v9 = vadd.f32 %v5538_v49, %v8615_v44 }
0x1a86   : > { %v5545_v39 = vsel %vm2120_vm9, %v5540_v9, %v5544_v48 }
0x1a87   : > { %5547 = vst [vmem:[%s1126_s6] sm:$0x77] %v5545_v39 }
0x1a88 PF: > { %s85_s7 = sadd.s32 1, %s5998_s7  }
0x1a89   : > { %p82_p4 = scmp.ge.s32.totalorder %s85_s7, 4  }
0x1a8b   :  { %84 = sbr.rel (!%p82_p4) target bundleno = 65 (0x41), region = 236 }

</bundles_post_ra>
